<compile_context>
chip_gen: v5e
topology: v5e:2x2
jax: 0.10.0
libtpu: 0.0.40
codegen_flags: <defaults>
</compile_context>

<pallas_src>
import functools

import jax
import jax.numpy as jnp
from jax.experimental import pallas as pl
from jax.experimental.pallas import tpu as pltpu

LN_EPS = 1e-5  # PyTorch nn.LayerNorm default eps


def _group_center_var(v, seg, seg_t, w_size, precision):
    """v: (tn, L) f32 with contiguous groups of `w_size` along the lane axis.

    Returns (v - group_mean, group_var broadcast back), both (tn, L).
    Reductions and broadcast-backs are routed through the otherwise-idle MXU
    via one-hot segment matrices, avoiding any lane-splitting reshape (which
    would force an XLU/VMEM relayout copy)."""
    inv_w = jnp.float32(1.0 / w_size)
    sums = jnp.dot(v, seg, preferred_element_type=jnp.float32,
                   precision=precision)                              # (tn, G)
    mean_b = jnp.dot(sums * inv_w, seg_t,
                     preferred_element_type=jnp.float32,
                     precision=precision)                            # (tn, L)
    cent = v - mean_b
    sq = jnp.dot(cent * cent, seg, preferred_element_type=jnp.float32,
                 precision=precision)                                # (tn, G)
    var_b = jnp.dot(sq * inv_w, seg_t,
                    preferred_element_type=jnp.float32,
                    precision=precision)                             # (tn, L)
    return cent, var_b


def resb_kernel(x_ref, wc_ref, bc_ref, g_ref, b_ref, seg_ref, segt_ref,
                out_ref, *, C, Co, H, W, precision):
    # x_ref:    (tn, L)  lane-dense input block, L = C*H*W
    # wc_ref:   (Co, C)  1x1 conv weight (resident across grid steps)
    # bc_ref:   (1, Co)  conv bias
    # g_ref:    (1, L)   LayerNorm weight, tiled onto the flattened lane axis
    # b_ref:    (1, L)   LayerNorm bias,   tiled onto the flattened lane axis
    # seg_ref:  (L, G)   one-hot group membership (G = C*H groups of W lanes)
    # segt_ref: (G, L)   its transpose (broadcast-back matrix)
    # out_ref:  (tn, L)
    x = x_ref[...].astype(jnp.float32)
    gamma = g_ref[...].astype(jnp.float32)
    beta = b_ref[...].astype(jnp.float32)
    seg = seg_ref[...]
    seg_t = segt_ref[...]

    if C == 1 and Co == 1:
        # Module default: the 1x1 conv is a scalar affine map; LayerNorm stats
        # transform exactly under it, so y = w0*x + b0 is never materialized
        # (one fewer full-tile FMA / live temporary; bias cancels in the LN).
        w0 = wc_ref[...].astype(jnp.float32)                     # (1, 1)
        cent_x, var_x = _group_center_var(x, seg, seg_t, W, precision)
        yn = (w0 * cent_x) * jax.lax.rsqrt(w0 * w0 * var_x + LN_EPS)
    else:
        # Small-C fallback: statically unrolled channel mix using (1,1) weight
        # slices (no (Co, C, H, W) broadcast-outer-product intermediate).
        # TODO(synk): for C/Co > ~8 move the channel mix onto the MXU
        # (e.g. a block-structured weight matmul) instead of this unrolled MAC.
        HW = H * W
        wcv = wc_ref[...].astype(jnp.float32)                    # (Co, C)
        bcv = bc_ref[...].astype(jnp.float32)                    # (1, Co)
        parts = []
        for co in range(Co):
            acc = x[:, 0:HW] * wcv[co:co + 1, 0:1]
            for c in range(1, C):
                acc = acc + x[:, c * HW:(c + 1) * HW] * wcv[co:co + 1, c:c + 1]
            parts.append(acc + bcv[:, co:co + 1])
        y = parts[0] if Co == 1 else jnp.concatenate(parts, axis=1)
        cent, var = _group_center_var(y, seg, seg_t, W, precision)
        yn = cent * jax.lax.rsqrt(var + LN_EPS)

    out_ref[...] = (yn * gamma + beta + x).astype(out_ref.dtype)


def _pick_tile(N, L, itemsize):
    """Batch tile tn (divides N) + vmem_limit, sized from *padded* VMEM bytes."""
    # Real VMEM footprint of one row: the lane axis pads to a multiple of 128.
    padded_row = pl.cdiv(L, 128) * 128 * itemsize
    try:
        vmem_cap = pltpu.get_tpu_info().vmem_capacity_bytes
    except Exception:
        vmem_cap = None  # unknown chip / interpret mode -> conservative sizing

    if vmem_cap is not None and vmem_cap >= 96 * 1024 * 1024:
        # v5e / v6e: 128 MiB VMEM, single TensorCore -> big blocks, no split.
        block_budget, vmem_limit, dual_tc = 12 << 20, 96 << 20, False
    else:
        # v7x (64 MiB / TC, 2 TCs) or unknown: keep double-buffered in+out
        # around 24-28 MiB.  Buffer depth stays at the default 2.
        block_budget, vmem_limit, dual_tc = 6 << 20, 40 << 20, True
    if vmem_cap is not None:
        vmem_limit = min(vmem_limit, vmem_cap)
        block_budget = min(block_budget, max(1 << 20, vmem_cap // 6))

    # TODO(synk): if a single row (padded_row) exceeds the budget (huge H),
    # additionally tile the lane axis in W-sized chunks (grid over H), which
    # also bounds the segment-matrix size; not needed at these shapes.
    cap = max(1, block_budget // max(1, padded_row))
    divs = [d for d in range(1, N + 1) if N % d == 0 and d <= cap]
    # Prefer sublane-aligned tiles (multiple of 8) unless the tile spans N.
    aligned = [d for d in divs if d == N or d % 8 == 0]
    tn = max(aligned) if aligned else max(divs)

    # v7x megacore: split into balanced grid steps only when each step is big
    # enough (>= ~512 KiB) to amortize the ~0.35 us per-step overhead.
    if dual_tc and tn == N and N > 1:
        half = [d for d in aligned if d <= N // 2]
        if half and max(half) * padded_row >= 512 * 1024:
            tn = max(half)
    return tn, vmem_limit


def resb_forward(x, conv_w, conv_b, ln_w, ln_b, *, tn=None):
    """x: (N, C, H, W); conv_w: (Co, C, 1, 1); conv_b: (Co,); ln_w/ln_b: (W,).
    Returns (N, Co, H, W).  Only ks=1/pad=0 and Co == C are supported (as the
    PyTorch module's residual add implies)."""
    N, C, H, W = x.shape
    Co = conv_w.shape[0]
    assert conv_w.shape == (Co, C, 1, 1), "only ks=1, pad=0 conv supported"
    assert Co == C, "residual add requires out_channels == in_channels"
    assert ln_w.shape == (W,) and ln_b.shape == (W,)

    L = C * H * W          # lane-dense flattened row length
    G = C * H              # number of LayerNorm groups (one per (c, h))

    # Lane-dense flatten (free: NCHW is contiguous per batch element).
    x2 = x.reshape(N, L)
    wc = conv_w.reshape(Co, C)
    bc = conv_b.reshape(1, Co)
    # LayerNorm affine params tiled once (tiny) onto the flattened lane axis.
    g = jnp.tile(ln_w.astype(jnp.float32), G).reshape(1, L)
    b = jnp.tile(ln_b.astype(jnp.float32), G).reshape(1, L)
    # One-hot segment matrices for the per-50-element mean/var on the MXU.
    lane = jnp.arange(L, dtype=jnp.int32)
    grp = jnp.arange(G, dtype=jnp.int32)
    seg = (lane[:, None] // W == grp[None, :]).astype(jnp.float32)   # (L, G)
    seg_t = seg.T                                                     # (G, L)

    itemsize = jnp.dtype(x.dtype).itemsize
    auto_tn, vmem_limit = _pick_tile(N, L, itemsize)
    if tn is None:
        tn = auto_tn
    assert N % tn == 0

    def _run(precision):
        kernel = functools.partial(resb_kernel, C=C, Co=Co, H=H, W=W,
                                   precision=precision)
        return pl.pallas_call(
            kernel,
            out_shape=jax.ShapeDtypeStruct((N, L), x.dtype),
            grid=(N // tn,),
            in_specs=[
                pl.BlockSpec((tn, L), lambda n: (n, 0)),   # x (lane-dense slab)
                pl.BlockSpec((Co, C), lambda n: (0, 0)),   # conv weight (resident)
                pl.BlockSpec((1, Co), lambda n: (0, 0)),   # conv bias (resident)
                pl.BlockSpec((1, L), lambda n: (0, 0)),    # ln weight (tiled)
                pl.BlockSpec((1, L), lambda n: (0, 0)),    # ln bias (tiled)
                pl.BlockSpec((L, G), lambda n: (0, 0)),    # segment one-hot
                pl.BlockSpec((G, L), lambda n: (0, 0)),    # its transpose
            ],
            out_specs=pl.BlockSpec((tn, L), lambda n: (n, 0)),
            compiler_params=pltpu.CompilerParams(
                dimension_semantics=("parallel",),
                vmem_limit_bytes=vmem_limit,
            ),
        )(x2, wc, bc, g, b, seg, seg_t)

    try:
        # Ask for full-f32 MXU passes on the LayerNorm reduction matmuls.
        out2 = _run(jax.lax.Precision.HIGHEST)
    except Exception:
        # Some Mosaic versions only accept default dot precision (whose f32
        # matmul path is still lowered through the full-precision MXU passes).
        out2 = _run(None)
    return out2.reshape(N, Co, H, W)


def resb_reference(x, conv_w, conv_b, ln_w, ln_b):
    """Pure-JAX reference of the PyTorch forward (NCHW)."""
    wc = conv_w.reshape(conv_w.shape[0], conv_w.shape[1])       # (Co, C)
    y = jnp.einsum("oc,nchw->nohw", wc, x) + conv_b[None, :, None, None]
    mean = jnp.mean(y, axis=-1, keepdims=True)
    var = jnp.mean((y - mean) ** 2, axis=-1, keepdims=True)
    yn = (y - mean) / jnp.sqrt(var + LN_EPS)
    yn = yn * ln_w + ln_b
    return yn + x


if __name__ == "__main__":
    # ResB(inc=1, outc=1, ks=1, pad=0); LayerNorm(50) -> last dim must be 50.
    N, C, H, W = 2, 1, 16, 50
    Co = 1

    key = jax.random.PRNGKey(0)
    kx, kw, kb, kg, kbe = jax.random.split(key, 5)

    x = jax.random.normal(kx, (N, C, H, W), dtype=jnp.float32)
    conv_w = jax.random.normal(kw, (Co, C, 1, 1), dtype=jnp.float32) * 0.5
    conv_b = jax.random.normal(kb, (Co,), dtype=jnp.float32) * 0.1
    ln_w = 1.0 + 0.1 * jax.random.normal(kg, (W,), dtype=jnp.float32)
    ln_b = 0.1 * jax.random.normal(kbe, (W,), dtype=jnp.float32)

    out = resb_forward(x, conv_w, conv_b, ln_w, ln_b)
    out = jax.block_until_ready(out)

    ref = resb_reference(x, conv_w, conv_b, ln_w, ln_b)
    assert out.shape == (N, Co, H, W)
    assert jnp.allclose(out, ref, atol=1e-5, rtol=1e-5), "mismatch vs reference"

    print("KERNEL_OK")
</pallas_src>

<mosaic_0001>
module attributes {stable_mosaic.version = 11 : i64} {
  func.func @resb_kernel(%arg0: i32, %arg1: memref<2x800xf32, #tpu.memory_space<vmem>>, %arg2: memref<1x1xf32, #tpu.memory_space<vmem>>, %arg3: memref<1x1xf32, #tpu.memory_space<vmem>>, %arg4: memref<1x800xf32, #tpu.memory_space<vmem>>, %arg5: memref<1x800xf32, #tpu.memory_space<vmem>>, %arg6: memref<800x16xf32, #tpu.memory_space<vmem>>, %arg7: memref<16x800xf32, #tpu.memory_space<vmem>>, %arg8: memref<2x800xf32, #tpu.memory_space<vmem>>) attributes {dimension_semantics = [#tpu.dimension_semantics<parallel>], iteration_bounds = array<i64: 1>, scalar_prefetch = 0 : i64, scratch_operands = 0 : i64, tpu.core_type = #tpu.core_type<tc>, window_params = [{transform_indices = @transform_0, window_bounds = array<i64: 2, 800>}, {pipeline_mode = #tpu.pipeline_mode<synchronous>, transform_indices = @transform_1, window_bounds = array<i64: 1, 1>}, {pipeline_mode = #tpu.pipeline_mode<synchronous>, transform_indices = @transform_2, window_bounds = array<i64: 1, 1>}, {pipeline_mode = #tpu.pipeline_mode<synchronous>, transform_indices = @transform_3, window_bounds = array<i64: 1, 800>}, {pipeline_mode = #tpu.pipeline_mode<synchronous>, transform_indices = @transform_4, window_bounds = array<i64: 1, 800>}, {pipeline_mode = #tpu.pipeline_mode<synchronous>, transform_indices = @transform_5, window_bounds = array<i64: 800, 16>}, {pipeline_mode = #tpu.pipeline_mode<synchronous>, transform_indices = @transform_6, window_bounds = array<i64: 16, 800>}, {transform_indices = @transform_7, window_bounds = array<i64: 2, 800>}]} {
    %c0 = arith.constant 0 : index
    %c0_0 = arith.constant 0 : index
    %0 = vector.load %arg1[%c0, %c0_0] : memref<2x800xf32, #tpu.memory_space<vmem>>, vector<2x800xf32>
    %c0_1 = arith.constant 0 : index
    %c0_2 = arith.constant 0 : index
    %1 = vector.load %arg4[%c0_1, %c0_2] : memref<1x800xf32, #tpu.memory_space<vmem>>, vector<1x800xf32>
    %c0_3 = arith.constant 0 : index
    %c0_4 = arith.constant 0 : index
    %2 = vector.load %arg5[%c0_3, %c0_4] : memref<1x800xf32, #tpu.memory_space<vmem>>, vector<1x800xf32>
    %c0_5 = arith.constant 0 : index
    %c0_6 = arith.constant 0 : index
    %3 = vector.load %arg6[%c0_5, %c0_6] : memref<800x16xf32, #tpu.memory_space<vmem>>, vector<800x16xf32>
    %c0_7 = arith.constant 0 : index
    %c0_8 = arith.constant 0 : index
    %4 = vector.load %arg7[%c0_7, %c0_8] : memref<16x800xf32, #tpu.memory_space<vmem>>, vector<16x800xf32>
    %c0_9 = arith.constant 0 : index
    %c0_10 = arith.constant 0 : index
    %5 = vector.load %arg2[%c0_9, %c0_10] : memref<1x1xf32, #tpu.memory_space<vmem>>, vector<1x1xf32>
    %cst = arith.constant dense<0.000000e+00> : vector<2x16xf32>
    %6 = tpu.matmul %0, %3, %cst {dimension_numbers = #tpu.dot_dimension_numbers<[1], [0], [0], [1], [0, 0, 1, 1], [], []>, precision = #tpu.contract_precision<fp32>} : vector<2x800xf32>, vector<800x16xf32>, vector<2x16xf32> -> vector<2x16xf32>
    %cst_11 = arith.constant 2.000000e-02 : f32
    %7 = vector.broadcast %cst_11 : f32 to vector<2x16xf32>
    %8 = arith.mulf %6, %7 : vector<2x16xf32>
    %cst_12 = arith.constant dense<0.000000e+00> : vector<2x800xf32>
    %9 = tpu.matmul %8, %4, %cst_12 {dimension_numbers = #tpu.dot_dimension_numbers<[1], [0], [0], [1], [0, 0, 1, 1], [], []>, precision = #tpu.contract_precision<fp32>} : vector<2x16xf32>, vector<16x800xf32>, vector<2x800xf32> -> vector<2x800xf32>
    %10 = arith.subf %0, %9 : vector<2x800xf32>
    %11 = arith.mulf %10, %10 : vector<2x800xf32>
    %cst_13 = arith.constant dense<0.000000e+00> : vector<2x16xf32>
    %12 = tpu.matmul %11, %3, %cst_13 {dimension_numbers = #tpu.dot_dimension_numbers<[1], [0], [0], [1], [0, 0, 1, 1], [], []>, precision = #tpu.contract_precision<fp32>} : vector<2x800xf32>, vector<800x16xf32>, vector<2x16xf32> -> vector<2x16xf32>
    %cst_14 = arith.constant 2.000000e-02 : f32
    %13 = vector.broadcast %cst_14 : f32 to vector<2x16xf32>
    %14 = arith.mulf %12, %13 : vector<2x16xf32>
    %cst_15 = arith.constant dense<0.000000e+00> : vector<2x800xf32>
    %15 = tpu.matmul %14, %4, %cst_15 {dimension_numbers = #tpu.dot_dimension_numbers<[1], [0], [0], [1], [0, 0, 1, 1], [], []>, precision = #tpu.contract_precision<fp32>} : vector<2x16xf32>, vector<16x800xf32>, vector<2x800xf32> -> vector<2x800xf32>
    %16 = vector.broadcast %5 : vector<1x1xf32> to vector<2x800xf32>
    %17 = arith.mulf %16, %10 : vector<2x800xf32>
    %18 = arith.mulf %5, %5 : vector<1x1xf32>
    %19 = vector.broadcast %18 : vector<1x1xf32> to vector<2x800xf32>
    %20 = arith.mulf %19, %15 : vector<2x800xf32>
    %cst_16 = arith.constant 9.99999974E-6 : f32
    %21 = vector.broadcast %cst_16 : f32 to vector<2x800xf32>
    %22 = arith.addf %20, %21 : vector<2x800xf32>
    %23 = math.rsqrt %22 : vector<2x800xf32>
    %24 = arith.mulf %17, %23 : vector<2x800xf32>
    %25 = vector.broadcast %1 : vector<1x800xf32> to vector<2x800xf32>
    %26 = arith.mulf %24, %25 : vector<2x800xf32>
    %27 = vector.broadcast %2 : vector<1x800xf32> to vector<2x800xf32>
    %28 = arith.addf %26, %27 : vector<2x800xf32>
    %29 = arith.addf %28, %0 : vector<2x800xf32>
    %c0_17 = arith.constant 0 : index
    %c0_18 = arith.constant 0 : index
    %30 = vector.load %arg8[%c0_17, %c0_18] : memref<2x800xf32, #tpu.memory_space<vmem>>, vector<2x800xf32>
    tpu.vector_store %arg8[%c0_17, %c0_18], %29 {strides = array<i32>} : memref<2x800xf32, #tpu.memory_space<vmem>>, vector<2x800xf32>,
    return
  }
  func.func @transform_0(%arg0: i32) -> (i32, i32) {
    %c0_i32 = arith.constant 0 : i32
    %c0_i32_0 = arith.constant 0 : i32
    return %arg0, %c0_i32 : i32, i32
  }
  func.func @transform_1(%arg0: i32) -> (i32, i32) {
    %c0_i32 = arith.constant 0 : i32
    %c0_i32_0 = arith.constant 0 : i32
    %c0_i32_1 = arith.constant 0 : i32
    return %c0_i32, %c0_i32_0 : i32, i32
  }
  func.func @transform_2(%arg0: i32) -> (i32, i32) {
    %c0_i32 = arith.constant 0 : i32
    %c0_i32_0 = arith.constant 0 : i32
    %c0_i32_1 = arith.constant 0 : i32
    return %c0_i32, %c0_i32_0 : i32, i32
  }
  func.func @transform_3(%arg0: i32) -> (i32, i32) {
    %c0_i32 = arith.constant 0 : i32
    %c0_i32_0 = arith.constant 0 : i32
    %c0_i32_1 = arith.constant 0 : i32
    return %c0_i32, %c0_i32_0 : i32, i32
  }
  func.func @transform_4(%arg0: i32) -> (i32, i32) {
    %c0_i32 = arith.constant 0 : i32
    %c0_i32_0 = arith.constant 0 : i32
    %c0_i32_1 = arith.constant 0 : i32
    return %c0_i32, %c0_i32_0 : i32, i32
  }
  func.func @transform_5(%arg0: i32) -> (i32, i32) {
    %c0_i32 = arith.constant 0 : i32
    %c0_i32_0 = arith.constant 0 : i32
    %c0_i32_1 = arith.constant 0 : i32
    return %c0_i32, %c0_i32_0 : i32, i32
  }
  func.func @transform_6(%arg0: i32) -> (i32, i32) {
    %c0_i32 = arith.constant 0 : i32
    %c0_i32_0 = arith.constant 0 : i32
    %c0_i32_1 = arith.constant 0 : i32
    return %c0_i32, %c0_i32_0 : i32, i32
  }
  func.func @transform_7(%arg0: i32) -> (i32, i32) {
    %c0_i32 = arith.constant 0 : i32
    %c0_i32_0 = arith.constant 0 : i32
    return %arg0, %c0_i32 : i32, i32
  }
}

module attributes {stable_mosaic.version = 11 : i64} {
  func.func @resb_kernel(%arg0: i32, %arg1: memref<2x800xf32, #tpu.memory_space<vmem>>, %arg2: memref<1x1xf32, #tpu.memory_space<vmem>>, %arg3: memref<1x1xf32, #tpu.memory_space<vmem>>, %arg4: memref<1x800xf32, #tpu.memory_space<vmem>>, %arg5: memref<1x800xf32, #tpu.memory_space<vmem>>, %arg6: memref<800x16xf32, #tpu.memory_space<vmem>>, %arg7: memref<16x800xf32, #tpu.memory_space<vmem>>, %arg8: memref<2x800xf32, #tpu.memory_space<vmem>>) attributes {dimension_semantics = [#tpu.dimension_semantics<parallel>], iteration_bounds = array<i64: 1>, scalar_prefetch = 0 : i64, scratch_operands = 0 : i64, tpu.core_type = #tpu.core_type<tc>, window_params = [{transform_indices = @transform_0, window_bounds = array<i64: 2, 800>}, {pipeline_mode = #tpu.pipeline_mode<synchronous>, transform_indices = @transform_1, window_bounds = array<i64: 1, 1>}, {pipeline_mode = #tpu.pipeline_mode<synchronous>, transform_indices = @transform_2, window_bounds = array<i64: 1, 1>}, {pipeline_mode = #tpu.pipeline_mode<synchronous>, transform_indices = @transform_3, window_bounds = array<i64: 1, 800>}, {pipeline_mode = #tpu.pipeline_mode<synchronous>, transform_indices = @transform_4, window_bounds = array<i64: 1, 800>}, {pipeline_mode = #tpu.pipeline_mode<synchronous>, transform_indices = @transform_5, window_bounds = array<i64: 800, 16>}, {pipeline_mode = #tpu.pipeline_mode<synchronous>, transform_indices = @transform_6, window_bounds = array<i64: 16, 800>}, {transform_indices = @transform_7, window_bounds = array<i64: 2, 800>}]} {
    %c0 = arith.constant 0 : index
    %c0_0 = arith.constant 0 : index
    %0 = vector.load %arg1[%c0, %c0_0] : memref<2x800xf32, #tpu.memory_space<vmem>>, vector<2x800xf32>
    %c0_1 = arith.constant 0 : index
    %c0_2 = arith.constant 0 : index
    %1 = vector.load %arg4[%c0_1, %c0_2] : memref<1x800xf32, #tpu.memory_space<vmem>>, vector<1x800xf32>
    %c0_3 = arith.constant 0 : index
    %c0_4 = arith.constant 0 : index
    %2 = vector.load %arg5[%c0_3, %c0_4] : memref<1x800xf32, #tpu.memory_space<vmem>>, vector<1x800xf32>
    %c0_5 = arith.constant 0 : index
    %c0_6 = arith.constant 0 : index
    %3 = vector.load %arg6[%c0_5, %c0_6] : memref<800x16xf32, #tpu.memory_space<vmem>>, vector<800x16xf32>
    %c0_7 = arith.constant 0 : index
    %c0_8 = arith.constant 0 : index
    %4 = vector.load %arg7[%c0_7, %c0_8] : memref<16x800xf32, #tpu.memory_space<vmem>>, vector<16x800xf32>
    %c0_9 = arith.constant 0 : index
    %c0_10 = arith.constant 0 : index
    %5 = vector.load %arg2[%c0_9, %c0_10] : memref<1x1xf32, #tpu.memory_space<vmem>>, vector<1x1xf32>
    %cst = arith.constant dense<0.000000e+00> : vector<2x16xf32>
    %6 = tpu.matmul %0, %3, %cst {dimension_numbers = #tpu.dot_dimension_numbers<[1], [0], [0], [1], [0, 0, 1, 1], [], []>} : vector<2x800xf32>, vector<800x16xf32>, vector<2x16xf32> -> vector<2x16xf32>
    %cst_11 = arith.constant 2.000000e-02 : f32
    %7 = vector.broadcast %cst_11 : f32 to vector<2x16xf32>
    %8 = arith.mulf %6, %7 : vector<2x16xf32>
    %cst_12 = arith.constant dense<0.000000e+00> : vector<2x800xf32>
    %9 = tpu.matmul %8, %4, %cst_12 {dimension_numbers = #tpu.dot_dimension_numbers<[1], [0], [0], [1], [0, 0, 1, 1], [], []>} : vector<2x16xf32>, vector<16x800xf32>, vector<2x800xf32> -> vector<2x800xf32>
    %10 = arith.subf %0, %9 : vector<2x800xf32>
    %11 = arith.mulf %10, %10 : vector<2x800xf32>
    %cst_13 = arith.constant dense<0.000000e+00> : vector<2x16xf32>
    %12 = tpu.matmul %11, %3, %cst_13 {dimension_numbers = #tpu.dot_dimension_numbers<[1], [0], [0], [1], [0, 0, 1, 1], [], []>} : vector<2x800xf32>, vector<800x16xf32>, vector<2x16xf32> -> vector<2x16xf32>
    %cst_14 = arith.constant 2.000000e-02 : f32
    %13 = vector.broadcast %cst_14 : f32 to vector<2x16xf32>
    %14 = arith.mulf %12, %13 : vector<2x16xf32>
    %cst_15 = arith.constant dense<0.000000e+00> : vector<2x800xf32>
    %15 = tpu.matmul %14, %4, %cst_15 {dimension_numbers = #tpu.dot_dimension_numbers<[1], [0], [0], [1], [0, 0, 1, 1], [], []>} : vector<2x16xf32>, vector<16x800xf32>, vector<2x800xf32> -> vector<2x800xf32>
    %16 = vector.broadcast %5 : vector<1x1xf32> to vector<2x800xf32>
    %17 = arith.mulf %16, %10 : vector<2x800xf32>
    %18 = arith.mulf %5, %5 : vector<1x1xf32>
    %19 = vector.broadcast %18 : vector<1x1xf32> to vector<2x800xf32>
    %20 = arith.mulf %19, %15 : vector<2x800xf32>
    %cst_16 = arith.constant 9.99999974E-6 : f32
    %21 = vector.broadcast %cst_16 : f32 to vector<2x800xf32>
    %22 = arith.addf %20, %21 : vector<2x800xf32>
    %23 = math.rsqrt %22 : vector<2x800xf32>
    %24 = arith.mulf %17, %23 : vector<2x800xf32>
    %25 = vector.broadcast %1 : vector<1x800xf32> to vector<2x800xf32>
    %26 = arith.mulf %24, %25 : vector<2x800xf32>
    %27 = vector.broadcast %2 : vector<1x800xf32> to vector<2x800xf32>
    %28 = arith.addf %26, %27 : vector<2x800xf32>
    %29 = arith.addf %28, %0 : vector<2x800xf32>
    %c0_17 = arith.constant 0 : index
    %c0_18 = arith.constant 0 : index
    %30 = vector.load %arg8[%c0_17, %c0_18] : memref<2x800xf32, #tpu.memory_space<vmem>>, vector<2x800xf32>
    tpu.vector_store %arg8[%c0_17, %c0_18], %29 {strides = array<i32>} : memref<2x800xf32, #tpu.memory_space<vmem>>, vector<2x800xf32>,
    return
  }
  func.func @transform_0(%arg0: i32) -> (i32, i32) {
    %c0_i32 = arith.constant 0 : i32
    %c0_i32_0 = arith.constant 0 : i32
    return %arg0, %c0_i32 : i32, i32
  }
  func.func @transform_1(%arg0: i32) -> (i32, i32) {
    %c0_i32 = arith.constant 0 : i32
    %c0_i32_0 = arith.constant 0 : i32
    %c0_i32_1 = arith.constant 0 : i32
    return %c0_i32, %c0_i32_0 : i32, i32
  }
  func.func @transform_2(%arg0: i32) -> (i32, i32) {
    %c0_i32 = arith.constant 0 : i32
    %c0_i32_0 = arith.constant 0 : i32
    %c0_i32_1 = arith.constant 0 : i32
    return %c0_i32, %c0_i32_0 : i32, i32
  }
  func.func @transform_3(%arg0: i32) -> (i32, i32) {
    %c0_i32 = arith.constant 0 : i32
    %c0_i32_0 = arith.constant 0 : i32
    %c0_i32_1 = arith.constant 0 : i32
    return %c0_i32, %c0_i32_0 : i32, i32
  }
  func.func @transform_4(%arg0: i32) -> (i32, i32) {
    %c0_i32 = arith.constant 0 : i32
    %c0_i32_0 = arith.constant 0 : i32
    %c0_i32_1 = arith.constant 0 : i32
    return %c0_i32, %c0_i32_0 : i32, i32
  }
  func.func @transform_5(%arg0: i32) -> (i32, i32) {
    %c0_i32 = arith.constant 0 : i32
    %c0_i32_0 = arith.constant 0 : i32
    %c0_i32_1 = arith.constant 0 : i32
    return %c0_i32, %c0_i32_0 : i32, i32
  }
  func.func @transform_6(%arg0: i32) -> (i32, i32) {
    %c0_i32 = arith.constant 0 : i32
    %c0_i32_0 = arith.constant 0 : i32
    %c0_i32_1 = arith.constant 0 : i32
    return %c0_i32, %c0_i32_0 : i32, i32
  }
  func.func @transform_7(%arg0: i32) -> (i32, i32) {
    %c0_i32 = arith.constant 0 : i32
    %c0_i32_0 = arith.constant 0 : i32
    return %arg0, %c0_i32 : i32, i32
  }
}

</mosaic_0001>

<bundles_post_ra>
// kernel: tpu_custom_call.1
= control target key start
LH: loop header
LB: loop body
LE: loop exit
PB: predicated region body
PF: predicated region fallthrough
CT: control target
= control target key end

     0   :  { %s10687_s0 = inlined_call_operand.vmem [shape: f32[2,800], index: 0, kind: input, shape index: {}]   ;;  %s10688_s1 = inlined_call_operand.<no memory space> [shape: f32[1,1], index: 1, kind: input, shape index: {}]   ;;  %s10689_s3 = inlined_call_operand.vmem [shape: f32[1,800], index: 3, kind: input, shape index: {}]   ;;  %s10690_s4 = inlined_call_operand.vmem [shape: f32[1,800], index: 4, kind: input, shape index: {}]   ;;  %s10691_s5 = inlined_call_operand.vmem [shape: f32[800,16], index: 5, kind: input, shape index: {}]   ;;  %s10692_s6 = inlined_call_operand.vmem [shape: f32[16,800], index: 6, kind: input, shape index: {}]   ;;  %s10693_s7 = inlined_call_operand.hbm [shape: f32[2,800], index: 7, kind: output, shape index: {}]   ;;  %s10694_s2 = inlined_call_operand.<no memory space> [shape: f32[1,1], index: 2, kind: input, shape index: {}]  }
   0x1   :  { %v12_v0 = vstv %s10688_s1 }
   0x2   :  { %13 = vst [vmem:[#allocation2] sm:$0x1] %v12_v0 }
   0x3   :  { %v50_v1 = vld [vmem:[%s10691_s5 + $0x78] sm:$0xff]  ;;  %v49_v2 = vld [vmem:[%s10691_s5 + $0x70] sm:$0xff]  ;;  %v48_v3 = vld [vmem:[%s10691_s5 + $0x68] sm:$0xff] }
   0x4   :  { %v7200_v4 = vand.u32 4294901760, %v50_v1  ;;  %v7202_v5 = vand.u32 4294901760, %v49_v2  ;;  %v7204_v6 = vand.u32 4294901760, %v48_v3  ;;  %v47_v7 = vld [vmem:[%s10691_s5 + $0x60] sm:$0xff]  ;;  %v46_v8 = vld [vmem:[%s10691_s5 + $0x58] sm:$0xff]  ;;  %v45_v9 = vld [vmem:[%s10691_s5 + $0x50] sm:$0xff] }
   0x5   :  { %v7215_v10 = vand.u32 4294901760, %v47_v7  ;;  %v7217_v11 = vand.u32 4294901760, %v46_v8  ;;  %v7219_v12 = vand.u32 4294901760, %v45_v9  ;;  %v44_v13 = vld [vmem:[%s10691_s5 + $0x48] sm:$0xff]  ;;  %v43_v14 = vld [vmem:[%s10691_s5 + $0x40] sm:$0xff]  ;;  %v42_v19 = vld [vmem:[%s10691_s5 + $0x38] sm:$0xff] }
   0x6   :  { %11276 = vst [vmem:[#allocation7_spill] sm:$0xff] %v7200_v4  ;;  %172 = vmatpush.msra.mxu0 %v7200_v4  ;;  %v7229_v15 = vsub.f32 %v50_v1, %v7200_v4  ;;  %v7232_v16 = vsub.f32 %v49_v2, %v7202_v5  ;;  %368 = vmatpush.msra.mxu3 %v7200_v4  ;;  %v7238_v18 = vand.u32 4294901760, %v44_v13  ;;  %v7263_v26 = vand.u32 4294901760, %v43_v14  ;;  %v41_v27 = vld [vmem:[%s10691_s5 + $0x30] sm:$0xff]  ;;  %v40_v35 = vld [vmem:[%s10691_s5 + $0x28] sm:$0xff] }
   0x7   :  { %11277 = vst [vmem:[#allocation8_spill] sm:$0xff] %v7202_v5  ;;  %v7236_v17 = vsub.f32 %v48_v3, %v7204_v6  ;;  %v7244_v20 = vsub.f32 %v47_v7, %v7215_v10  ;;  %v7247_v21 = vsub.f32 %v46_v8, %v7217_v11  ;;  %v7250_v22 = vsub.f32 %v45_v9, %v7219_v12 }
   0x8   :  { %11278 = vst [vmem:[#allocation9_spill] sm:$0xff] %v7204_v6  ;;  %174 = vmatpush.msra.mxu0 %v7202_v5  ;;  %315 = vmatpush.msra.mxu2 %v7229_v15  ;;  %v7255_v23 = vand.u32 4294901760, %v7229_v15  ;;  %v7258_v24 = vand.u32 4294901760, %v7232_v16  ;;  %v7272_v29 = vand.u32 4294901760, %v42_v19  ;;  %v7275_v30 = vsub.f32 %v44_v13, %v7238_v18 }
   0x9   :  { %11279 = vst [vmem:[#allocation10_spill] sm:$0xff] %v7215_v10  ;;  %v7261_v25 = vand.u32 4294901760, %v7236_v17  ;;  %370 = vmatpush.msra.mxu3 %v7202_v5  ;;  %v7270_v28 = vand.u32 4294901760, %v7244_v20  ;;  %v7286_v34 = vand.u32 4294901760, %v7247_v21 }
   0xa   :  { %11280 = vst [vmem:[#allocation11_spill] sm:$0xff] %v7217_v11  ;;  %176 = vmatpush.msra.mxu0 %v7204_v6  ;;  %318 = vmatpush.msra.mxu2 %v7232_v16  ;;  %v215_v31 = vsub.f32 %v7229_v15, %v7255_v23  ;;  %v221_v32 = vsub.f32 %v7232_v16, %v7258_v24 }
   0xb   :  { %11281 = vst [vmem:[#allocation12_spill] sm:$0xff] %v7219_v12  ;;  %v227_v33 = vsub.f32 %v7236_v17, %v7261_v25 }
   0xc   :  { %11282 = vst [vmem:[#allocation13_spill] sm:$0xff] %v7229_v15 }
   0xd   :  { %11283 = vst [vmem:[#allocation14_spill] sm:$0xff] %v7232_v16 }
   0xe   :  { %11284 = vst [vmem:[#allocation15_spill] sm:$0xff] %v7236_v17 }
   0xf   :  { %11285 = vst [vmem:[#allocation16_spill] sm:$0xff] %v7238_v18 }
  0x10   :  { %11286 = vst [vmem:[#allocation17_spill] sm:$0xff] %v7244_v20 }
  0x11   :  { %11287 = vst [vmem:[#allocation18_spill] sm:$0xff] %v7247_v21 }
  0x12   :  { %11288 = vst [vmem:[#allocation19_spill] sm:$0xff] %v7250_v22 }
  0x13   :  { %11289 = vst [vmem:[#allocation20_spill] sm:$0xff] %v7255_v23 }
  0x14   :  { %11290 = vst [vmem:[#allocation21_spill] sm:$0xff] %v7258_v24 }
  0x15   :  { %11291 = vst [vmem:[#allocation22_spill] sm:$0xff] %v7261_v25 }
  0x16   :  { %11292 = vst [vmem:[#allocation23_spill] sm:$0xff] %v7263_v26 }
  0x17   :  { %11293 = vst [vmem:[#allocation24_spill] sm:$0xff] %v7270_v28 }
  0x18   :  { %11294 = vst [vmem:[#allocation25_spill] sm:$0xff] %v7272_v29 }
  0x19   :  { %11295 = vst [vmem:[#allocation26_spill] sm:$0xff] %v7275_v30 }
  0x1a   :  { %11296 = vst [vmem:[#allocation27_spill] sm:$0xff] %v7286_v34 }
  0x1b   :  { %16 = vsyncpa [#allocation5], 0  ;;  %372 = vmatpush.msra.mxu3 %v7204_v6  ;;  %v7292_v36 = vand.u32 4294901760, %v41_v27  ;;  %v7295_v37 = vand.u32 4294901760, %v7250_v22  ;;  %178 = vmatpush.msra.mxu0 %v7215_v10  ;;  %v7298_v38 = vand.u32 4294901760, %v215_v31  ;;  %v7301_v39 = vand.u32 4294901760, %v221_v32 }
  0x1c   :  { %321 = vmatpush.msra.mxu2 %v7236_v17  ;;  %v233_v40 = vsub.f32 %v7244_v20, %v7270_v28  ;;  %v7306_v41 = vsub.f32 %v43_v14, %v7263_v26  ;;  %v7309_v42 = vand.u32 4294901760, %v40_v35  ;;  %v39_v43 = vld [vmem:[%s10691_s5 + $0x20] sm:$0xff]  ;;  %v7316_v44 = vand.u32 4294901760, %v227_v33  ;;  %v38_v49 = vld [vmem:[%s10691_s5 + $0x18] sm:$0xff]  ;;  %v37_v55 = vld [vmem:[%s10691_s5 + $0x10] sm:$0xff]  ;;  %s7093_s1 = sshll.u32 %s10693_s7, 4  ;;  %s7094_s1 = int_to_ptr.hbm [resolvable:$true] %s7093_s1 }
  0x1d   :  { %11297 = vst [vmem:[#allocation28_spill] sm:$0xff] %v7292_v36  ;;  %374 = vmatpush.msra.mxu3 %v7215_v10  ;;  %180 = vmatpush.msra.mxu0 %v7217_v11  ;;  %v239_v45 = vsub.f32 %v7247_v21, %v7286_v34  ;;  %v7321_v46 = vand.u32 4294901760, %v7275_v30  ;;  %v7324_v47 = vsub.f32 %v42_v19, %v7272_v29  ;;  %v7337_v51 = vand.u32 4294901760, %v39_v43  ;;  %v7356_v56 = vld [vmem:[%s10687_s0] sm:$0xff]  ;;  %v66_v61 = vld [vmem:[%s10691_s5 + $0xf8] sm:$0xff]  ;;  %v36_v63 = vld [vmem:[%s10691_s5 + $0x8] sm:$0xff] }
  0x1e   :  { %11298 = vst [vmem:[#allocation29_spill] sm:$0xff] %v7295_v37  ;;  %217 = vmatpush.msra.mxu1 %v7298_v38  ;;  %324 = vmatpush.msra.mxu2 %v7244_v20  ;;  %v245_v48 = vsub.f32 %v7250_v22, %v7295_v37  ;;  %v7335_v50 = vand.u32 4294901760, %v233_v40  ;;  %v7340_v52 = vand.u32 4294901760, %v7306_v41  ;;  %v7343_v53 = vsub.f32 %v41_v27, %v7292_v36  ;;  %v35_v7 = vld [vmem:[%s10691_s5] sm:$0xff]  ;;  %v65_v8 = vld [vmem:[%s10691_s5 + $0xf0] sm:$0xff] }
  0x1f   :  { %11299 = vst [vmem:[#allocation30_spill] sm:$0xff] %v7298_v38  ;;  %376 = vmatpush.msra.mxu3 %v7217_v11  ;;  %182 = vmatpush.msra.mxu0 %v7219_v12  ;;  %v7348_v54 = vsub.f32 %v40_v35, %v7309_v42  ;;  %v7360_v57 = vand.u32 4294901760, %v239_v45  ;;  %v251_v58 = vsub.f32 %v7275_v30, %v7321_v46  ;;  %v7364_v59 = vand.u32 4294901760, %v38_v49  ;;  %v64_v35 = vld [vmem:[%s10691_s5 + $0xe8] sm:$0xff] }
  0x20   :  { %11300 = vst [vmem:[#allocation31_spill] sm:$0xff] %v7301_v39  ;;  %223 = vmatpush.msra.mxu1 %v7301_v39  ;;  %327 = vmatpush.msra.mxu2 %v7247_v21  ;;  %v7367_v60 = vand.u32 4294901760, %v7324_v47  ;;  %v7374_v62 = vand.u32 4294901760, %v245_v48  ;;  %v257_v0 = vsub.f32 %v7306_v41, %v7340_v52  ;;  %v7384_v1 = vand.u32 4294901760, %v37_v55 }
  0x21   :  { %11301 = vst [vmem:[#allocation32_spill] sm:$0xff] %v7306_v41  ;;  %378 = vmatpush.msra.mxu3 %v7219_v12  ;;  %184 = vmatpush.msra.mxu0 %v7238_v18  ;;  %v7387_v2 = vand.u32 4294901760, %v7343_v53  ;;  %v7390_v3 = vsub.f32 %v39_v43, %v7337_v51  ;;  %v7401_v9 = vand.u32 4294901760, %v7348_v54  ;;  %v7403_v13 = vand.u32 4294901760, %v66_v61 }
  0x22   :  { %11302 = vst [vmem:[#allocation33_spill] sm:$0xff] %v7309_v42  ;;  %229 = vmatpush.msra.mxu1 %v7316_v44  ;;  %330 = vmatpush.msra.mxu2 %v7250_v22  ;;  %v7407_v14 = vand.u32 4294901760, %v251_v58  ;;  %v263_v19 = vsub.f32 %v7324_v47, %v7367_v60  ;;  %v7411_v27 = vand.u32 4294901760, %v36_v63  ;;  %v7414_v31 = vsub.f32 %v38_v49, %v7364_v59 }
  0x23   :  { %11303 = vst [vmem:[#allocation34_spill] sm:$0xff] %v7316_v44  ;;  %380 = vmatpush.msra.mxu3 %v7238_v18  ;;  %186 = vmatpush.msra.mxu0 %v7263_v26  ;;  %v7418_v32 = vand.u32 4294901760, %v35_v7  ;;  %v7420_v33 = vand.u32 4294901760, %v65_v8  ;;  %v7427_v40 = vand.u32 4294901760, %v257_v0  ;;  %v269_v43 = vsub.f32 %v7343_v53, %v7387_v2  ;;  %v63_v0 = vld [vmem:[%s10691_s5 + $0xe0] sm:$0xff] }
  0x24   :  { %11304 = vst [vmem:[#allocation35_spill] sm:$0xff] %v7321_v46  ;;  %235 = vmatpush.msra.mxu1 %v7335_v50  ;;  %333 = vmatpush.msra.mxu2 %v7275_v30  ;;  %v7432_v45 = vand.u32 4294901760, %v7390_v3  ;;  %v7435_v48 = vsub.f32 %v37_v55, %v7384_v1  ;;  %v275_v49 = vsub.f32 %v7348_v54, %v7401_v9  ;;  %v7449_v55 = vand.u32 4294901760, %v263_v19  ;;  %v62_v19 = vld [vmem:[%s10691_s5 + $0xd8] sm:$0xff] }
  0x25   :  { %11305 = vst [vmem:[#allocation36_spill] sm:$0xff] %v7324_v47  ;;  %382 = vmatpush.msra.mxu3 %v7263_v26  ;;  %188 = vmatpush.msra.mxu0 %v7272_v29  ;;  %v7442_v58 = vsub.f32 %v66_v61, %v7403_v13  ;;  %v7462_v61 = vsub.f32 %v35_v7, %v7418_v32  ;;  %v7479_v7 = vand.u32 4294901760, %v63_v0  ;;  %v7501_v17 = vand.u32 4294901760, %v62_v19 }
  0x26   :  { %11306 = vst [vmem:[#allocation37_spill] sm:$0xff] %v7335_v50  ;;  %241 = vmatpush.msra.mxu1 %v7360_v57  ;;  %336 = vmatpush.msra.mxu2 %v7306_v41  ;;  %v7457_v41 = vand.u32 4294901760, %v64_v35  ;;  %v7465_v30 = vsub.f32 %v65_v8, %v7420_v33  ;;  %v7477_v22 = vand.u32 4294901760, %v7435_v48  ;;  %v7482_v8 = vand.u32 4294901760, %v275_v49 }
  0x27   :  { %11307 = vst [vmem:[#allocation38_spill] sm:$0xff] %v7337_v51  ;;  %384 = vmatpush.msra.mxu3 %v7272_v29  ;;  %190 = vmatpush.msra.mxu0 %v7292_v36  ;;  %v7486_v21 = vand.u32 4294901760, %v7442_v58  ;;  %v7521_v15 = vsub.f32 %v63_v0, %v7479_v7  ;;  %vm168_vm0 = vcmask 261120   ;;  %vm2403_vm1 = vcmask 130048  }
  0x28   :  { %11308 = vst [vmem:[#allocation39_spill] sm:$0xff] %v7340_v52  ;;  %247 = vmatpush.msra.mxu1 %v7374_v62  ;;  %339 = vmatpush.msra.mxu2 %v7324_v47  ;;  %v7455_v47 = vsub.f32 %v36_v63, %v7411_v27  ;;  %v7472_v63 = vand.u32 4294901760, %v269_v43  ;;  %v61_v43 = vld [vmem:[%s10691_s5 + $0xd0] sm:$0xff]  ;;  %v7499_v49 = vsub.f32 %v64_v35, %v7457_v41  ;;  %v7512_v16 = vand.u32 4294901760, %v7465_v30 }
  0x29   :  { %11309 = vst [vmem:[#allocation40_spill] sm:$0xff] %v7343_v53  ;;  %386 = vmatpush.msra.mxu3 %v7292_v36  ;;  %192 = vmatpush.msra.mxu0 %v7309_v42  ;;  %vm3532_vm2 = vcmask 1041408   ;;  %vm3534_vm3 = vcmask 1045508   ;;  %vm3536_vm4 = vcmask 1043456  }
  0x2a   :  { %11310 = vst [vmem:[#allocation41_spill] sm:$0xff] %v7348_v54  ;;  %253 = vmatpush.msra.mxu1 %v7407_v14  ;;  %342 = vmatpush.msra.mxu2 %v7343_v53  ;;  %v281_v53 = vsub.f32 %v7390_v3, %v7432_v45  ;;  %v7541_v50 = vand.u32 4294901760, %v7499_v49  ;;  %v562_v44 = vsub.f32 %v7465_v30, %v7512_v16 }
  0x2b   :  { %11311 = vst [vmem:[#allocation42_spill] sm:$0xff] %v7356_v56  ;;  %388 = vmatpush.msra.mxu3 %v7309_v42  ;;  %194 = vmatpush.msra.mxu0 %v7337_v51 }
  0x2c   :  { %11312 = vst [vmem:[#allocation43_spill] sm:$0xff] %v7360_v57  ;;  %259 = vmatpush.msra.mxu1 %v7427_v40  ;;  %345 = vmatpush.msra.mxu2 %v7348_v54  ;;  %v7496_v54 = vand.u32 4294901760, %v7455_v47  ;;  %v7516_v35 = vand.u32 4294901760, %v281_v53  ;;  %v556_v53 = vsub.f32 %v7442_v58, %v7486_v21 }
  0x2d   :  { %11313 = vst [vmem:[#allocation44_spill] sm:$0xff] %v7364_v59  ;;  %390 = vmatpush.msra.mxu3 %v7337_v51  ;;  %196 = vmatpush.msra.mxu0 %v7364_v59 }
  0x2e   :  { %11314 = vst [vmem:[#allocation45_spill] sm:$0xff] %v7367_v60  ;;  %265 = vmatpush.msra.mxu1 %v7449_v55  ;;  %348 = vmatpush.msra.mxu2 %v7390_v3  ;;  %v299_v57 = vsub.f32 %v7455_v47, %v7496_v54 }
  0x2f   :  { %152 = vst [vmem:[#allocation1] ss:$4 sm:$0xff] %v7356_v56  ;;  %v7452_v56 = vand.u32 4294901760, %v7414_v31  ;;  %392 = vmatpush.msra.mxu3 %v7364_v59  ;;  %198 = vmatpush.msra.mxu0 %v7384_v1 }
  0x30   :  { %11315 = vst [vmem:[#allocation46_spill] sm:$0xff] %v7374_v62  ;;  %271 = vmatpush.msra.mxu1 %v7472_v63  ;;  %v59_v62 = vld [vmem:[%s10691_s5 + $0xc0] sm:$0xff]  ;;  %351 = vmatpush.msra.mxu2 %v7414_v31 }
  0x31   :  { %11316 = vst [vmem:[#allocation47_spill] sm:$0xff] %v7384_v1  ;;  %v287_v20 = vsub.f32 %v7414_v31, %v7452_v56  ;;  %394 = vmatpush.msra.mxu3 %v7384_v1  ;;  %200 = vmatpush.msra.mxu0 %v7411_v27  ;;  %v7550_v39 = vand.u32 4294901760, %v59_v62 }
  0x32   :  { %11317 = vst [vmem:[#allocation48_spill] sm:$0xff] %v7387_v2  ;;  %277 = vmatpush.msra.mxu1 %v7482_v8  ;;  %354 = vmatpush.msra.mxu2 %v7435_v48 }
  0x33   :  { %11318 = vst [vmem:[#allocation49_spill] sm:$0xff] %v7390_v3  ;;  %v7523_v3 = vand.u32 4294901760, %v61_v43  ;;  %v7536_v0 = vand.u32 4294901760, %v287_v20  ;;  %396 = vmatpush.msra.mxu3 %v7411_v27  ;;  %v58_v20 = vld [vmem:[%s10691_s5 + $0xb8] sm:$0xff]  ;;  %202 = vmatpush.msra.mxu0 %v7418_v32 }
  0x34   :  { %11319 = vst [vmem:[#allocation50_spill] sm:$0xff] %v7401_v9  ;;  %283 = vmatpush.msra.mxu1 %v7516_v35  ;;  %357 = vmatpush.msra.mxu2 %v7455_v47 }
  0x35   :  { %11320 = vst [vmem:[#allocation51_spill] sm:$0xff] %v7403_v13  ;;  %v7565_v38 = vsub.f32 %v61_v43, %v7523_v3  ;;  %409 = vmatpush.msrb.mxu0 %v7255_v23  ;;  %398 = vmatpush.msra.mxu3 %v7418_v32  ;;  %v568_v43 = vsub.f32 %v7499_v49, %v7541_v50 }
  0x36   :  { %11321 = vst [vmem:[#allocation52_spill] sm:$0xff] %v7407_v14  ;;  %v293_v14 = vsub.f32 %v7435_v48, %v7477_v22  ;;  %289 = vmatpush.msra.mxu1 %v7536_v0  ;;  %360 = vmatpush.msra.mxu2 %v7462_v61 }
  0x37   :  { %11322 = vst [vmem:[#allocation53_spill] sm:$0xff] %v7411_v27  ;;  %413 = vmatpush.msrb.mxu0 %v7258_v24 }
  0x38   :  { %11323 = vst [vmem:[#allocation54_spill] sm:$0xff] %v7414_v31  ;;  %v7544_v31 = vsub.f32 %v62_v19, %v7501_v17  ;;  %513 = vmatpush.msrb.mxu2 %v7403_v13 }
  0x39   :  { %11324 = vst [vmem:[#allocation55_spill] sm:$0xff] %v7418_v32  ;;  %417 = vmatpush.msrb.mxu0 %v7261_v25 }
  0x3a   :  { %11325 = vst [vmem:[#allocation56_spill] sm:$0xff] %v7420_v33  ;;  %v7584_v23 = vand.u32 4294901760, %v7544_v31  ;;  %515 = vmatpush.msrb.mxu2 %v7420_v33 }
  0x3b   :  { %11326 = vst [vmem:[#allocation57_spill] sm:$0xff] %v7427_v40  ;;  %v60_v40 = vld [vmem:[%s10691_s5 + $0xc8] sm:$0xff]  ;;  %421 = vmatpush.msrb.mxu0 %v7270_v28 }
  0x3c   :  { %11327 = vst [vmem:[#allocation58_spill] sm:$0xff] %v7432_v45  ;;  %517 = vmatpush.msrb.mxu2 %v7457_v41 }
  0x3d   :  { %11328 = vst [vmem:[#allocation59_spill] sm:$0xff] %v7435_v48  ;;  %v7562_v48 = vand.u32 4294901760, %v7521_v15  ;;  %425 = vmatpush.msrb.mxu0 %v7286_v34 }
  0x3e   :  { %11329 = vst [vmem:[#allocation60_spill] sm:$0xff] %v7442_v58  ;;  %519 = vmatpush.msrb.mxu2 %v7479_v7 }
  0x3f   :  { %11330 = vst [vmem:[#allocation61_spill] sm:$0xff] %v7449_v55  ;;  %v7509_v55 = vand.u32 4294901760, %v7462_v61  ;;  %v574_v24 = vsub.f32 %v7521_v15, %v7562_v48  ;;  %429 = vmatpush.msrb.mxu0 %v7295_v37 }
  0x40   :  { %11331 = vst [vmem:[#allocation62_spill] sm:$0xff] %v7452_v56  ;;  %521 = vmatpush.msrb.mxu2 %v7501_v17 }
  0x41   :  { %11332 = vst [vmem:[#allocation63_spill] sm:$0xff] %v7455_v47  ;;  %v305_v19 = vsub.f32 %v7462_v61, %v7509_v55  ;;  %v7593_v47 = vsub.f32 %v59_v62, %v7550_v39  ;;  %433 = vmatpush.msrb.mxu0 %v7321_v46 }
  0x42   :  { %11333 = vst [vmem:[#allocation64_spill] sm:$0xff] %v7457_v41  ;;  %523 = vmatpush.msrb.mxu2 %v7523_v3 }
  0x43   :  { %11334 = vst [vmem:[#allocation65_spill] sm:$0xff] %v7462_v61  ;;  %v7605_v61 = vand.u32 4294901760, %v7565_v38  ;;  %437 = vmatpush.msrb.mxu0 %v7340_v52 }
  0x44   :  { %11335 = vst [vmem:[#allocation66_spill] sm:$0xff] %v7465_v30 }
  0x45   :  { %11336 = vst [vmem:[#allocation67_spill] sm:$0xff] %v7472_v63  ;;  %v7532_v63 = vand.u32 4294901760, %v60_v40  ;;  %441 = vmatpush.msrb.mxu0 %v7367_v60 }
  0x46   :  { %11337 = vst [vmem:[#allocation68_spill] sm:$0xff] %v7477_v22 }
  0x47   :  { %11338 = vst [vmem:[#allocation69_spill] sm:$0xff] %v7479_v7  ;;  %v7572_v27 = vsub.f32 %v60_v40, %v7532_v63  ;;  %v7590_v40 = vand.u32 4294901760, %v562_v44  ;;  %525 = vmatpush.msrb.mxu2 %v7532_v63  ;;  %445 = vmatpush.msrb.mxu0 %v7387_v2  ;;  %v156_v2 = vld.sshfl [vmem:[#allocation1 + $0x8] sm:$0xff pattern:$0x73625140] }
  0x48   :  { %11339 = vst [vmem:[#allocation70_spill] sm:$0xff] %v7482_v8  ;;  %v7557_v8 = vand.u32 4294901760, %v293_v14  ;;  %v57_v14 = vld [vmem:[%s10691_s5 + $0xb0] sm:$0xff] }
  0x49   :  { %11340 = vst [vmem:[#allocation71_spill] sm:$0xff] %v7486_v21  ;;  %v7607_v44 = vand.u32 4294901760, %v57_v14  ;;  %v7612_v62 = vand.u32 4294901760, %v7572_v27  ;;  %527 = vmatpush.msrb.mxu2 %v7550_v39  ;;  %449 = vmatpush.msrb.mxu0 %v7401_v9 }
  0x4a   :  { %11341 = vst [vmem:[#allocation72_spill] sm:$0xff] %v7496_v54  ;;  %295 = vmatpush.msra.mxu1 %v7557_v8 }
  0x4b   :  { %11342 = vst [vmem:[#allocation73_spill] sm:$0xff] %v7499_v49  ;;  %v7643_v28 = vsub.f32 %v57_v14, %v7607_v44  ;;  %453 = vmatpush.msrb.mxu0 %v7432_v45 }
  0x4c   :  { %11343 = vst [vmem:[#allocation74_spill] sm:$0xff] %v7501_v17 }
  0x4d   :  { %11344 = vst [vmem:[#allocation75_spill] sm:$0xff] %v7509_v55  ;;  %457 = vmatpush.msrb.mxu0 %v7452_v56 }
  0x4e   :  { %11345 = vst [vmem:[#allocation76_spill] sm:$0xff] %v7512_v16  ;;  %v7569_v16 = vand.u32 4294901760, %v556_v53  ;;  %v7586_v53 = vand.u32 4294901760, %v58_v20 }
  0x4f   :  { %11346 = vst [vmem:[#allocation77_spill] sm:$0xff] %v7516_v35  ;;  %v7578_v35 = vand.u32 4294901760, %v299_v57  ;;  %v56_v57 = vld [vmem:[%s10691_s5 + $0xa8] sm:$0xff]  ;;  %461 = vmatpush.msrb.mxu0 %v7477_v22 }
  0x50   :  { %11347 = vst [vmem:[#allocation78_spill] sm:$0xff] %v7521_v15  ;;  %558 = vmatpush.msrb.mxu3 %v7569_v16  ;;  %v7624_v25 = vsub.f32 %v58_v20, %v7586_v53  ;;  %v586_v20 = vsub.f32 %v7565_v38, %v7605_v61  ;;  %529 = vmatpush.msrb.mxu2 %v7586_v53 }
  0x51   :  { %11348 = vst [vmem:[#allocation79_spill] sm:$0xff] %v7523_v3  ;;  %301 = vmatpush.msra.mxu1 %v7578_v35  ;;  %465 = vmatpush.msrb.mxu0 %v7496_v54 }
  0x52   :  { %11349 = vst [vmem:[#allocation80_spill] sm:$0xff] %v7532_v63  ;;  %564 = vmatpush.msrb.mxu3 %v7590_v40  ;;  %531 = vmatpush.msrb.mxu2 %v7607_v44 }
  0x53   :  { %11350 = vst [vmem:[#allocation81_spill] sm:$0xff] %v7536_v0  ;;  %v7600_v0 = vand.u32 4294901760, %v305_v19  ;;  %v55_v19 = vld [vmem:[%s10691_s5 + $0xa0] sm:$0xff]  ;;  %469 = vmatpush.msrb.mxu0 %v7509_v55 }
  0x54   :  { %11351 = vst [vmem:[#allocation82_spill] sm:$0xff] %v7541_v50  ;;  %v7631_v50 = vand.u32 4294901760, %v7593_v47 }
  0x55   :  { %11352 = vst [vmem:[#allocation83_spill] sm:$0xff] %v7544_v31  ;;  %307 = vmatpush.msra.mxu1 %v7600_v0 }
  0x56   :  { %11353 = vst [vmem:[#allocation84_spill] sm:$0xff] %v7550_v39  ;;  %v598_v34 = vsub.f32 %v7593_v47, %v7631_v50 }
  0x57   :  { %11354 = vst [vmem:[#allocation85_spill] sm:$0xff] %v7557_v8  ;;  %v7619_v8 = vand.u32 4294901760, %v568_v43  ;;  %v54_v43 = vld [vmem:[%s10691_s5 + $0x98] sm:$0xff]  ;;  %476 = vmatpush.msrb.mxu1 %v7200_v4 }
  0x58   :  { %11355 = vst [vmem:[#allocation86_spill] sm:$0xff] %v7562_v48  ;;  %v580_v48 = vsub.f32 %v7544_v31, %v7584_v23  ;;  %v7661_v41 = vand.u32 4294901760, %v54_v43 }
  0x59   :  { %11356 = vst [vmem:[#allocation87_spill] sm:$0xff] %v7565_v38  ;;  %570 = vmatpush.msrb.mxu3 %v7619_v8  ;;  %478 = vmatpush.msrb.mxu1 %v7202_v5 }
  0x5a   :  { %11357 = vst [vmem:[#allocation88_spill] sm:$0xff] %v7569_v16  ;;  %v7626_v16 = vand.u32 4294901760, %v56_v57  ;;  %v7699_v46 = vsub.f32 %v54_v43, %v7661_v41 }
  0x5b   :  { %11358 = vst [vmem:[#allocation89_spill] sm:$0xff] %v7572_v27  ;;  %480 = vmatpush.msrb.mxu1 %v7204_v6 }
  0x5c   :  { %11359 = vst [vmem:[#allocation90_spill] sm:$0xff] %v7578_v35  ;;  %v7638_v35 = vand.u32 4294901760, %v574_v24  ;;  %v7653_v24 = vand.u32 4294901760, %v580_v48  ;;  %v7659_v14 = vsub.f32 %v56_v57, %v7626_v16  ;;  %v53_v48 = vld [vmem:[%s10691_s5 + $0x90] sm:$0xff]  ;;  %v7675_v57 = vand.u32 4294901760, %v7643_v28  ;;  %533 = vmatpush.msrb.mxu2 %v7626_v16 }
  0x5d   :  { %11360 = vst [vmem:[#allocation91_spill] sm:$0xff] %v7584_v23  ;;  %v592_v23 = vsub.f32 %v7572_v27, %v7612_v62  ;;  %482 = vmatpush.msrb.mxu1 %v7215_v10 }
  0x5e   :  { %11361 = vst [vmem:[#allocation92_spill] sm:$0xff] %v7586_v53  ;;  %576 = vmatpush.msrb.mxu3 %v7638_v35 }
  0x5f   :  { %11362 = vst [vmem:[#allocation93_spill] sm:$0xff] %v7590_v40  ;;  %v7645_v40 = vand.u32 4294901760, %v55_v19  ;;  %v7684_v4 = vand.u32 4294901760, %v592_v23  ;;  %v7703_v23 = vand.u32 4294901760, %v598_v34  ;;  %v51_v34 = vld [vmem:[%s10691_s5 + $0x80] sm:$0xff]  ;;  %484 = vmatpush.msrb.mxu1 %v7217_v11 }
  0x60   :  { %11363 = vst [vmem:[#allocation94_spill] sm:$0xff] %v7593_v47  ;;  %582 = vmatpush.msrb.mxu3 %v7653_v24  ;;  %v7736_v60 = vand.u32 4294901760, %v51_v34 }
  0x61   :  { %11364 = vst [vmem:[#allocation95_spill] sm:$0xff] %v7600_v0  ;;  %v155_v0 = vld.sshfl [vmem:[#allocation1] sm:$0xff pattern:$0x73625140]  ;;  %v7678_v37 = vsub.f32 %v55_v19, %v7645_v40  ;;  %486 = vmatpush.msrb.mxu1 %v7219_v12  ;;  %535 = vmatpush.msrb.mxu2 %v7645_v40 }
  0x62   :  { %11365 = vst [vmem:[#allocation96_spill] sm:$0xff] %v7605_v61  ;;  %v7656_v61 = vand.u32 4294901760, %v7624_v25  ;;  %v7680_v5 = vand.u32 4294901760, %v155_v0 }
  0x63   :  { %11366 = vst [vmem:[#allocation97_spill] sm:$0xff] %v7607_v44  ;;  %v7710_v6 = vand.u32 4294901760, %v7678_v37  ;;  %488 = vmatpush.msrb.mxu1 %v7238_v18  ;;  %v7772_v18 = vand.u32 4294901760, %v156_v2  ;;  %537 = vmatpush.msrb.mxu2 %v7661_v41 }
  0x64   :  { %11367 = vst [vmem:[#allocation98_spill] sm:$0xff] %v7612_v62  ;;  %v604_v19 = vsub.f32 %v7624_v25, %v7656_v61  ;;  %309 = vmatmul.f32.vlgmr.msra.gmra.mxu1 %v7680_v5 }
  0x65   :  { %11368 = vst [vmem:[#allocation99_spill] sm:$0xff] %v7619_v8  ;;  %v7672_v8 = vand.u32 4294901760, %v586_v20  ;;  %v7694_v20 = vand.u32 4294901760, %v7659_v14  ;;  %490 = vmatpush.msrb.mxu1 %v7263_v26 }
  0x66   :  { %11369 = vst [vmem:[#allocation100_spill] sm:$0xff] %v7624_v25  ;;  %v7724_v52 = vand.u32 4294901760, %v604_v19 }
  0x67   :  { %11370 = vst [vmem:[#allocation101_spill] sm:$0xff] %v7626_v16  ;;  %588 = vmatpush.msrb.mxu3 %v7672_v8  ;;  %492 = vmatpush.msrb.mxu1 %v7272_v29 }
  0x68   :  { %11371 = vst [vmem:[#allocation102_spill] sm:$0xff] %v7631_v50  ;;  %v7696_v50 = vand.u32 4294901760, %v53_v48 }
  0x69   :  { %11372 = vst [vmem:[#allocation103_spill] sm:$0xff] %v7638_v35  ;;  %v52_v35 = vld [vmem:[%s10691_s5 + $0x88] sm:$0xff]  ;;  %594 = vmatpush.msrb.mxu3 %v7684_v4  ;;  %494 = vmatpush.msrb.mxu1 %v7292_v36 }
  0x6a   :  { %11373 = vst [vmem:[#allocation104_spill] sm:$0xff] %v7643_v28  ;;  %v7715_v43 = vand.u32 4294901760, %v52_v35  ;;  %v7732_v10 = vsub.f32 %v53_v48, %v7696_v50  ;;  %539 = vmatpush.msrb.mxu2 %v7696_v50 }
  0x6b   :  { %11374 = vst [vmem:[#allocation105_spill] sm:$0xff] %v7645_v40  ;;  %600 = vmatpush.msrb.mxu3 %v7703_v23  ;;  %496 = vmatpush.msrb.mxu1 %v7309_v42 }
  0x6c   :  { %11375 = vst [vmem:[#allocation106_spill] sm:$0xff] %v7653_v24  ;;  %v610_v24 = vsub.f32 %v7643_v28, %v7675_v57  ;;  %v7746_v48 = vsub.f32 %v52_v35, %v7715_v43  ;;  %v7757_v12 = vand.u32 4294901760, %v7732_v10  ;;  %v7762_v35 = vsub.f32 %v51_v34, %v7736_v60  ;;  %541 = vmatpush.msrb.mxu2 %v7715_v43 }
  0x6d   :  { %11376 = vst [vmem:[#allocation107_spill] sm:$0xff] %v7656_v61  ;;  %v7713_v61 = vsub.f32 %v155_v0, %v7680_v5  ;;  %v616_v0 = vsub.f32 %v7659_v14, %v7694_v20  ;;  %606 = vmatpush.msrb.mxu3 %v7724_v52  ;;  %498 = vmatpush.msrb.mxu1 %v7337_v51 }
  0x6e   :  { %11377 = vst [vmem:[#allocation108_spill] sm:$0xff] %v7659_v14  ;;  %v7740_v19 = vand.u32 4294901760, %v610_v24  ;;  %v7785_v45 = vand.u32 4294901760, %v7762_v35  ;;  %543 = vmatpush.msrb.mxu2 %v7736_v60 }
  0x6f   :  { %11378 = vst [vmem:[#allocation109_spill] sm:$0xff] %v7661_v41  ;;  %v205_v11 = vand.u32 4294901760, %v7713_v61  ;;  %500 = vmatpush.msrb.mxu1 %v7364_v59  ;;  %363 = vmatmul.f32.vlgmr.msra.gmra.mxu2 %v7713_v61 }
  0x70   :  { %11379 = vst [vmem:[#allocation110_spill] sm:$0xff] %v7672_v8  ;;  %v7729_v8 = vand.u32 4294901760, %v7699_v46  ;;  %612 = vmatpush.msrb.mxu3 %v7740_v19  ;;  %750 = vmatpush.msra.mxu2 %v7486_v21 }
  0x71   :  { %11380 = vst [vmem:[#allocation111_spill] sm:$0xff] %v7675_v57  ;;  %502 = vmatpush.msrb.mxu1 %v7384_v1  ;;  %402 = vmatmul.f32.vlgmr.msra.gmra.mxu3 %v205_v11 }
  0x72   :  { %11381 = vst [vmem:[#allocation112_spill] sm:$0xff] %v7678_v37  ;;  %v628_v24 = vsub.f32 %v7699_v46, %v7729_v8 }
  0x73   :  { %11382 = vst [vmem:[#allocation113_spill] sm:$0xff] %v7684_v4  ;;  %v622_v4 = vsub.f32 %v7678_v37, %v7710_v6 }
  0x74   :  { %11383 = vst [vmem:[#allocation114_spill] sm:$0xff] %v7694_v20  ;;  %v7778_v34 = vand.u32 4294901760, %v628_v24  ;;  %v7792_v24 = vsub.f32 %v156_v2, %v7772_v18 }
  0x75   :  { %11384 = vst [vmem:[#allocation115_spill] sm:$0xff] %v7696_v50  ;;  %v7766_v9 = vand.u32 4294901760, %v622_v4  ;;  %v634_v4 = vsub.f32 %v7732_v10, %v7757_v12 }
  0x76   :  { %11385 = vst [vmem:[#allocation116_spill] sm:$0xff] %v7699_v46  ;;  %v10786_v54 = vand.u32 4294901760, %v7792_v24 }
  0x77   :  { %11386 = vst [vmem:[#allocation117_spill] sm:$0xff] %v7703_v23  ;;  %v7752_v23 = vand.u32 4294901760, %v616_v0  ;;  %v206_v0 = vsub.f32 %v7713_v61, %v205_v11  ;;  %v7798_v22 = vand.u32 4294901760, %v634_v4  ;;  %v11405_v61 = vld [vmem:[#allocation53_spill] sm:$0xff]  ;;  %v11407_v11 = vld [vmem:[#allocation82_spill] sm:$0xff] }
  0x78   :  { %11387 = vst [vmem:[#allocation118_spill] sm:$0xff] %v7710_v6  ;;  %504 = vmatpush.msrb.mxu1 %v11405_v61 }
  0x79   :  { %11388 = vst [vmem:[#allocation119_spill] sm:$0xff] %v7715_v43  ;;  %618 = vmatpush.msrb.mxu3 %v7752_v23  ;;  %v207_v56 = vand.u32 4294901760, %v206_v0  ;;  %v646_v0 = vsub.f32 %v7762_v35, %v7785_v45 }
  0x7a   :  { %11389 = vst [vmem:[#allocation120_spill] sm:$0xff] %v7724_v52  ;;  %v7770_v52 = vand.u32 4294901760, %v7746_v48  ;;  %506 = vmatpush.msrb.mxu1 %v7418_v32 }
  0x7b   :  { %11390 = vst [vmem:[#allocation121_spill] sm:$0xff] %v7729_v8  ;;  %624 = vmatpush.msrb.mxu3 %v7766_v9  ;;  %208 = vmatmul.f32.vlgmr.msra.gmra.mxu0 %v207_v56  ;;  %v7814_v4 = vand.u32 4294901760, %v646_v0  ;;  %v547_v56 = vsub.f32 %v7792_v24, %v10786_v54  ;;  %v11408_v54 = vld [vmem:[#allocation86_spill] sm:$0xff] }
  0x7c   :  { %11391 = vst [vmem:[#allocation122_spill] sm:$0xff] %v7732_v10  ;;  %656 = vmatpush.msra.mxu0 %v7442_v58  ;;  %709 = vmatpush.msra.mxu1 %v7403_v13 }
  0x7d   :  { %11392 = vst [vmem:[#allocation123_spill] sm:$0xff] %v7736_v60  ;;  %630 = vmatpush.msrb.mxu3 %v7778_v34  ;;  %v548_v0 = vand.u32 4294901760, %v547_v56  ;;  %v11409_v56 = vld [vmem:[#allocation64_spill] sm:$0xff]  ;;  %508 = vmatmul.f32.vlgmr.msrb.gmra.mxu1 %v7680_v5 }
  0x7e   :  { %11393 = vst [vmem:[#allocation124_spill] sm:$0xff] %v7740_v19  ;;  %659 = vmatpush.msra.mxu0 %v7465_v30  ;;  %711 = vmatpush.msra.mxu1 %v7420_v33  ;;  %v73_v30 = vld [vmem:[%s10691_s5 + $0x130] sm:$0xff] }
  0x7f   :  { %11394 = vst [vmem:[#allocation125_spill] sm:$0xff] %v7746_v48  ;;  %636 = vmatpush.msrb.mxu3 %v7798_v22  ;;  %549 = vmatmul.f32.vlgmr.msrb.gmra.mxu2 %v548_v0  ;;  %v11411_v0 = vld [vmem:[#allocation96_spill] sm:$0xff]  ;;  %v8003_v21 = vand.u32 4294901760, %v73_v30 }
  0x80   :  { %11395 = vst [vmem:[#allocation126_spill] sm:$0xff] %v7752_v23  ;;  %v640_v23 = vsub.f32 %v7746_v48, %v7770_v52  ;;  %662 = vmatpush.msra.mxu0 %v7499_v49  ;;  %713 = vmatpush.msra.mxu1 %v11409_v56 }
  0x81   :  { %11396 = vst [vmem:[#allocation127_spill] sm:$0xff] %v7757_v12 }
  0x82   :  { %11397 = vst [vmem:[#allocation128_spill] sm:$0xff] %v7762_v35  ;;  %v7805_v2 = vand.u32 4294901760, %v640_v23  ;;  %665 = vmatpush.msra.mxu0 %v7521_v15  ;;  %v11406_v23 = vld [vmem:[#allocation76_spill] sm:$0xff]  ;;  %715 = vmatpush.msra.mxu1 %v7479_v7 }
  0x83   :  { %11398 = vst [vmem:[#allocation129_spill] sm:$0xff] %v7766_v9  ;;  %754 = vmatpush.msra.mxu2 %v11406_v23  ;;  %471 = vmatmul.f32.vlgmr.msrb.gmra.mxu0 %v7680_v5  ;;  %v11412_v5 = vld [vmem:[#allocation102_spill] sm:$0xff] }
  0x84   :  { %11399 = vst [vmem:[#allocation130_spill] sm:$0xff] %v7770_v52  ;;  %642 = vmatpush.msrb.mxu3 %v7805_v2  ;;  %668 = vmatpush.msra.mxu0 %v7544_v31  ;;  %v11410_v31 = vld [vmem:[#allocation91_spill] sm:$0xff] }
  0x85   :  { %11400 = vst [vmem:[#allocation131_spill] sm:$0xff] %v7778_v34  ;;  %758 = vmatpush.msra.mxu2 %v11407_v11  ;;  %717 = vmatpush.msra.mxu1 %v7501_v17 }
  0x86   :  { %11401 = vst [vmem:[#allocation132_spill] sm:$0xff] %v7785_v45  ;;  %648 = vmatpush.msrb.mxu3 %v7814_v4  ;;  %671 = vmatpush.msra.mxu0 %v7565_v38 }
  0x87   :  { %11402 = vst [vmem:[#allocation133_spill] sm:$0xff] %v7798_v22  ;;  %762 = vmatpush.msra.mxu2 %v11408_v54  ;;  %650 = vmatmul.f32.vlgmr.msrb.gmra.mxu3 %v7772_v18 }
  0x88   :  { %11403 = vst [vmem:[#allocation134_spill] sm:$0xff] %v7805_v2  ;;  %817 = vmatpush.msra.mxu3 %v7403_v13  ;;  %674 = vmatpush.msra.mxu0 %v7572_v27 }
  0x89   :  { %11404 = vst [vmem:[#allocation135_spill] sm:$0xff] %v7814_v4  ;;  %766 = vmatpush.msra.mxu2 %v11410_v31  ;;  %719 = vmatpush.msra.mxu1 %v7523_v3 }
  0x8a   :  { %819 = vmatpush.msra.mxu3 %v7420_v33  ;;  %677 = vmatpush.msra.mxu0 %v7593_v47  ;;  %v11413_v47 = vld [vmem:[#allocation107_spill] sm:$0xff]  ;;  %11438 = vst [vmem:[#allocation160_spill] sm:$0xff] %v8003_v21 }
  0x8b   :  { %770 = vmatpush.msra.mxu2 %v11411_v0  ;;  %721 = vmatpush.msra.mxu1 %v7532_v63  ;;  %v74_v0 = vld [vmem:[%s10691_s5 + $0x138] sm:$0xff] }
  0x8c   :  { %821 = vmatpush.msra.mxu3 %v11409_v56  ;;  %680 = vmatpush.msra.mxu0 %v7624_v25  ;;  %v82_v25 = vld [vmem:[%s10691_s5 + $0x178] sm:$0xff]  ;;  %v7984_v58 = vand.u32 4294901760, %v74_v0 }
  0x8d   :  { %774 = vmatpush.msra.mxu2 %v7612_v62  ;;  %723 = vmatpush.msra.mxu1 %v7550_v39  ;;  %v75_v62 = vld [vmem:[%s10691_s5 + $0x140] sm:$0xff] }
  0x8e   :  { %823 = vmatpush.msra.mxu3 %v7479_v7  ;;  %683 = vmatpush.msra.mxu0 %v7643_v28  ;;  %v81_v28 = vld [vmem:[%s10691_s5 + $0x170] sm:$0xff]  ;;  %v7965_v49 = vand.u32 4294901760, %v75_v62  ;;  %11434 = vst [vmem:[#allocation156_spill] sm:$0xff] %v7984_v58 }
  0x8f   :  { %778 = vmatpush.msra.mxu2 %v11412_v5  ;;  %725 = vmatpush.msra.mxu1 %v7586_v53  ;;  %v7880_v27 = vand.u32 4294901760, %v81_v28 }
  0x90   :  { %825 = vmatpush.msra.mxu3 %v7501_v17  ;;  %686 = vmatpush.msra.mxu0 %v7659_v14  ;;  %v7871_v14 = vand.u32 4294901760, %v82_v25  ;;  %11430 = vst [vmem:[#allocation152_spill] sm:$0xff] %v7965_v49 }
  0x91   :  { %782 = vmatpush.msra.mxu2 %v11413_v47  ;;  %11415 = vst [vmem:[#allocation137_spill] sm:$0xff] %v7880_v27  ;;  %727 = vmatpush.msra.mxu1 %v7607_v44  ;;  %v78_v47 = vld [vmem:[%s10691_s5 + $0x158] sm:$0xff] }
  0x92   :  { %827 = vmatpush.msra.mxu3 %v7523_v3  ;;  %689 = vmatpush.msra.mxu0 %v7678_v37  ;;  %11414 = vst [vmem:[#allocation136_spill] sm:$0xff] %v7871_v14  ;;  %v80_v37 = vld [vmem:[%s10691_s5 + $0x168] sm:$0xff] }
  0x93   :  { %786 = vmatpush.msra.mxu2 %v7675_v57  ;;  %v7889_v57 = vand.u32 4294901760, %v80_v37  ;;  %729 = vmatpush.msra.mxu1 %v7626_v16 }
  0x94   :  { %829 = vmatpush.msra.mxu3 %v7532_v63  ;;  %692 = vmatpush.msra.mxu0 %v7699_v46  ;;  %v79_v46 = vld [vmem:[%s10691_s5 + $0x160] sm:$0xff] }
  0x95   :  { %790 = vmatpush.msra.mxu2 %v7694_v20  ;;  %11416 = vst [vmem:[#allocation138_spill] sm:$0xff] %v7889_v57  ;;  %v7892_v20 = vsub.f32 %v82_v25, %v7871_v14  ;;  %v77_v25 = vld [vmem:[%s10691_s5 + $0x150] sm:$0xff]  ;;  %731 = vmatpush.msra.mxu1 %v7645_v40 }
  0x96   :  { %831 = vmatpush.msra.mxu3 %v7550_v39  ;;  %695 = vmatpush.msra.mxu0 %v7732_v10  ;;  %v7901_v10 = vand.u32 4294901760, %v79_v46  ;;  %v7923_v38 = vand.u32 4294901760, %v77_v25 }
  0x97   :  { %794 = vmatpush.msra.mxu2 %v7710_v6  ;;  %11417 = vst [vmem:[#allocation139_spill] sm:$0xff] %v7892_v20  ;;  %v7904_v6 = vsub.f32 %v81_v28, %v7880_v27  ;;  %v7919_v28 = vsub.f32 %v80_v37, %v7889_v57  ;;  %733 = vmatpush.msra.mxu1 %v7661_v41 }
  0x98   :  { %833 = vmatpush.msra.mxu3 %v7586_v53  ;;  %698 = vmatpush.msra.mxu0 %v7746_v48  ;;  %11418 = vst [vmem:[#allocation140_spill] sm:$0xff] %v7901_v10  ;;  %v7911_v48 = vand.u32 4294901760, %v78_v47  ;;  %v7934_v37 = vsub.f32 %v79_v46, %v7901_v10 }
  0x99   :  { %798 = vmatpush.msra.mxu2 %v7729_v8  ;;  %11419 = vst [vmem:[#allocation141_spill] sm:$0xff] %v7904_v6  ;;  %v7916_v8 = vand.u32 4294901760, %v7892_v20  ;;  %735 = vmatpush.msra.mxu1 %v7696_v50  ;;  %v7951_v15 = vand.u32 4294901760, %v7919_v28 }
  0x9a   :  { %835 = vmatpush.msra.mxu3 %v7607_v44  ;;  %701 = vmatpush.msra.mxu0 %v7762_v35  ;;  %11420 = vst [vmem:[#allocation142_spill] sm:$0xff] %v7911_v48  ;;  %v76_v35 = vld [vmem:[%s10691_s5 + $0x148] sm:$0xff]  ;;  %v7939_v5 = vsub.f32 %v78_v47, %v7911_v48  ;;  %v7956_v47 = vsub.f32 %v77_v25, %v7923_v38  ;;  %v7968_v31 = vand.u32 4294901760, %v7934_v37 }
  0x9b   :  { %802 = vmatpush.msra.mxu2 %v7757_v12  ;;  %11421 = vst [vmem:[#allocation143_spill] sm:$0xff] %v7916_v8  ;;  %704 = vmatmul.f32.vlgmr.msra.gmra.mxu0 %v7792_v24  ;;  %v7931_v12 = vand.u32 4294901760, %v7904_v6  ;;  %v7948_v46 = vand.u32 4294901760, %v76_v35  ;;  %v909_v54 = vsub.f32 %v7919_v28, %v7951_v15 }
  0x9c   :  { %837 = vmatpush.msra.mxu3 %v7626_v16  ;;  %11422 = vst [vmem:[#allocation144_spill] sm:$0xff] %v7919_v28  ;;  %854 = vmatpush.msrb.mxu0 %v7871_v14  ;;  %v7973_v25 = vand.u32 4294901760, %v7939_v5  ;;  %v7992_v23 = vand.u32 4294901760, %v7956_v47 }
  0x9d   :  { %11423 = vst [vmem:[#allocation145_spill] sm:$0xff] %v7923_v38  ;;  %806 = vmatpush.msra.mxu2 %v7770_v52  ;;  %v897_v52 = vsub.f32 %v7892_v20, %v7916_v8  ;;  %737 = vmatpush.msra.mxu1 %v7715_v43  ;;  %v7987_v11 = vsub.f32 %v76_v35, %v7948_v46  ;;  %v8018_v55 = vand.u32 4294901760, %v909_v54  ;;  %v70_v54 = vld [vmem:[%s10691_s5 + $0x118] sm:$0xff] }
  0x9e   :  { %839 = vmatpush.msra.mxu3 %v7645_v40  ;;  %11424 = vst [vmem:[#allocation146_spill] sm:$0xff] %v7931_v12  ;;  %856 = vmatpush.msrb.mxu0 %v7880_v27  ;;  %v915_v35 = vsub.f32 %v7934_v37, %v7968_v31  ;;  %v8060_v2 = vand.u32 4294901760, %v70_v54 }
  0x9f   :  { %11425 = vst [vmem:[#allocation147_spill] sm:$0xff] %v7934_v37  ;;  %810 = vmatpush.msra.mxu2 %v7785_v45  ;;  %v903_v45 = vsub.f32 %v7904_v6, %v7931_v12  ;;  %739 = vmatpush.msra.mxu1 %v7736_v60 }
  0xa0   :  { %841 = vmatpush.msra.mxu3 %v7661_v41  ;;  %11426 = vst [vmem:[#allocation148_spill] sm:$0xff] %v7939_v5  ;;  %812 = vmatmul.f32.vlgmr.msra.gmra.mxu2 %v7772_v18  ;;  %v8102_v44 = vsub.f32 %v70_v54, %v8060_v2 }
  0xa1   :  { %11427 = vst [vmem:[#allocation149_spill] sm:$0xff] %v7948_v46  ;;  %858 = vmatpush.msrb.mxu0 %v7889_v57  ;;  %997 = vmatpush.msrb.mxu2 %v7892_v20  ;;  %v7980_v20 = vand.u32 4294901760, %v897_v52  ;;  %v7999_v52 = vand.u32 4294901760, %v903_v45  ;;  %v71_v45 = vld [vmem:[%s10691_s5 + $0x120] sm:$0xff] }
  0xa2   :  { %843 = vmatpush.msra.mxu3 %v7696_v50  ;;  %11428 = vst [vmem:[#allocation150_spill] sm:$0xff] %v7951_v15  ;;  %v8037_v50 = vand.u32 4294901760, %v915_v35 }
  0xa3   :  { %11429 = vst [vmem:[#allocation151_spill] sm:$0xff] %v7956_v47  ;;  %860 = vmatpush.msrb.mxu0 %v7901_v10  ;;  %1000 = vmatpush.msrb.mxu2 %v7904_v6  ;;  %v8006_v6 = vsub.f32 %v75_v62, %v7965_v49 }
  0xa4   :  { %845 = vmatpush.msra.mxu3 %v7715_v43  ;;  %11431 = vst [vmem:[#allocation153_spill] sm:$0xff] %v7968_v31  ;;  %v11440_v43 = vand.u32 4294901760, %v7792_v24  ;;  %899 = vmatpush.msrb.mxu1 %v7980_v20  ;;  %v8023_v24 = vand.u32 4294901760, %v7987_v11 }
  0xa5   :  { %11432 = vst [vmem:[#allocation154_spill] sm:$0xff] %v7973_v25  ;;  %862 = vmatpush.msrb.mxu0 %v7911_v48  ;;  %1003 = vmatpush.msrb.mxu2 %v7919_v28  ;;  %v157_v28 = vld.sshfl [vmem:[#allocation1 + $0x10] sm:$0xff pattern:$0x73625140]  ;;  %v8042_v4 = vand.u32 4294901760, %v8006_v6 }
  0xa6   :  { %847 = vmatpush.msra.mxu3 %v7736_v60  ;;  %11433 = vst [vmem:[#allocation155_spill] sm:$0xff] %v7980_v20  ;;  %743 = vmatmul.f32.vlgmr.msra.gmra.mxu1 %v11440_v43  ;;  %v921_v60 = vsub.f32 %v7939_v5, %v7973_v25  ;;  %v8026_v43 = vsub.f32 %v74_v0, %v7984_v58  ;;  %v8039_v0 = vand.u32 4294901760, %v71_v45  ;;  %v8054_v35 = vand.u32 4294901760, %v157_v28 }
  0xa7   :  { %849 = vmatmul.f32.vlgmr.msra.gmra.mxu3 %v7772_v18  ;;  %11435 = vst [vmem:[#allocation157_spill] sm:$0xff] %v7987_v11  ;;  %v72_v18 = vld [vmem:[%s10691_s5 + $0x128] sm:$0xff]  ;;  %864 = vmatpush.msrb.mxu0 %v7923_v38  ;;  %v927_v20 = vsub.f32 %v7956_v47, %v7992_v23 }
  0xa8   :  { %1050 = vmatpush.msrb.mxu3 %v7871_v14  ;;  %11436 = vst [vmem:[#allocation158_spill] sm:$0xff] %v7992_v23  ;;  %v8020_v62 = vand.u32 4294901760, %v72_v18  ;;  %1006 = vmatpush.msrb.mxu2 %v7934_v37  ;;  %v8045_v37 = vsub.f32 %v73_v30, %v8003_v21  ;;  %v8049_v41 = vand.u32 4294901760, %v921_v60  ;;  %v933_v30 = vsub.f32 %v7987_v11, %v8023_v24 }
  0xa9   :  { %11437 = vst [vmem:[#allocation159_spill] sm:$0xff] %v7999_v52  ;;  %905 = vmatpush.msrb.mxu1 %v7999_v52  ;;  %866 = vmatpush.msrb.mxu0 %v7948_v46  ;;  %v69_v52 = vld [vmem:[%s10691_s5 + $0x110] sm:$0xff]  ;;  %v8063_v40 = vand.u32 4294901760, %v8026_v43 }
  0xaa   :  { %11439 = vst [vmem:[#allocation161_spill] sm:$0xff] %v8006_v6  ;;  %1052 = vmatpush.msrb.mxu3 %v7880_v27  ;;  %1009 = vmatpush.msrb.mxu2 %v7939_v5  ;;  %v8066_v60 = vsub.f32 %v72_v18, %v8020_v62  ;;  %v8070_v5 = vand.u32 4294901760, %v927_v20  ;;  %v8076_v22 = vand.u32 4294901760, %v69_v52  ;;  %v8079_v16 = vand.u32 4294901760, %v8045_v37  ;;  %v68_v20 = vld [vmem:[%s10691_s5 + $0x108] sm:$0xff] }
  0xab   :  { %11441 = vst [vmem:[#allocation162_spill] sm:$0xff] %v8018_v55  ;;  %911 = vmatpush.msrb.mxu1 %v8018_v55  ;;  %868 = vmatpush.msrb.mxu0 %v7965_v49  ;;  %v939_v55 = vsub.f32 %v8006_v6, %v8042_v4  ;;  %v8082_v18 = vsub.f32 %v71_v45, %v8039_v0 }
  0xac   :  { %11442 = vst [vmem:[#allocation163_spill] sm:$0xff] %v8020_v62  ;;  %1054 = vmatpush.msrb.mxu3 %v7889_v57  ;;  %1012 = vmatpush.msrb.mxu2 %v7956_v47  ;;  %v8090_v47 = vsub.f32 %v157_v28, %v8054_v35  ;;  %v945_v45 = vsub.f32 %v8026_v43, %v8063_v40  ;;  %v8099_v34 = vand.u32 4294901760, %v8066_v60  ;;  %v98_v28 = vld [vmem:[%s10691_s5 + $0x1f8] sm:$0xff] }
  0xad   :  { %11443 = vst [vmem:[#allocation164_spill] sm:$0xff] %v8023_v24  ;;  %917 = vmatpush.msrb.mxu1 %v8037_v50  ;;  %870 = vmatpush.msrb.mxu0 %v7984_v58  ;;  %v8116_v54 = vand.u32 4294901760, %v939_v55  ;;  %v8121_v9 = vand.u32 4294901760, %v8082_v18  ;;  %v97_v55 = vld [vmem:[%s10691_s5 + $0x1f0] sm:$0xff] }
  0xae   :  { %11444 = vst [vmem:[#allocation165_spill] sm:$0xff] %v8026_v43  ;;  %1056 = vmatpush.msrb.mxu3 %v7901_v10  ;;  %1015 = vmatpush.msrb.mxu2 %v7987_v11  ;;  %v8109_v11 = vand.u32 4294901760, %v68_v20  ;;  %v8136_v39 = vand.u32 4294901760, %v945_v45  ;;  %v96_v45 = vld [vmem:[%s10691_s5 + $0x1e8] sm:$0xff] }
  0xaf   :  { %11445 = vst [vmem:[#allocation166_spill] sm:$0xff] %v8037_v50  ;;  %923 = vmatpush.msrb.mxu1 %v8049_v41  ;;  %v8094_v50 = vand.u32 4294901760, %v933_v30  ;;  %872 = vmatpush.msrb.mxu0 %v8003_v21  ;;  %v67_v30 = vld [vmem:[%s10691_s5 + $0x100] sm:$0xff]  ;;  %v963_v63 = vsub.f32 %v8082_v18, %v8121_v9 }
  0xb0   :  { %11446 = vst [vmem:[#allocation167_spill] sm:$0xff] %v8039_v0  ;;  %1058 = vmatpush.msrb.mxu3 %v7911_v48  ;;  %1018 = vmatpush.msrb.mxu2 %v8006_v6  ;;  %v8124_v6 = vsub.f32 %v69_v52, %v8076_v22  ;;  %v957_v52 = vsub.f32 %v8066_v60, %v8099_v34  ;;  %v8140_v19 = vand.u32 4294901760, %v67_v30 }
  0xb1   :  { %11447 = vst [vmem:[#allocation168_spill] sm:$0xff] %v8042_v4  ;;  %929 = vmatpush.msrb.mxu1 %v8070_v5  ;;  %874 = vmatpush.msrb.mxu0 %v8020_v62  ;;  %v8148_v53 = vsub.f32 %v68_v20, %v8109_v11  ;;  %v95_v20 = vld [vmem:[%s10691_s5 + $0x1e0] sm:$0xff] }
  0xb2   :  { %11448 = vst [vmem:[#allocation169_spill] sm:$0xff] %v8045_v37  ;;  %1060 = vmatpush.msrb.mxu3 %v7923_v38  ;;  %1021 = vmatpush.msrb.mxu2 %v8026_v43  ;;  %v8143_v43 = vand.u32 4294901760, %v8102_v44  ;;  %v8160_v3 = vand.u32 4294901760, %v8124_v6  ;;  %v8177_v7 = vand.u32 4294901760, %v957_v52  ;;  %v8182_v33 = vsub.f32 %v67_v30, %v8140_v19 }
  0xb3   :  { %11449 = vst [vmem:[#allocation170_spill] sm:$0xff] %v8049_v41  ;;  %v951_v41 = vsub.f32 %v8045_v37, %v8079_v16  ;;  %935 = vmatpush.msrb.mxu1 %v8094_v50  ;;  %876 = vmatpush.msrb.mxu0 %v8039_v0  ;;  %v8194_v52 = vand.u32 4294901760, %v95_v20  ;;  %v8198_v30 = vand.u32 4294901760, %v963_v63  ;;  %v93_v63 = vld [vmem:[%s10691_s5 + $0x1d0] sm:$0xff] }
  0xb4   :  { %11450 = vst [vmem:[#allocation171_spill] sm:$0xff] %v8060_v2  ;;  %1062 = vmatpush.msrb.mxu3 %v7948_v46  ;;  %1024 = vmatpush.msrb.mxu2 %v8045_v37  ;;  %v8162_v37 = vand.u32 4294901760, %v97_v55  ;;  %v969_v56 = vsub.f32 %v8102_v44, %v8143_v43 }
  0xb5   :  { %11451 = vst [vmem:[#allocation172_spill] sm:$0xff] %v8063_v40  ;;  %941 = vmatpush.msrb.mxu1 %v8116_v54  ;;  %878 = vmatpush.msrb.mxu0 %v8060_v2  ;;  %v8230_v1 = vsub.f32 %v95_v20, %v8194_v52 }
  0xb6   :  { %11452 = vst [vmem:[#allocation173_spill] sm:$0xff] %v8066_v60  ;;  %1064 = vmatpush.msrb.mxu3 %v7965_v49  ;;  %1027 = vmatpush.msrb.mxu2 %v8066_v60  ;;  %v8184_v60 = vand.u32 4294901760, %v96_v45  ;;  %v8203_v13 = vsub.f32 %v97_v55, %v8162_v37  ;;  %v8217_v55 = vand.u32 4294901760, %v969_v56  ;;  %v92_v56 = vld [vmem:[%s10691_s5 + $0x1c8] sm:$0xff] }
  0xb7   :  { %11453 = vst [vmem:[#allocation174_spill] sm:$0xff] %v8070_v5  ;;  %v8129_v5 = vand.u32 4294901760, %v98_v28  ;;  %947 = vmatpush.msrb.mxu1 %v8136_v39  ;;  %880 = vmatpush.msrb.mxu0 %v8076_v22  ;;  %v8267_v51 = vand.u32 4294901760, %v8230_v1 }
  0xb8   :  { %11454 = vst [vmem:[#allocation175_spill] sm:$0xff] %v8076_v22  ;;  %1066 = vmatpush.msrb.mxu3 %v7984_v58  ;;  %1030 = vmatpush.msrb.mxu2 %v8082_v18 }
  0xb9   :  { %11455 = vst [vmem:[#allocation176_spill] sm:$0xff] %v8079_v16  ;;  %v8173_v17 = vsub.f32 %v98_v28, %v8129_v5  ;;  %v8192_v28 = vand.u32 4294901760, %v8148_v53  ;;  %882 = vmatpush.msrb.mxu0 %v8109_v11  ;;  %v1256_v26 = vsub.f32 %v8230_v1, %v8267_v51 }
  0xba   :  { %11456 = vst [vmem:[#allocation177_spill] sm:$0xff] %v8082_v18  ;;  %1068 = vmatpush.msrb.mxu3 %v8003_v21  ;;  %1033 = vmatpush.msrb.mxu2 %v8102_v44 }
  0xbb   :  { %11457 = vst [vmem:[#allocation178_spill] sm:$0xff] %v8094_v50  ;;  %v8155_v50 = vand.u32 4294901760, %v951_v41  ;;  %v8208_v32 = vand.u32 4294901760, %v8173_v17  ;;  %884 = vmatpush.msrb.mxu0 %v8140_v19 }
  0xbc   :  { %11458 = vst [vmem:[#allocation179_spill] sm:$0xff] %v8099_v34  ;;  %1070 = vmatpush.msrb.mxu3 %v8020_v62  ;;  %1036 = vmatpush.msrb.mxu2 %v8124_v6 }
  0xbd   :  { %11459 = vst [vmem:[#allocation180_spill] sm:$0xff] %v8102_v44  ;;  %953 = vmatpush.msrb.mxu1 %v8155_v50  ;;  %v981_v44 = vsub.f32 %v8148_v53, %v8192_v28  ;;  %v1238_v20 = vsub.f32 %v8173_v17, %v8208_v32  ;;  %1091 = vmatpush.msra.mxu0 %v7916_v8  ;;  %v90_v8 = vld [vmem:[%s10691_s5 + $0x1b8] sm:$0xff] }
  0xbe   :  { %11460 = vst [vmem:[#allocation181_spill] sm:$0xff] %v8109_v11  ;;  %1072 = vmatpush.msrb.mxu3 %v8039_v0  ;;  %1039 = vmatpush.msrb.mxu2 %v8148_v53 }
  0xbf   :  { %11461 = vst [vmem:[#allocation182_spill] sm:$0xff] %v8116_v54  ;;  %v11472_v54 = vand.u32 4294901760, %v8090_v47  ;;  %959 = vmatpush.msrb.mxu1 %v8177_v7  ;;  %1095 = vmatpush.msra.mxu0 %v7931_v12  ;;  %v89_v12 = vld [vmem:[%s10691_s5 + $0x1b0] sm:$0xff] }
  0xc0   :  { %11462 = vst [vmem:[#allocation183_spill] sm:$0xff] %v8121_v9  ;;  %1074 = vmatpush.msrb.mxu3 %v8060_v2  ;;  %1042 = vmatpush.msrb.mxu2 %v8182_v33 }
  0xc1   :  { %11463 = vst [vmem:[#allocation184_spill] sm:$0xff] %v8124_v6  ;;  %v888_v41 = vsub.f32 %v8090_v47, %v11472_v54  ;;  %v94_v54 = vld [vmem:[%s10691_s5 + $0x1d8] sm:$0xff]  ;;  %965 = vmatpush.msrb.mxu1 %v8198_v30  ;;  %1045 = vmatmul.f32.vlgmr.msrb.gmra.mxu2 %v8090_v47 }
  0xc2   :  { %11464 = vst [vmem:[#allocation185_spill] sm:$0xff] %v8129_v5  ;;  %v8210_v61 = vand.u32 4294901760, %v94_v54  ;;  %1076 = vmatpush.msrb.mxu3 %v8076_v22  ;;  %1099 = vmatpush.msra.mxu0 %v7951_v15  ;;  %v11502_v15 = vand.u32 4294901760, %v8090_v47 }
  0xc3   :  { %11465 = vst [vmem:[#allocation186_spill] sm:$0xff] %v8136_v39  ;;  %v975_v39 = vsub.f32 %v8124_v6, %v8160_v3  ;;  %v889_v18 = vand.u32 4294901760, %v888_v41  ;;  %v8223_v41 = vsub.f32 %v96_v45, %v8184_v60  ;;  %v8242_v6 = vand.u32 4294901760, %v93_v63  ;;  %971 = vmatpush.msrb.mxu1 %v8217_v55  ;;  %1195 = vmatpush.msra.mxu2 %v8129_v5 }
  0xc4   :  { %11466 = vst [vmem:[#allocation187_spill] sm:$0xff] %v8140_v19  ;;  %v8248_v59 = vsub.f32 %v94_v54, %v8210_v61  ;;  %v8264_v54 = vand.u32 4294901760, %v981_v44  ;;  %1078 = vmatpush.msrb.mxu3 %v8109_v11  ;;  %v8283_v44 = vand.u32 4294901760, %v1238_v20  ;;  %v8300_v20 = vand.u32 4294901760, %v90_v8  ;;  %1103 = vmatpush.msra.mxu0 %v7968_v31 }
  0xc5   :  { %11467 = vst [vmem:[#allocation188_spill] sm:$0xff] %v8143_v43  ;;  %v8237_v45 = vand.u32 4294901760, %v975_v39  ;;  %890 = vmatmul.f32.vlgmr.msrb.gmra.mxu0 %v889_v18  ;;  %v8258_v18 = vand.u32 4294901760, %v8223_v41  ;;  %v8277_v42 = vsub.f32 %v93_v63, %v8242_v6  ;;  %1197 = vmatpush.msra.mxu2 %v8162_v37 }
  0xc6   :  { %11468 = vst [vmem:[#allocation189_spill] sm:$0xff] %v8148_v53  ;;  %v8260_v53 = vand.u32 4294901760, %v92_v56  ;;  %v8286_v36 = vand.u32 4294901760, %v8248_v59  ;;  %1080 = vmatpush.msrb.mxu3 %v8140_v19  ;;  %v8320_v19 = vand.u32 4294901760, %v89_v12  ;;  %1107 = vmatpush.msra.mxu0 %v7973_v25  ;;  %v8337_v31 = vsub.f32 %v90_v8, %v8300_v20  ;;  %v86_v25 = vld [vmem:[%s10691_s5 + $0x198] sm:$0xff] }
  0xc7   :  { %11469 = vst [vmem:[#allocation190_spill] sm:$0xff] %v8155_v50  ;;  %v8220_v50 = vand.u32 4294901760, %v8182_v33  ;;  %977 = vmatpush.msrb.mxu1 %v8237_v45  ;;  %1084 = vmatmul.f32.vlgmr.msrb.gmra.mxu3 %v11502_v15  ;;  %v87_v15 = vld [vmem:[%s10691_s5 + $0x1a0] sm:$0xff] }
  0xc8   :  { %11470 = vst [vmem:[#allocation191_spill] sm:$0xff] %v8160_v3  ;;  %v8298_v29 = vsub.f32 %v92_v56, %v8260_v53  ;;  %1240 = vmatpush.msra.mxu3 %v8283_v44  ;;  %v1262_v47 = vsub.f32 %v8248_v59, %v8286_v36  ;;  %1199 = vmatpush.msra.mxu2 %v8184_v60 }
  0xc9   :  { %11471 = vst [vmem:[#allocation192_spill] sm:$0xff] %v8162_v37  ;;  %v987_v39 = vsub.f32 %v8182_v33, %v8220_v50  ;;  %983 = vmatpush.msrb.mxu1 %v8264_v54  ;;  %1111 = vmatpush.msra.mxu0 %v7992_v23 }
  0xca   :  { %11473 = vst [vmem:[#allocation193_spill] sm:$0xff] %v8173_v17  ;;  %1201 = vmatpush.msra.mxu2 %v8194_v52 }
  0xcb   :  { %11474 = vst [vmem:[#allocation194_spill] sm:$0xff] %v8177_v7  ;;  %v8240_v7 = vand.u32 4294901760, %v8203_v13  ;;  %v8293_v63 = vand.u32 4294901760, %v987_v39  ;;  %v88_v39 = vld [vmem:[%s10691_s5 + $0x1a8] sm:$0xff]  ;;  %1115 = vmatpush.msra.mxu0 %v8023_v24 }
  0xcc   :  { %11475 = vst [vmem:[#allocation195_spill] sm:$0xff] %v8182_v33  ;;  %1203 = vmatpush.msra.mxu2 %v8210_v61  ;;  %v84_v24 = vld [vmem:[%s10691_s5 + $0x188] sm:$0xff] }
  0xcd   :  { %11476 = vst [vmem:[#allocation196_spill] sm:$0xff] %v8184_v60  ;;  %989 = vmatpush.msrb.mxu1 %v8293_v63  ;;  %v8358_v60 = vand.u32 4294901760, %v87_v15  ;;  %1119 = vmatpush.msra.mxu0 %v8042_v4  ;;  %v83_v4 = vld [vmem:[%s10691_s5 + $0x180] sm:$0xff] }
  0xce   :  { %11477 = vst [vmem:[#allocation197_spill] sm:$0xff] %v8192_v28  ;;  %991 = vmatmul.f32.vlgmr.msrb.gmra.mxu1 %v8054_v35  ;;  %1205 = vmatpush.msra.mxu2 %v8242_v6 }
  0xcf   :  { %11478 = vst [vmem:[#allocation198_spill] sm:$0xff] %v8194_v52  ;;  %1158 = vmatpush.msra.mxu1 %v7871_v14  ;;  %v8369_v14 = vand.u32 4294901760, %v8337_v31  ;;  %1123 = vmatpush.msra.mxu0 %v8063_v40 }
  0xd0   :  { %11479 = vst [vmem:[#allocation199_spill] sm:$0xff] %v8198_v30  ;;  %v91_v30 = vld [vmem:[%s10691_s5 + $0x1c0] sm:$0xff]  ;;  %1207 = vmatpush.msra.mxu2 %v8260_v53 }
  0xd1   :  { %11480 = vst [vmem:[#allocation200_spill] sm:$0xff] %v8203_v13  ;;  %v8279_v33 = vand.u32 4294901760, %v91_v30  ;;  %1160 = vmatpush.msra.mxu1 %v7880_v27  ;;  %v8391_v27 = vsub.f32 %v87_v15, %v8358_v60  ;;  %v1286_v15 = vsub.f32 %v8337_v31, %v8369_v14  ;;  %1127 = vmatpush.msra.mxu0 %v8079_v16 }
  0xd2   :  { %11481 = vst [vmem:[#allocation201_spill] sm:$0xff] %v8208_v32 }
  0xd3   :  { %11482 = vst [vmem:[#allocation202_spill] sm:$0xff] %v8210_v61  ;;  %1162 = vmatpush.msra.mxu1 %v7889_v57  ;;  %1209 = vmatpush.msra.mxu2 %v8279_v33 }
  0xd4   :  { %11483 = vst [vmem:[#allocation203_spill] sm:$0xff] %v8217_v55  ;;  %v1244_v55 = vsub.f32 %v8203_v13, %v8240_v7  ;;  %1131 = vmatpush.msra.mxu0 %v8099_v34 }
  0xd5   :  { %11484 = vst [vmem:[#allocation204_spill] sm:$0xff] %v8220_v50  ;;  %1164 = vmatpush.msra.mxu1 %v7901_v10  ;;  %1211 = vmatpush.msra.mxu2 %v8300_v20 }
  0xd6   :  { %11485 = vst [vmem:[#allocation205_spill] sm:$0xff] %v8223_v41  ;;  %v8312_v56 = vand.u32 4294901760, %v1244_v55  ;;  %1135 = vmatpush.msra.mxu0 %v8121_v9 }
  0xd7   :  { %11486 = vst [vmem:[#allocation206_spill] sm:$0xff] %v8230_v1  ;;  %1166 = vmatpush.msra.mxu1 %v7911_v48  ;;  %1213 = vmatpush.msra.mxu2 %v8320_v19 }
  0xd8   :  { %11487 = vst [vmem:[#allocation207_spill] sm:$0xff] %v8237_v45  ;;  %v1250_v45 = vsub.f32 %v8223_v41, %v8258_v18  ;;  %1246 = vmatpush.msra.mxu3 %v8312_v56  ;;  %1139 = vmatpush.msra.mxu0 %v8143_v43 }
  0xd9   :  { %11488 = vst [vmem:[#allocation208_spill] sm:$0xff] %v8240_v7  ;;  %1168 = vmatpush.msra.mxu1 %v7923_v38 }
  0xda   :  { %11489 = vst [vmem:[#allocation209_spill] sm:$0xff] %v8242_v6  ;;  %v8331_v55 = vand.u32 4294901760, %v1250_v45  ;;  %1143 = vmatpush.msra.mxu0 %v8160_v3 }
  0xdb   :  { %11490 = vst [vmem:[#allocation210_spill] sm:$0xff] %v8248_v59  ;;  %1170 = vmatpush.msra.mxu1 %v7948_v46 }
  0xdc   :  { %11491 = vst [vmem:[#allocation211_spill] sm:$0xff] %v8258_v18  ;;  %v8315_v18 = vand.u32 4294901760, %v8277_v42  ;;  %1252 = vmatpush.msra.mxu3 %v8331_v55  ;;  %1147 = vmatpush.msra.mxu0 %v8192_v28 }
  0xdd   :  { %11492 = vst [vmem:[#allocation212_spill] sm:$0xff] %v8260_v53  ;;  %v8435_v53 = vand.u32 4294901760, %v83_v4  ;;  %1172 = vmatpush.msra.mxu1 %v7965_v49 }
  0xde   :  { %11493 = vst [vmem:[#allocation213_spill] sm:$0xff] %v8264_v54  ;;  %v8318_v54 = vsub.f32 %v91_v30, %v8279_v33  ;;  %v8334_v30 = vand.u32 4294901760, %v8298_v29  ;;  %v1268_v8 = vsub.f32 %v8277_v42, %v8315_v18  ;;  %1151 = vmatpush.msra.mxu0 %v8220_v50  ;;  %v105_v50 = vld [vmem:[%s10691_s5 + $0x230] sm:$0xff] }
  0xdf   :  { %11494 = vst [vmem:[#allocation214_spill] sm:$0xff] %v8267_v51  ;;  %1174 = vmatpush.msra.mxu1 %v7984_v58  ;;  %1153 = vmatmul.f32.vlgmr.msra.gmra.mxu0 %v8054_v35 }
  0xe0   :  { %11495 = vst [vmem:[#allocation215_spill] sm:$0xff] %v8277_v42  ;;  %v8353_v45 = vand.u32 4294901760, %v8318_v54  ;;  %v8383_v23 = vand.u32 4294901760, %v1268_v8  ;;  %1338 = vmatpush.msrb.mxu0 %v8173_v17 }
  0xe1   :  { %11496 = vst [vmem:[#allocation216_spill] sm:$0xff] %v8279_v33  ;;  %1176 = vmatpush.msra.mxu1 %v8003_v21 }
  0xe2   :  { %11497 = vst [vmem:[#allocation217_spill] sm:$0xff] %v8283_v44  ;;  %v8339_v44 = vand.u32 4294901760, %v88_v39  ;;  %1341 = vmatpush.msrb.mxu0 %v8203_v13 }
  0xe3   :  { %11498 = vst [vmem:[#allocation218_spill] sm:$0xff] %v8286_v36  ;;  %v8343_v36 = vand.u32 4294901760, %v1256_v26  ;;  %v8362_v26 = vand.u32 4294901760, %v1262_v47  ;;  %v85_v47 = vld [vmem:[%s10691_s5 + $0x190] sm:$0xff]  ;;  %1178 = vmatpush.msra.mxu1 %v8020_v62 }
  0xe4   :  { %11499 = vst [vmem:[#allocation219_spill] sm:$0xff] %v8293_v63  ;;  %v8356_v63 = vsub.f32 %v89_v12, %v8320_v19  ;;  %v8372_v12 = vsub.f32 %v88_v39, %v8339_v44  ;;  %v1280_v39 = vsub.f32 %v8318_v54, %v8353_v45  ;;  %v8398_v8 = vand.u32 4294901760, %v85_v47  ;;  %1215 = vmatpush.msra.mxu2 %v8339_v44 }
  0xe5   :  { %11500 = vst [vmem:[#allocation220_spill] sm:$0xff] %v8298_v29  ;;  %1258 = vmatpush.msra.mxu3 %v8343_v36  ;;  %1180 = vmatpush.msra.mxu1 %v8039_v0 }
  0xe6   :  { %11501 = vst [vmem:[#allocation221_spill] sm:$0xff] %v8300_v20  ;;  %v8407_v57 = vand.u32 4294901760, %v8372_v12  ;;  %v8423_v10 = vand.u32 4294901760, %v1280_v39  ;;  %v8433_v40 = vsub.f32 %v85_v47, %v8398_v8  ;;  %v8439_v39 = vand.u32 4294901760, %v1286_v15  ;;  %1217 = vmatpush.msra.mxu2 %v8358_v60  ;;  %1344 = vmatpush.msrb.mxu0 %v8223_v41  ;;  %v107_v41 = vld [vmem:[%s10691_s5 + $0x240] sm:$0xff] }
  0xe7   :  { %11503 = vst [vmem:[#allocation222_spill] sm:$0xff] %v8312_v56  ;;  %v1274_v56 = vsub.f32 %v8298_v29, %v8334_v30  ;;  %1264 = vmatpush.msra.mxu3 %v8362_v26  ;;  %1182 = vmatpush.msra.mxu1 %v8060_v2  ;;  %v8673_v17 = vand.u32 4294901760, %v107_v41 }
  0xe8   :  { %11504 = vst [vmem:[#allocation223_spill] sm:$0xff] %v8315_v18  ;;  %v8374_v18 = vand.u32 4294901760, %v86_v25  ;;  %v8463_v34 = vand.u32 4294901760, %v8433_v40  ;;  %1347 = vmatpush.msrb.mxu0 %v8230_v1 }
  0xe9   :  { %11505 = vst [vmem:[#allocation224_spill] sm:$0xff] %v8318_v54  ;;  %1270 = vmatpush.msra.mxu3 %v8383_v23  ;;  %1184 = vmatpush.msra.mxu1 %v8076_v22 }
  0xea   :  { %11506 = vst [vmem:[#allocation225_spill] sm:$0xff] %v8320_v19  ;;  %1219 = vmatpush.msra.mxu2 %v8374_v18  ;;  %1350 = vmatpush.msrb.mxu0 %v8248_v59  ;;  %v11554_v59 = vld [vmem:[#allocation212_spill] sm:$0xff] }
  0xeb   :  { %11507 = vst [vmem:[#allocation226_spill] sm:$0xff] %v8331_v55  ;;  %v8388_v55 = vand.u32 4294901760, %v8356_v63  ;;  %1186 = vmatpush.msra.mxu1 %v8109_v11 }
  0xec   :  { %11508 = vst [vmem:[#allocation227_spill] sm:$0xff] %v8334_v30  ;;  %v158_v30 = vld.sshfl [vmem:[#allocation1 + $0x18] sm:$0xff pattern:$0x73625140]  ;;  %1221 = vmatpush.msra.mxu2 %v8398_v8  ;;  %1353 = vmatpush.msrb.mxu0 %v8277_v42  ;;  %v8554_v42 = vld [vmem:[%s10687_s0 + $0x8] sm:$0x3f] }
  0xed   :  { %11509 = vst [vmem:[#allocation228_spill] sm:$0xff] %v8337_v31 }
  0xee   :  { %11510 = vst [vmem:[#allocation229_spill] sm:$0xff] %v8339_v44  ;;  %1356 = vmatpush.msrb.mxu0 %v8298_v29 }
  0xef   :  { %11511 = vst [vmem:[#allocation230_spill] sm:$0xff] %v8343_v36  ;;  %v8402_v36 = vand.u32 4294901760, %v1274_v56  ;;  %v8419_v56 = vand.u32 4294901760, %v158_v30 }
  0xf0   :  { %11512 = vst [vmem:[#allocation231_spill] sm:$0xff] %v8353_v45  ;;  %v8410_v45 = vsub.f32 %v86_v25, %v8374_v18  ;;  %v1292_v25 = vsub.f32 %v8356_v63, %v8388_v55  ;;  %1359 = vmatpush.msrb.mxu0 %v8318_v54 }
  0xf1   :  { %11513 = vst [vmem:[#allocation232_spill] sm:$0xff] %v8356_v63  ;;  %1276 = vmatpush.msra.mxu3 %v8402_v36  ;;  %v8452_v16 = vsub.f32 %v158_v30, %v8419_v56 }
  0xf2   :  { %11514 = vst [vmem:[#allocation233_spill] sm:$0xff] %v8358_v60  ;;  %v8444_v48 = vand.u32 4294901760, %v8410_v45  ;;  %v8456_v15 = vand.u32 4294901760, %v1292_v25  ;;  %1362 = vmatpush.msrb.mxu0 %v8337_v31  ;;  %v114_v31 = vld [vmem:[%s10691_s5 + $0x278] sm:$0xff] }
  0xf3   :  { %11515 = vst [vmem:[#allocation234_spill] sm:$0xff] %v8362_v26  ;;  %v8417_v26 = vand.u32 4294901760, %v84_v24  ;;  %1282 = vmatpush.msra.mxu3 %v8423_v10  ;;  %v11542_v3 = vand.u32 4294901760, %v8452_v16  ;;  %v11552_v29 = vld [vmem:[#allocation227_spill] sm:$0xff] }
  0xf4   :  { %11516 = vst [vmem:[#allocation235_spill] sm:$0xff] %v8369_v14  ;;  %v8428_v14 = vand.u32 4294901760, %v8391_v27  ;;  %v1310_v25 = vsub.f32 %v8410_v45, %v8444_v48  ;;  %1365 = vmatpush.msrb.mxu0 %v8356_v63  ;;  %v113_v63 = vld [vmem:[%s10691_s5 + $0x270] sm:$0xff] }
  0xf5   :  { %11517 = vst [vmem:[#allocation236_spill] sm:$0xff] %v8372_v12  ;;  %v8449_v47 = vsub.f32 %v84_v24, %v8417_v26  ;;  %v8466_v24 = vsub.f32 %v83_v4, %v8435_v53  ;;  %1288 = vmatpush.msra.mxu3 %v8439_v39  ;;  %1223 = vmatpush.msra.mxu2 %v8417_v26 }
  0xf6   :  { %11518 = vst [vmem:[#allocation237_spill] sm:$0xff] %v8374_v18  ;;  %1368 = vmatpush.msrb.mxu0 %v8372_v12 }
  0xf7   :  { %11519 = vst [vmem:[#allocation238_spill] sm:$0xff] %v8383_v23  ;;  %v1298_v23 = vsub.f32 %v8372_v12, %v8407_v57  ;;  %v8477_v9 = vand.u32 4294901760, %v8449_v47  ;;  %1294 = vmatpush.msra.mxu3 %v8456_v15  ;;  %v8489_v43 = vand.u32 4294901760, %v8466_v24  ;;  %1225 = vmatpush.msra.mxu2 %v8435_v53  ;;  %v11553_v54 = vld [vmem:[#allocation231_spill] sm:$0xff]  ;;  %v8579_v12 = vand.u32 4294901760, %v114_v31 }
  0xf8   :  { %11520 = vst [vmem:[#allocation239_spill] sm:$0xff] %v8388_v55  ;;  %1371 = vmatpush.msrb.mxu0 %v8391_v27 }
  0xf9   :  { %11521 = vst [vmem:[#allocation240_spill] sm:$0xff] %v8391_v27  ;;  %v8470_v30 = vand.u32 4294901760, %v1298_v23  ;;  %v1316_v23 = vsub.f32 %v8433_v40, %v8463_v34  ;;  %v1328_v28 = vsub.f32 %v8466_v24, %v8489_v43  ;;  %1432 = vmatpush.msrb.mxu2 %v8208_v32 }
  0xfa   :  { %11522 = vst [vmem:[#allocation241_spill] sm:$0xff] %v8398_v8  ;;  %1374 = vmatpush.msrb.mxu0 %v8410_v45 }
  0xfb   :  { %11523 = vst [vmem:[#allocation242_spill] sm:$0xff] %v8402_v36  ;;  %v1304_v36 = vsub.f32 %v8391_v27, %v8428_v14  ;;  %1300 = vmatpush.msra.mxu3 %v8470_v30  ;;  %1436 = vmatpush.msrb.mxu2 %v8240_v7  ;;  %v11555_v1 = vld [vmem:[#allocation235_spill] sm:$0xff]  ;;  %v112_v27 = vld [vmem:[%s10691_s5 + $0x268] sm:$0xff] }
  0xfc   :  { %11524 = vst [vmem:[#allocation243_spill] sm:$0xff] %v8407_v57  ;;  %1377 = vmatpush.msrb.mxu0 %v8433_v40 }
  0xfd   :  { %11525 = vst [vmem:[#allocation244_spill] sm:$0xff] %v8410_v45  ;;  %v8482_v4 = vand.u32 4294901760, %v1304_v36  ;;  %v1322_v36 = vsub.f32 %v8449_v47, %v8477_v9  ;;  %v111_v45 = vld [vmem:[%s10691_s5 + $0x260] sm:$0xff] }
  0xfe   :  { %11526 = vst [vmem:[#allocation245_spill] sm:$0xff] %v8417_v26  ;;  %1380 = vmatpush.msrb.mxu0 %v8449_v47 }
  0xff   :  { %11527 = vst [vmem:[#allocation246_spill] sm:$0xff] %v8423_v10  ;;  %v8493_v10 = vand.u32 4294901760, %v1310_v25  ;;  %1306 = vmatpush.msra.mxu3 %v8482_v4  ;;  %v8506_v25 = vand.u32 4294901760, %v1316_v23  ;;  %v8520_v23 = vand.u32 4294901760, %v1328_v28  ;;  %v11546_v28 = vld [vmem:[#allocation187_spill] sm:$0xff] }
 0x100   :  { %11528 = vst [vmem:[#allocation247_spill] sm:$0xff] %v8428_v14  ;;  %1188 = vmatpush.msra.mxu1 %v11546_v28  ;;  %1383 = vmatpush.msrb.mxu0 %v8466_v24 }
 0x101   :  { %11529 = vst [vmem:[#allocation248_spill] sm:$0xff] %v8433_v40  ;;  %1312 = vmatpush.msra.mxu3 %v8493_v10  ;;  %1190 = vmatmul.f32.vlgmr.msra.gmra.mxu1 %v8054_v35  ;;  %v11550_v35 = vld [vmem:[#allocation223_spill] sm:$0xff]  ;;  %v8609_v40 = vand.u32 4294901760, %v111_v45 }
 0x102   :  { %11530 = vst [vmem:[#allocation249_spill] sm:$0xff] %v8435_v53  ;;  %1391 = vmatpush.msrb.mxu1 %v8129_v5  ;;  %1386 = vmatmul.f32.vlgmr.msrb.gmra.mxu0 %v8452_v16 }
 0x103   :  { %11531 = vst [vmem:[#allocation250_spill] sm:$0xff] %v8439_v39  ;;  %1318 = vmatpush.msra.mxu3 %v8506_v25  ;;  %1536 = vmatpush.msra.mxu0 %v8579_v12 }
 0x104   :  { %11532 = vst [vmem:[#allocation251_spill] sm:$0xff] %v8444_v48  ;;  %1393 = vmatpush.msrb.mxu1 %v8162_v37 }
 0x105   :  { %11533 = vst [vmem:[#allocation252_spill] sm:$0xff] %v8449_v47 }
 0x106   :  { %11534 = vst [vmem:[#allocation253_spill] sm:$0xff] %v8456_v15  ;;  %v1229_v15 = vsub.f32 %v8452_v16, %v11542_v3  ;;  %v8514_v3 = vand.u32 4294901760, %v1322_v36  ;;  %v11549_v36 = vld [vmem:[#allocation218_spill] sm:$0xff] }
 0x107   :  { %11535 = vst [vmem:[#allocation254_spill] sm:$0xff] %v8463_v34 }
 0x108   :  { %11536 = vst [vmem:[#allocation255_spill] sm:$0xff] %v8466_v24  ;;  %1324 = vmatpush.msra.mxu3 %v8514_v3  ;;  %v108_v24 = vld [vmem:[%s10691_s5 + $0x248] sm:$0xff] }
 0x109   :  { %11537 = vst [vmem:[#allocation256_spill] sm:$0xff] %v8470_v30 }
 0x10a   :  { %11538 = vst [vmem:[#allocation257_spill] sm:$0xff] %v8477_v9  ;;  %1330 = vmatpush.msra.mxu3 %v8520_v23 }
 0x10b   :  { %11539 = vst [vmem:[#allocation258_spill] sm:$0xff] %v8482_v4  ;;  %v1230_v4 = vand.u32 4294901760, %v1229_v15  ;;  %1332 = vmatmul.f32.vlgmr.msra.gmra.mxu3 %v8419_v56  ;;  %v11547_v15 = vld [vmem:[#allocation211_spill] sm:$0xff] }
 0x10c   :  { %11540 = vst [vmem:[#allocation259_spill] sm:$0xff] %v8489_v43  ;;  %1499 = vmatpush.msrb.mxu3 %v8129_v5  ;;  %1440 = vmatpush.msrb.mxu2 %v11547_v15 }
 0x10d   :  { %11541 = vst [vmem:[#allocation260_spill] sm:$0xff] %v8493_v10  ;;  %1231 = vmatmul.f32.vlgmr.msra.gmra.mxu2 %v1230_v4  ;;  %v11548_v4 = vld [vmem:[#allocation196_spill] sm:$0xff] }
 0x10e   :  { %11543 = vst [vmem:[#allocation261_spill] sm:$0xff] %v8506_v25  ;;  %1501 = vmatpush.msrb.mxu3 %v8162_v37  ;;  %1444 = vmatpush.msrb.mxu2 %v8267_v51  ;;  %v11577_v25 = vand.u32 4294901760, %v8452_v16 }
 0x10f   :  { %11544 = vst [vmem:[#allocation262_spill] sm:$0xff] %v8514_v3  ;;  %1395 = vmatpush.msrb.mxu1 %v11548_v4  ;;  %v8711_v3 = vand.u32 4294901760, %v105_v50 }
 0x110   :  { %11545 = vst [vmem:[#allocation263_spill] sm:$0xff] %v8520_v23  ;;  %1503 = vmatpush.msrb.mxu3 %v11548_v4  ;;  %1448 = vmatpush.msrb.mxu2 %v11549_v36 }
 0x111   :  { %1397 = vmatpush.msrb.mxu1 %v8194_v52  ;;  %11551 = vst [vmem:[#allocation264_spill] sm:$0xff] %v8554_v42 }
 0x112   :  { %1505 = vmatpush.msrb.mxu3 %v8194_v52  ;;  %1452 = vmatpush.msrb.mxu2 %v11550_v35  ;;  %154 = vst [vmem:[#allocation1 + $0x20] ss:$4 sm:$0xff] %v8554_v42 }
 0x113   :  { %1399 = vmatpush.msrb.mxu1 %v8210_v61  ;;  %11556 = vst [vmem:[#allocation265_spill] sm:$0xff] %v8579_v12 }
 0x114   :  { %1507 = vmatpush.msrb.mxu3 %v8210_v61  ;;  %1456 = vmatpush.msrb.mxu2 %v11552_v29  ;;  %11560 = vst [vmem:[#allocation269_spill] sm:$0xff] %v8609_v40 }
 0x115   :  { %1401 = vmatpush.msrb.mxu1 %v8242_v6 }
 0x116   :  { %1509 = vmatpush.msrb.mxu3 %v8242_v6  ;;  %1460 = vmatpush.msrb.mxu2 %v11553_v54  ;;  %v110_v54 = vld [vmem:[%s10691_s5 + $0x258] sm:$0xff] }
 0x117   :  { %1403 = vmatpush.msrb.mxu1 %v11554_v59  ;;  %v8619_v47 = vand.u32 4294901760, %v110_v54 }
 0x118   :  { %1511 = vmatpush.msrb.mxu3 %v11554_v59  ;;  %1464 = vmatpush.msrb.mxu2 %v11555_v1  ;;  %v8600_v1 = vsub.f32 %v114_v31, %v8579_v12  ;;  %v109_v31 = vld [vmem:[%s10691_s5 + $0x250] sm:$0xff] }
 0x119   :  { %1405 = vmatpush.msrb.mxu1 %v8279_v33  ;;  %11562 = vst [vmem:[#allocation271_spill] sm:$0xff] %v8619_v47  ;;  %v8631_v29 = vand.u32 4294901760, %v109_v31 }
 0x11a   :  { %1513 = vmatpush.msrb.mxu3 %v8279_v33  ;;  %1468 = vmatpush.msrb.mxu2 %v8388_v55  ;;  %v8588_v55 = vand.u32 4294901760, %v113_v63  ;;  %11559 = vst [vmem:[#allocation268_spill] sm:$0xff] %v8600_v1 }
 0x11b   :  { %1407 = vmatpush.msrb.mxu1 %v8300_v20 }
 0x11c   :  { %1515 = vmatpush.msrb.mxu3 %v8300_v20  ;;  %1472 = vmatpush.msrb.mxu2 %v8407_v57  ;;  %11557 = vst [vmem:[#allocation266_spill] sm:$0xff] %v8588_v55  ;;  %v8597_v57 = vand.u32 4294901760, %v112_v27 }
 0x11d   :  { %1409 = vmatpush.msrb.mxu1 %v8320_v19  ;;  %1538 = vmatpush.msra.mxu0 %v8588_v55 }
 0x11e   :  { %1517 = vmatpush.msrb.mxu3 %v8320_v19  ;;  %1476 = vmatpush.msrb.mxu2 %v8428_v14  ;;  %11558 = vst [vmem:[#allocation267_spill] sm:$0xff] %v8597_v57  ;;  %v8612_v14 = vsub.f32 %v113_v63, %v8588_v55  ;;  %v8627_v63 = vsub.f32 %v112_v27, %v8597_v57 }
 0x11f   :  { %1411 = vmatpush.msrb.mxu1 %v8339_v44  ;;  %v8642_v27 = vsub.f32 %v111_v45, %v8609_v40  ;;  %v8656_v45 = vand.u32 4294901760, %v108_v24  ;;  %1540 = vmatpush.msra.mxu0 %v8597_v57 }
 0x120   :  { %1519 = vmatpush.msrb.mxu3 %v8339_v44  ;;  %1480 = vmatpush.msrb.mxu2 %v8444_v48  ;;  %11561 = vst [vmem:[#allocation270_spill] sm:$0xff] %v8612_v14  ;;  %v8624_v48 = vand.u32 4294901760, %v8600_v1  ;;  %v8659_v13 = vand.u32 4294901760, %v8627_v63 }
 0x121   :  { %1413 = vmatpush.msrb.mxu1 %v8358_v60  ;;  %11564 = vst [vmem:[#allocation273_spill] sm:$0xff] %v8627_v63  ;;  %v8676_v51 = vand.u32 4294901760, %v8642_v27  ;;  %1542 = vmatpush.msra.mxu0 %v8609_v40  ;;  %v8695_v23 = vsub.f32 %v108_v24, %v8656_v45 }
 0x122   :  { %1521 = vmatpush.msrb.mxu3 %v8358_v60  ;;  %1484 = vmatpush.msrb.mxu2 %v8463_v34  ;;  %11563 = vst [vmem:[#allocation272_spill] sm:$0xff] %v8624_v48  ;;  %v8639_v34 = vand.u32 4294901760, %v8612_v14  ;;  %v1579_v35 = vsub.f32 %v8600_v1, %v8624_v48  ;;  %v1591_v15 = vsub.f32 %v8627_v63, %v8659_v13 }
 0x123   :  { %1415 = vmatpush.msrb.mxu1 %v8374_v18  ;;  %11566 = vst [vmem:[#allocation275_spill] sm:$0xff] %v8642_v27  ;;  %1544 = vmatpush.msra.mxu0 %v8619_v47  ;;  %v1597_v24 = vsub.f32 %v8642_v27, %v8676_v51  ;;  %v8731_v16 = vand.u32 4294901760, %v8695_v23 }
 0x124   :  { %1523 = vmatpush.msrb.mxu3 %v8374_v18  ;;  %1488 = vmatpush.msrb.mxu2 %v8477_v9  ;;  %11565 = vst [vmem:[#allocation274_spill] sm:$0xff] %v8639_v34  ;;  %v8647_v9 = vsub.f32 %v110_v54, %v8619_v47  ;;  %v8664_v54 = vsub.f32 %v109_v31, %v8631_v29 }
 0x125   :  { %1417 = vmatpush.msrb.mxu1 %v8398_v8  ;;  %11568 = vst [vmem:[#allocation277_spill] sm:$0xff] %v8659_v13  ;;  %v1585_v36 = vsub.f32 %v8612_v14, %v8639_v34  ;;  %1546 = vmatpush.msra.mxu0 %v8631_v29  ;;  %v8745_v10 = vand.u32 4294901760, %v1597_v24 }
 0x126   :  { %1525 = vmatpush.msrb.mxu3 %v8398_v8  ;;  %1492 = vmatpush.msrb.mxu2 %v8489_v43  ;;  %11567 = vst [vmem:[#allocation276_spill] sm:$0xff] %v8647_v9  ;;  %v106_v43 = vld [vmem:[%s10691_s5 + $0x238] sm:$0xff]  ;;  %v8681_v31 = vand.u32 4294901760, %v8647_v9  ;;  %v8700_v32 = vand.u32 4294901760, %v8664_v54 }
 0x127   :  { %1494 = vmatmul.f32.vlgmr.msrb.gmra.mxu2 %v8419_v56  ;;  %11569 = vst [vmem:[#allocation278_spill] sm:$0xff] %v8664_v54  ;;  %1419 = vmatpush.msrb.mxu1 %v8417_v26  ;;  %v8692_v7 = vand.u32 4294901760, %v106_v43 }
 0x128   :  { %1527 = vmatpush.msrb.mxu3 %v8417_v26  ;;  %1679 = vmatpush.msra.mxu2 %v8600_v1  ;;  %11570 = vst [vmem:[#allocation279_spill] sm:$0xff] %v8676_v51  ;;  %v8688_v1 = vand.u32 4294901760, %v1579_v35  ;;  %v8707_v35 = vand.u32 4294901760, %v1585_v36  ;;  %v103_v36 = vld [vmem:[%s10691_s5 + $0x220] sm:$0xff]  ;;  %v8726_v26 = vand.u32 4294901760, %v1591_v15  ;;  %v102_v15 = vld [vmem:[%s10691_s5 + $0x218] sm:$0xff] }
 0x129   :  { %11571 = vst [vmem:[#allocation280_spill] sm:$0xff] %v8681_v31  ;;  %1421 = vmatpush.msrb.mxu1 %v8435_v53  ;;  %1548 = vmatpush.msra.mxu0 %v8656_v45  ;;  %v8768_v30 = vand.u32 4294901760, %v102_v15 }
 0x12a   :  { %1529 = vmatpush.msrb.mxu3 %v8435_v53  ;;  %11572 = vst [vmem:[#allocation281_spill] sm:$0xff] %v8688_v1  ;;  %1682 = vmatpush.msra.mxu2 %v8612_v14  ;;  %v8714_v14 = vsub.f32 %v107_v41, %v8673_v17  ;;  %v1603_v53 = vsub.f32 %v8647_v9, %v8681_v31 }
 0x12b   :  { %1531 = vmatmul.f32.vlgmr.msrb.gmra.mxu3 %v8419_v56  ;;  %11573 = vst [vmem:[#allocation282_spill] sm:$0xff] %v8695_v23  ;;  %v104_v56 = vld [vmem:[%s10691_s5 + $0x228] sm:$0xff]  ;;  %1425 = vmatmul.f32.vlgmr.msrb.gmra.mxu1 %v11577_v25  ;;  %v8734_v25 = vsub.f32 %v106_v43, %v8692_v7  ;;  %v8747_v43 = vand.u32 4294901760, %v103_v36  ;;  %v8810_v20 = vsub.f32 %v102_v15, %v8768_v30 }
 0x12c   :  { %1732 = vmatpush.msra.mxu3 %v8579_v12  ;;  %11574 = vst [vmem:[#allocation283_spill] sm:$0xff] %v8700_v32  ;;  %1685 = vmatpush.msra.mxu2 %v8627_v63  ;;  %v8728_v41 = vand.u32 4294901760, %v104_v56  ;;  %v159_v63 = vld.sshfl [vmem:[#allocation1 + $0x20] sm:$0xff pattern:$0x73625140]  ;;  %v8750_v8 = vand.u32 4294901760, %v8714_v14 }
 0x12d   :  { %11575 = vst [vmem:[#allocation284_spill] sm:$0xff] %v8707_v35  ;;  %1581 = vmatpush.msra.mxu1 %v8688_v1  ;;  %v1609_v1 = vsub.f32 %v8664_v54, %v8700_v32  ;;  %v8757_v18 = vand.u32 4294901760, %v1603_v53  ;;  %v8762_v24 = vand.u32 4294901760, %v159_v63  ;;  %v8771_v60 = vand.u32 4294901760, %v8734_v25  ;;  %1550 = vmatpush.msra.mxu0 %v8673_v17 }
 0x12e   :  { %11576 = vst [vmem:[#allocation285_spill] sm:$0xff] %v8714_v14  ;;  %1734 = vmatpush.msra.mxu3 %v8588_v55  ;;  %1688 = vmatpush.msra.mxu2 %v8642_v27  ;;  %v8753_v27 = vsub.f32 %v105_v50, %v8711_v3  ;;  %v1615_v50 = vsub.f32 %v8695_v23, %v8731_v16 }
 0x12f   :  { %11578 = vst [vmem:[#allocation286_spill] sm:$0xff] %v8726_v26  ;;  %1587 = vmatpush.msra.mxu1 %v8707_v35  ;;  %v101_v35 = vld [vmem:[%s10691_s5 + $0x210] sm:$0xff]  ;;  %v8774_v53 = vsub.f32 %v104_v56, %v8728_v41  ;;  %v8790_v56 = vsub.f32 %v103_v36, %v8747_v43  ;;  %1552 = vmatpush.msra.mxu0 %v8692_v7 }
 0x130   :  { %11579 = vst [vmem:[#allocation287_spill] sm:$0xff] %v8731_v16  ;;  %1736 = vmatpush.msra.mxu3 %v8597_v57  ;;  %1691 = vmatpush.msra.mxu2 %v8647_v9  ;;  %v8778_v9 = vand.u32 4294901760, %v1609_v1  ;;  %v8784_v44 = vand.u32 4294901760, %v101_v35  ;;  %v8787_v39 = vand.u32 4294901760, %v8753_v27  ;;  %v100_v1 = vld [vmem:[%s10691_s5 + $0x208] sm:$0xff]  ;;  %v1627_v36 = vsub.f32 %v8734_v25, %v8771_v60 }
 0x131   :  { %11580 = vst [vmem:[#allocation288_spill] sm:$0xff] %v8734_v25  ;;  %1593 = vmatpush.msra.mxu1 %v8726_v26  ;;  %v1621_v26 = vsub.f32 %v8714_v14, %v8750_v8  ;;  %v8807_v19 = vand.u32 4294901760, %v8774_v53  ;;  %1554 = vmatpush.msra.mxu0 %v8711_v3  ;;  %v8829_v33 = vand.u32 4294901760, %v8790_v56 }
 0x132   :  { %11581 = vst [vmem:[#allocation289_spill] sm:$0xff] %v8745_v10  ;;  %1738 = vmatpush.msra.mxu3 %v8609_v40  ;;  %1694 = vmatpush.msra.mxu2 %v8664_v54  ;;  %v8798_v54 = vsub.f32 %v159_v63, %v8762_v24  ;;  %v130_v63 = vld [vmem:[%s10691_s5 + $0x2f8] sm:$0xff]  ;;  %v8844_v6 = vand.u32 4294901760, %v1627_v36  ;;  %v128_v36 = vld [vmem:[%s10691_s5 + $0x2e8] sm:$0xff] }
 0x133   :  { %11582 = vst [vmem:[#allocation290_spill] sm:$0xff] %v8750_v8  ;;  %1599 = vmatpush.msra.mxu1 %v8745_v10  ;;  %v8802_v10 = vand.u32 4294901760, %v1615_v50  ;;  %v99_v50 = vld [vmem:[%s10691_s5 + $0x200] sm:$0xff]  ;;  %v8824_v15 = vand.u32 4294901760, %v1621_v26  ;;  %1556 = vmatpush.msra.mxu0 %v8728_v41  ;;  %v129_v26 = vld [vmem:[%s10691_s5 + $0x2f0] sm:$0xff]  ;;  %v1645_v52 = vsub.f32 %v8790_v56, %v8829_v33 }
 0x134   :  { %11583 = vst [vmem:[#allocation291_spill] sm:$0xff] %v8753_v27  ;;  %1740 = vmatpush.msra.mxu3 %v8619_v47  ;;  %1697 = vmatpush.msra.mxu2 %v8695_v23  ;;  %v8817_v23 = vand.u32 4294901760, %v100_v1  ;;  %v8848_v61 = vand.u32 4294901760, %v99_v50 }
 0x135   :  { %11584 = vst [vmem:[#allocation292_spill] sm:$0xff] %v8757_v18  ;;  %1605 = vmatpush.msra.mxu1 %v8757_v18  ;;  %v1633_v18 = vsub.f32 %v8753_v27, %v8787_v39  ;;  %1558 = vmatpush.msra.mxu0 %v8747_v43 }
 0x136   :  { %11585 = vst [vmem:[#allocation293_spill] sm:$0xff] %v8771_v60  ;;  %1742 = vmatpush.msra.mxu3 %v8631_v29  ;;  %1700 = vmatpush.msra.mxu2 %v8714_v14  ;;  %v8832_v14 = vsub.f32 %v101_v35, %v8784_v44  ;;  %v1639_v35 = vsub.f32 %v8774_v53, %v8807_v19 }
 0x137   :  { %11586 = vst [vmem:[#allocation294_spill] sm:$0xff] %v8774_v53  ;;  %1611 = vmatpush.msra.mxu1 %v8778_v9  ;;  %v8856_v59 = vsub.f32 %v100_v1, %v8817_v23  ;;  %v127_v1 = vld [vmem:[%s10691_s5 + $0x2e0] sm:$0xff]  ;;  %1560 = vmatpush.msra.mxu0 %v8768_v30  ;;  %v8890_v11 = vsub.f32 %v99_v50, %v8848_v61  ;;  %v8906_v50 = vand.u32 4294901760, %v1645_v52  ;;  %v125_v52 = vld [vmem:[%s10691_s5 + $0x2d0] sm:$0xff] }
 0x138   :  { %11587 = vst [vmem:[#allocation295_spill] sm:$0xff] %v8778_v9  ;;  %1744 = vmatpush.msra.mxu3 %v8656_v45  ;;  %1703 = vmatpush.msra.mxu2 %v8734_v25  ;;  %v8837_v9 = vand.u32 4294901760, %v130_v63  ;;  %v8851_v25 = vand.u32 4294901760, %v8810_v20  ;;  %v8868_v4 = vand.u32 4294901760, %v8832_v14  ;;  %v8885_v28 = vand.u32 4294901760, %v1639_v35 }
 0x139   :  { %11588 = vst [vmem:[#allocation296_spill] sm:$0xff] %v8787_v39  ;;  %1617 = vmatpush.msra.mxu1 %v8802_v10  ;;  %1562 = vmatpush.msra.mxu0 %v8784_v44  ;;  %v8902_v35 = vand.u32 4294901760, %v127_v1 }
 0x13a   :  { %11589 = vst [vmem:[#allocation297_spill] sm:$0xff] %v8790_v56  ;;  %1746 = vmatpush.msra.mxu3 %v8673_v17  ;;  %1706 = vmatpush.msra.mxu2 %v8753_v27  ;;  %v8870_v27 = vand.u32 4294901760, %v129_v26  ;;  %v8881_v37 = vsub.f32 %v130_v63, %v8837_v9  ;;  %v1651_v5 = vsub.f32 %v8810_v20, %v8851_v25  ;;  %v8900_v63 = vand.u32 4294901760, %v8856_v59 }
 0x13b   :  { %11590 = vst [vmem:[#allocation298_spill] sm:$0xff] %v8802_v10  ;;  %1623 = vmatpush.msra.mxu1 %v8824_v15  ;;  %v8863_v10 = vand.u32 4294901760, %v1633_v18  ;;  %1564 = vmatpush.msra.mxu0 %v8817_v23  ;;  %v8938_v62 = vsub.f32 %v127_v1, %v8902_v35 }
 0x13c   :  { %11591 = vst [vmem:[#allocation299_spill] sm:$0xff] %v8807_v19  ;;  %1748 = vmatpush.msra.mxu3 %v8692_v7  ;;  %1709 = vmatpush.msra.mxu2 %v8774_v53  ;;  %v8892_v53 = vand.u32 4294901760, %v128_v36  ;;  %v8911_v22 = vsub.f32 %v129_v26, %v8870_v27  ;;  %v8916_v2 = vand.u32 4294901760, %v8881_v37  ;;  %v8925_v26 = vand.u32 4294901760, %v1651_v5  ;;  %v124_v5 = vld [vmem:[%s10691_s5 + $0x2c8] sm:$0xff] }
 0x13d   :  { %11592 = vst [vmem:[#allocation300_spill] sm:$0xff] %v8810_v20  ;;  %1629 = vmatpush.msra.mxu1 %v8844_v6  ;;  %1566 = vmatpush.msra.mxu0 %v8848_v61  ;;  %v8975_v58 = vand.u32 4294901760, %v8938_v62 }
 0x13e   :  { %11593 = vst [vmem:[#allocation301_spill] sm:$0xff] %v8817_v23  ;;  %1750 = vmatpush.msra.mxu3 %v8711_v3  ;;  %1712 = vmatpush.msra.mxu2 %v8790_v56  ;;  %v1920_v1 = vsub.f32 %v8881_v37, %v8916_v2 }
 0x13f   :  { %11594 = vst [vmem:[#allocation302_spill] sm:$0xff] %v8824_v15  ;;  %v11605_v15 = vand.u32 4294901760, %v8798_v54  ;;  %1635 = vmatpush.msra.mxu1 %v8863_v10  ;;  %1773 = vmatpush.msrb.mxu0 %v8624_v48  ;;  %v122_v48 = vld [vmem:[%s10691_s5 + $0x2b8] sm:$0xff]  ;;  %v1938_v42 = vsub.f32 %v8938_v62, %v8975_v58 }
 0x140   :  { %11595 = vst [vmem:[#allocation303_spill] sm:$0xff] %v8829_v33  ;;  %1752 = vmatpush.msra.mxu3 %v8728_v41  ;;  %1715 = vmatpush.msra.mxu2 %v8810_v20  ;;  %v1663_v20 = vsub.f32 %v8856_v59, %v8900_v63 }
 0x141   :  { %11596 = vst [vmem:[#allocation304_spill] sm:$0xff] %v8832_v14  ;;  %v1570_v18 = vsub.f32 %v8798_v54, %v11605_v15  ;;  %v126_v15 = vld [vmem:[%s10691_s5 + $0x2d8] sm:$0xff]  ;;  %1641 = vmatpush.msra.mxu1 %v8885_v28  ;;  %1777 = vmatpush.msrb.mxu0 %v8639_v34  ;;  %v121_v34 = vld [vmem:[%s10691_s5 + $0x2b0] sm:$0xff] }
 0x142   :  { %11597 = vst [vmem:[#allocation305_spill] sm:$0xff] %v8837_v9  ;;  %v8918_v0 = vand.u32 4294901760, %v126_v15  ;;  %1754 = vmatpush.msra.mxu3 %v8747_v43  ;;  %1718 = vmatpush.msra.mxu2 %v8832_v14 }
 0x143   :  { %11598 = vst [vmem:[#allocation306_spill] sm:$0xff] %v8844_v6  ;;  %v1657_v6 = vsub.f32 %v8832_v14, %v8868_v4  ;;  %v1571_v56 = vand.u32 4294901760, %v1570_v18  ;;  %v8931_v18 = vsub.f32 %v128_v36, %v8892_v53  ;;  %1647 = vmatpush.msra.mxu1 %v8906_v50  ;;  %v8950_v14 = vand.u32 4294901760, %v125_v52  ;;  %1781 = vmatpush.msrb.mxu0 %v8659_v13 }
 0x144   :  { %11599 = vst [vmem:[#allocation307_spill] sm:$0xff] %v8848_v61  ;;  %1756 = vmatpush.msra.mxu3 %v8768_v30  ;;  %1721 = vmatpush.msra.mxu2 %v8856_v59  ;;  %v8956_v21 = vsub.f32 %v126_v15, %v8918_v0  ;;  %v8972_v15 = vand.u32 4294901760, %v1663_v20  ;;  %v8991_v20 = vand.u32 4294901760, %v1920_v1  ;;  %v9008_v1 = vand.u32 4294901760, %v122_v48 }
 0x145   :  { %11600 = vst [vmem:[#allocation308_spill] sm:$0xff] %v8851_v25  ;;  %v8945_v36 = vand.u32 4294901760, %v1657_v6  ;;  %1572 = vmatmul.f32.vlgmr.msra.gmra.mxu0 %v1571_v56  ;;  %1653 = vmatpush.msra.mxu1 %v8925_v26  ;;  %v8966_v56 = vand.u32 4294901760, %v8931_v18  ;;  %v8985_v49 = vsub.f32 %v125_v52, %v8950_v14  ;;  %v11635_v13 = vand.u32 4294901760, %v8798_v54 }
 0x146   :  { %11601 = vst [vmem:[#allocation309_spill] sm:$0xff] %v8856_v59  ;;  %v8968_v59 = vand.u32 4294901760, %v124_v5  ;;  %1758 = vmatpush.msra.mxu3 %v8784_v44  ;;  %1724 = vmatpush.msra.mxu2 %v8890_v11  ;;  %v8994_v46 = vand.u32 4294901760, %v8956_v21 }
 0x147   :  { %11602 = vst [vmem:[#allocation310_spill] sm:$0xff] %v8863_v10  ;;  %v8928_v10 = vand.u32 4294901760, %v8890_v11  ;;  %1659 = vmatpush.msra.mxu1 %v8945_v36  ;;  %1727 = vmatmul.f32.vlgmr.msra.gmra.mxu2 %v8798_v54 }
 0x148   :  { %11603 = vst [vmem:[#allocation311_spill] sm:$0xff] %v8868_v4  ;;  %1760 = vmatpush.msra.mxu3 %v8817_v23  ;;  %1877 = vmatpush.msrb.mxu2 %v8837_v9  ;;  %v9006_v38 = vsub.f32 %v124_v5, %v8968_v59  ;;  %v1944_v54 = vsub.f32 %v8956_v21, %v8994_v46 }
 0x149   :  { %11604 = vst [vmem:[#allocation312_spill] sm:$0xff] %v8870_v27  ;;  %v1669_v6 = vsub.f32 %v8890_v11, %v8928_v10  ;;  %1665 = vmatpush.msra.mxu1 %v8972_v15  ;;  %1785 = vmatpush.msrb.mxu0 %v8676_v51  ;;  %v9045_v51 = vsub.f32 %v122_v48, %v9008_v1 }
 0x14a   :  { %11606 = vst [vmem:[#allocation313_spill] sm:$0xff] %v8881_v37  ;;  %1762 = vmatpush.msra.mxu3 %v8848_v61  ;;  %v9028_v61 = vand.u32 4294901760, %v121_v34  ;;  %1879 = vmatpush.msrb.mxu2 %v8870_v27 }
 0x14b   :  { %11607 = vst [vmem:[#allocation314_spill] sm:$0xff] %v8885_v28  ;;  %v8948_v28 = vand.u32 4294901760, %v8911_v22  ;;  %v9001_v52 = vand.u32 4294901760, %v1669_v6  ;;  %v120_v6 = vld [vmem:[%s10691_s5 + $0x2a8] sm:$0xff]  ;;  %1766 = vmatmul.f32.vlgmr.msra.gmra.mxu3 %v11635_v13  ;;  %v119_v13 = vld [vmem:[%s10691_s5 + $0x2a0] sm:$0xff]  ;;  %1789 = vmatpush.msrb.mxu0 %v8681_v31  ;;  %v118_v31 = vld [vmem:[%s10691_s5 + $0x298] sm:$0xff] }
 0x14c   :  { %11608 = vst [vmem:[#allocation315_spill] sm:$0xff] %v8890_v11  ;;  %1922 = vmatpush.msrb.mxu3 %v8991_v20  ;;  %1881 = vmatpush.msrb.mxu2 %v8892_v53 }
 0x14d   :  { %11609 = vst [vmem:[#allocation316_spill] sm:$0xff] %v8892_v53  ;;  %1671 = vmatpush.msra.mxu1 %v9001_v52  ;;  %v9066_v53 = vand.u32 4294901760, %v119_v13  ;;  %1793 = vmatpush.msrb.mxu0 %v8700_v32 }
 0x14e   :  { %11610 = vst [vmem:[#allocation317_spill] sm:$0xff] %v8900_v63  ;;  %1673 = vmatmul.f32.vlgmr.msra.gmra.mxu1 %v8762_v24  ;;  %1883 = vmatpush.msrb.mxu2 %v8902_v35 }
 0x14f   :  { %11611 = vst [vmem:[#allocation318_spill] sm:$0xff] %v8902_v35  ;;  %1840 = vmatpush.msrb.mxu1 %v8579_v12  ;;  %v9077_v12 = vand.u32 4294901760, %v9045_v51  ;;  %1797 = vmatpush.msrb.mxu0 %v8731_v16  ;;  %v116_v16 = vld [vmem:[%s10691_s5 + $0x288] sm:$0xff] }
 0x150   :  { %11612 = vst [vmem:[#allocation319_spill] sm:$0xff] %v8906_v50  ;;  %v123_v50 = vld [vmem:[%s10691_s5 + $0x2c0] sm:$0xff]  ;;  %1885 = vmatpush.msrb.mxu2 %v8918_v0 }
 0x151   :  { %11613 = vst [vmem:[#allocation320_spill] sm:$0xff] %v8911_v22  ;;  %v8987_v11 = vand.u32 4294901760, %v123_v50  ;;  %1842 = vmatpush.msrb.mxu1 %v8588_v55  ;;  %v9099_v55 = vsub.f32 %v119_v13, %v9066_v53  ;;  %1801 = vmatpush.msrb.mxu0 %v8750_v8  ;;  %v1968_v13 = vsub.f32 %v9045_v51, %v9077_v12  ;;  %v115_v8 = vld [vmem:[%s10691_s5 + $0x280] sm:$0xff] }
 0x152   :  { %11614 = vst [vmem:[#allocation321_spill] sm:$0xff] %v8916_v2  ;;  %1887 = vmatpush.msrb.mxu2 %v8950_v14 }
 0x153   :  { %11615 = vst [vmem:[#allocation322_spill] sm:$0xff] %v8918_v0  ;;  %1844 = vmatpush.msrb.mxu1 %v8597_v57  ;;  %1805 = vmatpush.msrb.mxu0 %v8771_v60 }
 0x154   :  { %11616 = vst [vmem:[#allocation323_spill] sm:$0xff] %v8925_v26  ;;  %v1926_v26 = vsub.f32 %v8911_v22, %v8948_v28  ;;  %1889 = vmatpush.msrb.mxu2 %v8968_v59 }
 0x155   :  { %11617 = vst [vmem:[#allocation324_spill] sm:$0xff] %v8928_v10  ;;  %1846 = vmatpush.msrb.mxu1 %v8609_v40  ;;  %1809 = vmatpush.msrb.mxu0 %v8787_v39 }
 0x156   :  { %11618 = vst [vmem:[#allocation325_spill] sm:$0xff] %v8931_v18  ;;  %v9020_v5 = vand.u32 4294901760, %v1926_v26  ;;  %1891 = vmatpush.msrb.mxu2 %v8987_v11 }
 0x157   :  { %11619 = vst [vmem:[#allocation326_spill] sm:$0xff] %v8938_v62  ;;  %1848 = vmatpush.msrb.mxu1 %v8619_v47  ;;  %1813 = vmatpush.msrb.mxu0 %v8807_v19 }
 0x158   :  { %11620 = vst [vmem:[#allocation327_spill] sm:$0xff] %v8945_v36  ;;  %v1932_v36 = vsub.f32 %v8931_v18, %v8966_v56  ;;  %1928 = vmatpush.msrb.mxu3 %v9020_v5  ;;  %1893 = vmatpush.msrb.mxu2 %v9008_v1 }
 0x159   :  { %11621 = vst [vmem:[#allocation328_spill] sm:$0xff] %v8948_v28  ;;  %1850 = vmatpush.msrb.mxu1 %v8631_v29  ;;  %1817 = vmatpush.msrb.mxu0 %v8829_v33 }
 0x15a   :  { %11622 = vst [vmem:[#allocation329_spill] sm:$0xff] %v8950_v14  ;;  %v9039_v26 = vand.u32 4294901760, %v1932_v36  ;;  %1895 = vmatpush.msrb.mxu2 %v9028_v61 }
 0x15b   :  { %11623 = vst [vmem:[#allocation330_spill] sm:$0xff] %v8956_v21  ;;  %1852 = vmatpush.msrb.mxu1 %v8656_v45  ;;  %1821 = vmatpush.msrb.mxu0 %v8851_v25 }
 0x15c   :  { %11624 = vst [vmem:[#allocation331_spill] sm:$0xff] %v8966_v56  ;;  %v9023_v56 = vand.u32 4294901760, %v8985_v49  ;;  %1934 = vmatpush.msrb.mxu3 %v9039_v26 }
 0x15d   :  { %11625 = vst [vmem:[#allocation332_spill] sm:$0xff] %v8968_v59  ;;  %v9143_v59 = vand.u32 4294901760, %v115_v8  ;;  %1854 = vmatpush.msrb.mxu1 %v8673_v17  ;;  %1825 = vmatpush.msrb.mxu0 %v8868_v4 }
 0x15e   :  { %11626 = vst [vmem:[#allocation333_spill] sm:$0xff] %v8972_v15  ;;  %v9026_v15 = vsub.f32 %v123_v50, %v8987_v11  ;;  %v9042_v50 = vand.u32 4294901760, %v9006_v38  ;;  %v1950_v48 = vsub.f32 %v8985_v49, %v9023_v56 }
 0x15f   :  { %11627 = vst [vmem:[#allocation334_spill] sm:$0xff] %v8975_v58  ;;  %1856 = vmatpush.msrb.mxu1 %v8692_v7  ;;  %1829 = vmatpush.msrb.mxu0 %v8900_v63 }
 0x160   :  { %11628 = vst [vmem:[#allocation335_spill] sm:$0xff] %v8985_v49  ;;  %v9061_v36 = vand.u32 4294901760, %v9026_v15  ;;  %v9091_v32 = vand.u32 4294901760, %v1950_v48 }
 0x161   :  { %11629 = vst [vmem:[#allocation336_spill] sm:$0xff] %v8987_v11  ;;  %1858 = vmatpush.msrb.mxu1 %v8711_v3  ;;  %1833 = vmatpush.msrb.mxu0 %v8928_v10  ;;  %v11856_v10 = vld [vmem:[#allocation123_spill] sm:$0xff] }
 0x162   :  { %11630 = vst [vmem:[#allocation337_spill] sm:$0xff] %v8991_v20  ;;  %v9047_v20 = vand.u32 4294901760, %v120_v6  ;;  %1835 = vmatmul.f32.vlgmr.msrb.gmra.mxu0 %v8762_v24 }
 0x163   :  { %11631 = vst [vmem:[#allocation338_spill] sm:$0xff] %v8994_v46  ;;  %v9051_v46 = vand.u32 4294901760, %v1938_v42  ;;  %v9070_v42 = vand.u32 4294901760, %v1944_v54  ;;  %v117_v54 = vld [vmem:[%s10691_s5 + $0x290] sm:$0xff]  ;;  %1860 = vmatpush.msrb.mxu1 %v8728_v41  ;;  %2020 = vmatpush.msra.mxu0 %v8881_v37 }
 0x164   :  { %11632 = vst [vmem:[#allocation339_spill] sm:$0xff] %v9001_v52  ;;  %v9064_v52 = vsub.f32 %v121_v34, %v9028_v61  ;;  %v9080_v34 = vsub.f32 %v120_v6, %v9047_v20  ;;  %v1962_v6 = vsub.f32 %v9026_v15, %v9061_v36  ;;  %v9106_v48 = vand.u32 4294901760, %v117_v54  ;;  %1897 = vmatpush.msrb.mxu2 %v9047_v20 }
 0x165   :  { %11633 = vst [vmem:[#allocation340_spill] sm:$0xff] %v9006_v38  ;;  %1940 = vmatpush.msrb.mxu3 %v9051_v46  ;;  %1862 = vmatpush.msrb.mxu1 %v8747_v43 }
 0x166   :  { %11634 = vst [vmem:[#allocation341_spill] sm:$0xff] %v9008_v1  ;;  %v9115_v57 = vand.u32 4294901760, %v9080_v34  ;;  %v9131_v40 = vand.u32 4294901760, %v1962_v6  ;;  %v9141_v60 = vsub.f32 %v117_v54, %v9106_v48  ;;  %v9147_v6 = vand.u32 4294901760, %v1968_v13  ;;  %1899 = vmatpush.msrb.mxu2 %v9066_v53  ;;  %2023 = vmatpush.msra.mxu0 %v8911_v22 }
 0x167   :  { %11636 = vst [vmem:[#allocation342_spill] sm:$0xff] %v9020_v5  ;;  %v1956_v5 = vsub.f32 %v9006_v38, %v9042_v50  ;;  %1946 = vmatpush.msrb.mxu3 %v9070_v42  ;;  %1864 = vmatpush.msrb.mxu1 %v8768_v30 }
 0x168   :  { %11637 = vst [vmem:[#allocation343_spill] sm:$0xff] %v9023_v56  ;;  %v9082_v56 = vand.u32 4294901760, %v118_v31  ;;  %v9171_v19 = vand.u32 4294901760, %v9141_v60  ;;  %2026 = vmatpush.msra.mxu0 %v8931_v18 }
 0x169   :  { %11638 = vst [vmem:[#allocation344_spill] sm:$0xff] %v9026_v15  ;;  %1952 = vmatpush.msrb.mxu3 %v9091_v32  ;;  %1866 = vmatpush.msrb.mxu1 %v8784_v44 }
 0x16a   :  { %11639 = vst [vmem:[#allocation345_spill] sm:$0xff] %v9028_v61  ;;  %1901 = vmatpush.msrb.mxu2 %v9082_v56  ;;  %2029 = vmatpush.msra.mxu0 %v8938_v62  ;;  %v133_v62 = vld [vmem:[%s10691_s5 + $0x310] sm:$0xff] }
 0x16b   :  { %11640 = vst [vmem:[#allocation346_spill] sm:$0xff] %v9039_v26  ;;  %v9096_v26 = vand.u32 4294901760, %v9064_v52  ;;  %1868 = vmatpush.msrb.mxu1 %v8817_v23 }
 0x16c   :  { %11641 = vst [vmem:[#allocation347_spill] sm:$0xff] %v9042_v50  ;;  %v160_v50 = vld.sshfl [vmem:[#allocation1 + $0x28] sm:$0xff pattern:$0x73625140]  ;;  %1903 = vmatpush.msrb.mxu2 %v9106_v48  ;;  %2032 = vmatpush.msra.mxu0 %v8956_v21  ;;  %v11686_v21 = vld [vmem:[#allocation332_spill] sm:$0xff] }
 0x16d   :  { %11642 = vst [vmem:[#allocation348_spill] sm:$0xff] %v9045_v51 }
 0x16e   :  { %11643 = vst [vmem:[#allocation349_spill] sm:$0xff] %v9047_v20  ;;  %2035 = vmatpush.msra.mxu0 %v8985_v49 }
 0x16f   :  { %11644 = vst [vmem:[#allocation350_spill] sm:$0xff] %v9051_v46  ;;  %v9110_v46 = vand.u32 4294901760, %v1956_v5  ;;  %v9127_v5 = vand.u32 4294901760, %v160_v50 }
 0x170   :  { %11645 = vst [vmem:[#allocation351_spill] sm:$0xff] %v9061_v36  ;;  %v9118_v36 = vsub.f32 %v118_v31, %v9082_v56  ;;  %v1974_v31 = vsub.f32 %v9064_v52, %v9096_v26  ;;  %2038 = vmatpush.msra.mxu0 %v9006_v38 }
 0x171   :  { %11646 = vst [vmem:[#allocation352_spill] sm:$0xff] %v9064_v52  ;;  %1958 = vmatpush.msrb.mxu3 %v9110_v46  ;;  %v9160_v39 = vsub.f32 %v160_v50, %v9127_v5 }
 0x172   :  { %11647 = vst [vmem:[#allocation353_spill] sm:$0xff] %v9066_v53  ;;  %v9152_v47 = vand.u32 4294901760, %v9118_v36  ;;  %v9164_v13 = vand.u32 4294901760, %v1974_v31  ;;  %2041 = vmatpush.msra.mxu0 %v9026_v15  ;;  %v134_v15 = vld [vmem:[%s10691_s5 + $0x318] sm:$0xff] }
 0x173   :  { %11648 = vst [vmem:[#allocation354_spill] sm:$0xff] %v9070_v42  ;;  %v9125_v42 = vand.u32 4294901760, %v116_v16  ;;  %1964 = vmatpush.msrb.mxu3 %v9131_v40  ;;  %v11675_v4 = vand.u32 4294901760, %v9160_v39  ;;  %v11684_v49 = vld [vmem:[#allocation347_spill] sm:$0xff] }
 0x174   :  { %11649 = vst [vmem:[#allocation355_spill] sm:$0xff] %v9077_v12  ;;  %v9136_v12 = vand.u32 4294901760, %v9099_v55  ;;  %v1992_v31 = vsub.f32 %v9118_v36, %v9152_v47  ;;  %2044 = vmatpush.msra.mxu0 %v9045_v51 }
 0x175   :  { %11650 = vst [vmem:[#allocation356_spill] sm:$0xff] %v9080_v34  ;;  %v9157_v54 = vsub.f32 %v116_v16, %v9125_v42  ;;  %v9174_v16 = vsub.f32 %v115_v8, %v9143_v59  ;;  %1970 = vmatpush.msrb.mxu3 %v9147_v6  ;;  %1905 = vmatpush.msrb.mxu2 %v9125_v42 }
 0x176   :  { %11651 = vst [vmem:[#allocation357_spill] sm:$0xff] %v9082_v56  ;;  %2047 = vmatpush.msra.mxu0 %v9064_v52  ;;  %v9277_v52 = vand.u32 4294901760, %v134_v15 }
 0x177   :  { %11652 = vst [vmem:[#allocation358_spill] sm:$0xff] %v9091_v32  ;;  %v1980_v32 = vsub.f32 %v9080_v34, %v9115_v57  ;;  %v9185_v33 = vand.u32 4294901760, %v9157_v54  ;;  %1976 = vmatpush.msrb.mxu3 %v9164_v13  ;;  %v9197_v25 = vand.u32 4294901760, %v9174_v16  ;;  %1907 = vmatpush.msrb.mxu2 %v9143_v59  ;;  %v11685_v38 = vld [vmem:[#allocation351_spill] sm:$0xff] }
 0x178   :  { %11653 = vst [vmem:[#allocation359_spill] sm:$0xff] %v9096_v26  ;;  %2050 = vmatpush.msra.mxu0 %v9080_v34  ;;  %v132_v34 = vld [vmem:[%s10691_s5 + $0x308] sm:$0xff] }
 0x179   :  { %11654 = vst [vmem:[#allocation360_spill] sm:$0xff] %v9099_v55  ;;  %v9178_v50 = vand.u32 4294901760, %v1980_v32  ;;  %v1998_v32 = vsub.f32 %v9141_v60, %v9171_v19  ;;  %v2010_v63 = vsub.f32 %v9174_v16, %v9197_v25  ;;  %2114 = vmatpush.msra.mxu2 %v8916_v2  ;;  %v9299_v18 = vand.u32 4294901760, %v132_v34 }
 0x17a   :  { %11655 = vst [vmem:[#allocation361_spill] sm:$0xff] %v9106_v48  ;;  %2053 = vmatpush.msra.mxu0 %v9099_v55 }
 0x17b   :  { %11656 = vst [vmem:[#allocation362_spill] sm:$0xff] %v9110_v46  ;;  %v1986_v46 = vsub.f32 %v9099_v55, %v9136_v12  ;;  %1982 = vmatpush.msrb.mxu3 %v9178_v50  ;;  %2118 = vmatpush.msra.mxu2 %v8948_v28  ;;  %v11687_v51 = vld [vmem:[#allocation355_spill] sm:$0xff]  ;;  %v131_v55 = vld [vmem:[%s10691_s5 + $0x300] sm:$0xff] }
 0x17c   :  { %11657 = vst [vmem:[#allocation363_spill] sm:$0xff] %v9115_v57  ;;  %2056 = vmatpush.msra.mxu0 %v9118_v36 }
 0x17d   :  { %11658 = vst [vmem:[#allocation364_spill] sm:$0xff] %v9118_v36  ;;  %v9190_v8 = vand.u32 4294901760, %v1986_v46  ;;  %v2004_v46 = vsub.f32 %v9157_v54, %v9185_v33 }
 0x17e   :  { %11659 = vst [vmem:[#allocation365_spill] sm:$0xff] %v9125_v42  ;;  %2059 = vmatpush.msra.mxu0 %v9141_v60 }
 0x17f   :  { %11660 = vst [vmem:[#allocation366_spill] sm:$0xff] %v9131_v40  ;;  %v9201_v40 = vand.u32 4294901760, %v1992_v31  ;;  %1988 = vmatpush.msrb.mxu3 %v9190_v8  ;;  %v9214_v31 = vand.u32 4294901760, %v1998_v32  ;;  %v9228_v32 = vand.u32 4294901760, %v2010_v63  ;;  %v11679_v63 = vld [vmem:[#allocation307_spill] sm:$0xff] }
 0x180   :  { %11661 = vst [vmem:[#allocation367_spill] sm:$0xff] %v9136_v12  ;;  %1870 = vmatpush.msrb.mxu1 %v11679_v63  ;;  %2062 = vmatpush.msra.mxu0 %v9157_v54 }
 0x181   :  { %11662 = vst [vmem:[#allocation368_spill] sm:$0xff] %v9141_v60  ;;  %1994 = vmatpush.msrb.mxu3 %v9201_v40  ;;  %1872 = vmatmul.f32.vlgmr.msrb.gmra.mxu1 %v8762_v24  ;;  %v11683_v24 = vld [vmem:[#allocation343_spill] sm:$0xff]  ;;  %v9320_v60 = vsub.f32 %v132_v34, %v9299_v18 }
 0x182   :  { %11663 = vst [vmem:[#allocation369_spill] sm:$0xff] %v9143_v59  ;;  %2073 = vmatpush.msra.mxu1 %v8837_v9  ;;  %2065 = vmatpush.msra.mxu0 %v9174_v16 }
 0x183   :  { %11664 = vst [vmem:[#allocation370_spill] sm:$0xff] %v9147_v6  ;;  %2000 = vmatpush.msrb.mxu3 %v9214_v31  ;;  %2068 = vmatmul.f32.vlgmr.msra.gmra.mxu0 %v9160_v39  ;;  %v9340_v34 = vand.u32 4294901760, %v9320_v60 }
 0x184   :  { %11665 = vst [vmem:[#allocation371_spill] sm:$0xff] %v9152_v47  ;;  %2075 = vmatpush.msra.mxu1 %v8870_v27  ;;  %2230 = vmatpush.msrb.mxu0 %v9277_v52 }
 0x185   :  { %11666 = vst [vmem:[#allocation372_spill] sm:$0xff] %v9157_v54 }
 0x186   :  { %11667 = vst [vmem:[#allocation373_spill] sm:$0xff] %v9164_v13  ;;  %v1911_v13 = vsub.f32 %v9160_v39, %v11675_v4  ;;  %v9222_v4 = vand.u32 4294901760, %v2004_v46  ;;  %v11682_v46 = vld [vmem:[#allocation338_spill] sm:$0xff] }
 0x187   :  { %11668 = vst [vmem:[#allocation374_spill] sm:$0xff] %v9171_v19 }
 0x188   :  { %11669 = vst [vmem:[#allocation375_spill] sm:$0xff] %v9174_v16  ;;  %2006 = vmatpush.msrb.mxu3 %v9222_v4 }
 0x189   :  { %11670 = vst [vmem:[#allocation376_spill] sm:$0xff] %v9178_v50 }
 0x18a   :  { %11671 = vst [vmem:[#allocation377_spill] sm:$0xff] %v9185_v33  ;;  %2012 = vmatpush.msrb.mxu3 %v9228_v32 }
 0x18b   :  { %11672 = vst [vmem:[#allocation378_spill] sm:$0xff] %v9190_v8  ;;  %v1912_v8 = vand.u32 4294901760, %v1911_v13  ;;  %2014 = vmatmul.f32.vlgmr.msrb.gmra.mxu3 %v9127_v5  ;;  %v11680_v13 = vld [vmem:[#allocation331_spill] sm:$0xff] }
 0x18c   :  { %11673 = vst [vmem:[#allocation379_spill] sm:$0xff] %v9197_v25  ;;  %2181 = vmatpush.msra.mxu3 %v8837_v9  ;;  %2122 = vmatpush.msra.mxu2 %v11680_v13 }
 0x18d   :  { %11674 = vst [vmem:[#allocation380_spill] sm:$0xff] %v9201_v40  ;;  %1913 = vmatmul.f32.vlgmr.msrb.gmra.mxu2 %v1912_v8  ;;  %v11681_v8 = vld [vmem:[#allocation316_spill] sm:$0xff] }
 0x18e   :  { %11676 = vst [vmem:[#allocation381_spill] sm:$0xff] %v9214_v31  ;;  %2183 = vmatpush.msra.mxu3 %v8870_v27  ;;  %2126 = vmatpush.msra.mxu2 %v8975_v58  ;;  %v11854_v58 = vld [vmem:[#allocation75_spill] sm:$0xff] }
 0x18f   :  { %11677 = vst [vmem:[#allocation382_spill] sm:$0xff] %v9222_v4  ;;  %2077 = vmatpush.msra.mxu1 %v11681_v8 }
 0x190   :  { %11678 = vst [vmem:[#allocation383_spill] sm:$0xff] %v9228_v32  ;;  %2185 = vmatpush.msra.mxu3 %v11681_v8  ;;  %2130 = vmatpush.msra.mxu2 %v11682_v46 }
 0x191   :  { %2079 = vmatpush.msra.mxu1 %v8902_v35  ;;  %11688 = vst [vmem:[#allocation384_spill] sm:$0xff] %v9277_v52 }
 0x192   :  { %2187 = vmatpush.msra.mxu3 %v8902_v35  ;;  %2134 = vmatpush.msra.mxu2 %v11683_v24  ;;  %11691 = vst [vmem:[#allocation387_spill] sm:$0xff] %v9299_v18 }
 0x193   :  { %2081 = vmatpush.msra.mxu1 %v8918_v0  ;;  %11695 = vst [vmem:[#allocation391_spill] sm:$0xff] %v9320_v60 }
 0x194   :  { %2189 = vmatpush.msra.mxu3 %v8918_v0  ;;  %2138 = vmatpush.msra.mxu2 %v11684_v49  ;;  %v161_v49 = vld.sshfl [vmem:[#allocation1 + $0x30] sm:$0xff pattern:$0x73625140]  ;;  %11698 = vst [vmem:[#allocation394_spill] sm:$0xff] %v9340_v34 }
 0x195   :  { %2083 = vmatpush.msra.mxu1 %v8950_v14 }
 0x196   :  { %2191 = vmatpush.msra.mxu3 %v8950_v14  ;;  %2142 = vmatpush.msra.mxu2 %v11685_v38  ;;  %v169_v38 = vsel %vm168_vm0, %v161_v49, 0 }
 0x197   :  { %2085 = vmatpush.msra.mxu1 %v11686_v21  ;;  %v9303_v49 = vand.u32 4294901760, %v169_v38 }
 0x198   :  { %2193 = vmatpush.msra.mxu3 %v11686_v21  ;;  %2146 = vmatpush.msra.mxu2 %v11687_v51  ;;  %v9286_v51 = vand.u32 4294901760, %v133_v62 }
 0x199   :  { %2087 = vmatpush.msra.mxu1 %v8987_v11 }
 0x19a   :  { %2195 = vmatpush.msra.mxu3 %v8987_v11  ;;  %2150 = vmatpush.msra.mxu2 %v9096_v26  ;;  %11689 = vst [vmem:[#allocation385_spill] sm:$0xff] %v9286_v51  ;;  %v9297_v26 = vsub.f32 %v134_v15, %v9277_v52  ;;  %v9308_v36 = vsub.f32 %v133_v62, %v9286_v51 }
 0x19b   :  { %2089 = vmatpush.msra.mxu1 %v9008_v1  ;;  %v2238_v62 = vsub.f32 %v169_v38, %v9303_v49  ;;  %2232 = vmatpush.msrb.mxu0 %v9286_v51 }
 0x19c   :  { %2197 = vmatpush.msra.mxu3 %v9008_v1  ;;  %2154 = vmatpush.msra.mxu2 %v9115_v57  ;;  %11690 = vst [vmem:[#allocation386_spill] sm:$0xff] %v9297_v26  ;;  %v9310_v57 = vand.u32 4294901760, %v131_v55  ;;  %v9317_v15 = vand.u32 4294901760, %v9297_v26  ;;  %v9328_v54 = vand.u32 4294901760, %v9308_v36 }
 0x19d   :  { %2091 = vmatpush.msra.mxu1 %v9028_v61  ;;  %11692 = vst [vmem:[#allocation388_spill] sm:$0xff] %v9308_v36  ;;  %2234 = vmatpush.msrb.mxu0 %v9299_v18 }
 0x19e   :  { %2199 = vmatpush.msra.mxu3 %v9028_v61  ;;  %2158 = vmatpush.msra.mxu2 %v9136_v12  ;;  %11693 = vst [vmem:[#allocation389_spill] sm:$0xff] %v9310_v57  ;;  %v2261_v38 = vsub.f32 %v9297_v26, %v9317_v15  ;;  %v2267_v16 = vsub.f32 %v9308_v36, %v9328_v54 }
 0x19f   :  { %2093 = vmatpush.msra.mxu1 %v9047_v20  ;;  %11694 = vst [vmem:[#allocation390_spill] sm:$0xff] %v9317_v15  ;;  %2236 = vmatpush.msrb.mxu0 %v9310_v57 }
 0x1a0   :  { %2201 = vmatpush.msra.mxu3 %v9047_v20  ;;  %2162 = vmatpush.msra.mxu2 %v9152_v47  ;;  %11696 = vst [vmem:[#allocation392_spill] sm:$0xff] %v9328_v54  ;;  %v9331_v47 = vsub.f32 %v131_v55, %v9310_v57  ;;  %v2239_v55 = vand.u32 4294901760, %v2238_v62  ;;  %v9363_v24 = vand.u32 4294901760, %v2267_v16 }
 0x1a1   :  { %2095 = vmatpush.msra.mxu1 %v9066_v53  ;;  %2359 = vmatpush.msra.mxu0 %v9317_v15 }
 0x1a2   :  { %2203 = vmatpush.msra.mxu3 %v9066_v53  ;;  %2166 = vmatpush.msra.mxu2 %v9171_v19  ;;  %11697 = vst [vmem:[#allocation393_spill] sm:$0xff] %v9331_v47  ;;  %v2273_v19 = vsub.f32 %v9320_v60, %v9340_v34  ;;  %v2240_v12 = vsub.f32 %v2238_v62, %v2239_v55 }
 0x1a3   :  { %2097 = vmatpush.msra.mxu1 %v9082_v56  ;;  %11701 = vst [vmem:[#allocation397_spill] sm:$0xff] %v9363_v24  ;;  %2363 = vmatpush.msra.mxu0 %v9328_v54 }
 0x1a4   :  { %2205 = vmatpush.msra.mxu3 %v9082_v56  ;;  %2170 = vmatpush.msra.mxu2 %v9185_v33  ;;  %v9349_v33 = vand.u32 4294901760, %v9331_v47  ;;  %v2241_v16 = vand.u32 4294901760, %v2240_v12 }
 0x1a5   :  { %2099 = vmatpush.msra.mxu1 %v9106_v48  ;;  %2367 = vmatpush.msra.mxu0 %v9340_v34 }
 0x1a6   :  { %2207 = vmatpush.msra.mxu3 %v9106_v48  ;;  %2174 = vmatpush.msra.mxu2 %v9197_v25  ;;  %11699 = vst [vmem:[#allocation395_spill] sm:$0xff] %v9349_v33  ;;  %v9355_v25 = vand.u32 4294901760, %v2261_v38  ;;  %v2279_v22 = vsub.f32 %v9331_v47, %v9349_v33  ;;  %v11702_v38 = vand.u32 4294901760, %v9160_v39  ;;  %v364_v39 = vpop.f32.mrf.mxu2 }
 0x1a7   :  { %2176 = vmatmul.f32.vlgmr.msra.gmra.mxu2 %v9127_v5  ;;  %2101 = vmatpush.msra.mxu1 %v9125_v42 }
 0x1a8   :  { %2209 = vmatpush.msra.mxu3 %v9125_v42  ;;  %11700 = vst [vmem:[#allocation396_spill] sm:$0xff] %v9355_v25  ;;  %2301 = vmatpush.msrb.mxu2 %v9297_v26  ;;  %v9378_v26 = vand.u32 4294901760, %v2279_v22  ;;  %v310_v22 = vpop.f32.mrf.mxu1 }
 0x1a9   :  { %2103 = vmatpush.msra.mxu1 %v9143_v59  ;;  %2242 = vmatmul.f32.vlgmr.msrb.gmra.mxu0 %v2241_v16 }
 0x1aa   :  { %2211 = vmatpush.msra.mxu3 %v9143_v59  ;;  %2304 = vmatpush.msrb.mxu2 %v9308_v36  ;;  %11704 = vst [vmem:[#allocation399_spill] sm:$0xff] %v9378_v26 }
 0x1ab   :  { %2213 = vmatmul.f32.vlgmr.msra.gmra.mxu3 %v9127_v5  ;;  %2107 = vmatmul.f32.vlgmr.msra.gmra.mxu1 %v11702_v38  ;;  %v9372_v5 = vand.u32 4294901760, %v2273_v19  ;;  %v209_v19 = vpop.f32.mrf.mxu0 }
 0x1ac   :  { %2330 = vmatpush.msrb.mxu3 %v9277_v52  ;;  %2263 = vmatpush.msrb.mxu1 %v9355_v25  ;;  %v311_v12 = vadd.f32 %v310_v22, %v209_v19 }
 0x1ad   :  { %11703 = vst [vmem:[#allocation398_spill] sm:$0xff] %v9372_v5  ;;  %2307 = vmatpush.msrb.mxu2 %v9320_v60  ;;  %2371 = vmatpush.msra.mxu0 %v9349_v33 }
 0x1ae   :  { %2332 = vmatpush.msrb.mxu3 %v9286_v51  ;;  %2269 = vmatpush.msrb.mxu1 %v9363_v24 }
 0x1af   :  { %2310 = vmatpush.msrb.mxu2 %v9331_v47 }
 0x1b0   :  { %2334 = vmatpush.msrb.mxu3 %v9299_v18  ;;  %2313 = vmatmul.f32.vlgmr.msrb.gmra.mxu2 %v2238_v62  ;;  %v365_v62 = vadd.f32 %v364_v39, %v311_v12  ;;  %v509_v34 = vpop.f32.mrf.mxu1 }
 0x1b1   :  { %2275 = vmatpush.msrb.mxu1 %v9372_v5  ;;  %2373 = vmatmul.f32.vlgmr.msra.gmra.mxu0 %v9303_v49 }
 0x1b2   :  { %2336 = vmatpush.msrb.mxu3 %v9310_v57 }
 0x1b3   :  { %2340 = vmatmul.f32.vlgmr.msrb.gmra.mxu3 %v2239_v55  ;;  %2281 = vmatpush.msrb.mxu1 %v9378_v26  ;;  %v403_v55 = vpop.f32.mrf.mxu3  ;;  %v472_v16 = vpop.f32.mrf.mxu0 }
 0x1b4   :  { %2283 = vmatmul.f32.vlgmr.msrb.gmra.mxu1 %v9303_v49  ;;  %v404_v38 = vadd.f32 %v403_v55, %v365_v62 }
 0x1b5   :  { %2390 = vmatpush.msra.mxu1 %v9277_v52 }
 0x1b6   :  { %v473_v54 = vadd.f32 %v472_v16, %v404_v38 }
 0x1b7   :  { %2392 = vmatpush.msra.mxu1 %v9286_v51 }
 0x1b8   :  { %v510_v15 = vadd.f32 %v509_v34, %v473_v54  ;;  %v744_v26 = vpop.f32.mrf.mxu1 }
 0x1b9   :  { %2394 = vmatpush.msra.mxu1 %v9299_v18  ;;  %v550_v18 = vpop.f32.mrf.mxu2 }
 0x1ba   :  { %v551_v47 = vadd.f32 %v550_v18, %v510_v15 }
 0x1bb   :  { %2396 = vmatpush.msra.mxu1 %v9310_v57  ;;  %v651_v33 = vpop.f32.mrf.mxu3  ;;  %v705_v51 = vpop.f32.mrf.mxu0 }
 0x1bc   :  { %2398 = vmatmul.f32.vlgmr.msra.gmra.mxu1 %v9303_v49  ;;  %v652_v60 = vadd.f32 %v651_v33, %v551_v47 }
 0x1be   :  { %v706_v57 = vadd.f32 %v705_v51, %v652_v60 }
 0x1c0   :  { %v745_v52 = vadd.f32 %v744_v26, %v706_v57  ;;  %v992_v12 = vpop.f32.mrf.mxu1 }
 0x1c1   :  { %v813_v49 = vpop.f32.mrf.mxu2 }
 0x1c2   :  { %v814_v36 = vadd.f32 %v813_v49, %v745_v52 }
 0x1c3   :  { %v850_v5 = vpop.f32.mrf.mxu3  ;;  %v891_v22 = vpop.f32.mrf.mxu0 }
 0x1c4   :  { %v851_v19 = vadd.f32 %v850_v5, %v814_v36 }
 0x1c6   :  { %v892_v39 = vadd.f32 %v891_v22, %v851_v19 }
 0x1c8   :  { %v993_v62 = vadd.f32 %v992_v12, %v892_v39  ;;  %v1191_v18 = vpop.f32.mrf.mxu1 }
 0x1c9   :  { %v1046_v55 = vpop.f32.mrf.mxu2 }
 0x1ca   :  { %v1047_v38 = vadd.f32 %v1046_v55, %v993_v62 }
 0x1cb   :  { %v1085_v16 = vpop.f32.mrf.mxu3  ;;  %v1154_v54 = vpop.f32.mrf.mxu0 }
 0x1cc   :  { %v1086_v34 = vadd.f32 %v1085_v16, %v1047_v38  ;;  %v142_v16 = vld [vmem:[%s10692_s6 + $0x38] sm:$0xff] }
 0x1ce   :  { %v1155_v15 = vadd.f32 %v1154_v54, %v1086_v34  ;;  %v135_v34 = vld [vmem:[%s10692_s6] sm:$0xff] }
 0x1d0   :  { %v1192_v24 = vadd.f32 %v1191_v18, %v1155_v15  ;;  %v1426_v52 = vpop.f32.mrf.mxu1 }
 0x1d1   :  { %v1232_v33 = vpop.f32.mrf.mxu2 }
 0x1d2   :  { %v1233_v47 = vadd.f32 %v1232_v33, %v1192_v24  ;;  %v9399_v24 = vand.u32 4294901760, %v142_v16  ;;  %v9407_v33 = vand.u32 4294901760, %v135_v34 }
 0x1d3   :  { %v1333_v51 = vpop.f32.mrf.mxu3  ;;  %v1387_v57 = vpop.f32.mrf.mxu0 }
 0x1d4   :  { %v1334_v60 = vadd.f32 %v1333_v51, %v1233_v47  ;;  %11705 = vst [vmem:[#allocation400_spill] sm:$0xff] %v9399_v24  ;;  %v9405_v15 = vsub.f32 %v142_v16, %v9399_v24  ;;  %2506 = vmatpush.msrb.mxu1 %v9399_v24  ;;  %2422 = vmatpush.msra.mxu2 %v9399_v24  ;;  %v136_v16 = vld [vmem:[%s10692_s6 + $0x8] sm:$0xff] }
 0x1d5   :  { %11707 = vst [vmem:[#allocation402_spill] sm:$0xff] %v9407_v33 }
 0x1d6   :  { %v1388_v26 = vadd.f32 %v1387_v57, %v1334_v60  ;;  %11706 = vst [vmem:[#allocation401_spill] sm:$0xff] %v9405_v15  ;;  %v9412_v51 = vand.u32 4294901760, %v9405_v15  ;;  %v9415_v57 = vsub.f32 %v135_v34, %v9407_v33  ;;  %2481 = vmatpush.msrb.mxu0 %v9405_v15  ;;  %2508 = vmatpush.msrb.mxu1 %v9407_v33  ;;  %v9446_v34 = vand.u32 4294901760, %v136_v16 }
 0x1d7   :  { %2424 = vmatpush.msra.mxu2 %v9407_v33 }
 0x1d8   :  { %v1427_v49 = vadd.f32 %v1426_v52, %v1388_v26  ;;  %v1674_v39 = vpop.f32.mrf.mxu1  ;;  %11708 = vst [vmem:[#allocation403_spill] sm:$0xff] %v9412_v51  ;;  %v2451_v26 = vsub.f32 %v9405_v15, %v9412_v51  ;;  %2484 = vmatpush.msrb.mxu0 %v9415_v57 }
 0x1d9   :  { %v1495_v36 = vpop.f32.mrf.mxu2  ;;  %11709 = vst [vmem:[#allocation404_spill] sm:$0xff] %v9415_v57  ;;  %2533 = vmatpush.msrb.mxu2 %v9412_v51 }
 0x1da   :  { %v1496_v5 = vadd.f32 %v1495_v36, %v1427_v49  ;;  %v9423_v49 = vand.u32 4294901760, %v9415_v57  ;;  %11714 = vst [vmem:[#allocation409_spill] sm:$0xff] %v9446_v34 }
 0x1db   :  { %v1532_v22 = vpop.f32.mrf.mxu3  ;;  %v1573_v19 = vpop.f32.mrf.mxu0 }
 0x1dc   :  { %v1533_v12 = vadd.f32 %v1532_v22, %v1496_v5  ;;  %11710 = vst [vmem:[#allocation405_spill] sm:$0xff] %v9423_v49  ;;  %v9427_v5 = vand.u32 4294901760, %v2451_v26  ;;  %v2457_v22 = vsub.f32 %v9415_v57, %v9423_v49  ;;  %2537 = vmatpush.msrb.mxu2 %v9423_v49 }
 0x1de   :  { %v1574_v62 = vadd.f32 %v1573_v19, %v1533_v12  ;;  %11711 = vst [vmem:[#allocation406_spill] sm:$0xff] %v9427_v5  ;;  %2453 = vmatpush.msra.mxu3 %v9427_v5  ;;  %v144_v5 = vld [vmem:[%s10692_s6 + $0x48] sm:$0xff] }
 0x1e0   :  { %v1675_v55 = vadd.f32 %v1674_v39, %v1574_v62  ;;  %v9433_v39 = vand.u32 4294901760, %v2457_v22  ;;  %v143_v62 = vld [vmem:[%s10692_s6 + $0x40] sm:$0xff] }
 0x1e1   :  { %v1728_v38 = vpop.f32.mrf.mxu2 }
 0x1e2   :  { %v1729_v54 = vadd.f32 %v1728_v38, %v1675_v55  ;;  %11712 = vst [vmem:[#allocation407_spill] sm:$0xff] %v9433_v39  ;;  %2459 = vmatpush.msra.mxu3 %v9433_v39  ;;  %v9439_v55 = vand.u32 4294901760, %v143_v62 }
 0x1e3   :  { %v1767_v18 = vpop.f32.mrf.mxu3  ;;  %v1836_v47 = vpop.f32.mrf.mxu0 }
 0x1e4   :  { %v1768_v60 = vadd.f32 %v1767_v18, %v1729_v54  ;;  %11713 = vst [vmem:[#allocation408_spill] sm:$0xff] %v9439_v55  ;;  %2558 = vmatpush.msrb.mxu3 %v9399_v24  ;;  %2581 = vmatpush.msra.mxu0 %v9439_v55  ;;  %v9449_v18 = vsub.f32 %v143_v62, %v9439_v55 }
 0x1e6   :  { %v1837_v36 = vadd.f32 %v1836_v47, %v1768_v60  ;;  %11715 = vst [vmem:[#allocation410_spill] sm:$0xff] %v9449_v18  ;;  %2560 = vmatpush.msrb.mxu3 %v9407_v33  ;;  %2583 = vmatpush.msra.mxu0 %v9446_v34  ;;  %v9454_v60 = vand.u32 4294901760, %v9449_v18 }
 0x1e8   :  { %11716 = vst [vmem:[#allocation411_spill] sm:$0xff] %v9454_v60 }
 0x1fe   :  { %v1873_v52 = vpop.f32.mrf.mxu1 }
 0x1ff   :  { %v1874_v19 = vadd.f32 %v1873_v52, %v1837_v36  ;;  %v9457_v52 = vsub.f32 %v136_v16, %v9446_v34  ;;  %v2610_v36 = vsub.f32 %v9449_v18, %v9454_v60 }
 0x200   :  { %v2069_v47 = vpop.f32.mrf.mxu0 }
 0x201   :  { %11717 = vst [vmem:[#allocation412_spill] sm:$0xff] %v9457_v52  ;;  %v9462_v22 = vand.u32 4294901760, %v9457_v52  ;;  %v9464_v62 = vand.u32 4294901760, %v2610_v36 }
 0x203   :  { %11718 = vst [vmem:[#allocation413_spill] sm:$0xff] %v9462_v22  ;;  %v2616_v57 = vsub.f32 %v9457_v52, %v9462_v22  ;;  %2612 = vmatpush.msra.mxu1 %v9464_v62 }
 0x204   :  { %11719 = vst [vmem:[#allocation414_spill] sm:$0xff] %v9464_v62 }
 0x205   :  { %v9469_v16 = vand.u32 4294901760, %v2616_v57  ;;  %v137_v57 = vld [vmem:[%s10692_s6 + $0x10] sm:$0xff] }
 0x207   :  { %11720 = vst [vmem:[#allocation415_spill] sm:$0xff] %v9469_v16  ;;  %2618 = vmatpush.msra.mxu1 %v9469_v16 }
 0x20e   :  { %v2015_v54 = vpop.f32.mrf.mxu3 }
 0x210   :  { %v1914_v12 = vpop.f32.mrf.mxu2 }
 0x211   :  { %v1915_v38 = vadd.f32 %v1914_v12, %v1874_v19 }
 0x213   :  { %v2016_v26 = vadd.f32 %v2015_v54, %v1915_v38 }
 0x215   :  { %v2070_v19 = vadd.f32 %v2069_v47, %v2016_v26 }
 0x226   :  { %v2243_v33 = vpop.f32.mrf.mxu0 }
 0x228   :  { %v2108_v12 = vpop.f32.mrf.mxu1 }
 0x229   :  { %v2109_v15 = vadd.f32 %v2108_v12, %v2070_v19 }
 0x22a   :  { %v2177_v49 = vpop.f32.mrf.mxu2 }
 0x22b   :  { %v2178_v38 = vadd.f32 %v2177_v49, %v2109_v15  ;;  %v9478_v49 = vand.u32 4294901760, %v144_v5 }
 0x22d   :  { %11721 = vst [vmem:[#allocation416_spill] sm:$0xff] %v9478_v49 }
 0x22e   :  { %v2214_v54 = vpop.f32.mrf.mxu3  ;;  %v2374_v16 = vpop.f32.mrf.mxu0 }
 0x22f   :  { %v2215_v51 = vadd.f32 %v2214_v54, %v2178_v38 }
 0x231   :  { %v2244_v39 = vadd.f32 %v2243_v33, %v2215_v51  ;;  %v2284_v47 = vpop.f32.mrf.mxu1  ;;  %v9480_v33 = vand.u32 4294901760, %v137_v57 }
 0x233   :  { %v2285_v26 = vadd.f32 %v2284_v47, %v2244_v39  ;;  %v2314_v36 = vpop.f32.mrf.mxu2  ;;  %11722 = vst [vmem:[#allocation417_spill] sm:$0xff] %v9480_v33  ;;  %v9483_v39 = vsub.f32 %v144_v5, %v9478_v49 }
 0x235   :  { %v2315_v19 = vadd.f32 %v2314_v36, %v2285_v26  ;;  %11723 = vst [vmem:[#allocation418_spill] sm:$0xff] %v9483_v39  ;;  %v9486_v26 = vsub.f32 %v137_v57, %v9480_v33  ;;  %v138_v57 = vld [vmem:[%s10692_s6 + $0x18] sm:$0xff] }
 0x236   :  { %v2341_v12 = vpop.f32.mrf.mxu3 }
 0x237   :  { %v2342_v15 = vadd.f32 %v2341_v12, %v2315_v19  ;;  %11724 = vst [vmem:[#allocation419_spill] sm:$0xff] %v9486_v26  ;;  %v9490_v19 = vand.u32 4294901760, %v9483_v39 }
 0x239   :  { %v2375_v38 = vadd.f32 %v2374_v16, %v2342_v15  ;;  %v2399_v54 = vpop.f32.mrf.mxu1  ;;  %11725 = vst [vmem:[#allocation420_spill] sm:$0xff] %v9490_v19  ;;  %v145_v16 = vld [vmem:[%s10692_s6 + $0x50] sm:$0xff]  ;;  %v9498_v15 = vand.u32 4294901760, %v9486_v26 }
 0x23b   :  { %v2400_v51 = vadd.f32 %v2399_v54, %v2375_v38  ;;  %11726 = vst [vmem:[#allocation421_spill] sm:$0xff] %v9498_v15  ;;  %v2769_v38 = vsub.f32 %v9483_v39, %v9490_v19  ;;  %v9510_v54 = vand.u32 4294901760, %v145_v16 }
 0x23d   :  { %v2402_v47 = vmul.f32 0.02, %v2400_v51  ;;  %11727 = vst [vmem:[#allocation422_spill] sm:$0xff] %v9510_v54  ;;  %v9527_v24 = vand.u32 4294901760, %v2769_v38  ;;  %v9530_v25 = vsub.f32 %v145_v16, %v9510_v54  ;;  %v139_v38 = vld [vmem:[%s10692_s6 + $0x20] sm:$0xff] }
 0x23f   :  { %v2405_v36 = vsel %vm2403_vm1, %v2402_v47, 0  ;;  %v2775_v47 = vsub.f32 %v9486_v26, %v9498_v15  ;;  %11729 = vst [vmem:[#allocation424_spill] sm:$0xff] %v9527_v24  ;;  %v9545_v16 = vand.u32 4294901760, %v9530_v25 }
 0x240   :  { %v9492_v12 = vand.u32 4294901760, %v2405_v36  ;;  %11730 = vst [vmem:[#allocation425_spill] sm:$0xff] %v9530_v25 }
 0x241   :  { %v9535_v46 = vand.u32 4294901760, %v2775_v47  ;;  %11733 = vst [vmem:[#allocation428_spill] sm:$0xff] %v9545_v16  ;;  %v2928_v47 = vsub.f32 %v9530_v25, %v9545_v16 }
 0x242   :  { %v9501_v5 = vsub.f32 %v2405_v36, %v9492_v12  ;;  %2461 = vmatmul.f32.vlgmr.msra.gmra.mxu3 %v9492_v12  ;;  %v9520_v36 = vand.u32 4294901760, %v138_v57 }
 0x243   :  { %2665 = vmatpush.msra.mxu3 %v9439_v55  ;;  %11731 = vst [vmem:[#allocation426_spill] sm:$0xff] %v9535_v46 }
 0x244   :  { %2487 = vmatmul.f32.vlgmr.msrb.gmra.mxu0 %v9501_v5  ;;  %v9514_v51 = vand.u32 4294901760, %v9501_v5  ;;  %11728 = vst [vmem:[#allocation423_spill] sm:$0xff] %v9520_v36  ;;  %v9538_v37 = vsub.f32 %v138_v57, %v9520_v36 }
 0x245   :  { %2667 = vmatpush.msra.mxu3 %v9446_v34  ;;  %2692 = vmatpush.msrb.mxu0 %v9454_v60 }
 0x246   :  { %2512 = vmatmul.f32.vlgmr.msrb.gmra.mxu1 %v9514_v51  ;;  %v2428_v62 = vsub.f32 %v9501_v5, %v9514_v51  ;;  %11732 = vst [vmem:[#allocation427_spill] sm:$0xff] %v9538_v37  ;;  %v9554_v57 = vand.u32 4294901760, %v9538_v37 }
 0x247   :  { %2696 = vmatpush.msrb.mxu0 %v9462_v22  ;;  %2717 = vmatpush.msrb.mxu1 %v9439_v55 }
 0x248   :  { %v9532_v60 = vand.u32 4294901760, %v2428_v62  ;;  %v146_v62 = vld [vmem:[%s10692_s6 + $0x58] sm:$0xff]  ;;  %11734 = vst [vmem:[#allocation429_spill] sm:$0xff] %v9554_v57 }
 0x249   :  { %2719 = vmatpush.msrb.mxu1 %v9446_v34 }
 0x24a   :  { %2430 = vmatmul.f32.vlgmr.msra.gmra.mxu2 %v9532_v60  ;;  %2562 = vmatmul.f32.vlgmr.msrb.gmra.mxu3 %v9492_v12 }
 0x24b   :  { %2640 = vmatpush.msra.mxu2 %v9449_v18  ;;  %2771 = vmatpush.msrb.mxu3 %v9527_v24  ;;  %v9564_v24 = vand.u32 4294901760, %v146_v62 }
 0x24c   :  { %2589 = vmatmul.f32.vlgmr.msra.gmra.mxu0 %v9532_v60 }
 0x24d   :  { %2643 = vmatpush.msra.mxu2 %v9457_v52  ;;  %2777 = vmatpush.msrb.mxu3 %v9535_v46  ;;  %11735 = vst [vmem:[#allocation430_spill] sm:$0xff] %v9564_v24  ;;  %v2934_v46 = vsub.f32 %v9538_v37, %v9554_v57  ;;  %v9570_v52 = vand.u32 4294901760, %v139_v38  ;;  %v9579_v18 = vsub.f32 %v146_v62, %v9564_v24 }
 0x24e   :  { %2620 = vmatmul.f32.vlgmr.msra.gmra.mxu1 %v9492_v12  ;;  %2799 = vmatpush.msra.mxu0 %v9483_v39  ;;  %v9576_v39 = vand.u32 4294901760, %v2928_v47  ;;  %v147_v47 = vld [vmem:[%s10692_s6 + $0x60] sm:$0xff] }
 0x24f   :  { %2824 = vmatpush.msra.mxu1 %v9478_v49  ;;  %11736 = vst [vmem:[#allocation431_spill] sm:$0xff] %v9570_v52  ;;  %v9587_v22 = vsub.f32 %v139_v38, %v9570_v52  ;;  %v9593_v62 = vand.u32 4294901760, %v9579_v18  ;;  %v140_v38 = vld [vmem:[%s10692_s6 + $0x28] sm:$0xff] }
 0x250   :  { %2802 = vmatpush.msra.mxu0 %v9486_v26  ;;  %11737 = vst [vmem:[#allocation432_spill] sm:$0xff] %v9576_v39  ;;  %v9584_v26 = vand.u32 4294901760, %v2934_v46 }
 0x251   :  { %2826 = vmatpush.msra.mxu1 %v9480_v33  ;;  %11738 = vst [vmem:[#allocation433_spill] sm:$0xff] %v9579_v18  ;;  %v9601_v46 = vand.u32 4294901760, %v9587_v22 }
 0x252   :  { %2539 = vmatmul.f32.vlgmr.msrb.gmra.mxu2 %v9492_v12  ;;  %2671 = vmatmul.f32.vlgmr.msra.gmra.mxu3 %v9514_v51  ;;  %11739 = vst [vmem:[#allocation434_spill] sm:$0xff] %v9584_v26 }
 0x253   :  { %2740 = vmatpush.msrb.mxu2 %v9478_v49  ;;  %2876 = vmatpush.msra.mxu3 %v9478_v49  ;;  %11740 = vst [vmem:[#allocation435_spill] sm:$0xff] %v9587_v22  ;;  %v9619_v49 = vand.u32 4294901760, %v140_v38 }
 0x254   :  { %2698 = vmatmul.f32.vlgmr.msrb.gmra.mxu0 %v9492_v12  ;;  %11741 = vst [vmem:[#allocation436_spill] sm:$0xff] %v9593_v62 }
 0x255   :  { %2742 = vmatpush.msrb.mxu2 %v9480_v33  ;;  %2878 = vmatpush.msra.mxu3 %v9480_v33  ;;  %11742 = vst [vmem:[#allocation437_spill] sm:$0xff] %v9601_v46  ;;  %v9612_v33 = vand.u32 4294901760, %v147_v47  ;;  %v9634_v55 = vsub.f32 %v140_v38, %v9619_v49 }
 0x256   :  { %2721 = vmatmul.f32.vlgmr.msrb.gmra.mxu1 %v9492_v12  ;;  %2899 = vmatpush.msrb.mxu0 %v9510_v54  ;;  %11744 = vst [vmem:[#allocation439_spill] sm:$0xff] %v9619_v49 }
 0x257   :  { %2930 = vmatpush.msrb.mxu1 %v9576_v39  ;;  %v3087_v39 = vsub.f32 %v9579_v18, %v9593_v62  ;;  %11743 = vst [vmem:[#allocation438_spill] sm:$0xff] %v9612_v33  ;;  %v9627_v34 = vsub.f32 %v147_v47, %v9612_v33  ;;  %v149_v47 = vld [vmem:[#allocation2] sm:$0x1]  ;;  %v9650_v38 = vand.u32 4294901760, %v9634_v55 }
 0x258   :  { %2901 = vmatpush.msrb.mxu0 %v9520_v36  ;;  %11748 = vst [vmem:[#allocation443_spill] sm:$0xff] %v9634_v55 }
 0x259   :  { %2936 = vmatpush.msrb.mxu1 %v9584_v26  ;;  %v3093_v26 = vsub.f32 %v9587_v22, %v9601_v46  ;;  %11746 = vst [vmem:[#allocation441_spill] sm:$0xff] %v9627_v34 }
 0x25a   :  { %2646 = vmatmul.f32.vlgmr.msra.gmra.mxu2 %v9501_v5  ;;  %2779 = vmatmul.f32.vlgmr.msrb.gmra.mxu3 %v9492_v12  ;;  %11750 = vst [vmem:[#allocation445_spill] sm:$0xff] %v9650_v38 }
 0x25b   :  { %2851 = vmatpush.msra.mxu2 %v9490_v19  ;;  %2983 = vmatpush.msrb.mxu3 %v9510_v54  ;;  %v9624_v19 = vand.u32 4294901760, %v3087_v39  ;;  %v9641_v39 = vand.u32 4294901760, %v9627_v34 }
 0x25c   :  { %2805 = vmatmul.f32.vlgmr.msra.gmra.mxu0 %v9501_v5 }
 0x25d   :  { %2855 = vmatpush.msra.mxu2 %v9498_v15  ;;  %2985 = vmatpush.msrb.mxu3 %v9520_v36  ;;  %11745 = vst [vmem:[#allocation440_spill] sm:$0xff] %v9624_v19  ;;  %v9631_v15 = vand.u32 4294901760, %v3093_v26  ;;  %v148_v26 = vld [vmem:[%s10692_s6 + $0x68] sm:$0xff] }
 0x25e   :  { %2830 = vmatmul.f32.vlgmr.msra.gmra.mxu1 %v9514_v51  ;;  %3010 = vmatpush.msra.mxu0 %v9545_v16  ;;  %11749 = vst [vmem:[#allocation444_spill] sm:$0xff] %v9641_v39 }
 0x25f   :  { %3035 = vmatpush.msra.mxu1 %v9510_v54  ;;  %11747 = vst [vmem:[#allocation442_spill] sm:$0xff] %v9631_v15  ;;  %v11853_v54 = vld [vmem:[#allocation115_spill] sm:$0xff] }
 0x260   :  { %3014 = vmatpush.msra.mxu0 %v9554_v57  ;;  %v3246_v57 = vsub.f32 %v9627_v34, %v9641_v39 }
 0x261   :  { %3037 = vmatpush.msra.mxu1 %v9520_v36  ;;  %v11851_v36 = vld [vmem:[#allocation135_spill] sm:$0xff] }
 0x262   :  { %2748 = vmatmul.f32.vlgmr.msrb.gmra.mxu2 %v9532_v60  ;;  %2880 = vmatmul.f32.vlgmr.msra.gmra.mxu3 %v9492_v12 }
 0x263   :  { %2958 = vmatpush.msrb.mxu2 %v9530_v25  ;;  %3089 = vmatpush.msra.mxu3 %v9624_v19  ;;  %v6922_v25 = vmul.f32 %v149_v47, %v149_v47  ;;  %v141_v19 = vld [vmem:[%s10692_s6 + $0x30] sm:$0xff]  ;;  %v3252_v47 = vsub.f32 %v9634_v55, %v9650_v38 }
 0x264   :  { %2907 = vmatmul.f32.vlgmr.msrb.gmra.mxu0 %v9532_v60 }
 0x265   :  { %2961 = vmatpush.msrb.mxu2 %v9538_v37  ;;  %3095 = vmatpush.msra.mxu3 %v9631_v15  ;;  %v9660_v37 = vand.u32 4294901760, %v148_v26  ;;  %v7146_v15 = vmov 0   ;;  %v6924_v16 = vperm.slane %v6922_v25, 0 }
 0x266   :  { %2938 = vmatmul.f32.vlgmr.msrb.gmra.mxu1 %v9492_v12  ;;  %3117 = vmatpush.msrb.mxu0 %v9579_v18  ;;  %v9666_v18 = vand.u32 4294901760, %v141_v19 }
 0x267   :  { %3142 = vmatpush.msrb.mxu1 %v9564_v24  ;;  %11751 = vst [vmem:[#allocation446_spill] sm:$0xff] %v9660_v37  ;;  %7104 = vset.pattern.permute.xlu0 %v7146_v15  ;;  %v9672_v15 = vand.u32 4294901760, %v3246_v57  ;;  %v9675_v25 = vsub.f32 %v148_v26, %v9660_v37  ;;  %v7105_v57 = vld [vmem:[#allocation2] ss:$0 sm:$0xff] }
 0x268   :  { %3120 = vmatpush.msrb.mxu0 %v9587_v22  ;;  %6926 = vperm.xlu0 %7104, %v6924_v16   ;;  %11752 = vst [vmem:[#allocation447_spill] sm:$0xff] %v9666_v18  ;;  %v9680_v16 = vand.u32 4294901760, %v3252_v47  ;;  %v9683_v22 = vsub.f32 %v141_v19, %v9666_v18 }
 0x269   :  { %3144 = vmatpush.msrb.mxu1 %v9570_v52  ;;  %11753 = vst [vmem:[#allocation448_spill] sm:$0xff] %v9672_v15  ;;  %v9689_v26 = vand.u32 4294901760, %v9675_v25 }
 0x26a   :  { %2857 = vmatmul.f32.vlgmr.msra.gmra.mxu2 %v9492_v12  ;;  %2989 = vmatmul.f32.vlgmr.msrb.gmra.mxu3 %v9514_v51  ;;  %11754 = vst [vmem:[#allocation449_spill] sm:$0xff] %v9675_v25  ;;  %v9694_v47 = vand.u32 4294901760, %v9683_v22 }
 0x26b   :  { %3058 = vmatpush.msra.mxu2 %v9564_v24  ;;  %3194 = vmatpush.msrb.mxu3 %v9564_v24  ;;  %11755 = vst [vmem:[#allocation450_spill] sm:$0xff] %v9680_v16  ;;  %v3405_v19 = vsub.f32 %v9675_v25, %v9689_v26  ;;  %v11849_v24 = vld [vmem:[#allocation68_spill] sm:$0xff] }
 0x26c   :  { %3016 = vmatmul.f32.vlgmr.msra.gmra.mxu0 %v9492_v12  ;;  %11756 = vst [vmem:[#allocation451_spill] sm:$0xff] %v9683_v22 }
 0x26d   :  { %3060 = vmatpush.msra.mxu2 %v9570_v52  ;;  %3196 = vmatpush.msrb.mxu3 %v9570_v52  ;;  %11757 = vst [vmem:[#allocation452_spill] sm:$0xff] %v9689_v26  ;;  %v11848_v52 = vld [vmem:[#allocation134_spill] sm:$0xff] }
 0x26e   :  { %3039 = vmatmul.f32.vlgmr.msra.gmra.mxu1 %v9492_v12  ;;  %3217 = vmatpush.msra.mxu0 %v9612_v33  ;;  %11758 = vst [vmem:[#allocation453_spill] sm:$0xff] %v9694_v47 }
 0x26f   :  { %3248 = vmatpush.msra.mxu1 %v9672_v15  ;;  %v11812_v15 = vld [vmem:[#allocation65_spill] sm:$0xff] }
 0x270   :  { %3219 = vmatpush.msra.mxu0 %v9619_v49  ;;  %6917 = vperm.xlu0 %7104, %v7105_v57   ;;  %v3411_v57 = vsub.f32 %v9683_v22, %v9694_v47 }
 0x271   :  { %3254 = vmatpush.msra.mxu1 %v9680_v16 }
 0x272   :  { %2964 = vmatmul.f32.vlgmr.msrb.gmra.mxu2 %v9501_v5  ;;  %3097 = vmatmul.f32.vlgmr.msra.gmra.mxu3 %v9492_v12  ;;  %v9714_v16 = vand.u32 4294901760, %v3411_v57  ;;  %v11762_v57 = vld [vmem:[#allocation30_spill] sm:$0xff] }
 0x273   :  { %3169 = vmatpush.msrb.mxu2 %v9593_v62  ;;  %3301 = vmatpush.msra.mxu3 %v9612_v33  ;;  %v9710_v62 = vand.u32 4294901760, %v3405_v19  ;;  %v11761_v19 = vld [vmem:[#allocation7_spill] sm:$0xff] }
 0x274   :  { %3123 = vmatmul.f32.vlgmr.msrb.gmra.mxu0 %v9501_v5  ;;  %11760 = vst [vmem:[#allocation455_spill] sm:$0xff] %v9714_v16 }
 0x275   :  { %3173 = vmatpush.msrb.mxu2 %v9601_v46  ;;  %3303 = vmatpush.msra.mxu3 %v9619_v49  ;;  %11759 = vst [vmem:[#allocation454_spill] sm:$0xff] %v9710_v62  ;;  %v11799_v46 = vld [vmem:[#allocation95_spill] sm:$0xff] }
 0x276   :  { %3148 = vmatmul.f32.vlgmr.msrb.gmra.mxu1 %v9514_v51  ;;  %3328 = vmatpush.msrb.mxu0 %v9641_v39  ;;  %v11796_v39 = vld [vmem:[#allocation90_spill] sm:$0xff] }
 0x277   :  { %3353 = vmatpush.msrb.mxu1 %v9612_v33  ;;  %v11843_v33 = vld [vmem:[#allocation58_spill] sm:$0xff] }
 0x278   :  { %3332 = vmatpush.msrb.mxu0 %v9650_v38  ;;  %v11793_v38 = vld [vmem:[#allocation85_spill] sm:$0xff] }
 0x279   :  { %3355 = vmatpush.msrb.mxu1 %v9619_v49  ;;  %v11807_v49 = vld [vmem:[#allocation59_spill] sm:$0xff] }
 0x27a   :  { %3066 = vmatmul.f32.vlgmr.msra.gmra.mxu2 %v9532_v60  ;;  %3198 = vmatmul.f32.vlgmr.msrb.gmra.mxu3 %v9492_v12 }
 0x27b   :  { %3276 = vmatpush.msra.mxu2 %v9627_v34  ;;  %3407 = vmatpush.msrb.mxu3 %v9710_v62  ;;  %v11784_v62 = vld [vmem:[#allocation70_spill] sm:$0xff]  ;;  %v11787_v34 = vld [vmem:[#allocation77_spill] sm:$0xff] }
 0x27c   :  { %3225 = vmatmul.f32.vlgmr.msra.gmra.mxu0 %v9532_v60 }
 0x27d   :  { %3279 = vmatpush.msra.mxu2 %v9634_v55  ;;  %3413 = vmatpush.msrb.mxu3 %v9714_v16  ;;  %v11777_v16 = vld [vmem:[#allocation15_spill] sm:$0xff]  ;;  %v11780_v55 = vld [vmem:[#allocation17_spill] sm:$0xff] }
 0x27e   :  { %3256 = vmatmul.f32.vlgmr.msra.gmra.mxu1 %v9492_v12  ;;  %3435 = vmatpush.msra.mxu0 %v9675_v25  ;;  %v11764_v25 = vld [vmem:[#allocation31_spill] sm:$0xff] }
 0x27f   :  { %3460 = vmatpush.msra.mxu1 %v9660_v37 }
 0x280   :  { %3438 = vmatpush.msra.mxu0 %v9683_v22  ;;  %v11763_v22 = vld [vmem:[#allocation8_spill] sm:$0xff] }
 0x281   :  { %3462 = vmatpush.msra.mxu1 %v9666_v18 }
 0x282   :  { %3175 = vmatmul.f32.vlgmr.msrb.gmra.mxu2 %v9492_v12  ;;  %3307 = vmatmul.f32.vlgmr.msra.gmra.mxu3 %v9514_v51 }
 0x283   :  { %3376 = vmatpush.msrb.mxu2 %v9660_v37  ;;  %3512 = vmatpush.msra.mxu3 %v9660_v37  ;;  %v11765_v37 = vld [vmem:[#allocation34_spill] sm:$0xff] }
 0x284   :  { %3334 = vmatmul.f32.vlgmr.msrb.gmra.mxu0 %v9492_v12 }
 0x285   :  { %3378 = vmatpush.msrb.mxu2 %v9666_v18  ;;  %3514 = vmatpush.msra.mxu3 %v9666_v18  ;;  %v11766_v18 = vld [vmem:[#allocation37_spill] sm:$0xff] }
 0x286   :  { %3357 = vmatmul.f32.vlgmr.msrb.gmra.mxu1 %v9492_v12  ;;  %3567 = vmatpush.msrb.mxu0 %v11761_v19 }
 0x287   :  { %3612 = vmatpush.msrb.mxu1 %v11762_v57  ;;  %v11768_v57 = vld [vmem:[#allocation9_spill] sm:$0xff] }
 0x288   :  { %3569 = vmatpush.msrb.mxu0 %v11763_v22 }
 0x289   :  { %3618 = vmatpush.msrb.mxu1 %v11764_v25  ;;  %v11767_v25 = vld [vmem:[#allocation43_spill] sm:$0xff] }
 0x28a   :  { %3282 = vmatmul.f32.vlgmr.msra.gmra.mxu2 %v9501_v5  ;;  %3415 = vmatmul.f32.vlgmr.msrb.gmra.mxu3 %v9492_v12 }
 0x28b   :  { %3487 = vmatpush.msra.mxu2 %v9689_v26  ;;  %3624 = vmatpush.msrb.mxu1 %v11765_v37  ;;  %v11769_v26 = vld [vmem:[#allocation46_spill] sm:$0xff] }
 0x28c   :  { %3441 = vmatmul.f32.vlgmr.msra.gmra.mxu0 %v9501_v5  ;;  %3763 = vmatpush.msrb.mxu3 %v11761_v19  ;;  %v11770_v37 = vld [vmem:[#allocation10_spill] sm:$0xff]  ;;  %v11771_v5 = vld [vmem:[#allocation13_spill] sm:$0xff] }
 0x28d   :  { %3491 = vmatpush.msra.mxu2 %v9694_v47  ;;  %3630 = vmatpush.msrb.mxu1 %v11766_v18  ;;  %v11772_v18 = vld [vmem:[#allocation52_spill] sm:$0xff]  ;;  %v11775_v47 = vld [vmem:[#allocation57_spill] sm:$0xff] }
 0x28e   :  { %3466 = vmatmul.f32.vlgmr.msra.gmra.mxu1 %v9514_v51  ;;  %3765 = vmatpush.msrb.mxu3 %v11763_v22  ;;  %v11773_v51 = vld [vmem:[#allocation11_spill] sm:$0xff] }
 0x28f   :  { %3636 = vmatpush.msrb.mxu1 %v11767_v25  ;;  %3571 = vmatpush.msrb.mxu0 %v11768_v57  ;;  %v11774_v25 = vld [vmem:[#allocation14_spill] sm:$0xff] }
 0x290   :  { %3767 = vmatpush.msrb.mxu3 %v11768_v57 }
 0x291   :  { %3642 = vmatpush.msrb.mxu1 %v11769_v26  ;;  %3573 = vmatpush.msrb.mxu0 %v11770_v37  ;;  %v11776_v26 = vld [vmem:[#allocation12_spill] sm:$0xff] }
 0x292   :  { %3384 = vmatmul.f32.vlgmr.msrb.gmra.mxu2 %v9532_v60  ;;  %3516 = vmatmul.f32.vlgmr.msra.gmra.mxu3 %v9492_v12  ;;  %v11778_v60 = vld [vmem:[#allocation61_spill] sm:$0xff] }
 0x293   :  { %3710 = vmatpush.msrb.mxu2 %v11771_v5  ;;  %3769 = vmatpush.msrb.mxu3 %v11770_v37  ;;  %v11779_v5 = vld [vmem:[#allocation16_spill] sm:$0xff] }
 0x294   :  { %3648 = vmatpush.msrb.mxu1 %v11772_v18  ;;  %3575 = vmatpush.msrb.mxu0 %v11773_v51  ;;  %v11781_v18 = vld [vmem:[#allocation67_spill] sm:$0xff] }
 0x295   :  { %3713 = vmatpush.msrb.mxu2 %v11774_v25  ;;  %3771 = vmatpush.msrb.mxu3 %v11773_v51  ;;  %v11782_v25 = vld [vmem:[#allocation18_spill] sm:$0xff] }
 0x296   :  { %3654 = vmatpush.msrb.mxu1 %v11775_v47  ;;  %3577 = vmatpush.msrb.mxu0 %v11776_v26  ;;  %v11783_v47 = vld [vmem:[#allocation23_spill] sm:$0xff] }
 0x297   :  { %3716 = vmatpush.msrb.mxu2 %v11777_v16  ;;  %3773 = vmatpush.msrb.mxu3 %v11776_v26  ;;  %v11785_v16 = vld [vmem:[#allocation19_spill] sm:$0xff] }
 0x298   :  { %3660 = vmatpush.msrb.mxu1 %v11778_v60  ;;  %3579 = vmatpush.msrb.mxu0 %v11779_v5  ;;  %v11786_v60 = vld [vmem:[#allocation25_spill] sm:$0xff] }
 0x299   :  { %3719 = vmatpush.msrb.mxu2 %v11780_v55  ;;  %3775 = vmatpush.msrb.mxu3 %v11779_v5  ;;  %v11788_v55 = vld [vmem:[#allocation26_spill] sm:$0xff] }
 0x29a   :  { %3493 = vmatmul.f32.vlgmr.msra.gmra.mxu2 %v9492_v12  ;;  %3666 = vmatpush.msrb.mxu1 %v11781_v18  ;;  %v11789_v12 = vld [vmem:[#allocation28_spill] sm:$0xff]  ;;  %v11790_v18 = vld [vmem:[#allocation81_spill] sm:$0xff] }
 0x29b   :  { %3722 = vmatpush.msrb.mxu2 %v11782_v25  ;;  %3777 = vmatpush.msrb.mxu3 %v11783_v47  ;;  %v11791_v25 = vld [vmem:[#allocation32_spill] sm:$0xff] }
 0x29c   :  { %3672 = vmatpush.msrb.mxu1 %v11784_v62  ;;  %3581 = vmatpush.msrb.mxu0 %v11783_v47  ;;  %v11792_v62 = vld [vmem:[#allocation33_spill] sm:$0xff] }
 0x29d   :  { %3725 = vmatpush.msrb.mxu2 %v11785_v16  ;;  %3779 = vmatpush.msrb.mxu3 %v11786_v60  ;;  %v11794_v16 = vld [vmem:[#allocation36_spill] sm:$0xff] }
 0x29e   :  { %3678 = vmatpush.msrb.mxu1 %v11787_v34  ;;  %3583 = vmatpush.msrb.mxu0 %v11786_v60  ;;  %v11795_v34 = vld [vmem:[#allocation38_spill] sm:$0xff] }
 0x29f   :  { %3728 = vmatpush.msrb.mxu2 %v11788_v55  ;;  %3781 = vmatpush.msrb.mxu3 %v11789_v12  ;;  %v11797_v55 = vld [vmem:[#allocation40_spill] sm:$0xff] }
 0x2a0   :  { %3684 = vmatpush.msrb.mxu1 %v11790_v18  ;;  %3585 = vmatpush.msrb.mxu0 %v11789_v12  ;;  %v11798_v18 = vld [vmem:[#allocation44_spill] sm:$0xff] }
 0x2a1   :  { %3731 = vmatpush.msrb.mxu2 %v11791_v25  ;;  %3783 = vmatpush.msrb.mxu3 %v11792_v62  ;;  %v11800_v25 = vld [vmem:[#allocation41_spill] sm:$0xff] }
 0x2a2   :  { %3690 = vmatpush.msrb.mxu1 %v11793_v38  ;;  %3587 = vmatpush.msrb.mxu0 %v11792_v62  ;;  %v11801_v38 = vld [vmem:[#allocation47_spill] sm:$0xff] }
 0x2a3   :  { %3734 = vmatpush.msrb.mxu2 %v11794_v16  ;;  %3785 = vmatpush.msrb.mxu3 %v11795_v34  ;;  %v11802_v16 = vld [vmem:[#allocation49_spill] sm:$0xff] }
 0x2a4   :  { %3696 = vmatpush.msrb.mxu1 %v11796_v39  ;;  %3589 = vmatpush.msrb.mxu0 %v11795_v34  ;;  %v11803_v39 = vld [vmem:[#allocation53_spill] sm:$0xff] }
 0x2a5   :  { %3737 = vmatpush.msrb.mxu2 %v11797_v55  ;;  %3787 = vmatpush.msrb.mxu3 %v11798_v18  ;;  %v11804_v55 = vld [vmem:[#allocation54_spill] sm:$0xff] }
 0x2a6   :  { %3702 = vmatpush.msrb.mxu1 %v11799_v46  ;;  %3591 = vmatpush.msrb.mxu0 %v11798_v18  ;;  %v11805_v46 = vld [vmem:[#allocation55_spill] sm:$0xff] }
 0x2a7   :  { %3740 = vmatpush.msrb.mxu2 %v11800_v25  ;;  %3789 = vmatpush.msrb.mxu3 %v11801_v38  ;;  %v11806_v25 = vld [vmem:[#allocation88_spill] sm:$0xff] }
 0x2a8   :  { %3871 = vmatpush.msra.mxu1 %v11761_v19  ;;  %3593 = vmatpush.msrb.mxu0 %v11801_v38  ;;  %v11808_v19 = vld [vmem:[#allocation93_spill] sm:$0xff] }
 0x2a9   :  { %3743 = vmatpush.msrb.mxu2 %v11802_v16  ;;  %3791 = vmatpush.msrb.mxu3 %v11803_v39  ;;  %v11809_v16 = vld [vmem:[#allocation63_spill] sm:$0xff] }
 0x2aa   :  { %3873 = vmatpush.msra.mxu1 %v11763_v22  ;;  %3595 = vmatpush.msrb.mxu0 %v11803_v39  ;;  %v11810_v22 = vld [vmem:[#allocation20_spill] sm:$0xff] }
 0x2ab   :  { %3746 = vmatpush.msrb.mxu2 %v11804_v55  ;;  %3793 = vmatpush.msrb.mxu3 %v11805_v46  ;;  %v11811_v55 = vld [vmem:[#allocation99_spill] sm:$0xff] }
 0x2ac   :  { %3875 = vmatpush.msra.mxu1 %v11768_v57  ;;  %3597 = vmatpush.msrb.mxu0 %v11805_v46  ;;  %v11813_v57 = vld [vmem:[#allocation21_spill] sm:$0xff] }
 0x2ad   :  { %3953 = vmatpush.msra.mxu3 %v11806_v25  ;;  %3749 = vmatpush.msrb.mxu2 %v11807_v49  ;;  %v11814_v25 = vld [vmem:[#allocation51_spill] sm:$0xff] }
 0x2ae   :  { %3877 = vmatpush.msra.mxu1 %v11770_v37  ;;  %3804 = vmatpush.msra.mxu0 %v11810_v22  ;;  %v11815_v49 = vld [vmem:[#allocation103_spill] sm:$0xff]  ;;  %v11816_v37 = vld [vmem:[#allocation22_spill] sm:$0xff]  ;;  %v11820_v22 = vld [vmem:[#allocation64_spill] sm:$0xff] }
 0x2af   :  { %3959 = vmatpush.msra.mxu3 %v11808_v19  ;;  %3752 = vmatpush.msrb.mxu2 %v11809_v16  ;;  %v11817_v19 = vld [vmem:[#allocation56_spill] sm:$0xff]  ;;  %v11818_v16 = vld [vmem:[#allocation106_spill] sm:$0xff] }
 0x2b0   :  { %3879 = vmatpush.msra.mxu1 %v11773_v51  ;;  %3808 = vmatpush.msra.mxu0 %v11813_v57  ;;  %v11819_v51 = vld [vmem:[#allocation24_spill] sm:$0xff]  ;;  %v11824_v57 = vld [vmem:[#allocation113_spill] sm:$0xff] }
 0x2b1   :  { %3965 = vmatpush.msra.mxu3 %v11811_v55  ;;  %3755 = vmatpush.msrb.mxu2 %v11812_v15  ;;  %v11821_v15 = vld [vmem:[#allocation110_spill] sm:$0xff]  ;;  %v11822_v55 = vld [vmem:[#allocation27_spill] sm:$0xff] }
 0x2b2   :  { %3881 = vmatpush.msra.mxu1 %v11776_v26  ;;  %3812 = vmatpush.msra.mxu0 %v11816_v37  ;;  %v11823_v26 = vld [vmem:[#allocation69_spill] sm:$0xff] }
 0x2b3   :  { %3908 = vmatpush.msra.mxu2 %v11814_v25  ;;  %3971 = vmatpush.msra.mxu3 %v11815_v49  ;;  %v11825_v49 = vld [vmem:[#allocation29_spill] sm:$0xff] }
 0x2b4   :  { %3883 = vmatpush.msra.mxu1 %v11779_v5  ;;  %3816 = vmatpush.msra.mxu0 %v11819_v51  ;;  %v11826_v5 = vld [vmem:[#allocation74_spill] sm:$0xff]  ;;  %v11827_v37 = vld [vmem:[#allocation117_spill] sm:$0xff]  ;;  %v11830_v51 = vld [vmem:[#allocation120_spill] sm:$0xff] }
 0x2b5   :  { %3910 = vmatpush.msra.mxu2 %v11817_v19  ;;  %3977 = vmatpush.msra.mxu3 %v11818_v16  ;;  %v11828_v16 = vld [vmem:[#allocation35_spill] sm:$0xff] }
 0x2b6   :  { %3885 = vmatpush.msra.mxu1 %v11783_v47  ;;  %3820 = vmatpush.msra.mxu0 %v11822_v55  ;;  %v11829_v47 = vld [vmem:[#allocation79_spill] sm:$0xff]  ;;  %v11833_v55 = vld [vmem:[#allocation124_spill] sm:$0xff] }
 0x2b7   :  { %3912 = vmatpush.msra.mxu2 %v11820_v22  ;;  %3983 = vmatpush.msra.mxu3 %v11821_v15  ;;  %v11831_v15 = vld [vmem:[#allocation39_spill] sm:$0xff] }
 0x2b8   :  { %3887 = vmatpush.msra.mxu1 %v11786_v60  ;;  %3824 = vmatpush.msra.mxu0 %v11825_v49  ;;  %v11832_v60 = vld [vmem:[#allocation80_spill] sm:$0xff] }
 0x2b9   :  { %3914 = vmatpush.msra.mxu2 %v11823_v26  ;;  %3989 = vmatpush.msra.mxu3 %v11824_v57  ;;  %v11834_v57 = vld [vmem:[#allocation45_spill] sm:$0xff] }
 0x2ba   :  { %3889 = vmatpush.msra.mxu1 %v11789_v12  ;;  %3828 = vmatpush.msra.mxu0 %v11828_v16  ;;  %v11835_v12 = vld [vmem:[#allocation84_spill] sm:$0xff] }
 0x2bb   :  { %3916 = vmatpush.msra.mxu2 %v11826_v5  ;;  %3995 = vmatpush.msra.mxu3 %v11827_v37  ;;  %v11836_v37 = vld [vmem:[#allocation126_spill] sm:$0xff]  ;;  %v11838_v16 = vld [vmem:[#allocation92_spill] sm:$0xff] }
 0x2bc   :  { %3891 = vmatpush.msra.mxu1 %v11792_v62  ;;  %3832 = vmatpush.msra.mxu0 %v11831_v15  ;;  %v11837_v62 = vld [vmem:[#allocation48_spill] sm:$0xff]  ;;  %v11839_v15 = vld [vmem:[#allocation129_spill] sm:$0xff] }
 0x2bd   :  { %3918 = vmatpush.msra.mxu2 %v11829_v47  ;;  %4001 = vmatpush.msra.mxu3 %v11830_v51 }
 0x2be   :  { %3893 = vmatpush.msra.mxu1 %v11795_v34  ;;  %3836 = vmatpush.msra.mxu0 %v11834_v57  ;;  %v11840_v34 = vld [vmem:[#allocation50_spill] sm:$0xff] }
 0x2bf   :  { %3920 = vmatpush.msra.mxu2 %v11832_v60  ;;  %4007 = vmatpush.msra.mxu3 %v11833_v55  ;;  %v11841_v55 = vld [vmem:[#allocation97_spill] sm:$0xff] }
 0x2c0   :  { %3895 = vmatpush.msra.mxu1 %v11798_v18  ;;  %3840 = vmatpush.msra.mxu0 %v11837_v62  ;;  %v11842_v18 = vld [vmem:[#allocation131_spill] sm:$0xff]  ;;  %v11845_v62 = vld [vmem:[#allocation133_spill] sm:$0xff] }
 0x2c1   :  { %3922 = vmatpush.msra.mxu2 %v11835_v12  ;;  %v2488_v49 = vpop.f32.mrf.mxu0  ;;  %4013 = vmatpush.msra.mxu3 %v11836_v37  ;;  %v11844_v37 = vld [vmem:[#allocation101_spill] sm:$0xff] }
 0x2c2   :  { %3897 = vmatpush.msra.mxu1 %v11801_v38  ;;  %3844 = vmatpush.msra.mxu0 %v11840_v34  ;;  %v11846_v38 = vld [vmem:[#allocation62_spill] sm:$0xff] }
 0x2c3   :  { %3924 = vmatpush.msra.mxu2 %v11838_v16  ;;  %v2513_v51 = vpop.f32.mrf.mxu1  ;;  %4019 = vmatpush.msra.mxu3 %v11839_v15  ;;  %v11847_v15 = vld [vmem:[#allocation105_spill] sm:$0xff] }
 0x2c4   :  { %3899 = vmatpush.msra.mxu1 %v11803_v39  ;;  %3848 = vmatpush.msra.mxu0 %v11843_v33  ;;  %v11850_v39 = vld [vmem:[#allocation109_spill] sm:$0xff]  ;;  %v11852_v33 = vld [vmem:[#allocation72_spill] sm:$0xff] }
 0x2c5   :  { %3926 = vmatpush.msra.mxu2 %v11841_v55  ;;  %v2462_v57 = vpop.f32.mrf.mxu3  ;;  %4025 = vmatpush.msra.mxu3 %v11842_v18 }
 0x2c6   :  { %3901 = vmatpush.msra.mxu1 %v11805_v46  ;;  %3852 = vmatpush.msra.mxu0 %v11846_v38  ;;  %v11855_v38 = vld [vmem:[#allocation119_spill] sm:$0xff] }
 0x2c7   :  { %3928 = vmatpush.msra.mxu2 %v11844_v37  ;;  %4031 = vmatpush.msra.mxu3 %v11845_v62 }
 0x2c8   :  { %3856 = vmatpush.msra.mxu0 %v11849_v24 }
 0x2c9   :  { %3930 = vmatpush.msra.mxu2 %v11847_v15  ;;  %v2590_v34 = vpop.f32.mrf.mxu0  ;;  %4037 = vmatpush.msra.mxu3 %v11848_v52 }
 0x2ca   :  { %3860 = vmatpush.msra.mxu0 %v11852_v33 }
 0x2cb   :  { %3932 = vmatpush.msra.mxu2 %v11850_v39  ;;  %v2621_v18 = vpop.f32.mrf.mxu1  ;;  %4043 = vmatpush.msra.mxu3 %v11851_v36 }
 0x2cc   :  { %3864 = vmatpush.msra.mxu0 %v11854_v58  ;;  %v2622_v40 = vadd.f32 %v2621_v18, %v2590_v34 }
 0x2cd   :  { %3934 = vmatpush.msra.mxu2 %v11853_v54  ;;  %v2431_v46 = vpop.f32.mrf.mxu2  ;;  %v2563_v62 = vpop.f32.mrf.mxu3 }
 0x2ce   :  { %v2463_v20 = vadd.f32 %v2462_v57, %v2431_v46 }
 0x2cf   :  { %3936 = vmatpush.msra.mxu2 %v11855_v38 }
 0x2d0   :  { %v2489_v11 = vadd.f32 %v2488_v49, %v2463_v20 }
 0x2d1   :  { %3938 = vmatpush.msra.mxu2 %v11856_v10  ;;  %v2699_v52 = vpop.f32.mrf.mxu0 }
 0x2d2   :  { %v2514_v9 = vadd.f32 %v2513_v51, %v2489_v11 }
 0x2d3   :  { %v2722_v13 = vpop.f32.mrf.mxu1 }
 0x2d5   :  { %v2540_v24 = vpop.f32.mrf.mxu2  ;;  %v2672_v28 = vpop.f32.mrf.mxu3 }
 0x2d9   :  { %v2806_v32 = vpop.f32.mrf.mxu0 }
 0x2db   :  { %v2831_v36 = vpop.f32.mrf.mxu1 }
 0x2dd   :  { %v2647_v2 = vpop.f32.mrf.mxu2  ;;  %v2780_v4 = vpop.f32.mrf.mxu3 }
 0x2de   :  { %v2648_v48 = vadd.f32 %v2647_v2, %v2622_v40  ;;  %v2541_v2 = vadd.f32 %v2540_v24, %v2514_v9 }
 0x2e0   :  { %v2673_v6 = vadd.f32 %v2672_v28, %v2648_v48  ;;  %v2564_v20 = vadd.f32 %v2563_v62, %v2541_v2 }
 0x2e1   :  { %v2908_v59 = vpop.f32.mrf.mxu0 }
 0x2e2   :  { %v2700_v21 = vadd.f32 %v2699_v52, %v2673_v6 }
 0x2e3   :  { %v2939_v42 = vpop.f32.mrf.mxu1 }
 0x2e4   :  { %v2940_v14 = vadd.f32 %v2939_v42, %v2908_v59  ;;  %v2723_v23 = vadd.f32 %v2722_v13, %v2700_v21 }
 0x2e5   :  { %v2749_v33 = vpop.f32.mrf.mxu2  ;;  %v2881_v31 = vpop.f32.mrf.mxu3 }
 0x2e6   :  { %v2781_v56 = vadd.f32 %v2780_v4, %v2749_v33  ;;  %v3527_v33 = vrot.slane %v2723_v23, 6 }
 0x2e8   :  { %v2807_v61 = vadd.f32 %v2806_v32, %v2781_v56 }
 0x2e9   :  { %v3017_v53 = vpop.f32.mrf.mxu0 }
 0x2ea   :  { %v2832_v0 = vadd.f32 %v2831_v36, %v2807_v61 }
 0x2eb   :  { %v3040_v1 = vpop.f32.mrf.mxu1 }
 0x2ed   :  { %v2858_v58 = vpop.f32.mrf.mxu2  ;;  %v2990_v50 = vpop.f32.mrf.mxu3 }
 0x2ee   :  { %v2859_v8 = vadd.f32 %v2858_v58, %v2832_v0  ;;  %v11857_v0 = vld [vmem:[#allocation42_spill] sm:$0xff] }
 0x2f0   :  { %v2882_v4 = vadd.f32 %v2881_v31, %v2859_v8 }
 0x2f1   :  { %v3124_v40 = vpop.f32.mrf.mxu0 }
 0x2f2   :  { %v3528_v59 = vrot.slane %v2882_v4, 4 }
 0x2f3   :  { %v3149_v28 = vpop.f32.mrf.mxu1 }
 0x2f5   :  { %v2965_v35 = vpop.f32.mrf.mxu2  ;;  %v3098_v63 = vpop.f32.mrf.mxu3 }
 0x2f6   :  { %v2966_v27 = vadd.f32 %v2965_v35, %v2940_v14  ;;  %v3533_v14 = vsel %vm3532_vm2, %v2564_v20, %v3527_v33 }
 0x2f8   :  { %v2991_v34 = vadd.f32 %v2990_v50, %v2966_v27 }
 0x2f9   :  { %v3226_v23 = vpop.f32.mrf.mxu0 }
 0x2fa   :  { %v3018_v18 = vadd.f32 %v3017_v53, %v2991_v34  ;;  %v11858_v34 = vld [vmem:[#allocation71_spill] sm:$0xff] }
 0x2fc   :  { %v3041_v57 = vadd.f32 %v3040_v1, %v3018_v18  ;;  %v3257_v1 = vpop.f32.mrf.mxu1  ;;  %v11859_v18 = vld [vmem:[#allocation76_spill] sm:$0xff] }
 0x2fd   :  { %v3067_v56 = vpop.f32.mrf.mxu2  ;;  %v9875_v21 = vpop.f32.mrf.mxu3  ;;  %v3258_v48 = vadd.f32 %v3257_v1, %v3226_v23 }
 0x2fe   :  { %v3529_v61 = vrot.slane %v3041_v57, 2  ;;  %v3099_v36 = vadd.f32 %v3098_v63, %v3067_v56 }
 0x300   :  { %v3535_v11 = vsel %vm3534_vm3, %v3528_v59, %v3529_v61  ;;  %v3125_v20 = vadd.f32 %v3124_v40, %v3099_v36 }
 0x301   :  { %v3537_v9 = vsel %vm3536_vm4, %v3533_v14, %v3535_v11  ;;  %v3335_v6 = vpop.f32.mrf.mxu0  ;;  %v11860_v14 = vld [vmem:[#allocation82_spill] sm:$0xff] }
 0x302   :  { %v9879_v27 = vsub.f32 %v11857_v0, %v3537_v9  ;;  %v11861_v9 = vld [vmem:[#allocation60_spill] sm:$0xff]  ;;  %v3150_v40 = vadd.f32 %v3149_v28, %v3125_v20 }
 0x303   :  { %v11882_v20 = vld [vmem:[#allocation108_spill] sm:$0xff] }
 0x304   :  { %v3544_v53 = vmul.f32 %v9879_v27, %v9879_v27  ;;  %v3358_v62 = vpop.f32.mrf.mxu1 }
 0x305   :  { %v3176_v35 = vpop.f32.mrf.mxu2  ;;  %v3308_v42 = vpop.f32.mrf.mxu3 }
 0x306   :  { %3548 = vst [vmem:[#allocation1] ss:$4 sm:$0xff] %v3544_v53 }
 0x309   :  { %v3442_v59 = vpop.f32.mrf.mxu0 }
 0x30c   :  { %v3467_v53 = vpop.f32.mrf.mxu1 }
 0x30d   :  { %v3283_v50 = vpop.f32.mrf.mxu2  ;;  %v3551_v31 = vld.sshfl [vmem:[#allocation1] sm:$0xff pattern:$0x73625140]  ;;  %v3552_v32 = vld.sshfl [vmem:[#allocation1 + $0x8] sm:$0xff pattern:$0x73625140]  ;;  %v3416_v4 = vpop.f32.mrf.mxu3 }
 0x30e   :  { %v9883_v13 = vand.u32 4294901760, %v3551_v31  ;;  %v9885_v8 = vand.u32 4294901760, %v3552_v32  ;;  %v3284_v49 = vadd.f32 %v3283_v50, %v3258_v48  ;;  %v3177_v48 = vadd.f32 %v3176_v35, %v3150_v40  ;;  %v11867_v35 = vld [vmem:[#allocation78_spill] sm:$0xff]  ;;  %v11897_v40 = vld [vmem:[#allocation144_spill] sm:$0xff] }
 0x310   :  { %3704 = vmatmul.f32.vlgmr.msrb.gmra.mxu1 %v9883_v13  ;;  %v3599_v51 = vsub.f32 %v3551_v31, %v9883_v13  ;;  %v9890_v46 = vsub.f32 %v3552_v32, %v9885_v8  ;;  %v3309_v58 = vadd.f32 %v3308_v42, %v3284_v49  ;;  %v11863_v42 = vld [vmem:[#allocation66_spill] sm:$0xff]  ;;  %v11865_v31 = vld [vmem:[#allocation73_spill] sm:$0xff] }
 0x311   :  { %4104 = vmatpush.msrb.mxu1 %v11814_v25 }
 0x312   :  { %3758 = vmatmul.f32.vlgmr.msrb.gmra.mxu2 %v3599_v51  ;;  %v3600_v52 = vand.u32 4294901760, %v3599_v51  ;;  %v3941_v24 = vand.u32 4294901760, %v9890_v46  ;;  %v3336_v61 = vadd.f32 %v3335_v6, %v3309_v58  ;;  %v11864_v6 = vld [vmem:[#allocation91_spill] sm:$0xff] }
 0x313   :  { %4106 = vmatpush.msrb.mxu1 %v11817_v19  ;;  %4145 = vmatpush.msrb.mxu2 %v11858_v34  ;;  %v11869_v58 = vld [vmem:[#allocation83_spill] sm:$0xff]  ;;  %v11870_v34 = vld [vmem:[#allocation102_spill] sm:$0xff] }
 0x314   :  { %3797 = vmatmul.f32.vlgmr.msrb.gmra.mxu3 %v3600_v52  ;;  %v3601_v2 = vsub.f32 %v3599_v51, %v3600_v52  ;;  %v3942_v57 = vsub.f32 %v9890_v46, %v3941_v24  ;;  %v3359_v1 = vadd.f32 %v3358_v62, %v3336_v61  ;;  %v3200_v62 = vadd.f32 %v9875_v21, %v3177_v48  ;;  %v11871_v21 = vld [vmem:[#allocation264_spill] sm:$0xff]  ;;  %v11887_v61 = vld [vmem:[#allocation155_spill] sm:$0xff] }
 0x315   :  { %4108 = vmatpush.msrb.mxu1 %v11820_v22  ;;  %4149 = vmatpush.msrb.mxu2 %v11859_v18  ;;  %v3385_v33 = vpop.f32.mrf.mxu2  ;;  %v3517_v49 = vpop.f32.mrf.mxu3  ;;  %v11874_v18 = vld [vmem:[#allocation89_spill] sm:$0xff]  ;;  %v11904_v48 = vld [vmem:[#allocation148_spill] sm:$0xff] }
 0x316   :  { %4212 = vmatpush.msrb.mxu3 %v11814_v25  ;;  %v3417_v63 = vadd.f32 %v3416_v4, %v3385_v33  ;;  %v3602_v56 = vand.u32 4294901760, %v3601_v2  ;;  %v3943_v23 = vand.u32 4294901760, %v3942_v57  ;;  %v11862_v25 = vld [vmem:[#allocation86_spill] sm:$0xff]  ;;  %v3530_v32 = vrot.slane %v3359_v1, 6  ;;  %v11872_v4 = vld [vmem:[#allocation87_spill] sm:$0xff]  ;;  %v11899_v1 = vld [vmem:[#allocation128_spill] sm:$0xff] }
 0x317   :  { %4110 = vmatpush.msrb.mxu1 %v11823_v26  ;;  %4153 = vmatpush.msrb.mxu2 %v11860_v14  ;;  %v11875_v33 = vld [vmem:[#allocation111_spill] sm:$0xff]  ;;  %v11877_v57 = vld [vmem:[#allocation114_spill] sm:$0xff]  ;;  %v11888_v14 = vld [vmem:[#allocation132_spill] sm:$0xff] }
 0x318   :  { %v3443_v11 = vadd.f32 %v3442_v59, %v3417_v63  ;;  %4214 = vmatpush.msrb.mxu3 %v11817_v19  ;;  %3603 = vmatmul.f32.vlgmr.msrb.gmra.mxu0 %v3602_v56  ;;  %v3538_v36 = vsel %vm3532_vm2, %v3200_v62, %v3530_v32  ;;  %v11879_v63 = vld [vmem:[#allocation118_spill] sm:$0xff]  ;;  %v11880_v56 = vld [vmem:[#allocation104_spill] sm:$0xff]  ;;  %v11910_v32 = vld [vmem:[#allocation157_spill] sm:$0xff] }
 0x319   :  { %3903 = vmatmul.f32.vlgmr.msra.gmra.mxu1 %v9883_v13  ;;  %4051 = vmatpush.msrb.mxu0 %v11861_v9  ;;  %v11884_v59 = vld [vmem:[#allocation112_spill] sm:$0xff]  ;;  %v11891_v9 = vld [vmem:[#allocation122_spill] sm:$0xff] }
 0x31a   :  { %4112 = vmatpush.msrb.mxu1 %v11826_v5  ;;  %4157 = vmatpush.msrb.mxu2 %v11862_v25  ;;  %v3468_v19 = vadd.f32 %v3467_v53, %v3443_v11  ;;  %v11890_v11 = vld [vmem:[#allocation139_spill] sm:$0xff]  ;;  %v11895_v25 = vld [vmem:[#allocation125_spill] sm:$0xff]  ;;  %v11915_v62 = vld [vmem:[#allocation190_spill] sm:$0xff] }
 0x31b   :  { %4216 = vmatpush.msrb.mxu3 %v11820_v22  ;;  %3944 = vmatmul.f32.vlgmr.msra.gmra.mxu2 %v3943_v23  ;;  %v11866_v22 = vld [vmem:[#allocation96_spill] sm:$0xff]  ;;  %v11898_v53 = vld [vmem:[#allocation137_spill] sm:$0xff] }
 0x31c   :  { %4054 = vmatpush.msrb.mxu0 %v11863_v42  ;;  %4114 = vmatpush.msrb.mxu1 %v11829_v47  ;;  %v11894_v23 = vld [vmem:[#allocation136_spill] sm:$0xff]  ;;  %v11900_v42 = vld [vmem:[#allocation170_spill] sm:$0xff] }
 0x31d   :  { %4161 = vmatpush.msrb.mxu2 %v11864_v6  ;;  %4218 = vmatpush.msrb.mxu3 %v11823_v26  ;;  %v3494_v50 = vpop.f32.mrf.mxu2  ;;  %v11868_v26 = vld [vmem:[#allocation98_spill] sm:$0xff]  ;;  %v11905_v6 = vld [vmem:[#allocation140_spill] sm:$0xff] }
 0x31e   :  { %4045 = vmatmul.f32.vlgmr.msra.gmra.mxu3 %v9885_v8  ;;  %4057 = vmatpush.msrb.mxu0 %v11865_v31  ;;  %v3495_v28 = vadd.f32 %v3494_v50, %v3468_v19  ;;  %v11903_v19 = vld [vmem:[#allocation174_spill] sm:$0xff]  ;;  %v11907_v31 = vld [vmem:[#allocation151_spill] sm:$0xff] }
 0x31f   :  { %4116 = vmatpush.msrb.mxu1 %v11832_v60  ;;  %4165 = vmatpush.msrb.mxu2 %v11866_v22  ;;  %v11906_v50 = vld [vmem:[#allocation178_spill] sm:$0xff] }
 0x320   :  { %4220 = vmatpush.msrb.mxu3 %v11826_v5  ;;  %v3518_v51 = vadd.f32 %v3517_v49, %v3495_v28  ;;  %4060 = vmatpush.msrb.mxu0 %v11867_v35  ;;  %v11909_v28 = vld [vmem:[#allocation182_spill] sm:$0xff]  ;;  %v11911_v49 = vld [vmem:[#allocation145_spill] sm:$0xff] }
 0x321   :  { %4118 = vmatpush.msrb.mxu1 %v11835_v12  ;;  %4169 = vmatpush.msrb.mxu2 %v11868_v26  ;;  %v11912_v22 = vld [vmem:[#allocation186_spill] sm:$0xff]  ;;  %v11914_v35 = vld [vmem:[#allocation149_spill] sm:$0xff] }
 0x322   :  { %v3531_v52 = vrot.slane %v3518_v51, 4  ;;  %4222 = vmatpush.msrb.mxu3 %v11829_v47  ;;  %3866 = vmatmul.f32.vlgmr.msra.gmra.mxu0 %v9883_v13  ;;  %v11873_v47 = vld [vmem:[#allocation107_spill] sm:$0xff]  ;;  %v11913_v51 = vld [vmem:[#allocation161_spill] sm:$0xff] }
 0x323   :  { %4063 = vmatpush.msrb.mxu0 %v11869_v58  ;;  %4120 = vmatpush.msrb.mxu1 %v11838_v16  ;;  %v11916_v26 = vld [vmem:[#allocation165_spill] sm:$0xff] }
 0x324   :  { %v3539_v5 = vsel %vm3536_vm4, %v3538_v36, %v3531_v52  ;;  %4173 = vmatpush.msrb.mxu2 %v11870_v34  ;;  %4224 = vmatpush.msrb.mxu3 %v11832_v60  ;;  %v11876_v60 = vld [vmem:[#allocation94_spill] sm:$0xff]  ;;  %v11917_v52 = vld [vmem:[#allocation152_spill] sm:$0xff]  ;;  %v11919_v58 = vld [vmem:[#allocation169_spill] sm:$0xff] }
 0x325   :  { %v9932_v2 = vsub.f32 %v11871_v21, %v3539_v5  ;;  %4066 = vmatpush.msrb.mxu0 %v11872_v4  ;;  %4122 = vmatpush.msrb.mxu1 %v11841_v55  ;;  %v11918_v36 = vld [vmem:[#allocation194_spill] sm:$0xff]  ;;  %v11920_v5 = vld [vmem:[#allocation156_spill] sm:$0xff]  ;;  %v11921_v4 = vld [vmem:[#allocation199_spill] sm:$0xff] }
 0x326   :  { %4177 = vmatpush.msrb.mxu2 %v11873_v47  ;;  %4226 = vmatpush.msrb.mxu3 %v11835_v12  ;;  %v11878_v12 = vld [vmem:[#allocation100_spill] sm:$0xff]  ;;  %v3553_v34 = vld.sshfl [vmem:[#allocation1 + $0x10] sm:$0xff pattern:$0x73625140]  ;;  %v11922_v47 = vld [vmem:[#allocation173_spill] sm:$0xff] }
 0x327   :  { %v3545_v13 = vmul.f32 %v9932_v2, %v9932_v2  ;;  %4069 = vmatpush.msrb.mxu0 %v11874_v18  ;;  %4124 = vmatpush.msrb.mxu1 %v11844_v37  ;;  %v11924_v18 = vld [vmem:[#allocation203_spill] sm:$0xff] }
 0x328   :  { %4181 = vmatpush.msrb.mxu2 %v11875_v33  ;;  %4228 = vmatpush.msrb.mxu3 %v11838_v16  ;;  %v11881_v16 = vld [vmem:[#allocation121_spill] sm:$0xff] }
 0x329   :  { %3550 = vst [vmem:[#allocation1 + $0x20] ss:$4 sm:$0xff] %v3545_v13  ;;  %4072 = vmatpush.msrb.mxu0 %v11876_v60  ;;  %4126 = vmatpush.msrb.mxu1 %v11847_v15  ;;  %v11923_v13 = vld [vmem:[#allocation160_spill] sm:$0xff]  ;;  %v11925_v33 = vld [vmem:[#allocation177_spill] sm:$0xff]  ;;  %v10019_v60 = vand.u32 4294901760, %v3553_v34 }
 0x32a   :  { %4185 = vmatpush.msrb.mxu2 %v11877_v57  ;;  %4230 = vmatpush.msrb.mxu3 %v11841_v55  ;;  %v11883_v55 = vld [vmem:[#allocation127_spill] sm:$0xff] }
 0x32b   :  { %4075 = vmatpush.msrb.mxu0 %v11878_v12  ;;  %4128 = vmatpush.msrb.mxu1 %v11850_v39  ;;  %v11926_v57 = vld [vmem:[#allocation163_spill] sm:$0xff] }
 0x32c   :  { %4189 = vmatpush.msrb.mxu2 %v11879_v63  ;;  %4232 = vmatpush.msrb.mxu3 %v11844_v37  ;;  %v11885_v37 = vld [vmem:[#allocation130_spill] sm:$0xff]  ;;  %v11927_v12 = vld [vmem:[#allocation207_spill] sm:$0xff]  ;;  %v11928_v63 = vld [vmem:[#allocation180_spill] sm:$0xff] }
 0x32d   :  { %4078 = vmatpush.msrb.mxu0 %v11880_v56  ;;  %4130 = vmatpush.msrb.mxu1 %v11853_v54  ;;  %v11929_v56 = vld [vmem:[#allocation167_spill] sm:$0xff] }
 0x32e   :  { %4193 = vmatpush.msrb.mxu2 %v11881_v16  ;;  %4234 = vmatpush.msrb.mxu3 %v11847_v15  ;;  %v11886_v15 = vld [vmem:[#allocation116_spill] sm:$0xff]  ;;  %v11930_v16 = vld [vmem:[#allocation213_spill] sm:$0xff] }
 0x32f   :  { %4081 = vmatpush.msrb.mxu0 %v11882_v20  ;;  %4132 = vmatpush.msrb.mxu1 %v11855_v38  ;;  %v11931_v20 = vld [vmem:[#allocation184_spill] sm:$0xff] }
 0x330   :  { %4197 = vmatpush.msrb.mxu2 %v11883_v55  ;;  %4236 = vmatpush.msrb.mxu3 %v11850_v39  ;;  %v11889_v39 = vld [vmem:[#allocation159_spill] sm:$0xff]  ;;  %v4281_v55 = vsub.f32 %v3553_v34, %v10019_v60  ;;  %v11963_v34 = vld [vmem:[#allocation164_spill] sm:$0xff] }
 0x331   :  { %4084 = vmatpush.msrb.mxu0 %v11884_v59  ;;  %4134 = vmatpush.msrb.mxu1 %v11856_v10  ;;  %v11932_v59 = vld [vmem:[#allocation171_spill] sm:$0xff] }
 0x332   :  { %4201 = vmatpush.msrb.mxu2 %v11885_v37  ;;  %4238 = vmatpush.msrb.mxu3 %v11853_v54  ;;  %v11892_v54 = vld [vmem:[#allocation162_spill] sm:$0xff]  ;;  %v11933_v37 = vld [vmem:[#allocation219_spill] sm:$0xff] }
 0x333   :  { %4138 = vmatmul.f32.vlgmr.msrb.gmra.mxu1 %v3941_v24  ;;  %4087 = vmatpush.msrb.mxu0 %v11886_v15  ;;  %v11893_v24 = vld [vmem:[#allocation141_spill] sm:$0xff] }
 0x334   :  { %4294 = vmatpush.msra.mxu1 %v11887_v61  ;;  %4205 = vmatpush.msrb.mxu2 %v11888_v14  ;;  %v11934_v15 = vld [vmem:[#allocation189_spill] sm:$0xff]  ;;  %v11935_v61 = vld [vmem:[#allocation175_spill] sm:$0xff] }
 0x335   :  { %4240 = vmatpush.msrb.mxu3 %v11855_v38  ;;  %4207 = vmatmul.f32.vlgmr.msrb.gmra.mxu2 %v9885_v8  ;;  %v11896_v38 = vld [vmem:[#allocation166_spill] sm:$0xff]  ;;  %v11936_v14 = vld [vmem:[#allocation195_spill] sm:$0xff] }
 0x336   :  { %4300 = vmatpush.msra.mxu1 %v11889_v39  ;;  %4392 = vmatpush.msra.mxu2 %v11890_v11  ;;  %v4282_v39 = vand.u32 4294901760, %v4281_v55  ;;  %v11937_v11 = vld [vmem:[#allocation181_spill] sm:$0xff] }
 0x337   :  { %4090 = vmatpush.msrb.mxu0 %v11891_v9  ;;  %4242 = vmatpush.msrb.mxu3 %v11856_v10  ;;  %v11901_v10 = vld [vmem:[#allocation147_spill] sm:$0xff]  ;;  %v11938_v9 = vld [vmem:[#allocation185_spill] sm:$0xff] }
 0x338   :  { %4244 = vmatmul.f32.vlgmr.msrb.gmra.mxu3 %v9885_v8  ;;  %4306 = vmatpush.msra.mxu1 %v11892_v54  ;;  %v11902_v8 = vld [vmem:[#allocation138_spill] sm:$0xff]  ;;  %v11939_v54 = vld [vmem:[#allocation187_spill] sm:$0xff] }
 0x339   :  { %4395 = vmatpush.msra.mxu2 %v11893_v24  ;;  %4445 = vmatpush.msra.mxu3 %v11894_v23  ;;  %v4283_v24 = vsub.f32 %v4281_v55, %v4282_v39 }
 0x33a   :  { %4093 = vmatpush.msrb.mxu0 %v11895_v25  ;;  %4312 = vmatpush.msra.mxu1 %v11896_v38  ;;  %v11940_v25 = vld [vmem:[#allocation192_spill] sm:$0xff] }
 0x33b   :  { %4398 = vmatpush.msra.mxu2 %v11897_v40  ;;  %4447 = vmatpush.msra.mxu3 %v11898_v53  ;;  %v11942_v38 = vld [vmem:[#allocation196_spill] sm:$0xff]  ;;  %v11943_v40 = vld [vmem:[#allocation222_spill] sm:$0xff] }
 0x33c   :  { %4096 = vmatpush.msrb.mxu0 %v11899_v1  ;;  %4318 = vmatpush.msra.mxu1 %v11900_v42  ;;  %v11944_v1 = vld [vmem:[#allocation198_spill] sm:$0xff]  ;;  %v11945_v42 = vld [vmem:[#allocation143_spill] sm:$0xff] }
 0x33d   :  { %4099 = vmatmul.f32.vlgmr.msrb.gmra.mxu0 %v9890_v46  ;;  %4401 = vmatpush.msra.mxu2 %v11901_v10  ;;  %v11908_v46 = vld [vmem:[#allocation142_spill] sm:$0xff] }
 0x33e   :  { %4249 = vmatpush.msra.mxu0 %v11894_v23  ;;  %4449 = vmatpush.msra.mxu3 %v11902_v8  ;;  %v11946_v10 = vld [vmem:[#allocation226_spill] sm:$0xff] }
 0x33f   :  { %4324 = vmatpush.msra.mxu1 %v11903_v19  ;;  %4404 = vmatpush.msra.mxu2 %v11904_v48  ;;  %v11948_v19 = vld [vmem:[#allocation146_spill] sm:$0xff] }
 0x340   :  { %4251 = vmatpush.msra.mxu0 %v11898_v53  ;;  %4451 = vmatpush.msra.mxu3 %v11905_v6  ;;  %v11949_v48 = vld [vmem:[#allocation230_spill] sm:$0xff] }
 0x341   :  { %4330 = vmatpush.msra.mxu1 %v11906_v50  ;;  %4407 = vmatpush.msra.mxu2 %v11907_v31  ;;  %v11951_v50 = vld [vmem:[#allocation150_spill] sm:$0xff] }
 0x342   :  { %4253 = vmatpush.msra.mxu0 %v11902_v8  ;;  %4453 = vmatpush.msra.mxu3 %v11908_v46  ;;  %v11952_v31 = vld [vmem:[#allocation234_spill] sm:$0xff] }
 0x343   :  { %4336 = vmatpush.msra.mxu1 %v11909_v28  ;;  %4410 = vmatpush.msra.mxu2 %v11910_v32  ;;  %v11953_v28 = vld [vmem:[#allocation212_spill] sm:$0xff]  ;;  %v11954_v32 = vld [vmem:[#allocation153_spill] sm:$0xff] }
 0x344   :  { %4255 = vmatpush.msra.mxu0 %v11905_v6  ;;  %4455 = vmatpush.msra.mxu3 %v11911_v49 }
 0x345   :  { %4342 = vmatpush.msra.mxu1 %v11912_v22  ;;  %4413 = vmatpush.msra.mxu2 %v11913_v51  ;;  %v11956_v22 = vld [vmem:[#allocation216_spill] sm:$0xff] }
 0x346   :  { %4257 = vmatpush.msra.mxu0 %v11908_v46  ;;  %4457 = vmatpush.msra.mxu3 %v11914_v35 }
 0x347   :  { %4348 = vmatpush.msra.mxu1 %v11915_v62  ;;  %4416 = vmatpush.msra.mxu2 %v11916_v26  ;;  %v11958_v62 = vld [vmem:[#allocation242_spill] sm:$0xff]  ;;  %v11959_v26 = vld [vmem:[#allocation221_spill] sm:$0xff] }
 0x348   :  { %4259 = vmatpush.msra.mxu0 %v11911_v49  ;;  %4459 = vmatpush.msra.mxu3 %v11917_v52 }
 0x349   :  { %4354 = vmatpush.msra.mxu1 %v11918_v36  ;;  %4419 = vmatpush.msra.mxu2 %v11919_v58  ;;  %v11961_v36 = vld [vmem:[#allocation246_spill] sm:$0xff]  ;;  %v11962_v58 = vld [vmem:[#allocation225_spill] sm:$0xff] }
 0x34a   :  { %4261 = vmatpush.msra.mxu0 %v11914_v35  ;;  %4461 = vmatpush.msra.mxu3 %v11920_v5 }
 0x34b   :  { %4360 = vmatpush.msra.mxu1 %v11921_v4  ;;  %4422 = vmatpush.msra.mxu2 %v11922_v47  ;;  %v11964_v4 = vld [vmem:[#allocation250_spill] sm:$0xff]  ;;  %v11965_v47 = vld [vmem:[#allocation229_spill] sm:$0xff] }
 0x34c   :  { %4263 = vmatpush.msra.mxu0 %v11917_v52  ;;  %4463 = vmatpush.msra.mxu3 %v11923_v13 }
 0x34d   :  { %4366 = vmatpush.msra.mxu1 %v11924_v18  ;;  %4425 = vmatpush.msra.mxu2 %v11925_v33  ;;  %v11967_v18 = vld [vmem:[#allocation253_spill] sm:$0xff] }
 0x34e   :  { %4265 = vmatpush.msra.mxu0 %v11920_v5  ;;  %4465 = vmatpush.msra.mxu3 %v11926_v57  ;;  %v11968_v33 = vld [vmem:[#allocation233_spill] sm:$0xff] }
 0x34f   :  { %4372 = vmatpush.msra.mxu1 %v11927_v12  ;;  %4428 = vmatpush.msra.mxu2 %v11928_v63  ;;  %v11969_v12 = vld [vmem:[#allocation172_spill] sm:$0xff] }
 0x350   :  { %4267 = vmatpush.msra.mxu0 %v11923_v13  ;;  %4467 = vmatpush.msra.mxu3 %v11929_v56  ;;  %v11970_v63 = vld [vmem:[#allocation256_spill] sm:$0xff] }
 0x351   :  { %4378 = vmatpush.msra.mxu1 %v11930_v16  ;;  %4431 = vmatpush.msra.mxu2 %v11931_v20  ;;  %v11971_v16 = vld [vmem:[#allocation237_spill] sm:$0xff]  ;;  %v11973_v20 = vld [vmem:[#allocation258_spill] sm:$0xff] }
 0x352   :  { %4269 = vmatpush.msra.mxu0 %v11926_v57  ;;  %4469 = vmatpush.msra.mxu3 %v11932_v59 }
 0x353   :  { %4384 = vmatpush.msra.mxu1 %v11933_v37  ;;  %4434 = vmatpush.msra.mxu2 %v11934_v15  ;;  %v11975_v37 = vld [vmem:[#allocation179_spill] sm:$0xff]  ;;  %v11976_v15 = vld [vmem:[#allocation260_spill] sm:$0xff] }
 0x354   :  { %4271 = vmatpush.msra.mxu0 %v11929_v56  ;;  %4471 = vmatpush.msra.mxu3 %v11935_v61 }
 0x355   :  { %4386 = vmatmul.f32.vlgmr.msra.gmra.mxu1 %v10019_v60  ;;  %4437 = vmatpush.msra.mxu2 %v11936_v14  ;;  %v11978_v14 = vld [vmem:[#allocation183_spill] sm:$0xff] }
 0x356   :  { %4553 = vmatpush.msrb.mxu1 %v11894_v23  ;;  %4273 = vmatpush.msra.mxu0 %v11932_v59  ;;  %v11941_v23 = vld [vmem:[#allocation217_spill] sm:$0xff] }
 0x357   :  { %4473 = vmatpush.msra.mxu3 %v11937_v11  ;;  %4440 = vmatmul.f32.vlgmr.msra.gmra.mxu2 %v4281_v55  ;;  %v11974_v55 = vld [vmem:[#allocation241_spill] sm:$0xff] }
 0x358   :  { %4555 = vmatpush.msrb.mxu1 %v11898_v53  ;;  %4590 = vmatpush.msrb.mxu2 %v11938_v9  ;;  %v4284_v53 = vand.u32 4294901760, %v4283_v24 }
 0x359   :  { %4275 = vmatpush.msra.mxu0 %v11935_v61  ;;  %4475 = vmatpush.msra.mxu3 %v11939_v54 }
 0x35a   :  { %4479 = vmatmul.f32.vlgmr.msra.gmra.mxu3 %v4282_v39  ;;  %4557 = vmatpush.msrb.mxu1 %v11902_v8  ;;  %v11947_v8 = vld [vmem:[#allocation202_spill] sm:$0xff]  ;;  %v11979_v39 = vld [vmem:[#allocation261_spill] sm:$0xff] }
 0x35b   :  { %4592 = vmatpush.msrb.mxu2 %v11940_v25  ;;  %4635 = vmatpush.msrb.mxu3 %v11941_v23  ;;  %v11981_v23 = vld [vmem:[#allocation188_spill] sm:$0xff] }
 0x35c   :  { %4277 = vmatpush.msra.mxu0 %v11937_v11  ;;  %4559 = vmatpush.msrb.mxu1 %v11905_v6  ;;  %v11950_v6 = vld [vmem:[#allocation209_spill] sm:$0xff] }
 0x35d   :  { %4594 = vmatpush.msrb.mxu2 %v11942_v38  ;;  %4641 = vmatpush.msrb.mxu3 %v11943_v40  ;;  %v11982_v40 = vld [vmem:[#allocation262_spill] sm:$0xff] }
 0x35e   :  { %4279 = vmatpush.msra.mxu0 %v11939_v54  ;;  %4561 = vmatpush.msrb.mxu1 %v11908_v46  ;;  %v3554_v46 = vld.sshfl [vmem:[#allocation1 + $0x18] sm:$0xff pattern:$0x73625140] }
 0x35f   :  { %4285 = vmatmul.f32.vlgmr.msra.gmra.mxu0 %v4284_v53  ;;  %4596 = vmatpush.msrb.mxu2 %v11944_v1  ;;  %v10071_v51 = vand.u32 4294901760, %v3554_v46  ;;  %v11984_v53 = vld [vmem:[#allocation191_spill] sm:$0xff] }
 0x360   :  { %4486 = vmatpush.msrb.mxu0 %v11945_v42  ;;  %4647 = vmatpush.msrb.mxu3 %v11946_v10  ;;  %v11985_v42 = vld [vmem:[#allocation263_spill] sm:$0xff]  ;;  %v11986_v10 = vld [vmem:[#allocation208_spill] sm:$0xff] }
 0x361   :  { %4563 = vmatpush.msrb.mxu1 %v11911_v49  ;;  %4598 = vmatpush.msrb.mxu2 %v11947_v8  ;;  %v11955_v49 = vld [vmem:[#allocation238_spill] sm:$0xff] }
 0x362   :  { %4490 = vmatpush.msrb.mxu0 %v11948_v19  ;;  %4653 = vmatpush.msrb.mxu3 %v11949_v48  ;;  %v11987_v19 = vld [vmem:[#allocation197_spill] sm:$0xff]  ;;  %v11988_v48 = vld [vmem:[#allocation211_spill] sm:$0xff] }
 0x363   :  { %4565 = vmatpush.msrb.mxu1 %v11914_v35  ;;  %4600 = vmatpush.msrb.mxu2 %v11950_v6  ;;  %v11957_v35 = vld [vmem:[#allocation154_spill] sm:$0xff] }
 0x364   :  { %4494 = vmatpush.msrb.mxu0 %v11951_v50  ;;  %4659 = vmatpush.msrb.mxu3 %v11952_v31  ;;  %v11989_v50 = vld [vmem:[#allocation204_spill] sm:$0xff]  ;;  %v11990_v31 = vld [vmem:[#allocation214_spill] sm:$0xff] }
 0x365   :  { %4567 = vmatpush.msrb.mxu1 %v11917_v52  ;;  %4602 = vmatpush.msrb.mxu2 %v11953_v28  ;;  %v11960_v52 = vld [vmem:[#allocation158_spill] sm:$0xff] }
 0x366   :  { %4498 = vmatpush.msrb.mxu0 %v11954_v32  ;;  %4665 = vmatpush.msrb.mxu3 %v11955_v49  ;;  %v11993_v32 = vld [vmem:[#allocation200_spill] sm:$0xff]  ;;  %v11995_v49 = vld [vmem:[#allocation205_spill] sm:$0xff] }
 0x367   :  { %4569 = vmatpush.msrb.mxu1 %v11920_v5  ;;  %4604 = vmatpush.msrb.mxu2 %v11956_v22  ;;  %v10082_v5 = vsub.f32 %v3554_v46, %v10071_v51  ;;  %v11991_v46 = vld [vmem:[#allocation193_spill] sm:$0xff] }
 0x368   :  { %4502 = vmatpush.msrb.mxu0 %v11957_v35  ;;  %4671 = vmatpush.msrb.mxu3 %v11958_v62  ;;  %v11998_v35 = vld [vmem:[#allocation231_spill] sm:$0xff] }
 0x369   :  { %4571 = vmatpush.msrb.mxu1 %v11923_v13  ;;  %4606 = vmatpush.msrb.mxu2 %v11959_v26  ;;  %v11966_v13 = vld [vmem:[#allocation168_spill] sm:$0xff]  ;;  %v12000_v62 = vld [vmem:[#allocation235_spill] sm:$0xff] }
 0x36a   :  { %4506 = vmatpush.msrb.mxu0 %v11960_v52  ;;  %4677 = vmatpush.msrb.mxu3 %v11961_v36  ;;  %v12002_v52 = vld [vmem:[#allocation239_spill] sm:$0xff] }
 0x36b   :  { %4573 = vmatpush.msrb.mxu1 %v11926_v57  ;;  %4608 = vmatpush.msrb.mxu2 %v11962_v58  ;;  %v4623_v57 = vand.u32 4294901760, %v10082_v5  ;;  %v12004_v36 = vld [vmem:[#allocation243_spill] sm:$0xff] }
 0x36c   :  { %4510 = vmatpush.msrb.mxu0 %v11963_v34  ;;  %4683 = vmatpush.msrb.mxu3 %v11964_v4  ;;  %v12006_v34 = vld [vmem:[#allocation247_spill] sm:$0xff] }
 0x36d   :  { %4575 = vmatpush.msrb.mxu1 %v11929_v56  ;;  %4610 = vmatpush.msrb.mxu2 %v11965_v47  ;;  %v11972_v56 = vld [vmem:[#allocation176_spill] sm:$0xff]  ;;  %v12008_v4 = vld [vmem:[#allocation251_spill] sm:$0xff] }
 0x36e   :  { %4514 = vmatpush.msrb.mxu0 %v11966_v13  ;;  %4689 = vmatpush.msrb.mxu3 %v11967_v18  ;;  %v12010_v13 = vld [vmem:[#allocation254_spill] sm:$0xff]  ;;  %v12012_v18 = vld [vmem:[#allocation257_spill] sm:$0xff] }
 0x36f   :  { %4577 = vmatpush.msrb.mxu1 %v11932_v59  ;;  %4612 = vmatpush.msrb.mxu2 %v11968_v33  ;;  %v4624_v59 = vsub.f32 %v10082_v5, %v4623_v57 }
 0x370   :  { %4518 = vmatpush.msrb.mxu0 %v11969_v12  ;;  %4695 = vmatpush.msrb.mxu3 %v11970_v63  ;;  %v12015_v12 = vld [vmem:[#allocation281_spill] sm:$0xff]  ;;  %v12016_v63 = vld [vmem:[#allocation244_spill] sm:$0xff] }
 0x371   :  { %4579 = vmatpush.msrb.mxu1 %v11935_v61  ;;  %4614 = vmatpush.msrb.mxu2 %v11971_v16  ;;  %v11977_v61 = vld [vmem:[#allocation245_spill] sm:$0xff]  ;;  %v4625_v24 = vand.u32 4294901760, %v4624_v59 }
 0x372   :  { %4522 = vmatpush.msrb.mxu0 %v11972_v56  ;;  %4701 = vmatpush.msrb.mxu3 %v11973_v20  ;;  %v12018_v56 = vld [vmem:[#allocation268_spill] sm:$0xff]  ;;  %v12022_v59 = vld [vmem:[#allocation265_spill] sm:$0xff] }
 0x373   :  { %4581 = vmatpush.msrb.mxu1 %v11937_v11  ;;  %4616 = vmatpush.msrb.mxu2 %v11974_v55  ;;  %v11980_v11 = vld [vmem:[#allocation249_spill] sm:$0xff]  ;;  %v12019_v20 = vld [vmem:[#allocation248_spill] sm:$0xff] }
 0x374   :  { %4526 = vmatpush.msrb.mxu0 %v11975_v37  ;;  %4707 = vmatpush.msrb.mxu3 %v11976_v15  ;;  %v12023_v37 = vld [vmem:[#allocation252_spill] sm:$0xff]  ;;  %v12024_v15 = vld [vmem:[#allocation289_spill] sm:$0xff] }
 0x375   :  { %4583 = vmatpush.msrb.mxu1 %v11939_v54  ;;  %4618 = vmatpush.msrb.mxu2 %v11977_v61  ;;  %v11983_v54 = vld [vmem:[#allocation201_spill] sm:$0xff] }
 0x376   :  { %4530 = vmatpush.msrb.mxu0 %v11978_v14  ;;  %4713 = vmatpush.msrb.mxu3 %v11979_v39  ;;  %v12026_v14 = vld [vmem:[#allocation266_spill] sm:$0xff]  ;;  %v12027_v39 = vld [vmem:[#allocation255_spill] sm:$0xff] }
 0x377   :  { %4585 = vmatmul.f32.vlgmr.msrb.gmra.mxu1 %v10019_v60  ;;  %4620 = vmatpush.msrb.mxu2 %v11980_v11 }
 0x378   :  { %4786 = vmatpush.msra.mxu1 %v11938_v9  ;;  %4534 = vmatpush.msrb.mxu0 %v11981_v23  ;;  %v12031_v23 = vld [vmem:[#allocation295_spill] sm:$0xff] }
 0x379   :  { %4719 = vmatpush.msrb.mxu3 %v11982_v40  ;;  %4626 = vmatmul.f32.vlgmr.msrb.gmra.mxu2 %v4625_v24  ;;  %v12028_v24 = vld [vmem:[#allocation292_spill] sm:$0xff] }
 0x37a   :  { %4788 = vmatpush.msra.mxu1 %v11940_v25  ;;  %4827 = vmatpush.msra.mxu2 %v11983_v54  ;;  %v12032_v40 = vld [vmem:[#allocation276_spill] sm:$0xff]  ;;  %v12033_v54 = vld [vmem:[#allocation269_spill] sm:$0xff] }
 0x37b   :  { %4538 = vmatpush.msrb.mxu0 %v11984_v53  ;;  %4725 = vmatpush.msrb.mxu3 %v11985_v42  ;;  %v12034_v53 = vld [vmem:[#allocation298_spill] sm:$0xff] }
 0x37c   :  { %4727 = vmatmul.f32.vlgmr.msrb.gmra.mxu3 %v10071_v51  ;;  %4790 = vmatpush.msra.mxu1 %v11942_v38  ;;  %v12035_v42 = vld [vmem:[#allocation278_spill] sm:$0xff] }
 0x37d   :  { %4831 = vmatpush.msra.mxu2 %v11986_v10  ;;  %4894 = vmatpush.msra.mxu3 %v11938_v9  ;;  %v11992_v9 = vld [vmem:[#allocation218_spill] sm:$0xff] }
 0x37e   :  { %4542 = vmatpush.msrb.mxu0 %v11987_v19  ;;  %4792 = vmatpush.msra.mxu1 %v11944_v1  ;;  %v12037_v10 = vld [vmem:[#allocation302_spill] sm:$0xff] }
 0x37f   :  { %4835 = vmatpush.msra.mxu2 %v11988_v48  ;;  %4896 = vmatpush.msra.mxu3 %v11940_v25  ;;  %v11994_v25 = vld [vmem:[#allocation223_spill] sm:$0xff]  ;;  %v12038_v19 = vld [vmem:[#allocation282_spill] sm:$0xff] }
 0x380   :  { %4546 = vmatpush.msrb.mxu0 %v11989_v50  ;;  %4794 = vmatpush.msra.mxu1 %v11947_v8  ;;  %v12039_v48 = vld [vmem:[#allocation306_spill] sm:$0xff]  ;;  %v12040_v50 = vld [vmem:[#allocation285_spill] sm:$0xff] }
 0x381   :  { %4548 = vmatmul.f32.vlgmr.msrb.gmra.mxu0 %v10019_v60  ;;  %4839 = vmatpush.msra.mxu2 %v11990_v31  ;;  %v11996_v60 = vld [vmem:[#allocation227_spill] sm:$0xff]  ;;  %v12041_v31 = vld [vmem:[#allocation310_spill] sm:$0xff] }
 0x382   :  { %4733 = vmatpush.msra.mxu0 %v11991_v46  ;;  %4898 = vmatpush.msra.mxu3 %v11942_v38  ;;  %v11997_v38 = vld [vmem:[#allocation206_spill] sm:$0xff]  ;;  %v12042_v46 = vld [vmem:[#allocation288_spill] sm:$0xff] }
 0x383   :  { %4796 = vmatpush.msra.mxu1 %v11950_v6  ;;  %4843 = vmatpush.msra.mxu2 %v11992_v9  ;;  %v12043_v9 = vld [vmem:[#allocation314_spill] sm:$0xff] }
 0x384   :  { %4736 = vmatpush.msra.mxu0 %v11993_v32  ;;  %4900 = vmatpush.msra.mxu3 %v11944_v1  ;;  %v11999_v1 = vld [vmem:[#allocation210_spill] sm:$0xff]  ;;  %v12044_v32 = vld [vmem:[#allocation291_spill] sm:$0xff] }
 0x385   :  { %4798 = vmatpush.msra.mxu1 %v11953_v28  ;;  %4847 = vmatpush.msra.mxu2 %v11994_v25  ;;  %v3555_v25 = vld.sshfl [vmem:[#allocation1 + $0x20] sm:$0xff pattern:$0x73625140] }
 0x386   :  { %4739 = vmatpush.msra.mxu0 %v11995_v49  ;;  %4902 = vmatpush.msra.mxu3 %v11947_v8  ;;  %v12001_v8 = vld [vmem:[#allocation215_spill] sm:$0xff] }
 0x387   :  { %4800 = vmatpush.msra.mxu1 %v11956_v22  ;;  %4851 = vmatpush.msra.mxu2 %v11996_v60  ;;  %v12045_v49 = vld [vmem:[#allocation319_spill] sm:$0xff]  ;;  %v12046_v60 = vld [vmem:[#allocation294_spill] sm:$0xff] }
 0x388   :  { %4742 = vmatpush.msra.mxu0 %v11997_v38  ;;  %4904 = vmatpush.msra.mxu3 %v11950_v6  ;;  %v12003_v6 = vld [vmem:[#allocation220_spill] sm:$0xff]  ;;  %v12047_v38 = vld [vmem:[#allocation323_spill] sm:$0xff] }
 0x389   :  { %4802 = vmatpush.msra.mxu1 %v11959_v26  ;;  %4855 = vmatpush.msra.mxu2 %v11998_v35  ;;  %v12048_v35 = vld [vmem:[#allocation297_spill] sm:$0xff] }
 0x38a   :  { %4745 = vmatpush.msra.mxu0 %v11999_v1  ;;  %4906 = vmatpush.msra.mxu3 %v11953_v28  ;;  %v12005_v28 = vld [vmem:[#allocation224_spill] sm:$0xff]  ;;  %v10232_v1 = vand.u32 4294901760, %v3555_v25 }
 0x38b   :  { %4804 = vmatpush.msra.mxu1 %v11962_v58  ;;  %4859 = vmatpush.msra.mxu2 %v12000_v62  ;;  %v12049_v62 = vld [vmem:[#allocation327_spill] sm:$0xff] }
 0x38c   :  { %4748 = vmatpush.msra.mxu0 %v12001_v8  ;;  %4908 = vmatpush.msra.mxu3 %v11956_v22  ;;  %v12007_v22 = vld [vmem:[#allocation228_spill] sm:$0xff] }
 0x38d   :  { %4806 = vmatpush.msra.mxu1 %v11965_v47  ;;  %4863 = vmatpush.msra.mxu2 %v12002_v52  ;;  %v12050_v8 = vld [vmem:[#allocation300_spill] sm:$0xff]  ;;  %v12051_v52 = vld [vmem:[#allocation333_spill] sm:$0xff] }
 0x38e   :  { %4751 = vmatpush.msra.mxu0 %v12003_v6  ;;  %4910 = vmatpush.msra.mxu3 %v11959_v26  ;;  %v12009_v26 = vld [vmem:[#allocation232_spill] sm:$0xff] }
 0x38f   :  { %4808 = vmatpush.msra.mxu1 %v11968_v33  ;;  %4867 = vmatpush.msra.mxu2 %v12004_v36  ;;  %v12052_v6 = vld [vmem:[#allocation304_spill] sm:$0xff]  ;;  %v4963_v36 = vsub.f32 %v3555_v25, %v10232_v1  ;;  %v12093_v25 = vld [vmem:[#allocation361_spill] sm:$0xff] }
 0x390   :  { %4754 = vmatpush.msra.mxu0 %v12005_v28  ;;  %4912 = vmatpush.msra.mxu3 %v11962_v58  ;;  %v12011_v58 = vld [vmem:[#allocation236_spill] sm:$0xff]  ;;  %v12053_v28 = vld [vmem:[#allocation339_spill] sm:$0xff] }
 0x391   :  { %4810 = vmatpush.msra.mxu1 %v11971_v16  ;;  %4871 = vmatpush.msra.mxu2 %v12006_v34  ;;  %v12054_v34 = vld [vmem:[#allocation309_spill] sm:$0xff] }
 0x392   :  { %4757 = vmatpush.msra.mxu0 %v12007_v22  ;;  %4914 = vmatpush.msra.mxu3 %v11965_v47  ;;  %v12013_v47 = vld [vmem:[#allocation240_spill] sm:$0xff]  ;;  %v12055_v22 = vld [vmem:[#allocation315_spill] sm:$0xff] }
 0x393   :  { %4812 = vmatpush.msra.mxu1 %v11974_v55  ;;  %4875 = vmatpush.msra.mxu2 %v12008_v4  ;;  %v4964_v4 = vand.u32 4294901760, %v4963_v36 }
 0x394   :  { %4760 = vmatpush.msra.mxu0 %v12009_v26  ;;  %4916 = vmatpush.msra.mxu3 %v11968_v33  ;;  %v12014_v33 = vld [vmem:[#allocation259_spill] sm:$0xff]  ;;  %v12056_v26 = vld [vmem:[#allocation301_spill] sm:$0xff] }
 0x395   :  { %4814 = vmatpush.msra.mxu1 %v11977_v61  ;;  %4879 = vmatpush.msra.mxu2 %v12010_v13  ;;  %v12057_v13 = vld [vmem:[#allocation305_spill] sm:$0xff] }
 0x396   :  { %4763 = vmatpush.msra.mxu0 %v12011_v58  ;;  %4918 = vmatpush.msra.mxu3 %v11971_v16  ;;  %v12017_v16 = vld [vmem:[#allocation284_spill] sm:$0xff]  ;;  %v12058_v58 = vld [vmem:[#allocation307_spill] sm:$0xff] }
 0x397   :  { %4816 = vmatpush.msra.mxu1 %v11980_v11  ;;  %4883 = vmatpush.msra.mxu2 %v12012_v18  ;;  %v4965_v18 = vsub.f32 %v4963_v36, %v4964_v4 }
 0x398   :  { %4766 = vmatpush.msra.mxu0 %v12013_v47  ;;  %4920 = vmatpush.msra.mxu3 %v11974_v55  ;;  %v12021_v55 = vld [vmem:[#allocation270_spill] sm:$0xff]  ;;  %v12059_v47 = vld [vmem:[#allocation312_spill] sm:$0xff] }
 0x399   :  { %4820 = vmatmul.f32.vlgmr.msra.gmra.mxu1 %v4623_v57  ;;  %4887 = vmatpush.msra.mxu2 %v12014_v33  ;;  %v12020_v57 = vld [vmem:[#allocation286_spill] sm:$0xff]  ;;  %v12060_v33 = vld [vmem:[#allocation337_spill] sm:$0xff] }
 0x39a   :  { %4976 = vmatpush.msrb.mxu1 %v12015_v12  ;;  %4769 = vmatpush.msra.mxu0 %v12016_v63  ;;  %v12061_v12 = vld [vmem:[#allocation316_spill] sm:$0xff]  ;;  %v12062_v63 = vld [vmem:[#allocation342_spill] sm:$0xff] }
 0x39b   :  { %4922 = vmatpush.msra.mxu3 %v11977_v61  ;;  %4889 = vmatmul.f32.vlgmr.msra.gmra.mxu2 %v10071_v51  ;;  %v12025_v61 = vld [vmem:[#allocation273_spill] sm:$0xff] }
 0x39c   :  { %4982 = vmatpush.msrb.mxu1 %v12017_v16  ;;  %5074 = vmatpush.msrb.mxu2 %v12018_v56  ;;  %v4966_v16 = vand.u32 4294901760, %v4965_v18  ;;  %v12063_v56 = vld [vmem:[#allocation318_spill] sm:$0xff] }
 0x39d   :  { %4772 = vmatpush.msra.mxu0 %v12019_v20  ;;  %4924 = vmatpush.msra.mxu3 %v11980_v11  ;;  %v12030_v11 = vld [vmem:[#allocation267_spill] sm:$0xff]  ;;  %v12064_v20 = vld [vmem:[#allocation272_spill] sm:$0xff]  ;;  %v12109_v18 = vld [vmem:[#allocation334_spill] sm:$0xff] }
 0x39e   :  { %4926 = vmatmul.f32.vlgmr.msra.gmra.mxu3 %v10071_v51  ;;  %4988 = vmatpush.msrb.mxu1 %v12020_v57  ;;  %v12029_v51 = vld [vmem:[#allocation275_spill] sm:$0xff]  ;;  %v12065_v57 = vld [vmem:[#allocation346_spill] sm:$0xff] }
 0x39f   :  { %5077 = vmatpush.msrb.mxu2 %v12021_v55  ;;  %5127 = vmatpush.msrb.mxu3 %v12022_v59  ;;  %v12066_v55 = vld [vmem:[#allocation322_spill] sm:$0xff] }
 0x3a0   :  { %4775 = vmatpush.msra.mxu0 %v12023_v37  ;;  %4994 = vmatpush.msrb.mxu1 %v12024_v15  ;;  %v12068_v37 = vld [vmem:[#allocation350_spill] sm:$0xff]  ;;  %v12069_v15 = vld [vmem:[#allocation329_spill] sm:$0xff] }
 0x3a1   :  { %5080 = vmatpush.msrb.mxu2 %v12025_v61  ;;  %5129 = vmatpush.msrb.mxu3 %v12026_v14  ;;  %v12070_v61 = vld [vmem:[#allocation277_spill] sm:$0xff] }
 0x3a2   :  { %4778 = vmatpush.msra.mxu0 %v12027_v39  ;;  %5000 = vmatpush.msrb.mxu1 %v12028_v24  ;;  %v3556_v39 = vld.sshfl [vmem:[#allocation1 + $0x28] sm:$0xff pattern:$0x73625140]  ;;  %v12072_v24 = vld [vmem:[#allocation332_spill] sm:$0xff] }
 0x3a3   :  { %4781 = vmatmul.f32.vlgmr.msra.gmra.mxu0 %v10082_v5  ;;  %5083 = vmatpush.msrb.mxu2 %v12029_v51  ;;  %v12036_v5 = vld [vmem:[#allocation271_spill] sm:$0xff]  ;;  %v12074_v51 = vld [vmem:[#allocation358_spill] sm:$0xff] }
 0x3a4   :  { %4931 = vmatpush.msrb.mxu0 %v12022_v59  ;;  %5131 = vmatpush.msrb.mxu3 %v12030_v11 }
 0x3a5   :  { %5006 = vmatpush.msrb.mxu1 %v12031_v23  ;;  %5086 = vmatpush.msrb.mxu2 %v12032_v40  ;;  %v12076_v23 = vld [vmem:[#allocation280_spill] sm:$0xff]  ;;  %v12077_v40 = vld [vmem:[#allocation362_spill] sm:$0xff] }
 0x3a6   :  { %4933 = vmatpush.msrb.mxu0 %v12026_v14  ;;  %5133 = vmatpush.msrb.mxu3 %v12033_v54 }
 0x3a7   :  { %5012 = vmatpush.msrb.mxu1 %v12034_v53  ;;  %5089 = vmatpush.msrb.mxu2 %v12035_v42  ;;  %v12080_v53 = vld [vmem:[#allocation366_spill] sm:$0xff]  ;;  %v12081_v42 = vld [vmem:[#allocation345_spill] sm:$0xff] }
 0x3a8   :  { %4935 = vmatpush.msrb.mxu0 %v12030_v11  ;;  %5135 = vmatpush.msrb.mxu3 %v12036_v5 }
 0x3a9   :  { %5018 = vmatpush.msrb.mxu1 %v12037_v10  ;;  %5092 = vmatpush.msrb.mxu2 %v12038_v19  ;;  %v12083_v10 = vld [vmem:[#allocation370_spill] sm:$0xff] }
 0x3aa   :  { %4937 = vmatpush.msrb.mxu0 %v12033_v54  ;;  %5137 = vmatpush.msrb.mxu3 %v8631_v29  ;;  %v12085_v19 = vld [vmem:[#allocation290_spill] sm:$0xff] }
 0x3ab   :  { %5024 = vmatpush.msrb.mxu1 %v12039_v48  ;;  %5095 = vmatpush.msrb.mxu2 %v12040_v50  ;;  %v12086_v48 = vld [vmem:[#allocation373_spill] sm:$0xff] }
 0x3ac   :  { %4939 = vmatpush.msrb.mxu0 %v12036_v5  ;;  %5139 = vmatpush.msrb.mxu3 %v8656_v45 }
 0x3ad   :  { %5030 = vmatpush.msrb.mxu1 %v12041_v31  ;;  %5098 = vmatpush.msrb.mxu2 %v12042_v46  ;;  %v12088_v31 = vld [vmem:[#allocation293_spill] sm:$0xff]  ;;  %v12089_v46 = vld [vmem:[#allocation376_spill] sm:$0xff] }
 0x3ae   :  { %4941 = vmatpush.msrb.mxu0 %v8631_v29  ;;  %5141 = vmatpush.msrb.mxu3 %v8673_v17 }
 0x3af   :  { %5036 = vmatpush.msrb.mxu1 %v12043_v9  ;;  %5101 = vmatpush.msrb.mxu2 %v12044_v32  ;;  %v12090_v9 = vld [vmem:[#allocation357_spill] sm:$0xff]  ;;  %v12092_v32 = vld [vmem:[#allocation378_spill] sm:$0xff] }
 0x3b0   :  { %4943 = vmatpush.msrb.mxu0 %v8656_v45  ;;  %5143 = vmatpush.msrb.mxu3 %v8692_v7 }
 0x3b1   :  { %5042 = vmatpush.msrb.mxu1 %v12045_v49  ;;  %5104 = vmatpush.msrb.mxu2 %v12046_v60  ;;  %v12094_v49 = vld [vmem:[#allocation299_spill] sm:$0xff]  ;;  %v12095_v60 = vld [vmem:[#allocation380_spill] sm:$0xff] }
 0x3b2   :  { %4945 = vmatpush.msrb.mxu0 %v8673_v17  ;;  %5145 = vmatpush.msrb.mxu3 %v8711_v3 }
 0x3b3   :  { %5048 = vmatpush.msrb.mxu1 %v12047_v38  ;;  %5107 = vmatpush.msrb.mxu2 %v12048_v35  ;;  %v12097_v38 = vld [vmem:[#allocation303_spill] sm:$0xff]  ;;  %v12098_v35 = vld [vmem:[#allocation381_spill] sm:$0xff] }
 0x3b4   :  { %4947 = vmatpush.msrb.mxu0 %v8692_v7  ;;  %5147 = vmatpush.msrb.mxu3 %v8728_v41 }
 0x3b5   :  { %5054 = vmatpush.msrb.mxu1 %v12049_v62  ;;  %5110 = vmatpush.msrb.mxu2 %v12050_v8  ;;  %v12099_v62 = vld [vmem:[#allocation369_spill] sm:$0xff] }
 0x3b6   :  { %4949 = vmatpush.msrb.mxu0 %v8711_v3  ;;  %5149 = vmatpush.msrb.mxu3 %v8747_v43 }
 0x3b7   :  { %5060 = vmatpush.msrb.mxu1 %v12051_v52  ;;  %5113 = vmatpush.msrb.mxu2 %v12052_v6  ;;  %v12100_v52 = vld [vmem:[#allocation308_spill] sm:$0xff]  ;;  %v12101_v6 = vld [vmem:[#allocation382_spill] sm:$0xff] }
 0x3b8   :  { %4951 = vmatpush.msrb.mxu0 %v8728_v41  ;;  %5151 = vmatpush.msrb.mxu3 %v8768_v30 }
 0x3b9   :  { %5066 = vmatpush.msrb.mxu1 %v12053_v28  ;;  %5116 = vmatpush.msrb.mxu2 %v12054_v34  ;;  %v12103_v28 = vld [vmem:[#allocation311_spill] sm:$0xff] }
 0x3ba   :  { %4953 = vmatpush.msrb.mxu0 %v8747_v43  ;;  %5153 = vmatpush.msrb.mxu3 %v8784_v44  ;;  %v12104_v34 = vld [vmem:[#allocation383_spill] sm:$0xff] }
 0x3bb   :  { %5068 = vmatmul.f32.vlgmr.msrb.gmra.mxu1 %v10232_v1  ;;  %5119 = vmatpush.msrb.mxu2 %v12055_v22  ;;  %v12105_v22 = vld [vmem:[#allocation328_spill] sm:$0xff] }
 0x3bc   :  { %5235 = vmatpush.msra.mxu1 %v12022_v59  ;;  %4955 = vmatpush.msrb.mxu0 %v8768_v30  ;;  %v12067_v59 = vld [vmem:[#allocation274_spill] sm:$0xff] }
 0x3bd   :  { %5155 = vmatpush.msrb.mxu3 %v12056_v26  ;;  %5122 = vmatmul.f32.vlgmr.msrb.gmra.mxu2 %v4963_v36  ;;  %v12102_v36 = vld [vmem:[#allocation321_spill] sm:$0xff] }
 0x3be   :  { %5237 = vmatpush.msra.mxu1 %v12026_v14  ;;  %5272 = vmatpush.msra.mxu2 %v12057_v13  ;;  %v12071_v14 = vld [vmem:[#allocation354_spill] sm:$0xff] }
 0x3bf   :  { %4957 = vmatpush.msrb.mxu0 %v8784_v44  ;;  %5157 = vmatpush.msrb.mxu3 %v12058_v58 }
 0x3c0   :  { %5161 = vmatmul.f32.vlgmr.msrb.gmra.mxu3 %v4964_v4  ;;  %5239 = vmatpush.msra.mxu1 %v12030_v11  ;;  %v12075_v11 = vld [vmem:[#allocation336_spill] sm:$0xff]  ;;  %v12106_v4 = vld [vmem:[#allocation317_spill] sm:$0xff] }
 0x3c1   :  { %5274 = vmatpush.msra.mxu2 %v12059_v47  ;;  %5317 = vmatpush.msra.mxu3 %v12060_v33  ;;  %v12110_v33 = vld [vmem:[#allocation313_spill] sm:$0xff] }
 0x3c2   :  { %4959 = vmatpush.msrb.mxu0 %v12056_v26  ;;  %5241 = vmatpush.msra.mxu1 %v12033_v54  ;;  %v12078_v54 = vld [vmem:[#allocation341_spill] sm:$0xff] }
 0x3c3   :  { %5276 = vmatpush.msra.mxu2 %v12061_v12  ;;  %5323 = vmatpush.msra.mxu3 %v12062_v63  ;;  %v12112_v63 = vld [vmem:[#allocation320_spill] sm:$0xff] }
 0x3c4   :  { %4961 = vmatpush.msrb.mxu0 %v12058_v58  ;;  %5243 = vmatpush.msra.mxu1 %v12036_v5  ;;  %v12082_v5 = vld [vmem:[#allocation287_spill] sm:$0xff] }
 0x3c5   :  { %4967 = vmatmul.f32.vlgmr.msrb.gmra.mxu0 %v4966_v16  ;;  %5278 = vmatpush.msra.mxu2 %v12063_v56  ;;  %v12114_v16 = vld [vmem:[#allocation325_spill] sm:$0xff] }
 0x3c6   :  { %5168 = vmatpush.msra.mxu0 %v12064_v20  ;;  %5329 = vmatpush.msra.mxu3 %v12065_v57  ;;  %v12117_v20 = vld [vmem:[#allocation351_spill] sm:$0xff] }
 0x3c7   :  { %5245 = vmatpush.msra.mxu1 %v8631_v29  ;;  %5280 = vmatpush.msra.mxu2 %v12066_v55  ;;  %v12073_v29 = vld [vmem:[#allocation279_spill] sm:$0xff] }
 0x3c8   :  { %5172 = vmatpush.msra.mxu0 %v12067_v59  ;;  %5335 = vmatpush.msra.mxu3 %v12068_v37  ;;  %v12119_v57 = vld [vmem:[#allocation355_spill] sm:$0xff]  ;;  %v12122_v37 = vld [vmem:[#allocation340_spill] sm:$0xff] }
 0x3c9   :  { %5247 = vmatpush.msra.mxu1 %v8656_v45  ;;  %5282 = vmatpush.msra.mxu2 %v12069_v15  ;;  %v10284_v45 = vand.u32 4294901760, %v3556_v39  ;;  %v12121_v59 = vld [vmem:[#allocation359_spill] sm:$0xff] }
 0x3ca   :  { %5176 = vmatpush.msra.mxu0 %v12070_v61  ;;  %5341 = vmatpush.msra.mxu3 %v12071_v14  ;;  %v12124_v61 = vld [vmem:[#allocation344_spill] sm:$0xff]  ;;  %v12125_v14 = vld [vmem:[#allocation367_spill] sm:$0xff] }
 0x3cb   :  { %5249 = vmatpush.msra.mxu1 %v8673_v17  ;;  %5284 = vmatpush.msra.mxu2 %v12072_v24  ;;  %v12079_v17 = vld [vmem:[#allocation283_spill] sm:$0xff] }
 0x3cc   :  { %5180 = vmatpush.msra.mxu0 %v12073_v29  ;;  %5347 = vmatpush.msra.mxu3 %v12074_v51  ;;  %v12127_v29 = vld [vmem:[#allocation371_spill] sm:$0xff]  ;;  %v12128_v51 = vld [vmem:[#allocation352_spill] sm:$0xff] }
 0x3cd   :  { %5251 = vmatpush.msra.mxu1 %v8692_v7  ;;  %5286 = vmatpush.msra.mxu2 %v12075_v11  ;;  %v10295_v7 = vsub.f32 %v3556_v39, %v10284_v45  ;;  %v12126_v39 = vld [vmem:[#allocation348_spill] sm:$0xff] }
 0x3ce   :  { %5184 = vmatpush.msra.mxu0 %v12076_v23  ;;  %5353 = vmatpush.msra.mxu3 %v12077_v40  ;;  %v12130_v40 = vld [vmem:[#allocation356_spill] sm:$0xff] }
 0x3cf   :  { %5253 = vmatpush.msra.mxu1 %v8711_v3  ;;  %5288 = vmatpush.msra.mxu2 %v12078_v54  ;;  %v12084_v3 = vld [vmem:[#allocation349_spill] sm:$0xff]  ;;  %v5305_v50 = vand.u32 4294901760, %v10295_v7 }
 0x3d0   :  { %5188 = vmatpush.msra.mxu0 %v12079_v17  ;;  %5359 = vmatpush.msra.mxu3 %v12080_v53  ;;  %v12132_v17 = vld [vmem:[#allocation360_spill] sm:$0xff] }
 0x3d1   :  { %5255 = vmatpush.msra.mxu1 %v8728_v41  ;;  %5290 = vmatpush.msra.mxu2 %v12081_v42  ;;  %v12087_v41 = vld [vmem:[#allocation353_spill] sm:$0xff] }
 0x3d2   :  { %5192 = vmatpush.msra.mxu0 %v12082_v5  ;;  %5365 = vmatpush.msra.mxu3 %v12083_v10  ;;  %v12134_v5 = vld [vmem:[#allocation364_spill] sm:$0xff] }
 0x3d3   :  { %5257 = vmatpush.msra.mxu1 %v8747_v43  ;;  %5292 = vmatpush.msra.mxu2 %v12084_v3  ;;  %v12091_v43 = vld [vmem:[#allocation296_spill] sm:$0xff] }
 0x3d4   :  { %5196 = vmatpush.msra.mxu0 %v12085_v19  ;;  %5371 = vmatpush.msra.mxu3 %v12086_v48  ;;  %v12135_v10 = vld [vmem:[#allocation396_spill] sm:$0xff]  ;;  %v12137_v48 = vld [vmem:[#allocation397_spill] sm:$0xff] }
 0x3d5   :  { %5259 = vmatpush.msra.mxu1 %v8768_v30  ;;  %5294 = vmatpush.msra.mxu2 %v12087_v41  ;;  %v5306_v30 = vsub.f32 %v10295_v7, %v5305_v50 }
 0x3d6   :  { %5200 = vmatpush.msra.mxu0 %v12088_v31  ;;  %5377 = vmatpush.msra.mxu3 %v12089_v46  ;;  %v12140_v31 = vld [vmem:[#allocation398_spill] sm:$0xff]  ;;  %v12141_v46 = vld [vmem:[#allocation388_spill] sm:$0xff] }
 0x3d7   :  { %5261 = vmatpush.msra.mxu1 %v8784_v44  ;;  %5296 = vmatpush.msra.mxu2 %v12090_v9  ;;  %v12096_v44 = vld [vmem:[#allocation365_spill] sm:$0xff]  ;;  %v5307_v8 = vand.u32 4294901760, %v5306_v30  ;;  %v12145_v30 = vld [vmem:[#allocation391_spill] sm:$0xff] }
 0x3d8   :  { %5204 = vmatpush.msra.mxu0 %v12091_v43  ;;  %5383 = vmatpush.msra.mxu3 %v12092_v32  ;;  %v12143_v43 = vld [vmem:[#allocation375_spill] sm:$0xff] }
 0x3d9   :  { %5263 = vmatpush.msra.mxu1 %v12056_v26  ;;  %5298 = vmatpush.msra.mxu2 %v12093_v25  ;;  %v12107_v26 = vld [vmem:[#allocation331_spill] sm:$0xff] }
 0x3da   :  { %5208 = vmatpush.msra.mxu0 %v12094_v49  ;;  %5389 = vmatpush.msra.mxu3 %v12095_v60  ;;  %v12146_v49 = vld [vmem:[#allocation385_spill] sm:$0xff]  ;;  %v12148_v60 = vld [vmem:[#allocation387_spill] sm:$0xff] }
 0x3db   :  { %5265 = vmatpush.msra.mxu1 %v12058_v58  ;;  %5300 = vmatpush.msra.mxu2 %v12096_v44  ;;  %v12108_v58 = vld [vmem:[#allocation324_spill] sm:$0xff] }
 0x3dc   :  { %5212 = vmatpush.msra.mxu0 %v12097_v38  ;;  %5395 = vmatpush.msra.mxu3 %v12098_v35  ;;  %v12149_v38 = vld [vmem:[#allocation389_spill] sm:$0xff]  ;;  %v12150_v35 = vld [vmem:[#allocation400_spill] sm:$0xff] }
 0x3dd   :  { %5267 = vmatmul.f32.vlgmr.msra.gmra.mxu1 %v10232_v1  ;;  %5302 = vmatpush.msra.mxu2 %v12099_v62 }
 0x3de   :  { %5468 = vmatpush.msrb.mxu1 %v12057_v13  ;;  %5216 = vmatpush.msra.mxu0 %v12100_v52  ;;  %v12153_v52 = vld [vmem:[#allocation407_spill] sm:$0xff] }
 0x3df   :  { %5401 = vmatpush.msra.mxu3 %v12101_v6  ;;  %5308 = vmatmul.f32.vlgmr.msra.gmra.mxu2 %v5307_v8  ;;  %v12152_v8 = vld [vmem:[#allocation390_spill] sm:$0xff]  ;;  %v12154_v6 = vld [vmem:[#allocation392_spill] sm:$0xff] }
 0x3e0   :  { %5470 = vmatpush.msrb.mxu1 %v12059_v47  ;;  %5509 = vmatpush.msrb.mxu2 %v12102_v36  ;;  %v12155_v36 = vld [vmem:[#allocation402_spill] sm:$0xff] }
 0x3e1   :  { %5220 = vmatpush.msra.mxu0 %v12103_v28  ;;  %5407 = vmatpush.msra.mxu3 %v12104_v34  ;;  %v12156_v28 = vld [vmem:[#allocation394_spill] sm:$0xff]  ;;  %v12157_v34 = vld [vmem:[#allocation403_spill] sm:$0xff] }
 0x3e2   :  { %5409 = vmatmul.f32.vlgmr.msra.gmra.mxu3 %v10284_v45  ;;  %5472 = vmatpush.msrb.mxu1 %v12061_v12 }
 0x3e3   :  { %5513 = vmatpush.msrb.mxu2 %v12105_v22  ;;  %5576 = vmatpush.msrb.mxu3 %v12057_v13  ;;  %v12111_v13 = vld [vmem:[#allocation338_spill] sm:$0xff]  ;;  %v3604_v22 = vpop.f32.mrf.mxu0 }
 0x3e4   :  { %5224 = vmatpush.msra.mxu0 %v12106_v4  ;;  %5474 = vmatpush.msrb.mxu1 %v12063_v56  ;;  %v12158_v4 = vld [vmem:[#allocation395_spill] sm:$0xff] }
 0x3e5   :  { %5517 = vmatpush.msrb.mxu2 %v12107_v26  ;;  %5578 = vmatpush.msrb.mxu3 %v12059_v47  ;;  %v12113_v47 = vld [vmem:[#allocation343_spill] sm:$0xff]  ;;  %v12159_v26 = vld [vmem:[#allocation414_spill] sm:$0xff] }
 0x3e6   :  { %5228 = vmatpush.msra.mxu0 %v12108_v58  ;;  %5476 = vmatpush.msrb.mxu1 %v12066_v55  ;;  %v12160_v58 = vld [vmem:[#allocation405_spill] sm:$0xff] }
 0x3e7   :  { %5230 = vmatmul.f32.vlgmr.msra.gmra.mxu0 %v10232_v1  ;;  %5521 = vmatpush.msrb.mxu2 %v12109_v18  ;;  %v12115_v1 = vld [vmem:[#allocation347_spill] sm:$0xff]  ;;  %v3705_v18 = vpop.f32.mrf.mxu1 }
 0x3e8   :  { %5415 = vmatpush.msrb.mxu0 %v12110_v33  ;;  %5580 = vmatpush.msrb.mxu3 %v12061_v12  ;;  %v12116_v12 = vld [vmem:[#allocation326_spill] sm:$0xff]  ;;  %v12161_v33 = vld [vmem:[#allocation401_spill] sm:$0xff] }
 0x3e9   :  { %5478 = vmatpush.msrb.mxu1 %v12069_v15  ;;  %5525 = vmatpush.msrb.mxu2 %v12111_v13  ;;  %v12162_v13 = vld [vmem:[#allocation415_spill] sm:$0xff] }
 0x3ea   :  { %5418 = vmatpush.msrb.mxu0 %v12112_v63  ;;  %5582 = vmatpush.msrb.mxu3 %v12063_v56  ;;  %v12118_v56 = vld [vmem:[#allocation330_spill] sm:$0xff]  ;;  %v3706_v63 = vadd.f32 %v3705_v18, %v3604_v22 }
 0x3eb   :  { %5480 = vmatpush.msrb.mxu1 %v12072_v24  ;;  %5529 = vmatpush.msrb.mxu2 %v12113_v47  ;;  %v12163_v47 = vld [vmem:[#allocation404_spill] sm:$0xff] }
 0x3ec   :  { %5421 = vmatpush.msrb.mxu0 %v12114_v16  ;;  %5584 = vmatpush.msrb.mxu3 %v12066_v55  ;;  %v12120_v55 = vld [vmem:[#allocation335_spill] sm:$0xff]  ;;  %v12164_v16 = vld [vmem:[#allocation408_spill] sm:$0xff] }
 0x3ed   :  { %5482 = vmatpush.msrb.mxu1 %v12075_v11  ;;  %5533 = vmatpush.msrb.mxu2 %v12115_v1  ;;  %v3759_v1 = vpop.f32.mrf.mxu2 }
 0x3ee   :  { %5424 = vmatpush.msrb.mxu0 %v12116_v12  ;;  %5586 = vmatpush.msrb.mxu3 %v12069_v15  ;;  %v12123_v15 = vld [vmem:[#allocation363_spill] sm:$0xff]  ;;  %v3760_v12 = vadd.f32 %v3759_v1, %v3706_v63 }
 0x3ef   :  { %5484 = vmatpush.msrb.mxu1 %v12078_v54  ;;  %5537 = vmatpush.msrb.mxu2 %v12117_v20  ;;  %v12165_v20 = vld [vmem:[#allocation409_spill] sm:$0xff] }
 0x3f0   :  { %5427 = vmatpush.msrb.mxu0 %v12118_v56  ;;  %5588 = vmatpush.msrb.mxu3 %v12072_v24  ;;  %v3557_v24 = vld.sshfl [vmem:[#allocation1 + $0x30] sm:$0xff pattern:$0x73625140]  ;;  %v3798_v56 = vpop.f32.mrf.mxu3 }
 0x3f1   :  { %5486 = vmatpush.msrb.mxu1 %v12081_v42  ;;  %5541 = vmatpush.msrb.mxu2 %v12119_v57  ;;  %v3564_v23 = vsel %vm168_vm0, %v3557_v24, 0  ;;  %v3867_v57 = vpop.f32.mrf.mxu0 }
 0x3f2   :  { %5430 = vmatpush.msrb.mxu0 %v12120_v55  ;;  %5590 = vmatpush.msrb.mxu3 %v12075_v11  ;;  %v12129_v11 = vld [vmem:[#allocation374_spill] sm:$0xff]  ;;  %v5632_v53 = vand.u32 4294901760, %v3564_v23  ;;  %v3799_v55 = vadd.f32 %v3798_v56, %v3760_v12 }
 0x3f3   :  { %5488 = vmatpush.msrb.mxu1 %v12084_v3  ;;  %5545 = vmatpush.msrb.mxu2 %v12121_v59 }
 0x3f4   :  { %5433 = vmatpush.msrb.mxu0 %v12122_v37  ;;  %5592 = vmatpush.msrb.mxu3 %v12078_v54  ;;  %v12131_v54 = vld [vmem:[#allocation377_spill] sm:$0xff]  ;;  %v5633_v19 = vsub.f32 %v3564_v23, %v5632_v53  ;;  %v3868_v59 = vadd.f32 %v3867_v57, %v3799_v55  ;;  %v3904_v37 = vpop.f32.mrf.mxu1 }
 0x3f5   :  { %5490 = vmatpush.msrb.mxu1 %v12087_v41  ;;  %5549 = vmatpush.msrb.mxu2 %v12123_v15 }
 0x3f6   :  { %5436 = vmatpush.msrb.mxu0 %v12124_v61  ;;  %5594 = vmatpush.msrb.mxu3 %v12081_v42  ;;  %v12133_v42 = vld [vmem:[#allocation379_spill] sm:$0xff]  ;;  %v5634_v32 = vand.u32 4294901760, %v5633_v19  ;;  %v3905_v15 = vadd.f32 %v3904_v37, %v3868_v59  ;;  %v3945_v61 = vpop.f32.mrf.mxu2 }
 0x3f7   :  { %5492 = vmatpush.msrb.mxu1 %v12090_v9  ;;  %5553 = vmatpush.msrb.mxu2 %v12125_v14 }
 0x3f8   :  { %5439 = vmatpush.msrb.mxu0 %v12126_v39  ;;  %5596 = vmatpush.msrb.mxu3 %v12084_v3  ;;  %v12136_v3 = vld [vmem:[#allocation368_spill] sm:$0xff]  ;;  %v3946_v14 = vadd.f32 %v3945_v61, %v3905_v15  ;;  %v4046_v39 = vpop.f32.mrf.mxu3 }
 0x3f9   :  { %5494 = vmatpush.msrb.mxu1 %v12093_v25  ;;  %5557 = vmatpush.msrb.mxu2 %v12127_v29  ;;  %v4100_v24 = vpop.f32.mrf.mxu0 }
 0x3fa   :  { %5442 = vmatpush.msrb.mxu0 %v12128_v51  ;;  %5598 = vmatpush.msrb.mxu3 %v12087_v41  ;;  %v12138_v41 = vld [vmem:[#allocation386_spill] sm:$0xff]  ;;  %v4047_v29 = vadd.f32 %v4046_v39, %v3946_v14 }
 0x3fb   :  { %5496 = vmatpush.msrb.mxu1 %v12096_v44  ;;  %5561 = vmatpush.msrb.mxu2 %v12129_v11 }
 0x3fc   :  { %5445 = vmatpush.msrb.mxu0 %v12130_v40  ;;  %5600 = vmatpush.msrb.mxu3 %v12090_v9  ;;  %v12142_v9 = vld [vmem:[#allocation384_spill] sm:$0xff]  ;;  %v4101_v51 = vadd.f32 %v4100_v24, %v4047_v29  ;;  %v4139_v11 = vpop.f32.mrf.mxu1 }
 0x3fd   :  { %5498 = vmatpush.msrb.mxu1 %v12099_v62  ;;  %5565 = vmatpush.msrb.mxu2 %v12131_v54 }
 0x3fe   :  { %5448 = vmatpush.msrb.mxu0 %v12132_v17  ;;  %5602 = vmatpush.msrb.mxu3 %v12093_v25  ;;  %v12144_v25 = vld [vmem:[#allocation399_spill] sm:$0xff]  ;;  %v4140_v23 = vadd.f32 %v4139_v11, %v4101_v51  ;;  %v4208_v40 = vpop.f32.mrf.mxu2 }
 0x3ff   :  { %5502 = vmatmul.f32.vlgmr.msrb.gmra.mxu1 %v5305_v50  ;;  %5569 = vmatpush.msrb.mxu2 %v12133_v42  ;;  %v12139_v50 = vld [vmem:[#allocation372_spill] sm:$0xff] }
 0x400   :  { %5451 = vmatpush.msrb.mxu0 %v12134_v5  ;;  %5604 = vmatpush.msrb.mxu3 %v12096_v44  ;;  %v5635_v44 = vsub.f32 %v5633_v19, %v5634_v32  ;;  %v4209_v54 = vadd.f32 %v4208_v40, %v4140_v23  ;;  %v4245_v17 = vpop.f32.mrf.mxu3 }
 0x401   :  { %5658 = vmatpush.msra.mxu1 %v12135_v10  ;;  %5571 = vmatmul.f32.vlgmr.msrb.gmra.mxu2 %v10284_v45 }
 0x402   :  { %5454 = vmatpush.msrb.mxu0 %v12136_v3  ;;  %5606 = vmatpush.msrb.mxu3 %v12099_v62  ;;  %v12151_v62 = vld [vmem:[#allocation406_spill] sm:$0xff]  ;;  %v4246_v42 = vadd.f32 %v4245_v17, %v4209_v54 }
 0x403   :  { %5664 = vmatpush.msra.mxu1 %v12137_v48  ;;  %5696 = vmatpush.msra.mxu2 %v12138_v41 }
 0x404   :  { %5608 = vmatmul.f32.vlgmr.msrb.gmra.mxu3 %v10284_v45  ;;  %5457 = vmatpush.msrb.mxu0 %v12139_v50  ;;  %v12147_v45 = vld [vmem:[#allocation393_spill] sm:$0xff]  ;;  %v4387_v10 = vpop.f32.mrf.mxu1 }
 0x405   :  { %5670 = vmatpush.msra.mxu1 %v12140_v31  ;;  %5699 = vmatpush.msra.mxu2 %v12141_v46 }
 0x406   :  { %5725 = vmatpush.msra.mxu3 %v12142_v9  ;;  %5460 = vmatpush.msrb.mxu0 %v12143_v43 }
 0x407   :  { %5676 = vmatpush.msra.mxu1 %v12144_v25  ;;  %5702 = vmatpush.msra.mxu2 %v12145_v30 }
 0x408   :  { %5727 = vmatpush.msra.mxu3 %v12146_v49  ;;  %5463 = vmatmul.f32.vlgmr.msrb.gmra.mxu0 %v10295_v7  ;;  %v5636_v7 = vand.u32 4294901760, %v5635_v44  ;;  %v4480_v41 = vpop.f32.mrf.mxu3 }
 0x409   :  { %5625 = vmatpush.msra.mxu0 %v12142_v9  ;;  %5678 = vmatmul.f32.vlgmr.msra.gmra.mxu1 %v5632_v53 }
 0x40a   :  { %5705 = vmatpush.msra.mxu2 %v12147_v45  ;;  %5729 = vmatpush.msra.mxu3 %v12148_v60 }
 0x40b   :  { %5785 = vmatpush.msrb.mxu1 %v12142_v9  ;;  %5627 = vmatpush.msra.mxu0 %v12146_v49 }
 0x40c   :  { %5708 = vmatmul.f32.vlgmr.msra.gmra.mxu2 %v5633_v19  ;;  %5731 = vmatpush.msra.mxu3 %v12149_v38  ;;  %v4441_v19 = vpop.f32.mrf.mxu2  ;;  %v4586_v9 = vpop.f32.mrf.mxu1 }
 0x40d   :  { %5787 = vmatpush.msrb.mxu1 %v12146_v49  ;;  %5629 = vmatpush.msra.mxu0 %v12148_v60 }
 0x40e   :  { %5735 = vmatmul.f32.vlgmr.msra.gmra.mxu3 %v5634_v32  ;;  %5816 = vmatpush.msrb.mxu2 %v12150_v35 }
 0x40f   :  { %5789 = vmatpush.msrb.mxu1 %v12148_v60  ;;  %5631 = vmatpush.msra.mxu0 %v12149_v38 }
 0x410   :  { %5637 = vmatmul.f32.vlgmr.msra.gmra.mxu0 %v5636_v7  ;;  %5847 = vmatpush.msrb.mxu3 %v12151_v62  ;;  %v4728_v30 = vpop.f32.mrf.mxu3 }
 0x411   :  { %5791 = vmatpush.msrb.mxu1 %v12149_v38  ;;  %5754 = vmatpush.msrb.mxu0 %v12152_v8 }
 0x412   :  { %5793 = vmatmul.f32.vlgmr.msrb.gmra.mxu1 %v5632_v53  ;;  %5853 = vmatpush.msrb.mxu3 %v12153_v52 }
 0x413   :  { %5758 = vmatpush.msrb.mxu0 %v12154_v6  ;;  %5900 = vmatpush.msra.mxu1 %v12150_v35 }
 0x414   :  { %5818 = vmatpush.msrb.mxu2 %v12155_v36  ;;  %5952 = vmatpush.msra.mxu3 %v12150_v35  ;;  %v4627_v32 = vpop.f32.mrf.mxu2 }
 0x415   :  { %5762 = vmatpush.msrb.mxu0 %v12156_v28  ;;  %5902 = vmatpush.msra.mxu1 %v12155_v36 }
 0x416   :  { %5954 = vmatpush.msra.mxu3 %v12155_v36  ;;  %5927 = vmatpush.msra.mxu2 %v12157_v34  ;;  %v4821_v44 = vpop.f32.mrf.mxu1 }
 0x417   :  { %5766 = vmatpush.msrb.mxu0 %v12158_v4  ;;  %6006 = vmatpush.msrb.mxu1 %v12159_v26 }
 0x418   :  { %5768 = vmatmul.f32.vlgmr.msrb.gmra.mxu0 %v5632_v53  ;;  %5931 = vmatpush.msra.mxu2 %v12160_v58  ;;  %v4286_v53 = vpop.f32.mrf.mxu0 }
 0x419   :  { %5875 = vmatpush.msra.mxu0 %v12161_v33  ;;  %6012 = vmatpush.msrb.mxu1 %v12162_v13  ;;  %v4287_v5 = vadd.f32 %v4286_v53, %v4246_v42 }
 0x41b   :  { %5878 = vmatpush.msra.mxu0 %v12163_v47  ;;  %v4388_v3 = vadd.f32 %v4387_v10, %v4287_v5 }
 0x41d   :  { %5975 = vmatpush.msrb.mxu0 %v12164_v16  ;;  %v4442_v48 = vadd.f32 %v4441_v19, %v4388_v3 }
 0x41e   :  { %v4890_v7 = vpop.f32.mrf.mxu2 }
 0x41f   :  { %5977 = vmatpush.msrb.mxu0 %v12165_v20  ;;  %v4481_v31 = vadd.f32 %v4480_v41, %v4442_v48 }
 0x420   :  { %v4549_v50 = vpop.f32.mrf.mxu0 }
 0x421   :  { %v4550_v46 = vadd.f32 %v4549_v50, %v4481_v31  ;;  %v4927_v62 = vpop.f32.mrf.mxu3  ;;  %v12166_v50 = vld [vmem:[#allocation411_spill] sm:$0xff] }
 0x423   :  { %v4587_v43 = vadd.f32 %v4586_v9, %v4550_v46  ;;  %v12167_v46 = vld [vmem:[#allocation413_spill] sm:$0xff] }
 0x425   :  { %v4628_v25 = vadd.f32 %v4627_v32, %v4587_v43  ;;  %v12168_v43 = vld [vmem:[#allocation410_spill] sm:$0xff]  ;;  %v12169_v32 = vld [vmem:[#allocation424_spill] sm:$0xff] }
 0x427   :  { %v4729_v45 = vadd.f32 %v4728_v30, %v4628_v25  ;;  %v12170_v25 = vld [vmem:[#allocation412_spill] sm:$0xff]  ;;  %v12171_v30 = vld [vmem:[#allocation426_spill] sm:$0xff] }
 0x428   :  { %v4782_v49 = vpop.f32.mrf.mxu0 }
 0x429   :  { %v4783_v60 = vadd.f32 %v4782_v49, %v4729_v45  ;;  %v12173_v49 = vld [vmem:[#allocation416_spill] sm:$0xff]  ;;  %v12175_v45 = vld [vmem:[#allocation417_spill] sm:$0xff] }
 0x42b   :  { %v4822_v38 = vadd.f32 %v4821_v44, %v4783_v60  ;;  %v12176_v60 = vld [vmem:[#allocation422_spill] sm:$0xff]  ;;  %v12177_v44 = vld [vmem:[#allocation432_spill] sm:$0xff] }
 0x42d   :  { %v4891_v35 = vadd.f32 %v4890_v7, %v4822_v38  ;;  %v12178_v38 = vld [vmem:[#allocation423_spill] sm:$0xff]  ;;  %v12179_v7 = vld [vmem:[#allocation434_spill] sm:$0xff] }
 0x42f   :  { %v4928_v52 = vadd.f32 %v4927_v62, %v4891_v35  ;;  %v12180_v35 = vld [vmem:[#allocation420_spill] sm:$0xff]  ;;  %v12181_v62 = vld [vmem:[#allocation421_spill] sm:$0xff] }
 0x438   :  { %v5069_v36 = vpop.f32.mrf.mxu1 }
 0x440   :  { %v5123_v34 = vpop.f32.mrf.mxu2 }
 0x442   :  { %v4968_v8 = vpop.f32.mrf.mxu0 }
 0x443   :  { %v4969_v6 = vadd.f32 %v4968_v8, %v4928_v52  ;;  %v5162_v4 = vpop.f32.mrf.mxu3  ;;  %v12182_v8 = vld [vmem:[#allocation428_spill] sm:$0xff]  ;;  %v12183_v52 = vld [vmem:[#allocation429_spill] sm:$0xff] }
 0x445   :  { %v5070_v28 = vadd.f32 %v5069_v36, %v4969_v6  ;;  %v12184_v6 = vld [vmem:[#allocation425_spill] sm:$0xff]  ;;  %v12185_v36 = vld [vmem:[#allocation440_spill] sm:$0xff] }
 0x447   :  { %v5124_v22 = vadd.f32 %v5123_v34, %v5070_v28  ;;  %v12186_v28 = vld [vmem:[#allocation427_spill] sm:$0xff]  ;;  %v12187_v34 = vld [vmem:[#allocation442_spill] sm:$0xff] }
 0x449   :  { %v5163_v58 = vadd.f32 %v5162_v4, %v5124_v22  ;;  %v12188_v22 = vld [vmem:[#allocation433_spill] sm:$0xff]  ;;  %v12189_v4 = vld [vmem:[#allocation430_spill] sm:$0xff] }
 0x45a   :  { %v5268_v33 = vpop.f32.mrf.mxu1 }
 0x462   :  { %v5309_v63 = vpop.f32.mrf.mxu2 }
 0x464   :  { %v5231_v26 = vpop.f32.mrf.mxu0 }
 0x465   :  { %v5232_v18 = vadd.f32 %v5231_v26, %v5163_v58  ;;  %v5410_v1 = vpop.f32.mrf.mxu3  ;;  %v12190_v26 = vld [vmem:[#allocation435_spill] sm:$0xff] }
 0x466   :  { %v12191_v58 = vld [vmem:[#allocation431_spill] sm:$0xff] }
 0x467   :  { %v5269_v13 = vadd.f32 %v5268_v33, %v5232_v18  ;;  %v12192_v18 = vld [vmem:[#allocation438_spill] sm:$0xff]  ;;  %v12193_v33 = vld [vmem:[#allocation448_spill] sm:$0xff] }
 0x469   :  { %v5310_v47 = vadd.f32 %v5309_v63, %v5269_v13  ;;  %v12194_v13 = vld [vmem:[#allocation439_spill] sm:$0xff]  ;;  %v12195_v63 = vld [vmem:[#allocation450_spill] sm:$0xff] }
 0x46b   :  { %v5411_v56 = vadd.f32 %v5410_v1, %v5310_v47  ;;  %v12196_v47 = vld [vmem:[#allocation436_spill] sm:$0xff]  ;;  %v12197_v1 = vld [vmem:[#allocation437_spill] sm:$0xff] }
 0x47c   :  { %v5503_v12 = vpop.f32.mrf.mxu1 }
 0x484   :  { %v5572_v59 = vpop.f32.mrf.mxu2 }
 0x485   :  { %v5464_v57 = vpop.f32.mrf.mxu0 }
 0x486   :  { %v5465_v55 = vadd.f32 %v5464_v57, %v5411_v56  ;;  %v5679_v39 = vpop.f32.mrf.mxu1  ;;  %v12199_v56 = vld [vmem:[#allocation445_spill] sm:$0xff] }
 0x487   :  { %v5609_v15 = vpop.f32.mrf.mxu3  ;;  %v12200_v57 = vld [vmem:[#allocation441_spill] sm:$0xff] }
 0x488   :  { %v5504_v37 = vadd.f32 %v5503_v12, %v5465_v55  ;;  %v12198_v12 = vld [vmem:[#allocation444_spill] sm:$0xff]  ;;  %v12201_v55 = vld [vmem:[#allocation454_spill] sm:$0xff] }
 0x48a   :  { %v5573_v61 = vadd.f32 %v5572_v59, %v5504_v37  ;;  %v12202_v59 = vld [vmem:[#allocation443_spill] sm:$0xff] }
 0x48b   :  { %v12203_v37 = vld [vmem:[#allocation455_spill] sm:$0xff] }
 0x48c   :  { %v5610_v14 = vadd.f32 %v5609_v15, %v5573_v61  ;;  %v12204_v15 = vld [vmem:[#allocation449_spill] sm:$0xff]  ;;  %v12205_v61 = vld [vmem:[#allocation446_spill] sm:$0xff] }
 0x48d   :  { %v5638_v24 = vpop.f32.mrf.mxu0 }
 0x48e   :  { %v5639_v29 = vadd.f32 %v5638_v24, %v5610_v14  ;;  %v12206_v14 = vld [vmem:[#allocation451_spill] sm:$0xff]  ;;  %v12208_v24 = vld [vmem:[#allocation452_spill] sm:$0xff] }
 0x48f   :  { %v5709_v11 = vpop.f32.mrf.mxu2  ;;  %v5794_v42 = vpop.f32.mrf.mxu1 }
 0x490   :  { %v5680_v51 = vadd.f32 %v5679_v39, %v5639_v29  ;;  %v12207_v39 = vld [vmem:[#allocation447_spill] sm:$0xff]  ;;  %v12209_v29 = vld [vmem:[#allocation453_spill] sm:$0xff] }
 0x491   :  { %v5736_v40 = vpop.f32.mrf.mxu3 }
 0x492   :  { %v5710_v23 = vadd.f32 %v5709_v11, %v5680_v51 }
 0x494   :  { %v5737_v54 = vadd.f32 %v5736_v40, %v5710_v23 }
 0x495   :  { %v5769_v17 = vpop.f32.mrf.mxu0 }
 0x496   :  { %v5770_v53 = vadd.f32 %v5769_v17, %v5737_v54 }
 0x498   :  { %v5795_v5 = vadd.f32 %v5794_v42, %v5770_v53 }
 0x49a   :  { %v5797_v10 = vmul.f32 0.02, %v5795_v5 }
 0x49c   :  { %v5799_v3 = vsel %vm2403_vm1, %v5797_v10, 0 }
 0x49d   :  { %v10444_v19 = vand.u32 4294901760, %v5799_v3 }
 0x49f   :  { %v10447_v48 = vsub.f32 %v5799_v3, %v10444_v19  ;;  %5855 = vmatmul.f32.vlgmr.msrb.gmra.mxu3 %v10444_v19 }
 0x4a0   :  { %6059 = vmatpush.msrb.mxu3 %v12164_v16 }
 0x4a1   :  { %5881 = vmatmul.f32.vlgmr.msra.gmra.mxu0 %v10447_v48  ;;  %v10453_v41 = vand.u32 4294901760, %v10447_v48 }
 0x4a2   :  { %6061 = vmatpush.msrb.mxu3 %v12165_v20  ;;  %6086 = vmatpush.msra.mxu0 %v12166_v50 }
 0x4a3   :  { %5906 = vmatmul.f32.vlgmr.msra.gmra.mxu1 %v10453_v41  ;;  %v5822_v31 = vsub.f32 %v10447_v48, %v10453_v41 }
 0x4a4   :  { %6090 = vmatpush.msra.mxu0 %v12167_v46  ;;  %6111 = vmatpush.msra.mxu1 %v12164_v16  ;;  %v12172_v16 = vld [vmem:[#allocation418_spill] sm:$0xff] }
 0x4a5   :  { %v10462_v9 = vand.u32 4294901760, %v5822_v31 }
 0x4a6   :  { %6113 = vmatpush.msra.mxu1 %v12165_v20  ;;  %v12174_v20 = vld [vmem:[#allocation419_spill] sm:$0xff] }
 0x4a7   :  { %5824 = vmatmul.f32.vlgmr.msrb.gmra.mxu2 %v10462_v9  ;;  %5956 = vmatmul.f32.vlgmr.msra.gmra.mxu3 %v10444_v19 }
 0x4a8   :  { %6034 = vmatpush.msrb.mxu2 %v12168_v43  ;;  %6165 = vmatpush.msra.mxu3 %v12169_v32 }
 0x4a9   :  { %5983 = vmatmul.f32.vlgmr.msrb.gmra.mxu0 %v10462_v9 }
 0x4aa   :  { %6037 = vmatpush.msrb.mxu2 %v12170_v25  ;;  %6171 = vmatpush.msra.mxu3 %v12171_v30 }
 0x4ab   :  { %6014 = vmatmul.f32.vlgmr.msrb.gmra.mxu1 %v10444_v19  ;;  %6193 = vmatpush.msrb.mxu0 %v12172_v16 }
 0x4ac   :  { %6218 = vmatpush.msrb.mxu1 %v12173_v49 }
 0x4ad   :  { %6196 = vmatpush.msrb.mxu0 %v12174_v20 }
 0x4ae   :  { %6220 = vmatpush.msrb.mxu1 %v12175_v45 }
 0x4af   :  { %5933 = vmatmul.f32.vlgmr.msra.gmra.mxu2 %v10444_v19  ;;  %6065 = vmatmul.f32.vlgmr.msrb.gmra.mxu3 %v10453_v41 }
 0x4b0   :  { %6134 = vmatpush.msra.mxu2 %v12173_v49  ;;  %6270 = vmatpush.msrb.mxu3 %v12173_v49 }
 0x4b1   :  { %6092 = vmatmul.f32.vlgmr.msra.gmra.mxu0 %v10444_v19 }
 0x4b2   :  { %6136 = vmatpush.msra.mxu2 %v12175_v45  ;;  %6272 = vmatpush.msrb.mxu3 %v12175_v45 }
 0x4b3   :  { %6115 = vmatmul.f32.vlgmr.msra.gmra.mxu1 %v10444_v19  ;;  %6293 = vmatpush.msra.mxu0 %v12176_v60 }
 0x4b4   :  { %6324 = vmatpush.msra.mxu1 %v12177_v44 }
 0x4b5   :  { %6295 = vmatpush.msra.mxu0 %v12178_v38 }
 0x4b6   :  { %6330 = vmatpush.msra.mxu1 %v12179_v7  ;;  %v10566_v7 = vpop.permute.xlu0 %6926 }
 0x4b7   :  { %6040 = vmatmul.f32.vlgmr.msrb.gmra.mxu2 %v10447_v48  ;;  %6173 = vmatmul.f32.vlgmr.msra.gmra.mxu3 %v10444_v19 }
 0x4b8   :  { %6245 = vmatpush.msrb.mxu2 %v12180_v35  ;;  %6377 = vmatpush.msra.mxu3 %v12176_v60 }
 0x4b9   :  { %6199 = vmatmul.f32.vlgmr.msrb.gmra.mxu0 %v10447_v48 }
 0x4ba   :  { %6249 = vmatpush.msrb.mxu2 %v12181_v62  ;;  %6379 = vmatpush.msra.mxu3 %v12178_v38 }
 0x4bb   :  { %6224 = vmatmul.f32.vlgmr.msrb.gmra.mxu1 %v10453_v41  ;;  %6404 = vmatpush.msrb.mxu0 %v12182_v8 }
 0x4bc   :  { %6429 = vmatpush.msrb.mxu1 %v12176_v60 }
 0x4bd   :  { %6408 = vmatpush.msrb.mxu0 %v12183_v52 }
 0x4be   :  { %6431 = vmatpush.msrb.mxu1 %v12178_v38 }
 0x4bf   :  { %6142 = vmatmul.f32.vlgmr.msra.gmra.mxu2 %v10462_v9  ;;  %6274 = vmatmul.f32.vlgmr.msrb.gmra.mxu3 %v10444_v19 }
 0x4c0   :  { %6352 = vmatpush.msra.mxu2 %v12184_v6  ;;  %6483 = vmatpush.msrb.mxu3 %v12185_v36 }
 0x4c1   :  { %6301 = vmatmul.f32.vlgmr.msra.gmra.mxu0 %v10462_v9 }
 0x4c2   :  { %6355 = vmatpush.msra.mxu2 %v12186_v28  ;;  %6489 = vmatpush.msrb.mxu3 %v12187_v34 }
 0x4c3   :  { %6332 = vmatmul.f32.vlgmr.msra.gmra.mxu1 %v10444_v19  ;;  %6511 = vmatpush.msra.mxu0 %v12188_v22 }
 0x4c4   :  { %6536 = vmatpush.msra.mxu1 %v12189_v4 }
 0x4c5   :  { %6514 = vmatpush.msra.mxu0 %v12190_v26 }
 0x4c6   :  { %6538 = vmatpush.msra.mxu1 %v12191_v58 }
 0x4c7   :  { %6251 = vmatmul.f32.vlgmr.msrb.gmra.mxu2 %v10444_v19  ;;  %6383 = vmatmul.f32.vlgmr.msra.gmra.mxu3 %v10453_v41 }
 0x4c8   :  { %6452 = vmatpush.msrb.mxu2 %v12189_v4  ;;  %6588 = vmatpush.msra.mxu3 %v12189_v4 }
 0x4c9   :  { %6410 = vmatmul.f32.vlgmr.msrb.gmra.mxu0 %v10444_v19 }
 0x4ca   :  { %6454 = vmatpush.msrb.mxu2 %v12191_v58  ;;  %6590 = vmatpush.msra.mxu3 %v12191_v58 }
 0x4cb   :  { %6433 = vmatmul.f32.vlgmr.msrb.gmra.mxu1 %v10444_v19  ;;  %6611 = vmatpush.msrb.mxu0 %v12192_v18 }
 0x4cc   :  { %6642 = vmatpush.msrb.mxu1 %v12193_v33 }
 0x4cd   :  { %6613 = vmatpush.msrb.mxu0 %v12194_v13 }
 0x4ce   :  { %6648 = vmatpush.msrb.mxu1 %v12195_v63 }
 0x4cf   :  { %6358 = vmatmul.f32.vlgmr.msra.gmra.mxu2 %v10447_v48  ;;  %6491 = vmatmul.f32.vlgmr.msrb.gmra.mxu3 %v10444_v19 }
 0x4d0   :  { %6563 = vmatpush.msra.mxu2 %v12196_v47  ;;  %6695 = vmatpush.msrb.mxu3 %v12192_v18 }
 0x4d1   :  { %6517 = vmatmul.f32.vlgmr.msra.gmra.mxu0 %v10447_v48 }
 0x4d2   :  { %6567 = vmatpush.msra.mxu2 %v12197_v1  ;;  %6697 = vmatpush.msrb.mxu3 %v12194_v13 }
 0x4d3   :  { %6542 = vmatmul.f32.vlgmr.msra.gmra.mxu1 %v10453_v41  ;;  %6722 = vmatpush.msra.mxu0 %v12198_v12 }
 0x4d4   :  { %6747 = vmatpush.msra.mxu1 %v12192_v18 }
 0x4d5   :  { %6726 = vmatpush.msra.mxu0 %v12199_v56 }
 0x4d6   :  { %6749 = vmatpush.msra.mxu1 %v12194_v13 }
 0x4d7   :  { %6460 = vmatmul.f32.vlgmr.msrb.gmra.mxu2 %v10462_v9  ;;  %6592 = vmatmul.f32.vlgmr.msra.gmra.mxu3 %v10444_v19 }
 0x4d8   :  { %6670 = vmatpush.msrb.mxu2 %v12200_v57  ;;  %6801 = vmatpush.msra.mxu3 %v12201_v55 }
 0x4d9   :  { %6619 = vmatmul.f32.vlgmr.msrb.gmra.mxu0 %v10462_v9 }
 0x4da   :  { %6673 = vmatpush.msrb.mxu2 %v12202_v59  ;;  %6807 = vmatpush.msra.mxu3 %v12203_v37 }
 0x4db   :  { %6650 = vmatmul.f32.vlgmr.msrb.gmra.mxu1 %v10444_v19  ;;  %6829 = vmatpush.msrb.mxu0 %v12204_v15 }
 0x4dc   :  { %6854 = vmatpush.msrb.mxu1 %v12205_v61 }
 0x4dd   :  { %6832 = vmatpush.msrb.mxu0 %v12206_v14 }
 0x4de   :  { %6856 = vmatpush.msrb.mxu1 %v12207_v39 }
 0x4df   :  { %6569 = vmatmul.f32.vlgmr.msra.gmra.mxu2 %v10444_v19  ;;  %6701 = vmatmul.f32.vlgmr.msrb.gmra.mxu3 %v10453_v41 }
 0x4e0   :  { %6770 = vmatpush.msra.mxu2 %v12205_v61  ;;  %6906 = vmatpush.msrb.mxu3 %v12205_v61 }
 0x4e1   :  { %6728 = vmatmul.f32.vlgmr.msra.gmra.mxu0 %v10444_v19 }
 0x4e2   :  { %6772 = vmatpush.msra.mxu2 %v12207_v39  ;;  %6908 = vmatpush.msrb.mxu3 %v12207_v39 }
 0x4e3   :  { %6751 = vmatmul.f32.vlgmr.msra.gmra.mxu1 %v10444_v19 }
 0x4e7   :  { %6676 = vmatmul.f32.vlgmr.msrb.gmra.mxu2 %v10447_v48  ;;  %6809 = vmatmul.f32.vlgmr.msra.gmra.mxu3 %v10444_v19 }
 0x4e8   :  { %6881 = vmatpush.msrb.mxu2 %v12208_v24 }
 0x4e9   :  { %6835 = vmatmul.f32.vlgmr.msrb.gmra.mxu0 %v10447_v48 }
 0x4ea   :  { %6885 = vmatpush.msrb.mxu2 %v12209_v29 }
 0x4eb   :  { %6860 = vmatmul.f32.vlgmr.msrb.gmra.mxu1 %v10453_v41 }
 0x4ef   :  { %6778 = vmatmul.f32.vlgmr.msra.gmra.mxu2 %v10462_v9  ;;  %6910 = vmatmul.f32.vlgmr.msrb.gmra.mxu3 %v10444_v19 }
 0x4f7   :  { %6887 = vmatmul.f32.vlgmr.msrb.gmra.mxu2 %v10444_v19 }
 0x51e   :  { %v5882_v51 = vpop.f32.mrf.mxu0 }
 0x520   :  { %v5907_v11 = vpop.f32.mrf.mxu1 }
 0x522   :  { %v5856_v23 = vpop.f32.mrf.mxu3 }
 0x526   :  { %v5984_v40 = vpop.f32.mrf.mxu0 }
 0x528   :  { %v6015_v54 = vpop.f32.mrf.mxu1 }
 0x529   :  { %v6016_v31 = vadd.f32 %v6015_v54, %v5984_v40 }
 0x52a   :  { %v5825_v17 = vpop.f32.mrf.mxu2  ;;  %v5957_v53 = vpop.f32.mrf.mxu3 }
 0x52b   :  { %v5857_v48 = vadd.f32 %v5856_v23, %v5825_v17 }
 0x52d   :  { %v5883_v41 = vadd.f32 %v5882_v51, %v5857_v48 }
 0x52e   :  { %v6093_v42 = vpop.f32.mrf.mxu0 }
 0x52f   :  { %v5908_v32 = vadd.f32 %v5907_v11, %v5883_v41 }
 0x530   :  { %v6116_v5 = vpop.f32.mrf.mxu1 }
 0x532   :  { %v5934_v10 = vpop.f32.mrf.mxu2  ;;  %v6066_v3 = vpop.f32.mrf.mxu3 }
 0x533   :  { %v5935_v30 = vadd.f32 %v5934_v10, %v5908_v32 }
 0x535   :  { %v5958_v20 = vadd.f32 %v5957_v53, %v5935_v30  ;;  %v10599_v30 = vld [vmem:[%s10689_s3] sm:$0x7f]  ;;  %s7147_s3 = smov [#allocation4]  }
 0x536   :  { %v6200_v50 = vpop.f32.mrf.mxu0 }
 0x537   :  { %v6929_v62 = vmul.f32 %v10566_v7, %v5958_v20 }
 0x538   :  { %v6225_v19 = vpop.f32.mrf.mxu1 }
 0x539   :  { %v10570_v36 = vadd.f32 1e-05, %v6929_v62  ;;  %v7037_v62 = vperm.slane %v10599_v30, 2 }
 0x53a   :  { %v6041_v46 = vpop.f32.mrf.mxu2  ;;  %v6174_v9 = vpop.f32.mrf.mxu3 }
 0x53b   :  { %v6042_v43 = vadd.f32 %v6041_v46, %v6016_v31  ;;  %7106 = vrsqrt.f32 %v10570_v36  ;;  %vm6949_vm7 = vweird.f32 %v10570_v36 }
 0x53d   :  { %v6067_v25 = vadd.f32 %v6066_v3, %v6042_v43 }
 0x53e   :  { %v6302_v49 = vpop.f32.mrf.mxu0 }
 0x53f   :  { %v6094_v16 = vadd.f32 %v6093_v42, %v6067_v25 }
 0x540   :  { %v6333_v8 = vpop.f32.mrf.mxu1 }
 0x541   :  { %v6117_v44 = vadd.f32 %v6116_v5, %v6094_v16  ;;  %v6334_v13 = vadd.f32 %v6333_v8, %v6302_v49  ;;  %v10580_v12 = vpop.eup %7106 }
 0x542   :  { %v6143_v45 = vpop.f32.mrf.mxu2  ;;  %v6275_v60 = vpop.f32.mrf.mxu3  ;;  %v6944_v37 = vmul.f32 %v10580_v12, %v10570_v36  ;;  %vm6950_vm5 = vweird.f32 %v10580_v12 }
 0x543   :  { %v6175_v38 = vadd.f32 %v6174_v9, %v6143_v45  ;;  %v6930_v52 = vmul.f32 %v10566_v7, %v6117_v44  ;;  %v10612_v44 = vld [vmem:[%s10690_s4] sm:$0x7f]  ;;  %vm6951_vm0 = vmor %vm6949_vm7, %vm6950_vm5  ;;  %s7091_s4 = sshll.u32 %s7147_s3, 4  ;;  %s7092_s4 = int_to_ptr.vmem [resolvable:$true] %s7091_s4 }
 0x544   :  { %v6945_v11 = vmul.f32 %v10580_v12, %v6944_v37  ;;  %v7043_v37 = vrot.slane %v7037_v62, 4 }
 0x545   :  { %v6201_v35 = vadd.f32 %v6200_v50, %v6175_v38  ;;  %v10572_v22 = vadd.f32 1e-05, %v6930_v52 }
 0x546   :  { %v6411_v26 = vpop.f32.mrf.mxu0  ;;  %v6946_v5 = vmul.f32 0.5, %v6945_v11 }
 0x547   :  { %v6226_v6 = vadd.f32 %v6225_v19, %v6201_v35  ;;  %7108 = vrsqrt.f32 %v10572_v22  ;;  %vm6959_vm6 = vweird.f32 %v10572_v22  ;;  %v7036_v35 = vperm.slane %v10599_v30, 1 }
 0x548   :  { %v6434_v33 = vpop.f32.mrf.mxu1  ;;  %v6947_v31 = vsub.f32 1.5, %v6946_v5 }
 0x54a   :  { %v6252_v28 = vpop.f32.mrf.mxu2  ;;  %v6384_v34 = vpop.f32.mrf.mxu3  ;;  %v10602_v16 = vmul.f32 %v10580_v12, %v6947_v31 }
 0x54b   :  { %v6253_v4 = vadd.f32 %v6252_v28, %v6226_v6 }
 0x54d   :  { %v6276_v58 = vadd.f32 %v6275_v60, %v6253_v4  ;;  %v10582_v57 = vpop.eup %7108 }
 0x54e   :  { %v6518_v59 = vpop.f32.mrf.mxu0  ;;  %v6954_v61 = vmul.f32 %v10582_v57, %v10572_v22  ;;  %vm6960_vm8 = vweird.f32 %v10582_v57 }
 0x54f   :  { %v6931_v18 = vmul.f32 %v10566_v7, %v6276_v58  ;;  %vm10624_vm11 = vmor %vm6959_vm6, %vm6960_vm8  ;;  %v7058_v58 = vperm.slane %v10612_v44, 1 }
 0x550   :  { %v6543_v29 = vpop.f32.mrf.mxu1  ;;  %v6955_v40 = vmul.f32 %v10582_v57, %v6954_v61 }
 0x551   :  { %v10577_v63 = vadd.f32 1e-05, %v6931_v18  ;;  %v7059_v18 = vperm.slane %v10612_v44, 2  ;;  %v7064_v11 = vrot.slane %v7058_v58, 6 }
 0x552   :  { %v6359_v47 = vpop.f32.mrf.mxu2  ;;  %v6492_v56 = vpop.f32.mrf.mxu3  ;;  %v6956_v10 = vmul.f32 0.5, %v6955_v40 }
 0x553   :  { %7110 = vrsqrt.f32 %v10577_v63  ;;  %v6360_v1 = vadd.f32 %v6359_v47, %v6334_v13  ;;  %vm6969_vm9 = vweird.f32 %v10577_v63 }
 0x554   :  { %v6957_v46 = vsub.f32 1.5, %v6956_v10  ;;  %v6952_v10 = vsel %vm6951_vm0, %v10580_v12, %v10602_v16 }
 0x555   :  { %v6385_v55 = vadd.f32 %v6384_v34, %v6360_v1  ;;  %v7038_v34 = vperm.slane %v10599_v30, 3 }
 0x556   :  { %v6620_v3 = vpop.f32.mrf.mxu0  ;;  %v6958_v49 = vmul.f32 %v10582_v57, %v6957_v46 }
 0x557   :  { %v6412_v15 = vadd.f32 %v6411_v26, %v6385_v55  ;;  %v7035_v55 = vperm.slane %v10599_v30, 0 }
 0x558   :  { %v6651_v9 = vpop.f32.mrf.mxu1  ;;  %v6962_v13 = vsel %vm10624_vm11, %v10582_v57, %v6958_v49 }
 0x559   :  { %v10588_v14 = vpop.eup %7110  ;;  %v6435_v39 = vadd.f32 %v6434_v33, %v6412_v15  ;;  %v6652_v38 = vadd.f32 %v6651_v9, %v6620_v3  ;;  %v7060_v33 = vperm.slane %v10612_v44, 3 }
 0x55a   :  { %v6964_v24 = vmul.f32 %v10588_v14, %v10577_v63  ;;  %v6461_v51 = vpop.f32.mrf.mxu2  ;;  %v6593_v42 = vpop.f32.mrf.mxu3  ;;  %vm6970_vm10 = vweird.f32 %v10588_v14  ;;  %v7020_v63 = vrot.slane %v6962_v13, 6 }
 0x55b   :  { %v6932_v23 = vmul.f32 %v10566_v7, %v6435_v39  ;;  %v6493_v53 = vadd.f32 %v6492_v56, %v6461_v51  ;;  %vm10636_vm13 = vmor %vm6969_vm9, %vm6970_vm10  ;;  %v7044_v39 = vrot.slane %v7038_v34, 2  ;;  %v7057_v51 = vperm.slane %v10612_v44, 0 }
 0x55c   :  { %v6965_v17 = vmul.f32 %v10588_v14, %v6964_v24  ;;  %v10644_v24 = vpop.permute.xlu0 %6917  ;;  %v7025_v36 = vsel %vm3532_vm2, %v6952_v10, %v7020_v63 }
 0x55d   :  { %v6939_v54 = vadd.f32 1e-05, %v6932_v23  ;;  %v6519_v50 = vadd.f32 %v6518_v59, %v6493_v53  ;;  %v7042_v59 = vrot.slane %v7036_v35, 6  ;;  %v7066_v53 = vrot.slane %v7060_v33, 2 }
 0x55e   :  { %v6966_v48 = vmul.f32 0.5, %v6965_v17  ;;  %v6729_v6 = vpop.f32.mrf.mxu0  ;;  %v7065_v17 = vrot.slane %v7059_v18, 4  ;;  %v6920_v5 = vmul.f32 %v10644_v24, %v9879_v27 }
 0x55f   :  { %7112 = vrsqrt.f32 %v6939_v54  ;;  %v6544_v25 = vadd.f32 %v6543_v29, %v6519_v50  ;;  %vm6979_vm14 = vweird.f32 %v6939_v54  ;;  %v7047_v50 = vsel %vm3532_vm2, %v7035_v55, %v7042_v59 }
 0x560   :  { %v6967_v32 = vsub.f32 1.5, %v6966_v48  ;;  %v6752_v57 = vpop.f32.mrf.mxu1  ;;  %v7070_v12 = vsel %vm3534_vm3, %v7065_v17, %v7066_v53  ;;  %v7061_v17 = vperm.slane %v10612_v44, 4  ;;  %v7063_v53 = vperm.slane %v10612_v44, 6 }
 0x562   :  { %v6570_v41 = vpop.f32.mrf.mxu2  ;;  %v6702_v60 = vpop.f32.mrf.mxu3  ;;  %v6968_v8 = vmul.f32 %v10588_v14, %v6967_v32 }
 0x563   :  { %v6571_v45 = vadd.f32 %v6570_v41, %v6544_v25  ;;  %v7048_v41 = vsel %vm3534_vm3, %v7043_v37, %v7044_v39 }
 0x564   :  { %v6972_v15 = vsel %vm10636_vm13, %v10588_v14, %v6968_v8 }
 0x565   :  { %v7113_v43 = vpop.eup %7112  ;;  %v6594_v1 = vadd.f32 %v6593_v42, %v6571_v45  ;;  %v7021_v14 = vrot.slane %v6972_v15, 4 }
 0x566   :  { %v6974_v19 = vmul.f32 %v7113_v43, %v6939_v54  ;;  %vm6980_vm12 = vweird.f32 %v7113_v43  ;;  %v6836_v32 = vpop.f32.mrf.mxu0 }
 0x567   :  { %vm6981_vm15 = vmor %vm6979_vm14, %vm6980_vm12  ;;  %v6933_v40 = vmul.f32 %v10566_v7, %v6594_v1  ;;  %vm7081_vm12 = vcmask 1043458   ;;  %vm7083_vm14 = vcmask 259076  }
 0x568   :  { %v6975_v20 = vmul.f32 %v7113_v43, %v6974_v19  ;;  %v7069_v19 = vsel %vm3532_vm2, %v7057_v51, %v7064_v11  ;;  %v7039_v11 = vperm.slane %v10599_v30, 4  ;;  %vm7082_vm13 = vmor %vm7081_vm12, %vm3532_vm2 }
 0x569   :  { %v7071_v45 = vsel %vm3536_vm4, %v7069_v19, %v7070_v12 }
 0x56a   :  { %v6976_v52 = vmul.f32 0.5, %v6975_v20  ;;  %v6677_v28 = vpop.f32.mrf.mxu2  ;;  %v6810_v3 = vpop.f32.mrf.mxu3  ;;  %v7049_v20 = vsel %vm3536_vm4, %v7047_v50, %v7048_v41  ;;  %v7068_v50 = vrot.slane %v7063_v53, 4  ;;  %v6921_v41 = vmul.f32 %v10644_v24, %v9932_v2 }
 0x56b   :  { %v6678_v26 = vadd.f32 %v6677_v28, %v6652_v38 }
 0x56c   :  { %v6977_v47 = vsub.f32 1.5, %v6976_v52 }
 0x56d   :  { %v6703_v56 = vadd.f32 %v6702_v60, %v6678_v26  ;;  %v6861_v60 = vpop.f32.mrf.mxu1 }
 0x56e   :  { %v6978_v61 = vmul.f32 %v7113_v43, %v6977_v47 }
 0x56f   :  { %v6730_v29 = vadd.f32 %v6729_v6, %v6703_v56 }
 0x570   :  { %v6982_v23 = vsel %vm6981_vm15, %v7113_v43, %v6978_v61  ;;  %v6940_v43 = vadd.f32 1e-05, %v6933_v40  ;;  %v7040_v61 = vperm.slane %v10599_v30, 5  ;;  %vm7084_vm15 = vmor %vm7083_vm14, %vm7082_vm13 }
 0x571   :  { %v7022_v54 = vrot.slane %v6982_v23, 2  ;;  %v6753_v42 = vadd.f32 %v6752_v57, %v6730_v29  ;;  %v7041_v29 = vperm.slane %v10599_v30, 6 }
 0x572   :  { %v6779_v48 = vpop.f32.mrf.mxu2  ;;  %v6911_v6 = vpop.f32.mrf.mxu3  ;;  %v7045_v23 = vrot.slane %v7040_v61, 6  ;;  %vm6989_vm9 = vweird.f32 %v6940_v43 }
 0x573   :  { %v6934_v31 = vmul.f32 %v10566_v7, %v6753_v42  ;;  %v6811_v46 = vadd.f32 %v6810_v3, %v6779_v48  ;;  %v7026_v9 = vsel %vm3534_vm3, %v7021_v14, %v7022_v54 }
 0x574   :  { %v7027_v27 = vsel %vm3536_vm4, %v7025_v36, %v7026_v9  ;;  %v7050_v3 = vsel %vm3532_vm2, %v7039_v11, %v7045_v23 }
 0x575   :  { %v6941_v25 = vadd.f32 1e-05, %v6934_v31  ;;  %v6837_v16 = vadd.f32 %v6836_v32, %v6811_v46  ;;  %v7032_v49 = vmul.f32 %v7027_v27, %v6920_v5  ;;  %v7046_v5 = vrot.slane %v7041_v29, 4 }
 0x577   :  { %7114 = vrsqrt.f32 %v6941_v25  ;;  %v7054_v38 = vmul.f32 %v7049_v20, %v7032_v49  ;;  %v6862_v35 = vadd.f32 %v6861_v60, %v6837_v16  ;;  %vm6999_vm3 = vweird.f32 %v6941_v25 }
 0x578   :  { %7116 = vrsqrt.f32 %v6940_v43  ;;  %v7051_v36 = vsel %vm3536_vm4, %v7050_v3, %v7046_v5 }
 0x579   :  { %v7076_v8 = vadd.f32 %v7071_v45, %v7054_v38 }
 0x57a   :  { %v6888_v62 = vpop.f32.mrf.mxu2 }
 0x57b   :  { %v6889_v52 = vadd.f32 %v6888_v62, %v6862_v35  ;;  %v7078_v28 = vadd.f32 %v7076_v8, %v11857_v0 }
 0x57d   :  { %v7115_v34 = vpop.eup %7114  ;;  %v6912_v4 = vadd.f32 %v6911_v6, %v6889_v52  ;;  %7080 = vst [vmem:[#allocation4] sm:$0xff] %v7078_v28 }
 0x57e   :  { %v7117_v26 = vpop.eup %7116  ;;  %v6994_v58 = vmul.f32 %v7115_v34, %v6941_v25  ;;  %vm7000_vm1 = vweird.f32 %v7115_v34 }
 0x57f   :  { %v6935_v18 = vmul.f32 %v10566_v7, %v6912_v4  ;;  %v6984_v13 = vmul.f32 %v7117_v26, %v6940_v43  ;;  %vm7001_vm5 = vmor %vm6999_vm3, %vm7000_vm1  ;;  %v7062_v7 = vperm.slane %v10612_v44, 5  ;;  %vm6990_vm7 = vweird.f32 %v7117_v26 }
 0x580   :  { %v6995_v33 = vmul.f32 %v7115_v34, %v6994_v58  ;;  %vm6991_vm11 = vmor %vm6989_vm9, %vm6990_vm7 }
 0x581   :  { %v6942_v47 = vadd.f32 1e-05, %v6935_v18  ;;  %v6985_v22 = vmul.f32 %v7117_v26, %v6984_v13  ;;  %v7067_v42 = vrot.slane %v7062_v7, 6 }
 0x582   :  { %v6996_v1 = vmul.f32 0.5, %v6995_v33 }
 0x583   :  { %7118 = vrsqrt.f32 %v6942_v47  ;;  %v6986_v59 = vmul.f32 0.5, %v6985_v22  ;;  %vm7009_vm8 = vweird.f32 %v6942_v47  ;;  %v7072_v44 = vsel %vm3532_vm2, %v7061_v17, %v7067_v42 }
 0x584   :  { %v6997_v56 = vsub.f32 1.5, %v6996_v1  ;;  %v7073_v43 = vsel %vm3536_vm4, %v7072_v44, %v7068_v50 }
 0x585   :  { %v6987_v57 = vsub.f32 1.5, %v6986_v59 }
 0x586   :  { %v6998_v15 = vmul.f32 %v7115_v34, %v6997_v56 }
 0x587   :  { %v6988_v40 = vmul.f32 %v7117_v26, %v6987_v57 }
 0x588   :  { %v7002_v63 = vsel %vm7001_vm5, %v7115_v34, %v6998_v15 }
 0x589   :  { %v7119_v55 = vpop.eup %7118  ;;  %v7023_v14 = vrot.slane %v7002_v63, 6  ;;  %v6992_v48 = vsel %vm6991_vm11, %v7117_v26, %v6988_v40 }
 0x58a   :  { %v7004_v37 = vmul.f32 %v7119_v55, %v6942_v47  ;;  %vm7010_vm6 = vweird.f32 %v7119_v55 }
 0x58b   :  { %vm7011_vm10 = vmor %vm7009_vm8, %vm7010_vm6  ;;  %v7028_v31 = vsel %vm3532_vm2, %v6992_v48, %v7023_v14 }
 0x58c   :  { %v7005_v0 = vmul.f32 %v7119_v55, %v7004_v37 }
 0x58e   :  { %v7006_v39 = vmul.f32 0.5, %v7005_v0 }
 0x590   :  { %v7007_v51 = vsub.f32 1.5, %v7006_v39 }
 0x592   :  { %v7008_v54 = vmul.f32 %v7119_v55, %v7007_v51 }
 0x594   :  { %v7012_v10 = vsel %vm7011_vm10, %v7119_v55, %v7008_v54 }
 0x595   :  { %v7024_v30 = vrot.slane %v7012_v10, 4 }
 0x597   :  { %v7029_v46 = vsel %vm3536_vm4, %v7028_v31, %v7024_v30 }
 0x598   :  { %v7033_v9 = vmul.f32 %v7029_v46, %v6921_v41 }
 0x59a   :  { %v7055_v32 = vmul.f32 %v7051_v36, %v7033_v9 }
 0x59c   :  { %v7077_v2 = vadd.f32 %v7073_v43, %v7055_v32 }
 0x59e   :  { %v7079_v24 = vadd.f32 %v7077_v2, %v11871_v21 }
 0x5a0   :  { %7085 = vst.msk [vmem:[#allocation4 + $0x8] sm:$0x3f] %vm7084_vm15, %v7079_v24 }
 0x5a1   :  { %7096 = dma.vmem_to_hbm [thread:$0]  %s7092_s4, 224, %s7094_s1, [#allocation5]  }
 0x5a2   :  { %7144 = dma.done.wait [#allocation5], 224  }
 0x5a3   :  { %7145 = vsyncadd [#allocation5], 4294967072 }
 0x5a4   :  { %7101 = vsyncpa [#allocation5], 1 }

// kernel: tpu_custom_call.1
= control target key start
LH: loop header
LB: loop body
LE: loop exit
PB: predicated region body
PF: predicated region fallthrough
CT: control target
= control target key end

     0   :  { %s2033_s0 = inlined_call_operand.vmem [shape: f32[2,800], index: 0, kind: input, shape index: {}]   ;;  %s2034_s1 = inlined_call_operand.<no memory space> [shape: f32[1,1], index: 1, kind: input, shape index: {}]   ;;  %s2035_s3 = inlined_call_operand.vmem [shape: f32[1,800], index: 3, kind: input, shape index: {}]   ;;  %s2036_s4 = inlined_call_operand.vmem [shape: f32[1,800], index: 4, kind: input, shape index: {}]   ;;  %s2037_s5 = inlined_call_operand.vmem [shape: f32[800,16], index: 5, kind: input, shape index: {}]   ;;  %s2038_s6 = inlined_call_operand.vmem [shape: f32[16,800], index: 6, kind: input, shape index: {}]   ;;  %s2039_s7 = inlined_call_operand.hbm [shape: f32[2,800], index: 7, kind: output, shape index: {}]   ;;  %s2040_s2 = inlined_call_operand.<no memory space> [shape: f32[1,1], index: 2, kind: input, shape index: {}]  }
   0x1   :  { %v12_v0 = vstv %s2034_s1 }
   0x2   :  { %13 = vst [vmem:[#allocation2] sm:$0x1] %v12_v0 }
   0x3   :  { %v1082_v1 = vld [vmem:[%s2037_s5 + $0x78] sm:$0xff]  ;;  %v1087_v2 = vld [vmem:[%s2037_s5 + $0x70] sm:$0xff]  ;;  %v1104_v5 = vld [vmem:[%s2037_s5 + $0x68] sm:$0xff] }
   0x4   :  { %v1092_v3 = vld [vmem:[%s2037_s5 + $0xf8] sm:$0xff]  ;;  %171 = vmatpush.msra.mxu0 %v1082_v1  ;;  %v1099_v4 = vld [vmem:[%s2037_s5 + $0xf0] sm:$0xff]  ;;  %v1109_v6 = vld [vmem:[%s2037_s5 + $0xe8] sm:$0xff] }
   0x5   :  { %191 = vmatpush.msra.mxu1 %v1092_v3  ;;  %v1116_v7 = vld [vmem:[%s2037_s5 + $0x60] sm:$0xff]  ;;  %v1128_v9 = vld [vmem:[%s2037_s5 + $0x58] sm:$0xff]  ;;  %v1145_v12 = vld [vmem:[%s2037_s5 + $0x170] sm:$0xff] }
   0x6   :  { %172 = vmatpush.msra.mxu0 %v1087_v2  ;;  %v1121_v8 = vld [vmem:[%s2037_s5 + $0xe0] sm:$0xff]  ;;  %v1133_v10 = vld [vmem:[%s2037_s5 + $0xd8] sm:$0xff]  ;;  %2084 = vst [vmem:[#allocation8_spill] sm:$0xff] %v1145_v12  ;;  %v1155_v14 = vld [vmem:[%s2037_s5 + $0x50] sm:$0xff] }
   0x7   :  { %192 = vmatpush.msra.mxu1 %v1099_v4  ;;  %v1138_v11 = vld [vmem:[%s2037_s5 + $0x178] sm:$0xff]  ;;  %v1160_v15 = vld [vmem:[%s2037_s5 + $0xd0] sm:$0xff]  ;;  %v1169_v16 = vld [vmem:[%s2037_s5 + $0x168] sm:$0xff] }
   0x8   :  { %173 = vmatpush.msra.mxu0 %v1104_v5  ;;  %2083 = vst [vmem:[#allocation7_spill] sm:$0xff] %v1138_v11  ;;  %v1150_v13 = vld [vmem:[%s2037_s5 + $0x1f8] sm:$0xff]  ;;  %211 = vmatpush.msra.mxu2 %v1138_v11  ;;  %v1174_v17 = vld [vmem:[%s2037_s5 + $0x1f0] sm:$0xff]  ;;  %v1179_v18 = vld [vmem:[%s2037_s5 + $0x48] sm:$0xff] }
   0x9   :  { %193 = vmatpush.msra.mxu1 %v1109_v6  ;;  %2085 = vst [vmem:[#allocation9_spill] sm:$0xff] %v1150_v13  ;;  %231 = vmatpush.msra.mxu3 %v1150_v13  ;;  %v1184_v19 = vld [vmem:[%s2037_s5 + $0xc8] sm:$0xff]  ;;  %v1198_v21 = vld [vmem:[%s2037_s5 + $0x160] sm:$0xff]  ;;  %v1222_v25 = vld [vmem:[%s2037_s5 + $0x158] sm:$0xff] }
   0xa   :  { %174 = vmatpush.msra.mxu0 %v1116_v7  ;;  %2086 = vst [vmem:[#allocation10_spill] sm:$0xff] %v1169_v16  ;;  %212 = vmatpush.msra.mxu2 %v1145_v12  ;;  %v1191_v20 = vld [vmem:[%s2037_s5 + $0x1e8] sm:$0xff]  ;;  %v1203_v22 = vld [vmem:[%s2037_s5 + $0x1e0] sm:$0xff]  ;;  %v1227_v26 = vld [vmem:[%s2037_s5 + $0x1d8] sm:$0xff] }
   0xb   :  { %194 = vmatpush.msra.mxu1 %v1121_v8  ;;  %2087 = vst [vmem:[#allocation11_spill] sm:$0xff] %v1174_v17  ;;  %232 = vmatpush.msra.mxu3 %v1174_v17  ;;  %v1208_v23 = vld [vmem:[%s2037_s5 + $0x40] sm:$0xff]  ;;  %v1232_v27 = vld [vmem:[%s2037_s5 + $0x38] sm:$0xff]  ;;  %v1246_v29 = vld [vmem:[%s2037_s5 + $0x150] sm:$0xff] }
   0xc   :  { %175 = vmatpush.msra.mxu0 %v1128_v9  ;;  %2088 = vst [vmem:[#allocation12_spill] sm:$0xff] %v1191_v20  ;;  %v1213_v24 = vld [vmem:[%s2037_s5 + $0xc0] sm:$0xff]  ;;  %213 = vmatpush.msra.mxu2 %v1169_v16  ;;  %v1237_v28 = vld [vmem:[%s2037_s5 + $0xb8] sm:$0xff]  ;;  %v1251_v30 = vld [vmem:[%s2037_s5 + $0x1d0] sm:$0xff] }
   0xd   :  { %195 = vmatpush.msra.mxu1 %v1133_v10  ;;  %2089 = vst [vmem:[#allocation13_spill] sm:$0xff] %v1198_v21  ;;  %233 = vmatpush.msra.mxu3 %v1191_v20  ;;  %v1256_v31 = vld [vmem:[%s2037_s5 + $0x30] sm:$0xff]  ;;  %v1270_v33 = vld [vmem:[%s2037_s5 + $0x148] sm:$0xff]  ;;  %v1294_v37 = vld [vmem:[%s2037_s5 + $0x140] sm:$0xff] }
   0xe   :  { %176 = vmatpush.msra.mxu0 %v1155_v14  ;;  %2090 = vst [vmem:[#allocation14_spill] sm:$0xff] %v1203_v22  ;;  %214 = vmatpush.msra.mxu2 %v1198_v21  ;;  %v1261_v32 = vld [vmem:[%s2037_s5 + $0xb0] sm:$0xff]  ;;  %v1275_v34 = vld [vmem:[%s2037_s5 + $0x1c8] sm:$0xff]  ;;  %v1299_v38 = vld [vmem:[%s2037_s5 + $0x1c0] sm:$0xff] }
   0xf   :  { %196 = vmatpush.msra.mxu1 %v1160_v15  ;;  %2091 = vst [vmem:[#allocation15_spill] sm:$0xff] %v1222_v25  ;;  %234 = vmatpush.msra.mxu3 %v1203_v22  ;;  %v1280_v35 = vld [vmem:[%s2037_s5 + $0x28] sm:$0xff]  ;;  %v1304_v39 = vld [vmem:[%s2037_s5 + $0x20] sm:$0xff]  ;;  %v1318_v41 = vld [vmem:[%s2037_s5 + $0x138] sm:$0xff] }
  0x10   :  { %177 = vmatpush.msra.mxu0 %v1179_v18  ;;  %2092 = vst [vmem:[#allocation16_spill] sm:$0xff] %v1227_v26  ;;  %215 = vmatpush.msra.mxu2 %v1222_v25  ;;  %v1285_v36 = vld [vmem:[%s2037_s5 + $0xa8] sm:$0xff]  ;;  %v1309_v40 = vld [vmem:[%s2037_s5 + $0xa0] sm:$0xff]  ;;  %v1323_v42 = vld [vmem:[%s2037_s5 + $0x1b8] sm:$0xff] }
  0x11   :  { %197 = vmatpush.msra.mxu1 %v1184_v19  ;;  %2093 = vst [vmem:[#allocation17_spill] sm:$0xff] %v1246_v29  ;;  %235 = vmatpush.msra.mxu3 %v1227_v26  ;;  %v1328_v43 = vld [vmem:[%s2037_s5 + $0x18] sm:$0xff]  ;;  %v1342_v45 = vld [vmem:[%s2037_s5 + $0x130] sm:$0xff]  ;;  %v1366_v49 = vld [vmem:[%s2037_s5 + $0x128] sm:$0xff] }
  0x12   :  { %178 = vmatpush.msra.mxu0 %v1208_v23  ;;  %2094 = vst [vmem:[#allocation18_spill] sm:$0xff] %v1251_v30  ;;  %216 = vmatpush.msra.mxu2 %v1246_v29  ;;  %v1333_v44 = vld [vmem:[%s2037_s5 + $0x98] sm:$0xff]  ;;  %v1347_v46 = vld [vmem:[%s2037_s5 + $0x1b0] sm:$0xff]  ;;  %v1371_v50 = vld [vmem:[%s2037_s5 + $0x1a8] sm:$0xff] }
  0x13   :  { %198 = vmatpush.msra.mxu1 %v1213_v24  ;;  %2095 = vst [vmem:[#allocation19_spill] sm:$0xff] %v1270_v33  ;;  %236 = vmatpush.msra.mxu3 %v1251_v30  ;;  %v1352_v47 = vld [vmem:[%s2037_s5 + $0x10] sm:$0xff]  ;;  %v1376_v51 = vld [vmem:[%s2037_s5 + $0x8] sm:$0xff]  ;;  %v1390_v53 = vld [vmem:[%s2037_s5 + $0x120] sm:$0xff] }
  0x14   :  { %179 = vmatpush.msra.mxu0 %v1232_v27  ;;  %2096 = vst [vmem:[#allocation20_spill] sm:$0xff] %v1275_v34  ;;  %217 = vmatpush.msra.mxu2 %v1270_v33  ;;  %v1357_v48 = vld [vmem:[%s2037_s5 + $0x90] sm:$0xff]  ;;  %v1381_v52 = vld [vmem:[%s2037_s5 + $0x88] sm:$0xff]  ;;  %v1395_v54 = vld [vmem:[%s2037_s5 + $0x1a0] sm:$0xff] }
  0x15   :  { %199 = vmatpush.msra.mxu1 %v1237_v28  ;;  %2097 = vst [vmem:[#allocation21_spill] sm:$0xff] %v1294_v37  ;;  %237 = vmatpush.msra.mxu3 %v1275_v34  ;;  %v1400_v55 = vld [vmem:[%s2033_s0] sm:$0xff]  ;;  %v1420_v58 = vld [vmem:[%s2037_s5 + $0x278] sm:$0xff]  ;;  %v1444_v62 = vld [vmem:[%s2037_s5 + $0x270] sm:$0xff] }
  0x16   :  { %180 = vmatpush.msra.mxu0 %v1256_v31  ;;  %2098 = vst [vmem:[#allocation22_spill] sm:$0xff] %v1299_v38  ;;  %218 = vmatpush.msra.mxu2 %v1294_v37  ;;  %v1405_v56 = vld [vmem:[%s2037_s5] sm:$0xff]  ;;  %v1425_v59 = vld [vmem:[%s2037_s5 + $0x2f8] sm:$0xff]  ;;  %v1449_v63 = vld [vmem:[%s2037_s5 + $0x2f0] sm:$0xff] }
  0x17   :  { %200 = vmatpush.msra.mxu1 %v1261_v32  ;;  %2099 = vst [vmem:[#allocation23_spill] sm:$0xff] %v1318_v41  ;;  %238 = vmatpush.msra.mxu3 %v1299_v38  ;;  %v1410_v57 = vld [vmem:[%s2037_s5 + $0x80] sm:$0xff]  ;;  %v1431_v60 = vld [vmem:[%s2037_s5 + $0x118] sm:$0xff]  ;;  %v1456_v0 = vld [vmem:[%s2037_s5 + $0x110] sm:$0xff] }
  0x18   :  { %181 = vmatpush.msra.mxu0 %v1280_v35  ;;  %2100 = vst [vmem:[#allocation24_spill] sm:$0xff] %v1323_v42  ;;  %219 = vmatpush.msra.mxu2 %v1318_v41  ;;  %v1437_v61 = vld [vmem:[%s2037_s5 + $0x198] sm:$0xff] }
  0x19   :  { %201 = vmatpush.msra.mxu1 %v1285_v36  ;;  %2101 = vst [vmem:[#allocation25_spill] sm:$0xff] %v1342_v45  ;;  %239 = vmatpush.msra.mxu3 %v1323_v42  ;;  %v1486_v42 = vld [vmem:[%s2037_s5 + $0x108] sm:$0xff] }
  0x1a   :  { %182 = vmatpush.msra.mxu0 %v1304_v39  ;;  %2102 = vst [vmem:[#allocation26_spill] sm:$0xff] %v1347_v46  ;;  %220 = vmatpush.msra.mxu2 %v1342_v45 }
  0x1b   :  { %202 = vmatpush.msra.mxu1 %v1309_v40  ;;  %2103 = vst [vmem:[#allocation27_spill] sm:$0xff] %v1366_v49  ;;  %240 = vmatpush.msra.mxu3 %v1347_v46  ;;  %v1476_v46 = vld [vmem:[%s2037_s5 + $0x2e8] sm:$0xff] }
  0x1c   :  { %183 = vmatpush.msra.mxu0 %v1328_v43  ;;  %2104 = vst [vmem:[#allocation28_spill] sm:$0xff] %v1371_v50  ;;  %221 = vmatpush.msra.mxu2 %v1366_v49 }
  0x1d   :  { %203 = vmatpush.msra.mxu1 %v1333_v44  ;;  %2105 = vst [vmem:[#allocation29_spill] sm:$0xff] %v1390_v53  ;;  %241 = vmatpush.msra.mxu3 %v1371_v50  ;;  %v1471_v50 = vld [vmem:[%s2037_s5 + $0x268] sm:$0xff] }
  0x1e   :  { %184 = vmatpush.msra.mxu0 %v1352_v47  ;;  %2106 = vst [vmem:[#allocation30_spill] sm:$0xff] %v1395_v54  ;;  %222 = vmatpush.msra.mxu2 %v1390_v53  ;;  %v1491_v53 = vld [vmem:[%s2037_s5 + $0x188] sm:$0xff] }
  0x1f   :  { %204 = vmatpush.msra.mxu1 %v1357_v48  ;;  %2107 = vst [vmem:[#allocation31_spill] sm:$0xff] %v1400_v55  ;;  %242 = vmatpush.msra.mxu3 %v1395_v54  ;;  %v1466_v54 = vld [vmem:[%s2033_s0 + $0x8] sm:$0x3f] }
  0x20   :  { %152 = vst [vmem:[#allocation1] ss:$4 sm:$0xff] %v1400_v55  ;;  %185 = vmatpush.msra.mxu0 %v1376_v51  ;;  %v1461_v55 = vld [vmem:[%s2037_s5 + $0x190] sm:$0xff]  ;;  %223 = vmatpush.msra.mxu2 %v1431_v60 }
  0x21   :  { %205 = vmatpush.msra.mxu1 %v1381_v52  ;;  %2108 = vst [vmem:[#allocation32_spill] sm:$0xff] %v1431_v60  ;;  %243 = vmatpush.msra.mxu3 %v1437_v61 }
  0x22   :  { %2109 = vst [vmem:[#allocation33_spill] sm:$0xff] %v1437_v61  ;;  %186 = vmatpush.msra.mxu0 %v1405_v56 }
  0x23   :  { %206 = vmatpush.msra.mxu1 %v1410_v57  ;;  %2110 = vst [vmem:[#allocation34_spill] sm:$0xff] %v1456_v0 }
  0x24   :  { %251 = vmatpush.msrb.mxu0 %v1420_v58  ;;  %2111 = vst [vmem:[#allocation35_spill] sm:$0xff] %v1461_v55 }
  0x25   :  { %271 = vmatpush.msrb.mxu1 %v1425_v59  ;;  %2112 = vst [vmem:[#allocation36_spill] sm:$0xff] %v1466_v54 }
  0x26   :  { %154 = vst [vmem:[#allocation1 + $0x20] ss:$4 sm:$0xff] %v1466_v54  ;;  %252 = vmatpush.msrb.mxu0 %v1444_v62 }
  0x27   :  { %272 = vmatpush.msrb.mxu1 %v1449_v63  ;;  %2113 = vst [vmem:[#allocation37_spill] sm:$0xff] %v1486_v42 }
  0x28   :  { %2114 = vst [vmem:[#allocation38_spill] sm:$0xff] %v1491_v53 }
  0x29   :  { %16 = vsyncpa [#allocation5], 0  ;;  %v1496_v61 = vld [vmem:[%s2037_s5 + $0x260] sm:$0xff]  ;;  %224 = vmatpush.msra.mxu2 %v1456_v0  ;;  %244 = vmatpush.msra.mxu3 %v1461_v55  ;;  %v1520_v0 = vld [vmem:[%s2037_s5 + $0x258] sm:$0xff]  ;;  %vm168_vm0 = vcmask 261120   ;;  %vm312_vm1 = vcmask 130048  }
  0x2a   :  { %v1501_v54 = vld [vmem:[%s2037_s5 + $0x2e0] sm:$0xff]  ;;  %253 = vmatpush.msrb.mxu0 %v1471_v50  ;;  %273 = vmatpush.msrb.mxu1 %v1476_v46  ;;  %v1525_v55 = vld [vmem:[%s2037_s5 + $0x2d8] sm:$0xff]  ;;  %v157_v49 = vld.sshfl [vmem:[#allocation1 + $0x10] sm:$0xff pattern:$0x73625140]  ;;  %vm468_vm2 = vcmask 1041408  }
  0x2b   :  { %v1510_v60 = vld [vmem:[%s2037_s5 + $0x100] sm:$0xff]  ;;  %225 = vmatpush.msra.mxu2 %v1486_v42  ;;  %245 = vmatpush.msra.mxu3 %v1491_v53  ;;  %v158_v34 = vld.sshfl [vmem:[#allocation1 + $0x18] sm:$0xff pattern:$0x73625140]  ;;  %v1534_v45 = vld [vmem:[%s2037_s5 + $0x250] sm:$0xff]  ;;  %vm470_vm3 = vcmask 1045508  }
  0x2c   :  { %2115 = vst [vmem:[#allocation39_spill] sm:$0xff] %v1510_v60  ;;  %v1515_v38 = vld [vmem:[%s2037_s5 + $0x180] sm:$0xff]  ;;  %254 = vmatpush.msrb.mxu0 %v1496_v61  ;;  %274 = vmatpush.msrb.mxu1 %v1501_v54  ;;  %v1539_v30 = vld [vmem:[%s2037_s5 + $0x2d0] sm:$0xff]  ;;  %v1548_v53 = vld [vmem:[%s2037_s5 + $0x318] sm:$0xff]  ;;  %vm472_vm4 = vcmask 1043456   ;;  %s965_s1 = sshll.u32 %s2039_s7, 4  ;;  %s966_s1 = int_to_ptr.hbm [resolvable:$true] %s965_s1 }
  0x2d   :  { %2116 = vst [vmem:[#allocation40_spill] sm:$0xff] %v1515_v38  ;;  %226 = vmatpush.msra.mxu2 %v1510_v60  ;;  %246 = vmatpush.msra.mxu3 %v1515_v38  ;;  %v155_v42 = vld.sshfl [vmem:[#allocation1] sm:$0xff pattern:$0x73625140]  ;;  %v1553_v41 = vld [vmem:[%s2037_s5 + $0x248] sm:$0xff]  ;;  %v1565_v26 = vld [vmem:[%s2037_s5 + $0x310] sm:$0xff] }
  0x2e   :  { %255 = vmatpush.msrb.mxu0 %v1520_v0  ;;  %275 = vmatpush.msrb.mxu1 %v1525_v55  ;;  %2117 = vst [vmem:[#allocation41_spill] sm:$0xff] %v1548_v53  ;;  %v1558_v60 = vld [vmem:[%s2037_s5 + $0x2c8] sm:$0xff]  ;;  %v1570_v37 = vld [vmem:[%s2037_s5 + $0x240] sm:$0xff]  ;;  %v1588_v22 = vld [vmem:[%s2037_s5 + $0x238] sm:$0xff] }
  0x2f   :  { %227 = vmatmul.f32.vlgmr.msra.gmra.mxu2 %v157_v49  ;;  %247 = vmatmul.f32.vlgmr.msra.gmra.mxu3 %v158_v34  ;;  %v156_v38 = vld.sshfl [vmem:[#allocation1 + $0x8] sm:$0xff pattern:$0x73625140]  ;;  %2118 = vst [vmem:[#allocation42_spill] sm:$0xff] %v1565_v26  ;;  %v1575_v49 = vld [vmem:[%s2037_s5 + $0x2c0] sm:$0xff]  ;;  %v1593_v33 = vld [vmem:[%s2037_s5 + $0x2b8] sm:$0xff] }
  0x30   :  { %256 = vmatpush.msrb.mxu0 %v1534_v45  ;;  %276 = vmatpush.msrb.mxu1 %v1539_v30  ;;  %v1583_v34 = vld [vmem:[%s2037_s5 + $0x308] sm:$0xff]  ;;  %v1637_v17 = vld [vmem:[%s2037_s5 + $0x2a0] sm:$0xff]  ;;  %v1650_v25 = vld [vmem:[%s2037_s5 + $0x298] sm:$0xff] }
  0x31   :  { %303 = vmatpush.msrb.mxu2 %v1548_v53  ;;  %187 = vmatmul.f32.vlgmr.msra.gmra.mxu0 %v155_v42  ;;  %2119 = vst [vmem:[#allocation43_spill] sm:$0xff] %v1583_v34  ;;  %v1601_v42 = vld [vmem:[%s2037_s5 + $0x300] sm:$0xff]  ;;  %v1606_v53 = vld [vmem:[%s2037_s5 + $0x230] sm:$0xff]  ;;  %v1619_v20 = vld [vmem:[%s2037_s5 + $0x228] sm:$0xff] }
  0x32   :  { %257 = vmatpush.msrb.mxu0 %v1553_v41  ;;  %277 = vmatpush.msrb.mxu1 %v1558_v60  ;;  %2120 = vst [vmem:[#allocation44_spill] sm:$0xff] %v1601_v42  ;;  %v1624_v29 = vld [vmem:[%s2037_s5 + $0x2a8] sm:$0xff]  ;;  %v1662_v13 = vld [vmem:[%s2037_s5 + $0x290] sm:$0xff]  ;;  %v1681_v12 = vld [vmem:[%s2037_s5 + $0x200] sm:$0xff] }
  0x33   :  { %207 = vmatmul.f32.vlgmr.msra.gmra.mxu1 %v156_v38  ;;  %304 = vmatpush.msrb.mxu2 %v1565_v26  ;;  %v1611_v38 = vld [vmem:[%s2037_s5 + $0x2b0] sm:$0xff]  ;;  %2122 = vst [vmem:[#allocation46_spill] sm:$0xff] %v1650_v25  ;;  %v1669_v21 = vld [vmem:[%s2037_s5 + $0x208] sm:$0xff]  ;;  %v1686_v11 = vld [vmem:[%s2037_s5 + $0x280] sm:$0xff] }
  0x34   :  { %258 = vmatpush.msrb.mxu0 %v1570_v37  ;;  %278 = vmatpush.msrb.mxu1 %v1575_v49  ;;  %v161_v26 = vld.sshfl [vmem:[#allocation1 + $0x30] sm:$0xff pattern:$0x73625140]  ;;  %v1674_v16 = vld [vmem:[%s2037_s5 + $0x288] sm:$0xff] }
  0x35   :  { %305 = vmatpush.msrb.mxu2 %v1583_v34  ;;  %v1632_v34 = vld [vmem:[%s2037_s5 + $0x220] sm:$0xff] }
  0x36   :  { %259 = vmatpush.msrb.mxu0 %v1588_v22  ;;  %279 = vmatpush.msrb.mxu1 %v1593_v33 }
  0x37   :  { %306 = vmatpush.msrb.mxu2 %v1601_v42  ;;  %v1645_v42 = vld [vmem:[%s2037_s5 + $0x218] sm:$0xff] }
  0x38   :  { %260 = vmatpush.msrb.mxu0 %v1606_v53  ;;  %280 = vmatpush.msrb.mxu1 %v1611_v38  ;;  %2121 = vst [vmem:[#allocation45_spill] sm:$0xff] %v1645_v42 }
  0x39   :  { %974 = vmatmul.msk.f32.vlgmr.msrb.gmra.mxu2 %vm168_vm0, %v161_v26  ;;  %v1657_v26 = vld [vmem:[%s2037_s5 + $0x210] sm:$0xff] }
  0x3a   :  { %261 = vmatpush.msrb.mxu0 %v1619_v20  ;;  %281 = vmatpush.msrb.mxu1 %v1624_v29 }
  0x3c   :  { %262 = vmatpush.msrb.mxu0 %v1632_v34  ;;  %282 = vmatpush.msrb.mxu1 %v1637_v17 }
  0x3e   :  { %263 = vmatpush.msrb.mxu0 %v1645_v42  ;;  %283 = vmatpush.msrb.mxu1 %v1650_v25  ;;  %v159_v25 = vld.sshfl [vmem:[#allocation1 + $0x20] sm:$0xff pattern:$0x73625140]  ;;  %v160_v42 = vld.sshfl [vmem:[#allocation1 + $0x28] sm:$0xff pattern:$0x73625140] }
  0x40   :  { %264 = vmatpush.msrb.mxu0 %v1657_v26  ;;  %284 = vmatpush.msrb.mxu1 %v1662_v13 }
  0x42   :  { %265 = vmatpush.msrb.mxu0 %v1669_v21  ;;  %285 = vmatpush.msrb.mxu1 %v1674_v16 }
  0x44   :  { %266 = vmatpush.msrb.mxu0 %v1681_v12  ;;  %286 = vmatpush.msrb.mxu1 %v1686_v11 }
  0x45   :  { %267 = vmatmul.f32.vlgmr.msrb.gmra.mxu0 %v159_v25  ;;  %287 = vmatmul.f32.vlgmr.msrb.gmra.mxu1 %v160_v42  ;;  %v2151_v42 = vld [vmem:[#allocation30_spill] sm:$0xff] }
  0x46   :  { %502 = vmatpush.msra.mxu0 %v1082_v1  ;;  %522 = vmatpush.msra.mxu1 %v1092_v3  ;;  %v2123_v1 = vld [vmem:[#allocation45_spill] sm:$0xff]  ;;  %v1759_v3 = vld [vmem:[%s2038_s6 + $0x38] sm:$0xff] }
  0x47   :  { %330 = vmatpush.msrb.mxu3 %v1759_v3 }
  0x48   :  { %503 = vmatpush.msra.mxu0 %v1087_v2  ;;  %523 = vmatpush.msra.mxu1 %v1099_v4  ;;  %v2124_v2 = vld [vmem:[#allocation46_spill] sm:$0xff]  ;;  %v1765_v4 = vld [vmem:[%s2038_s6 + $0x40] sm:$0xff] }
  0x49   :  { %350 = vmatpush.msra.mxu2 %v1765_v4 }
  0x4a   :  { %504 = vmatpush.msra.mxu0 %v1104_v5  ;;  %524 = vmatpush.msra.mxu1 %v1109_v6  ;;  %v1771_v5 = vld [vmem:[%s2038_s6] sm:$0xff]  ;;  %v1776_v6 = vld [vmem:[%s2038_s6 + $0x8] sm:$0xff] }
  0x4b   :  { %331 = vmatpush.msrb.mxu3 %v1771_v5  ;;  %351 = vmatpush.msra.mxu2 %v1776_v6 }
  0x4c   :  { %505 = vmatpush.msra.mxu0 %v1116_v7  ;;  %525 = vmatpush.msra.mxu1 %v1121_v8  ;;  %v1783_v7 = vld [vmem:[%s2038_s6 + $0x48] sm:$0xff]  ;;  %v1788_v8 = vld [vmem:[%s2038_s6 + $0x10] sm:$0xff] }
  0x4d   :  { %370 = vmatpush.msra.mxu3 %v1783_v7 }
  0x4e   :  { %506 = vmatpush.msra.mxu0 %v1128_v9  ;;  %526 = vmatpush.msra.mxu1 %v1133_v10  ;;  %v1793_v9 = vld [vmem:[%s2038_s6 + $0x50] sm:$0xff]  ;;  %v1800_v10 = vld [vmem:[%s2038_s6 + $0x18] sm:$0xff] }
  0x4f   :  { %390 = vmatpush.msrb.mxu2 %v1793_v9  ;;  %371 = vmatpush.msra.mxu3 %v1788_v8 }
  0x50   :  { %507 = vmatpush.msra.mxu0 %v1155_v14  ;;  %527 = vmatpush.msra.mxu1 %v1160_v15  ;;  %v149_v15 = vld [vmem:[#allocation2] sm:$0x1] }
  0x51   :  { %391 = vmatpush.msrb.mxu2 %v1800_v10 }
  0x52   :  { %508 = vmatpush.msra.mxu0 %v1179_v18  ;;  %528 = vmatpush.msra.mxu1 %v1184_v19 }
  0x54   :  { %509 = vmatpush.msra.mxu0 %v1208_v23  ;;  %529 = vmatpush.msra.mxu1 %v1213_v24 }
  0x56   :  { %510 = vmatpush.msra.mxu0 %v1232_v27  ;;  %530 = vmatpush.msra.mxu1 %v1237_v28  ;;  %v993_v27 = vld [vmem:[#allocation2] ss:$0 sm:$0xff] }
  0x58   :  { %511 = vmatpush.msra.mxu0 %v1256_v31  ;;  %531 = vmatpush.msra.mxu1 %v1261_v32  ;;  %v1807_v31 = vld [vmem:[%s2038_s6 + $0x58] sm:$0xff]  ;;  %v1812_v32 = vld [vmem:[%s2038_s6 + $0x60] sm:$0xff] }
  0x5a   :  { %512 = vmatpush.msra.mxu0 %v1280_v35  ;;  %532 = vmatpush.msra.mxu1 %v1285_v36  ;;  %v1824_v35 = vld [vmem:[%s2038_s6 + $0x28] sm:$0xff] }
  0x5b   :  { %v1833_v36 = vld [vmem:[%s2038_s6 + $0x68] sm:$0xff] }
  0x5c   :  { %513 = vmatpush.msra.mxu0 %v1304_v39  ;;  %533 = vmatpush.msra.mxu1 %v1309_v40  ;;  %v2125_v39 = vld [vmem:[#allocation7_spill] sm:$0xff]  ;;  %v2126_v40 = vld [vmem:[#allocation8_spill] sm:$0xff] }
  0x5e   :  { %514 = vmatpush.msra.mxu0 %v1328_v43  ;;  %534 = vmatpush.msra.mxu1 %v1333_v44  ;;  %v2128_v43 = vld [vmem:[#allocation13_spill] sm:$0xff] }
  0x5f   :  { %v2129_v44 = vld [vmem:[#allocation9_spill] sm:$0xff] }
  0x60   :  { %515 = vmatpush.msra.mxu0 %v1352_v47  ;;  %535 = vmatpush.msra.mxu1 %v1357_v48  ;;  %v2132_v47 = vld [vmem:[#allocation17_spill] sm:$0xff]  ;;  %v2133_v48 = vld [vmem:[#allocation12_spill] sm:$0xff] }
  0x62   :  { %516 = vmatpush.msra.mxu0 %v1376_v51  ;;  %536 = vmatpush.msra.mxu1 %v1381_v52  ;;  %v2135_v51 = vld [vmem:[#allocation14_spill] sm:$0xff]  ;;  %v2136_v52 = vld [vmem:[#allocation21_spill] sm:$0xff] }
  0x64   :  { %517 = vmatpush.msra.mxu0 %v1405_v56  ;;  %537 = vmatpush.msra.mxu1 %v1410_v57  ;;  %v2140_v56 = vld [vmem:[#allocation25_spill] sm:$0xff]  ;;  %v2141_v57 = vld [vmem:[#allocation20_spill] sm:$0xff] }
  0x66   :  { %582 = vmatpush.msrb.mxu0 %v1420_v58  ;;  %602 = vmatpush.msrb.mxu1 %v1425_v59  ;;  %v2142_v58 = vld [vmem:[#allocation27_spill] sm:$0xff]  ;;  %v2143_v59 = vld [vmem:[#allocation22_spill] sm:$0xff] }
  0x68   :  { %583 = vmatpush.msrb.mxu0 %v1444_v62  ;;  %603 = vmatpush.msrb.mxu1 %v1449_v63  ;;  %v2146_v62 = vld [vmem:[#allocation32_spill] sm:$0xff]  ;;  %v2147_v63 = vld [vmem:[#allocation26_spill] sm:$0xff] }
  0x6a   :  { %584 = vmatpush.msrb.mxu0 %v1471_v50  ;;  %604 = vmatpush.msrb.mxu1 %v1476_v46  ;;  %v2131_v46 = vld [vmem:[#allocation11_spill] sm:$0xff] }
  0x6b   :  { %v2134_v50 = vld [vmem:[#allocation19_spill] sm:$0xff] }
  0x6c   :  { %585 = vmatpush.msrb.mxu0 %v1496_v61  ;;  %605 = vmatpush.msrb.mxu1 %v1501_v54  ;;  %v2138_v54 = vld [vmem:[#allocation23_spill] sm:$0xff]  ;;  %v2145_v61 = vld [vmem:[#allocation24_spill] sm:$0xff] }
  0x6e   :  { %586 = vmatpush.msrb.mxu0 %v1520_v0  ;;  %606 = vmatpush.msrb.mxu1 %v1525_v55  ;;  %v2139_v55 = vld [vmem:[#allocation18_spill] sm:$0xff] }
  0x6f   :  { %v2148_v0 = vld [vmem:[#allocation34_spill] sm:$0xff] }
  0x70   :  { %587 = vmatpush.msrb.mxu0 %v1534_v45  ;;  %607 = vmatpush.msrb.mxu1 %v1539_v30  ;;  %v2130_v45 = vld [vmem:[#allocation15_spill] sm:$0xff] }
  0x72   :  { %588 = vmatpush.msrb.mxu0 %v1553_v41  ;;  %608 = vmatpush.msrb.mxu1 %v1558_v60  ;;  %v2127_v41 = vld [vmem:[#allocation10_spill] sm:$0xff]  ;;  %v2144_v60 = vld [vmem:[#allocation29_spill] sm:$0xff] }
  0x74   :  { %589 = vmatpush.msrb.mxu0 %v1570_v37  ;;  %609 = vmatpush.msrb.mxu1 %v1575_v49  ;;  %v1840_v37 = vld [vmem:[%s2038_s6 + $0x30] sm:$0xff]  ;;  %v2149_v49 = vld [vmem:[#allocation28_spill] sm:$0xff] }
  0x76   :  { %590 = vmatpush.msrb.mxu0 %v1588_v22  ;;  %610 = vmatpush.msrb.mxu1 %v1593_v33  ;;  %v1819_v33 = vld [vmem:[%s2038_s6 + $0x20] sm:$0xff] }
  0x78   :  { %591 = vmatpush.msrb.mxu0 %v1606_v53  ;;  %611 = vmatpush.msrb.mxu1 %v1611_v38  ;;  %v2137_v53 = vld [vmem:[#allocation16_spill] sm:$0xff]  ;;  %v2152_v38 = vld [vmem:[#allocation39_spill] sm:$0xff] }
  0x7a   :  { %592 = vmatpush.msrb.mxu0 %v1619_v20  ;;  %612 = vmatpush.msrb.mxu1 %v1624_v29 }
  0x7c   :  { %593 = vmatpush.msrb.mxu0 %v1632_v34  ;;  %613 = vmatpush.msrb.mxu1 %v1637_v17  ;;  %v794_v17 = vmul.f32 %v149_v15, %v149_v15  ;;  %v2150_v34 = vld [vmem:[#allocation37_spill] sm:$0xff]  ;;  %v2160_v15 = vld [vmem:[#allocation40_spill] sm:$0xff] }
  0x7e   :  { %594 = vmatpush.msrb.mxu0 %v2123_v1  ;;  %614 = vmatpush.msrb.mxu1 %v2124_v2  ;;  %v796_v20 = vperm.slane %v794_v17, 0  ;;  %v2154_v1 = vld [vmem:[#allocation33_spill] sm:$0xff]  ;;  %v2155_v2 = vld [vmem:[#allocation42_spill] sm:$0xff] }
  0x80   :  { %595 = vmatpush.msrb.mxu0 %v1657_v26  ;;  %615 = vmatpush.msrb.mxu1 %v1662_v13  ;;  %v2153_v26 = vld [vmem:[#allocation41_spill] sm:$0xff] }
  0x82   :  { %596 = vmatpush.msrb.mxu0 %v1669_v21  ;;  %616 = vmatpush.msrb.mxu1 %v1674_v16  ;;  %v1034_v16 = vmov 0  }
  0x83   :  { %992 = vset.pattern.permute.xlu0 %v1034_v16 }
  0x84   :  { %597 = vmatpush.msrb.mxu0 %v1681_v12  ;;  %617 = vmatpush.msrb.mxu1 %v1686_v11 }
  0x85   :  { %798 = vperm.xlu0 %992, %v796_v20  }
  0x8d   :  { %789 = vperm.xlu0 %992, %v993_v27   ;;  %v2161_v27 = vld [vmem:[#allocation31_spill] sm:$0xff] }
  0xae   :  { %v188_v11 = vpop.f32.mrf.mxu0 }
  0xb0   :  { %v208_v12 = vpop.f32.mrf.mxu1 }
  0xb1   :  { %v209_v13 = vadd.f32 %v208_v12, %v188_v11  ;;  %v2156_v11 = vld [vmem:[#allocation35_spill] sm:$0xff] }
  0xb2   :  { %v228_v14 = vpop.f32.mrf.mxu2  ;;  %v248_v19 = vpop.f32.mrf.mxu3  ;;  %v2157_v12 = vld [vmem:[#allocation43_spill] sm:$0xff] }
  0xb3   :  { %v229_v18 = vadd.f32 %v228_v14, %v209_v13  ;;  %v2158_v13 = vld [vmem:[#allocation38_spill] sm:$0xff]  ;;  %v2159_v14 = vld [vmem:[#allocation44_spill] sm:$0xff] }
  0xb5   :  { %v249_v21 = vadd.f32 %v248_v19, %v229_v18 }
  0xbc   :  { %v308_v25 = vpop.f32.mrf.mxu2 }
  0xc2   :  { %v268_v22 = vpop.f32.mrf.mxu0  ;;  %v288_v23 = vpop.f32.mrf.mxu1 }
  0xc3   :  { %v269_v24 = vadd.f32 %v268_v22, %v249_v21 }
  0xc5   :  { %v289_v28 = vadd.f32 %v288_v23, %v269_v24 }
  0xc7   :  { %v309_v29 = vadd.f32 %v308_v25, %v289_v28 }
  0xc9   :  { %v311_v30 = vmul.f32 0.02, %v309_v29 }
  0xcb   :  { %975 = vmatmul.msk.f32.vlgmr.msrb.gmra.mxu3 %vm312_vm1, %v311_v30  ;;  %976 = vmatmul.msk.f32.vlgmr.msra.gmra.mxu2 %vm312_vm1, %v311_v30 }
  0xcc   :  { %410 = vmatpush.msrb.mxu3 %v1807_v31  ;;  %430 = vmatpush.msra.mxu2 %v1812_v32 }
  0xce   :  { %411 = vmatpush.msrb.mxu3 %v1819_v33  ;;  %431 = vmatpush.msra.mxu2 %v1824_v35 }
  0xd3   :  { %977 = vmatmul.msk.f32.vlgmr.msra.gmra.mxu3 %vm312_vm1, %v311_v30  ;;  %978 = vmatmul.msk.f32.vlgmr.msrb.gmra.mxu2 %vm312_vm1, %v311_v30 }
  0xd4   :  { %450 = vmatpush.msra.mxu3 %v1833_v36  ;;  %542 = vmatpush.msrb.mxu2 %v2125_v39 }
  0xd6   :  { %451 = vmatpush.msra.mxu3 %v1840_v37  ;;  %543 = vmatpush.msrb.mxu2 %v2126_v40 }
  0xd8   :  { %544 = vmatpush.msrb.mxu2 %v2127_v41 }
  0xda   :  { %545 = vmatpush.msrb.mxu2 %v2128_v43 }
  0xdb   :  { %979 = vmatmul.msk.f32.vlgmr.msrb.gmra.mxu3 %vm312_vm1, %v311_v30  ;;  %980 = vmatmul.msk.f32.vlgmr.msra.gmra.mxu2 %vm312_vm1, %v311_v30 }
  0xdc   :  { %562 = vmatpush.msrb.mxu3 %v2129_v44  ;;  %546 = vmatpush.msrb.mxu2 %v2130_v45 }
  0xde   :  { %563 = vmatpush.msrb.mxu3 %v2131_v46  ;;  %547 = vmatpush.msrb.mxu2 %v2132_v47 }
  0xe0   :  { %564 = vmatpush.msrb.mxu3 %v2133_v48  ;;  %548 = vmatpush.msrb.mxu2 %v2134_v50  ;;  %v2162_v48 = vld [vmem:[#allocation36_spill] sm:$0xff] }
  0xe2   :  { %565 = vmatpush.msrb.mxu3 %v2135_v51  ;;  %549 = vmatpush.msrb.mxu2 %v2136_v52 }
  0xe3   :  { %981 = vmatmul.msk.f32.vlgmr.msra.gmra.mxu3 %vm312_vm1, %v311_v30 }
  0xe4   :  { %566 = vmatpush.msrb.mxu3 %v2137_v53  ;;  %550 = vmatpush.msrb.mxu2 %v2138_v54 }
  0xe6   :  { %567 = vmatpush.msrb.mxu3 %v2139_v55  ;;  %551 = vmatpush.msrb.mxu2 %v2140_v56 }
  0xe8   :  { %568 = vmatpush.msrb.mxu3 %v2141_v57  ;;  %552 = vmatpush.msrb.mxu2 %v2142_v58 }
  0xea   :  { %569 = vmatpush.msrb.mxu3 %v2143_v59  ;;  %553 = vmatpush.msrb.mxu2 %v2144_v60 }
  0xec   :  { %570 = vmatpush.msrb.mxu3 %v2145_v61  ;;  %554 = vmatpush.msrb.mxu2 %v2146_v62 }
  0xee   :  { %571 = vmatpush.msrb.mxu3 %v2147_v63  ;;  %555 = vmatpush.msrb.mxu2 %v2148_v0 }
  0xf0   :  { %572 = vmatpush.msrb.mxu3 %v2149_v49  ;;  %556 = vmatpush.msrb.mxu2 %v2150_v34 }
  0xf2   :  { %573 = vmatpush.msrb.mxu3 %v2151_v42  ;;  %557 = vmatpush.msrb.mxu2 %v2152_v38 }
  0xf4   :  { %634 = vmatpush.msra.mxu2 %v2153_v26  ;;  %574 = vmatpush.msrb.mxu3 %v2154_v1 }
  0xf6   :  { %635 = vmatpush.msra.mxu2 %v2155_v2  ;;  %575 = vmatpush.msrb.mxu3 %v2156_v11  ;;  %v1934_v11 = vld [vmem:[%s2035_s3] sm:$0x7f] }
  0xf8   :  { %636 = vmatpush.msra.mxu2 %v2157_v12  ;;  %576 = vmatpush.msrb.mxu3 %v2158_v13 }
  0xfa   :  { %637 = vmatpush.msra.mxu2 %v2159_v14  ;;  %577 = vmatpush.msrb.mxu3 %v2160_v15  ;;  %v909_v15 = vperm.slane %v1934_v11, 2 }
  0xfc   :  { %660 = vmatpush.msra.mxu3 %v1759_v3 }
  0xfe   :  { %661 = vmatpush.msra.mxu3 %v1771_v5 }
 0x14e   :  { %v333_v16 = vpop.f32.mrf.mxu3  ;;  %v353_v17 = vpop.f32.mrf.mxu2 }
 0x14f   :  { %v463_v18 = vrot.slane %v353_v17, 6 }
 0x151   :  { %v469_v23 = vsel %vm468_vm2, %v333_v16, %v463_v18  ;;  %v910_v16 = vperm.slane %v1934_v11, 3 }
 0x156   :  { %v373_v19 = vpop.f32.mrf.mxu3  ;;  %v393_v20 = vpop.f32.mrf.mxu2 }
 0x157   :  { %v464_v21 = vrot.slane %v373_v19, 4  ;;  %v465_v22 = vrot.slane %v393_v20, 2 }
 0x159   :  { %v471_v24 = vsel %vm470_vm3, %v464_v21, %v465_v22 }
 0x15a   :  { %v473_v25 = vsel %vm472_vm4, %v469_v23, %v471_v24  ;;  %v1948_v23 = vld [vmem:[%s2036_s4] sm:$0x7f]  ;;  %v908_v24 = vperm.slane %v1934_v11, 1  ;;  %s1035_s4 = smov [#allocation4]  }
 0x15b   :  { %v1889_v3 = vsub.f32 %v2161_v27, %v473_v25  ;;  %s963_s29 = sshll.u32 %s1035_s4, 4  ;;  %s964_s29 = int_to_ptr.vmem [resolvable:$true] %s963_s29 }
 0x15d   :  { %v480_v5 = vmul.f32 %v1889_v3, %v1889_v3 }
 0x15e   :  { %v413_v28 = vpop.f32.mrf.mxu3  ;;  %v433_v29 = vpop.f32.mrf.mxu2 }
 0x15f   :  { %484 = vst [vmem:[#allocation1] ss:$4 sm:$0xff] %v480_v5  ;;  %v466_v30 = vrot.slane %v433_v29, 6 }
 0x161   :  { %v474_v45 = vsel %vm468_vm2, %v413_v28, %v466_v30 }
 0x166   :  { %v453_v39 = vpop.f32.mrf.mxu3  ;;  %v487_v40 = vld.sshfl [vmem:[#allocation1] sm:$0xff pattern:$0x73625140]  ;;  %v488_v41 = vld.sshfl [vmem:[#allocation1 + $0x8] sm:$0xff pattern:$0x73625140] }
 0x167   :  { %v467_v43 = vrot.slane %v453_v39, 4  ;;  %518 = vmatmul.f32.vlgmr.msra.gmra.mxu0 %v487_v40  ;;  %538 = vmatmul.f32.vlgmr.msra.gmra.mxu1 %v488_v41  ;;  %v489_v44 = vld.sshfl [vmem:[#allocation1 + $0x10] sm:$0xff pattern:$0x73625140]  ;;  %v915_v39 = vrot.slane %v909_v15, 4  ;;  %v916_v40 = vrot.slane %v910_v16, 2 }
 0x168   :  { %558 = vmatmul.f32.vlgmr.msrb.gmra.mxu2 %v489_v44  ;;  %v490_v46 = vld.sshfl [vmem:[#allocation1 + $0x18] sm:$0xff pattern:$0x73625140] }
 0x169   :  { %v475_v47 = vsel %vm472_vm4, %v474_v45, %v467_v43  ;;  %578 = vmatmul.f32.vlgmr.msrb.gmra.mxu3 %v490_v46  ;;  %680 = vmatpush.msrb.mxu2 %v1765_v4  ;;  %v907_v45 = vperm.slane %v1934_v11, 0 }
 0x16a   :  { %v1897_v50 = vsub.f32 %v2162_v48, %v475_v47  ;;  %700 = vmatpush.msrb.mxu3 %v1783_v7  ;;  %v914_v47 = vrot.slane %v908_v24, 6 }
 0x16b   :  { %681 = vmatpush.msrb.mxu2 %v1776_v6 }
 0x16c   :  { %v481_v51 = vmul.f32 %v1897_v50, %v1897_v50  ;;  %701 = vmatpush.msrb.mxu3 %v1788_v8  ;;  %v919_v16 = vsel %vm468_vm2, %v907_v45, %v914_v47 }
 0x16e   :  { %486 = vst [vmem:[#allocation1 + $0x20] ss:$4 sm:$0xff] %v481_v51  ;;  %v930_v51 = vperm.slane %v1948_v23, 1 }
 0x175   :  { %v491_v52 = vld.sshfl [vmem:[#allocation1 + $0x20] sm:$0xff pattern:$0x73625140]  ;;  %v492_v53 = vld.sshfl [vmem:[#allocation1 + $0x28] sm:$0xff pattern:$0x73625140] }
 0x176   :  { %598 = vmatmul.f32.vlgmr.msrb.gmra.mxu0 %v491_v52  ;;  %618 = vmatmul.f32.vlgmr.msrb.gmra.mxu1 %v492_v53  ;;  %v493_v54 = vld.sshfl [vmem:[#allocation1 + $0x30] sm:$0xff pattern:$0x73625140] }
 0x177   :  { %982 = vmatmul.msk.f32.vlgmr.msra.gmra.mxu2 %vm168_vm0, %v493_v54  ;;  %v931_v54 = vperm.slane %v1948_v23, 2 }
 0x178   :  { %720 = vmatpush.msra.mxu2 %v1793_v9  ;;  %v799_v9 = vpop.permute.xlu0 %798 }
 0x17a   :  { %721 = vmatpush.msra.mxu2 %v1800_v10 }
 0x1e4   :  { %v519_v4 = vpop.f32.mrf.mxu0  ;;  %v539_v7 = vpop.f32.mrf.mxu1 }
 0x1e5   :  { %v540_v55 = vadd.f32 %v539_v7, %v519_v4 }
 0x1eb   :  { %v559_v6 = vpop.f32.mrf.mxu2 }
 0x1ec   :  { %v560_v56 = vadd.f32 %v559_v6, %v540_v55  ;;  %v579_v57 = vpop.f32.mrf.mxu3  ;;  %v932_v6 = vperm.slane %v1948_v23, 3 }
 0x1ee   :  { %v580_v58 = vadd.f32 %v579_v57, %v560_v56 }
 0x1f3   :  { %v599_v8 = vpop.f32.mrf.mxu0  ;;  %v619_v60 = vpop.f32.mrf.mxu1 }
 0x1f4   :  { %v600_v59 = vadd.f32 %v599_v8, %v580_v58  ;;  %v929_v58 = vperm.slane %v1948_v23, 0 }
 0x1f6   :  { %v620_v61 = vadd.f32 %v619_v60, %v600_v59  ;;  %v936_v60 = vrot.slane %v930_v51, 6  ;;  %v934_v51 = vperm.slane %v1948_v23, 5 }
 0x1fa   :  { %v639_v62 = vpop.f32.mrf.mxu2 }
 0x1fb   :  { %v640_v63 = vadd.f32 %v639_v62, %v620_v61 }
 0x1fd   :  { %v642_v0 = vmul.f32 0.02, %v640_v63 }
 0x1ff   :  { %983 = vmatmul.msk.f32.vlgmr.msra.gmra.mxu3 %vm312_vm1, %v642_v0  ;;  %984 = vmatmul.msk.f32.vlgmr.msrb.gmra.mxu2 %vm312_vm1, %v642_v0 }
 0x200   :  { %740 = vmatpush.msra.mxu3 %v1807_v31  ;;  %760 = vmatpush.msrb.mxu2 %v1812_v32 }
 0x202   :  { %741 = vmatpush.msra.mxu3 %v1819_v33  ;;  %761 = vmatpush.msrb.mxu2 %v1824_v35 }
 0x207   :  { %985 = vmatmul.msk.f32.vlgmr.msrb.gmra.mxu3 %vm312_vm1, %v642_v0  ;;  %986 = vmatmul.msk.f32.vlgmr.msra.gmra.mxu2 %vm312_vm1, %v642_v0 }
 0x208   :  { %780 = vmatpush.msrb.mxu3 %v1833_v36 }
 0x20a   :  { %781 = vmatpush.msrb.mxu3 %v1840_v37 }
 0x20f   :  { %987 = vmatmul.msk.f32.vlgmr.msra.gmra.mxu3 %vm312_vm1, %v642_v0  ;;  %988 = vmatmul.msk.f32.vlgmr.msrb.gmra.mxu2 %vm312_vm1, %v642_v0 }
 0x217   :  { %989 = vmatmul.msk.f32.vlgmr.msrb.gmra.mxu3 %vm312_vm1, %v642_v0 }
 0x282   :  { %v663_v10 = vpop.f32.mrf.mxu3  ;;  %v683_v31 = vpop.f32.mrf.mxu2 }
 0x283   :  { %v801_v32 = vmul.f32 %v799_v9, %v663_v10  ;;  %v802_v33 = vmul.f32 %v799_v9, %v683_v31 }
 0x285   :  { %v1920_v35 = vadd.f32 1e-05, %v801_v32  ;;  %v809_v49 = vadd.f32 1e-05, %v802_v33 }
 0x287   :  { %994 = vrsqrt.f32 %v1920_v35  ;;  %vm821_vm6 = vweird.f32 %v1920_v35  ;;  %vm831_vm7 = vweird.f32 %v809_v49 }
 0x288   :  { %996 = vrsqrt.f32 %v809_v49 }
 0x28a   :  { %v703_v36 = vpop.f32.mrf.mxu3  ;;  %v723_v34 = vpop.f32.mrf.mxu2 }
 0x28b   :  { %v803_v37 = vmul.f32 %v799_v9, %v703_v36  ;;  %v804_v42 = vmul.f32 %v799_v9, %v723_v34  ;;  %v1986_v36 = vpop.permute.xlu0 %789 }
 0x28d   :  { %v1923_v38 = vpop.eup %994  ;;  %v1925_v26 = vadd.f32 1e-05, %v803_v37  ;;  %v1927_v1 = vadd.f32 1e-05, %v804_v42  ;;  %v937_v42 = vrot.slane %v931_v54, 4  ;;  %v911_v54 = vperm.slane %v1934_v11, 4 }
 0x28e   :  { %v1929_v2 = vpop.eup %996  ;;  %v816_v12 = vmul.f32 %v1923_v38, %v1920_v35  ;;  %vm822_vm8 = vweird.f32 %v1923_v38 }
 0x28f   :  { %v826_v13 = vmul.f32 %v1929_v2, %v809_v49  ;;  %998 = vrsqrt.f32 %v1925_v26  ;;  %vm832_vm5 = vweird.f32 %v1929_v2  ;;  %vm841_vm12 = vweird.f32 %v1925_v26  ;;  %vm823_vm0 = vmor %vm821_vm6, %vm822_vm8 }
 0x290   :  { %1000 = vrsqrt.f32 %v1927_v1  ;;  %v817_v19 = vmul.f32 %v1923_v38, %v816_v12  ;;  %vm1968_vm9 = vmor %vm831_vm7, %vm832_vm5  ;;  %vm851_vm13 = vweird.f32 %v1927_v1 }
 0x291   :  { %v827_v14 = vmul.f32 %v1929_v2, %v826_v13 }
 0x292   :  { %v743_v17 = vpop.f32.mrf.mxu3  ;;  %v763_v18 = vpop.f32.mrf.mxu2  ;;  %v818_v43 = vmul.f32 0.5, %v817_v19 }
 0x293   :  { %v828_v20 = vmul.f32 0.5, %v827_v14  ;;  %v805_v21 = vmul.f32 %v799_v9, %v743_v17  ;;  %v806_v22 = vmul.f32 %v799_v9, %v763_v18  ;;  %v920_v14 = vsel %vm470_vm3, %v915_v39, %v916_v40 }
 0x294   :  { %v819_v55 = vsub.f32 1.5, %v818_v43  ;;  %v792_v17 = vmul.f32 %v1986_v36, %v1889_v3  ;;  %v921_v39 = vsel %vm472_vm4, %v919_v16, %v920_v14 }
 0x295   :  { %v999_v25 = vpop.eup %998  ;;  %v829_v5 = vsub.f32 1.5, %v828_v20  ;;  %v1951_v28 = vadd.f32 1e-05, %v805_v21  ;;  %v1953_v29 = vadd.f32 1e-05, %v806_v22  ;;  %v941_v22 = vsel %vm468_vm2, %v929_v58, %v936_v60 }
 0x296   :  { %v1001_v30 = vpop.eup %1000  ;;  %v836_v41 = vmul.f32 %v999_v25, %v1925_v26  ;;  %vm842_vm10 = vweird.f32 %v999_v25  ;;  %v820_v32 = vmul.f32 %v1923_v38, %v819_v55  ;;  %v938_v26 = vrot.slane %v932_v6, 2 }
 0x297   :  { %v846_v44 = vmul.f32 %v1001_v30, %v1927_v1  ;;  %1002 = vrsqrt.f32 %v1951_v28  ;;  %v830_v52 = vmul.f32 %v1929_v2, %v829_v5  ;;  %vm852_vm11 = vweird.f32 %v1001_v30  ;;  %vm843_vm14 = vmor %vm841_vm12, %vm842_vm10 }
 0x298   :  { %v837_v46 = vmul.f32 %v999_v25, %v836_v41  ;;  %1004 = vrsqrt.f32 %v1953_v29  ;;  %vm853_vm15 = vmor %vm851_vm13, %vm852_vm11  ;;  %v824_v18 = vsel %vm823_vm0, %v1923_v38, %v820_v32  ;;  %v942_v24 = vsel %vm470_vm3, %v937_v42, %v938_v26 }
 0x299   :  { %v847_v53 = vmul.f32 %v1001_v30, %v846_v44  ;;  %v834_v62 = vsel %vm1968_vm9, %v1929_v2, %v830_v52  ;;  %v943_v41 = vsel %vm472_vm4, %v941_v22, %v942_v24  ;;  %v912_v44 = vperm.slane %v1934_v11, 5 }
 0x29a   :  { %v838_v4 = vmul.f32 0.5, %v837_v46  ;;  %v783_v7 = vpop.f32.mrf.mxu3  ;;  %v892_v34 = vrot.slane %v834_v62, 6  ;;  %vm861_vm9 = vweird.f32 %v1951_v28  ;;  %vm953_vm12 = vcmask 1043458  }
 0x29b   :  { %v848_v56 = vmul.f32 0.5, %v847_v53  ;;  %v807_v57 = vmul.f32 %v799_v9, %v783_v7  ;;  %v917_v6 = vrot.slane %v912_v44, 6  ;;  %vm954_vm13 = vmor %vm953_vm12, %vm468_vm2 }
 0x29c   :  { %v839_v59 = vsub.f32 1.5, %v838_v4  ;;  %v897_v20 = vsel %vm468_vm2, %v824_v18, %v892_v34  ;;  %v913_v4 = vperm.slane %v1934_v11, 6 }
 0x29d   :  { %v1972_v61 = vpop.eup %1002  ;;  %v849_v63 = vsub.f32 1.5, %v848_v56  ;;  %v1977_v0 = vadd.f32 1e-05, %v807_v57  ;;  %v935_v57 = vperm.slane %v1948_v23, 6  ;;  %v922_v60 = vsel %vm468_vm2, %v911_v54, %v917_v6 }
 0x29e   :  { %v1005_v9 = vpop.eup %1004  ;;  %v840_v10 = vmul.f32 %v999_v25, %v839_v59  ;;  %v856_v31 = vmul.f32 %v1972_v61, %v1951_v28  ;;  %vm862_vm7 = vweird.f32 %v1972_v61  ;;  %v939_v59 = vrot.slane %v934_v51, 6 }
 0x29f   :  { %v850_v33 = vmul.f32 %v1001_v30, %v849_v63  ;;  %v866_v49 = vmul.f32 %v1005_v9, %v1953_v29  ;;  %1006 = vrsqrt.f32 %v1977_v0  ;;  %vm872_vm1 = vweird.f32 %v1005_v9  ;;  %vm863_vm11 = vmor %vm861_vm9, %vm862_vm7 }
 0x2a0   :  { %v844_v37 = vsel %vm843_vm14, %v999_v25, %v840_v10  ;;  %v857_v12 = vmul.f32 %v1972_v61, %v856_v31  ;;  %vm881_vm8 = vweird.f32 %v1977_v0  ;;  %v918_v11 = vrot.slane %v913_v4, 4 }
 0x2a1   :  { %v893_v1 = vrot.slane %v844_v37, 4  ;;  %v854_v2 = vsel %vm853_vm15, %v1001_v30, %v850_v33  ;;  %v867_v13 = vmul.f32 %v1005_v9, %v866_v49  ;;  %vm955_vm14 = vcmask 259076  }
 0x2a2   :  { %v894_v15 = vrot.slane %v854_v2, 2  ;;  %v858_v35 = vmul.f32 0.5, %v857_v12  ;;  %v923_v28 = vsel %vm472_vm4, %v922_v60, %v918_v11  ;;  %vm956_vm15 = vmor %vm955_vm14, %vm954_vm13 }
 0x2a3   :  { %v868_v19 = vmul.f32 0.5, %v867_v13 }
 0x2a4   :  { %v898_v21 = vsel %vm470_vm3, %v893_v1, %v894_v15  ;;  %v859_v46 = vsub.f32 1.5, %v858_v35  ;;  %vm871_vm3 = vweird.f32 %v1953_v29  ;;  %v933_v29 = vperm.slane %v1948_v23, 4 }
 0x2a5   :  { %v1007_v25 = vpop.eup %1006  ;;  %v869_v5 = vsub.f32 1.5, %v868_v19  ;;  %v899_v30 = vsel %vm472_vm4, %v897_v20, %v898_v21  ;;  %vm873_vm5 = vmor %vm871_vm3, %vm872_vm1  ;;  %v793_v23 = vmul.f32 %v1986_v36, %v1897_v50 }
 0x2a6   :  { %v876_v3 = vmul.f32 %v1007_v25, %v1977_v0  ;;  %v904_v40 = vmul.f32 %v899_v30, %v792_v17  ;;  %vm882_vm6 = vweird.f32 %v1007_v25  ;;  %v860_v56 = vmul.f32 %v1972_v61, %v859_v46 }
 0x2a7   :  { %v870_v38 = vmul.f32 %v1005_v9, %v869_v5  ;;  %vm883_vm10 = vmor %vm881_vm8, %vm882_vm6  ;;  %v944_v0 = vsel %vm468_vm2, %v933_v29, %v939_v59 }
 0x2a8   :  { %v877_v43 = vmul.f32 %v1007_v25, %v876_v3  ;;  %v926_v45 = vmul.f32 %v921_v39, %v904_v40  ;;  %v864_v62 = vsel %vm863_vm11, %v1972_v61, %v860_v56 }
 0x2a9   :  { %v874_v53 = vsel %vm873_vm5, %v1005_v9, %v870_v38  ;;  %v940_v9 = vrot.slane %v935_v57, 4 }
 0x2aa   :  { %v878_v47 = vmul.f32 0.5, %v877_v43  ;;  %v948_v52 = vadd.f32 %v943_v41, %v926_v45  ;;  %v895_v58 = vrot.slane %v874_v53, 6 }
 0x2ab   :  { %v945_v33 = vsel %vm472_vm4, %v944_v0, %v940_v9 }
 0x2ac   :  { %v879_v7 = vsub.f32 1.5, %v878_v47  ;;  %v950_v55 = vadd.f32 %v948_v52, %v2161_v27  ;;  %v900_v10 = vsel %vm468_vm2, %v864_v62, %v895_v58 }
 0x2ae   :  { %v880_v8 = vmul.f32 %v1007_v25, %v879_v7  ;;  %952 = vst [vmem:[#allocation4] sm:$0xff] %v950_v55 }
 0x2b0   :  { %v884_v27 = vsel %vm883_vm10, %v1007_v25, %v880_v8 }
 0x2b1   :  { %v896_v63 = vrot.slane %v884_v27, 4 }
 0x2b3   :  { %v901_v31 = vsel %vm472_vm4, %v900_v10, %v896_v63 }
 0x2b4   :  { %v905_v32 = vmul.f32 %v901_v31, %v793_v23 }
 0x2b6   :  { %v927_v49 = vmul.f32 %v923_v28, %v905_v32 }
 0x2b8   :  { %v949_v50 = vadd.f32 %v945_v33, %v927_v49 }
 0x2ba   :  { %v951_v61 = vadd.f32 %v949_v50, %v2162_v48 }
 0x2bc   :  { %957 = vst.msk [vmem:[#allocation4 + $0x8] sm:$0x3f] %vm956_vm15, %v951_v61 }
 0x2bd   :  { %968 = dma.vmem_to_hbm [thread:$0]  %s964_s29, 224, %s966_s1, [#allocation5]  }
 0x2be   :  { %1032 = dma.done.wait [#allocation5], 224  }
 0x2bf   :  { %1033 = vsyncadd [#allocation5], 4294967072 }
 0x2c0   :  { %973 = vsyncpa [#allocation5], 1 }

</bundles_post_ra>
